<compile_context>
chip_gen: v6e
topology: v6e:2x2x1
jax: 0.10.0
libtpu: 0.0.40
codegen_flags: <defaults>
</compile_context>

<pallas_src>
from functools import partial
from math import sqrt

import jax
import jax.numpy as jnp
from jax.experimental import pallas as pl
from jax.experimental.pallas import tpu as pltpu

GEM_EPS = 1e-6
BN_EPS = 1e-5
_LANE = 128


def _int_pow(x, n):
    """x ** n for a small positive integer n via square-and-multiply (VPU only)."""
    acc = None
    base = x
    while n > 0:
        if n & 1:
            acc = base if acc is None else acc * base
        n >>= 1
        if n:
            base = base * base
    return acc


def _gem_pool_kernel(p_ref, x_ref, psum_ref, *, eps, p_static):
    """Accumulate sum over this split's spatial tiles of clamp(x, eps)**p."""
    # p_ref   : SMEM (1,) f32        GeM exponent (read only on the dynamic-p path)
    # x_ref   : VMEM (B, C, hw_tile) input tile, native dtype, spatial axis on lanes
    # psum_ref: VMEM (1, B, C) f32   this split's running spatial sum (block stays
    #                                resident across the "arbitrary" reduction axis)
    k = pl.program_id(1)

    @pl.when(k == 0)
    def _():
        psum_ref[...] = jnp.zeros_like(psum_ref)

    x = x_ref[...]
    if p_static is not None:
        # Small-integer p (module default p=3): clamp + repeated squaring in the
        # input dtype (bf16 stays bf16 on v6e/v7x VALUs; f32 accumulation keeps
        # accuracy). No per-element EUP transcendentals.
        xc = jnp.maximum(x, eps)                       # weak-typed eps keeps x.dtype
        xp = _int_pow(xc, p_static).astype(jnp.float32)
    else:
        # Arbitrary / learned p: 2 EUP transcendentals per element.
        # TODO(synk): half-integer p could compose int-pow with sqrt to stay off
        # the EUP, which becomes the binding unit for this path on v7x.
        xc = jnp.maximum(x.astype(jnp.float32), eps)
        xp = jnp.exp(p_ref[0] * jnp.log(xc))

    # Spatial (lane-axis) reduction of this tile; the XLU reduce is hidden under
    # the next tile's DMA in the steady state.
    psum_ref[...] += jnp.sum(xp, axis=-1)[None]


def _vmem_limit_bytes():
    """Per-chip scoped-VMEM budget: ~3/4 of physical VMEM, capped at 96 MiB.

    -> ~48 MiB on v7x (64 MiB physical), ~96 MiB on v5e / v6e (128 MiB physical).
    """
    try:
        cap = int(pltpu.get_tpu_info().vmem_capacity_bytes)
    except Exception:  # non-TPU tracing / attribute unavailable: v7x-safe fallback
        cap = 64 * 1024 * 1024
    return max(32 * 1024 * 1024, min(cap * 3 // 4, 96 * 1024 * 1024))


def _plan_tiling(B, C, HW, itemsize, vmem_limit):
    """Choose (hw_tile, n_hw_per_split, num_splits) for the streaming reduction.

    The spatial axis sits on the 128-lane axis, so hw_tile is a multiple of 128
    (C is the sublane axis and is kept at full extent, so no dtype-dependent
    sublane rounding is needed). hw_tile is sized so one double-buffered input
    tile is ~8 MiB. The spatial stream is split in two (leading "parallel" grid
    axis) so v7x's 2 TensorCores each stream half of x; on single-TC v5e/v6e the
    extra grid step is negligible.
    """
    if HW % _LANE != 0:
        # TODO(synk): pad/mask spatial extents that are not a multiple of 128;
        # for now fall back to one full-extent spatial block on a single split.
        return HW, 1, 1
    units = HW // _LANE
    num_splits = 2 if units % 2 == 0 else 1
    units_per_split = units // num_splits

    per_buf_target = min(8 * 1024 * 1024, vmem_limit // 3)  # x is double-buffered
    bytes_per_unit = B * C * _LANE * itemsize
    max_units = max(1, min(units_per_split, per_buf_target // max(bytes_per_unit, 1)))

    tile_units = 1
    for d in range(max_units, 0, -1):  # largest divisor of the split that fits budget
        if units_per_split % d == 0:
            tile_units = d
            break
    return tile_units * _LANE, units_per_split // tile_units, num_splits


def gem_forward(x_nchw, hidden_weights, p_scalar, eps=GEM_EPS):
    """GeM forward: Pallas streaming-pooling kernel + tiny XLA finalize epilogue."""
    B, C, H, W = x_nchw.shape
    HW = H * W

    # (B, C, H, W) -> (B, C, HW) is a free row-major reshape: no transpose pass,
    # no extra HBM round trip. Channels stay on sublanes, spatial goes to lanes.
    x3 = x_nchw.reshape(B, C, HW)

    # Compile-time small-integer p hits the VPU-only fast path (module default
    # p=3). A traced / learned p falls back to exp(p*log(x)) in-kernel.
    p_static = None
    if isinstance(p_scalar, (int, float)) and float(p_scalar) == int(p_scalar) \
            and 1 <= int(p_scalar) <= 8:
        p_static = int(p_scalar)
    p_arr = jnp.asarray(p_scalar, jnp.float32).reshape(1)

    vmem_limit = _vmem_limit_bytes()
    hw_tile, n_hw, num_splits = _plan_tiling(B, C, HW, x3.dtype.itemsize, vmem_limit)

    kernel = partial(_gem_pool_kernel, eps=float(eps), p_static=p_static)
    cost = pl.CostEstimate(
        flops=4 * B * C * HW,
        transcendentals=0 if p_static is not None else 2 * B * C * HW,
        bytes_accessed=x3.size * x3.dtype.itemsize + num_splits * B * C * 4 + 4,
    )

    # Streaming GeM reduction: per-split partial sums of clamp(x, eps)**p.
    partial_sums = pl.pallas_call(
        kernel,
        out_shape=jax.ShapeDtypeStruct((num_splits, B, C), jnp.float32),
        grid=(num_splits, n_hw),
        in_specs=[
            pl.BlockSpec(memory_space=pltpu.MemorySpace.SMEM),                  # p
            pl.BlockSpec((B, C, hw_tile), lambda c, k: (0, 0, c * n_hw + k)),   # x
        ],
        out_specs=pl.BlockSpec((1, B, C), lambda c, k: (c, 0, 0)),
        compiler_params=pltpu.CompilerParams(
            dimension_semantics=("parallel", "arbitrary"),  # TC split x reduction
            vmem_limit_bytes=vmem_limit,
        ),
        cost_estimate=cost,
    )(p_arr, x3)

    # Finalize epilogue (per perf review, kept out of the streaming kernel: it is
    # O(B*C + B*C*D) one-shot work vs. the O(B*C*HW) HBM stream above, and the
    # projection weights never occupy the kernel's VMEM budget).
    # TODO(synk): this could equivalently live in a tiny second pallas_call.
    p_val = jnp.asarray(p_scalar, jnp.float32)
    pooled = jnp.sum(partial_sums, axis=0) * (1.0 / HW)      # avg_pool2d + squeeze
    pooled = jnp.power(pooled, 1.0 / p_val)                  # .pow(1/p)
    if hidden_weights is None:                               # output_dim_matching=False
        return pooled
    y = jnp.dot(pooled, hidden_weights.astype(jnp.float32),
                precision=jax.lax.Precision.HIGHEST)         # true-f32 projection
    # BatchNorm1d, training mode: batch stats, biased variance, gamma=1, beta=0,
    # no running-stats update (matches a freshly constructed nn.BatchNorm1d).
    mean = jnp.mean(y, axis=0, keepdims=True)
    var = jnp.mean(jnp.square(y - mean), axis=0, keepdims=True)
    return (y - mean) / jnp.sqrt(var + BN_EPS)


def gem_reference(x_nchw, hidden_weights, p_scalar, eps=GEM_EPS):
    """Pure-JAX mirror of the PyTorch GeM.forward (BatchNorm1d in train mode)."""
    p = jnp.asarray(p_scalar, jnp.float32)
    x = x_nchw.astype(jnp.float32)
    pooled = jnp.mean(jnp.power(jnp.maximum(x, eps), p), axis=(-2, -1))
    pooled = jnp.power(pooled, 1.0 / p)
    if hidden_weights is None:
        return pooled
    y = jnp.dot(pooled, hidden_weights.astype(jnp.float32),
                precision=jax.lax.Precision.HIGHEST)
    mean = jnp.mean(y, axis=0, keepdims=True)
    var = jnp.mean(jnp.square(y - mean), axis=0, keepdims=True)
    return (y - mean) / jnp.sqrt(var + BN_EPS)


if __name__ == "__main__":
    # Small shapes consistent with the module (feature_size=C, output_dim=D, p=3).
    B, C, H, W = 8, 256, 32, 32
    D = 128
    P = 3.0

    key = jax.random.PRNGKey(0)
    kx, kw = jax.random.split(key)
    x = jax.random.uniform(kx, (B, C, H, W), dtype=jnp.float32)          # NCHW input
    hidden_weights = (1.0 / sqrt(C)) * jax.random.normal(kw, (C, D), dtype=jnp.float32)

    out = jax.block_until_ready(gem_forward(x, hidden_weights, P))
    ref = gem_reference(x, hidden_weights, P)

    assert out.shape == (B, D)
    # Outputs are unit-variance (BatchNorm'd); 1e-3 comfortably covers f32
    # accumulation-order differences while still catching any real bug.
    assert bool(jnp.allclose(out, ref, atol=1e-3, rtol=1e-3)), "mismatch vs reference"

    print("KERNEL_OK")
</pallas_src>

<mosaic_0001>
module attributes {stable_mosaic.version = 11 : i64} {
  func.func @_gem_pool_kernel(%arg0: i32, %arg1: i32, %arg2: memref<1xf32, #tpu.memory_space<smem>>, %arg3: memref<8x256x512xf32, #tpu.memory_space<vmem>>, %arg4: memref<1x8x256xf32, #tpu.memory_space<vmem>>) attributes {dimension_semantics = [#tpu.dimension_semantics<parallel>, #tpu.dimension_semantics<arbitrary>], iteration_bounds = array<i64: 2, 1>, scalar_prefetch = 0 : i64, scratch_operands = 0 : i64, tpu.core_type = #tpu.core_type<tc>, window_params = [{transform_indices = @transform_0, window_bounds = array<i64: 1>}, {transform_indices = @transform_1, window_bounds = array<i64: 8, 256, 512>}, {transform_indices = @transform_2, window_bounds = array<i64: 1, 8, 256>}]} {
    %c0_i32 = arith.constant 0 : i32
    %0 = arith.cmpi eq, %arg1, %c0_i32 : i32
    %1 = arith.extui %0 : i1 to i32
    %c0_i32_0 = arith.constant 0 : i32
    %2 = arith.cmpi ne, %1, %c0_i32_0 : i32
    scf.if %2 {
      %cst_10 = arith.constant 0.000000e+00 : f32
      %13 = vector.broadcast %cst_10 : f32 to vector<1x8x256xf32>
      %c0_11 = arith.constant 0 : index
      %c0_12 = arith.constant 0 : index
      %c0_13 = arith.constant 0 : index
      %14 = vector.load %arg4[%c0_11, %c0_12, %c0_13] : memref<1x8x256xf32, #tpu.memory_space<vmem>>, vector<1x8x256xf32>
      tpu.vector_store %arg4[%c0_11, %c0_12, %c0_13], %13 {strides = array<i32>} : memref<1x8x256xf32, #tpu.memory_space<vmem>>, vector<1x8x256xf32>,
    } else {
    }
    %c0 = arith.constant 0 : index
    %c0_1 = arith.constant 0 : index
    %c0_2 = arith.constant 0 : index
    %3 = vector.load %arg3[%c0, %c0_1, %c0_2] : memref<8x256x512xf32, #tpu.memory_space<vmem>>, vector<8x256x512xf32>
    %cst = arith.constant 9.99999997E-7 : f32
    %4 = vector.broadcast %cst : f32 to vector<8x256x512xf32>
    %5 = arith.maximumf %3, %4 : vector<8x256x512xf32>
    %6 = arith.mulf %5, %5 : vector<8x256x512xf32>
    %7 = arith.mulf %5, %6 : vector<8x256x512xf32>
    %c0_3 = arith.constant 0 : index
    %c0_4 = arith.constant 0 : index
    %c0_5 = arith.constant 0 : index
    %8 = vector.load %arg4[%c0_3, %c0_4, %c0_5] : memref<1x8x256xf32, #tpu.memory_space<vmem>>, vector<1x8x256xf32>
    %cst_6 = arith.constant dense<0.000000e+00> : vector<8x256xf32>
    %9 = vector.multi_reduction <add>, %7, %cst_6 [2] : vector<8x256x512xf32> to vector<8x256xf32>
    %10 = vector.shape_cast %9 : vector<8x256xf32> to vector<1x8x256xf32>
    %11 = arith.addf %8, %10 : vector<1x8x256xf32>
    %c0_7 = arith.constant 0 : index
    %c0_8 = arith.constant 0 : index
    %c0_9 = arith.constant 0 : index
    %12 = vector.load %arg4[%c0_7, %c0_8, %c0_9] : memref<1x8x256xf32, #tpu.memory_space<vmem>>, vector<1x8x256xf32>
    tpu.vector_store %arg4[%c0_7, %c0_8, %c0_9], %11 {strides = array<i32>} : memref<1x8x256xf32, #tpu.memory_space<vmem>>, vector<1x8x256xf32>,
    return
  }
  func.func @transform_0(%arg0: i32, %arg1: i32) -> i32 {
    %c0_i32 = arith.constant 0 : i32
    %c0_i32_0 = arith.constant 0 : i32
    return %c0_i32 : i32
  }
  func.func @transform_1(%arg0: i32, %arg1: i32) -> (i32, i32, i32) {
    %c1_i32 = arith.constant 1 : i32
    %0 = arith.muli %arg0, %c1_i32 : i32
    %1 = arith.addi %0, %arg1 : i32
    %c0_i32 = arith.constant 0 : i32
    %c0_i32_0 = arith.constant 0 : i32
    %c0_i32_1 = arith.constant 0 : i32
    return %c0_i32, %c0_i32_0, %1 : i32, i32, i32
  }
  func.func @transform_2(%arg0: i32, %arg1: i32) -> (i32, i32, i32) {
    %c0_i32 = arith.constant 0 : i32
    %c0_i32_0 = arith.constant 0 : i32
    %c0_i32_1 = arith.constant 0 : i32
    return %arg0, %c0_i32, %c0_i32_0 : i32, i32, i32
  }
}

</mosaic_0001>

<bundles_post_ra>
// kernel: tpu_custom_call.1
= control target key start
LH: loop header
LB: loop body
LE: loop exit
PB: predicated region body
PF: predicated region fallthrough
CT: control target
= control target key end

     0   :  { %8 = vsyncpa [#allocation4], 0  ;;  %s9998_s0 = inlined_call_operand.<no memory space> [shape: f32[1], index: 0, kind: input, shape index: {}]   ;;  %s9999_s1 = inlined_call_operand.hbm [shape: f32[8,256,1024], index: 1, kind: input, shape index: {}]   ;;  %s10000_s2 = inlined_call_operand.hbm [shape: f32[2,8,256], index: 2, kind: output, shape index: {}]  }
   0x1   :  { %10 = vsyncpa [#allocation4 + $0x1], 0 }
   0x2   :  { %11 = vsyncpa [#allocation5], 0 }
   0x3   :  { %13 = vsyncpa [#allocation5 + $0x1], 0  ;;  %s7450_s9 = smov 0   ;;  %s7452_s10 = smov 0  }
   0x4   :  { %s7454_s11 = smov 0   ;;  %s7456_s12 = smov 0  }
   0x5   :  { %s7458_s13 = smov 0   ;;  %s7460_s0 = smov 0  }
   0x6 LB: > { %s7237_s14 = sadd.s32 4294967295, %s7428_s0   ;;  %s7238_s15 = sadd.s32 4294967294, %s7428_s0   ;;  %s7428_s0 = sphi %s7460_s0, %s19_s0   ;;  %s7424_s13 = sphi %s7458_s13, %s10447_s13   ;;  %s7420_s12 = sphi %s7456_s12, %s10446_s12   ;;  %s7416_s11 = sphi %s7454_s11, %s10445_s11   ;;  %s7412_s10 = sphi %s7452_s10, %s10444_s10   ;;  %s7408_s9 = sphi %s7450_s9, %s10443_s9  }
   0x7   : > { %s31_s16 = sadd.s32 1, %s7424_s13  ;;  %s61_s17 = sadd.s32 1, %s7416_s11 }
   0x8   : > { %p33_p0 = scmp.ge.s32.totalorder %s31_s16, 2  ;;  %p68_p1 = scmp.ne.s32.totalorder %s7416_s11, %s7412_s10 }
   0x9   : > { %p69_p2 = scmp.eq.s32.totalorder %s7428_s0, 0  ;;  %p74_p3 = scmp.ne.s32.totalorder %s7412_s10, %s7408_s9 }
   0xa   : > { %s10449_s16 = smov (%p33_p0, %s31_s16), 0  ;;  %p75_p5 = scmp.eq.s32.totalorder %s7237_s14, 0 }
   0xb   : > { %p7491_p4 = por %p69_p2, %p68_p1  ;;  %s58_s19 = ssub.s32 %s7424_s13, %s10449_s16 }
   0xc   : > { %p98_p6 = scmp.eq.s32.totalorder %s7237_s14, 1  ;;  %p59_p7 = scmp.eq.s32.totalorder %s58_s19, 0 }
   0xd   : > { %p7497_p8 = por %p75_p5, %p74_p3  ;;  %p104_p10 = scmp.eq.s32.totalorder %s7238_s15, 1 }
   0xe   : > { %p7501_p9 = por %p98_p6, %p68_p1  ;;  %p7266_p13 = scmp.lt.s32.totalorder %s7428_s0, 2 }
   0xf   : > { %s7506_s22 = scalar_select %p59_p7, %s7416_s11, %s61_s17  }
  0x10   : > { %p7508_p11 = por %p104_p10, %p74_p3  ;;  %s127_s24 = sand.u32 1, %s7416_s11  }
  0x11   : > { %s7241_s25 = sshll.u32 %s127_s24, 13  ;;  %s7252_s26 = sshll.u32 %s7424_s13, 9 }
  0x12   : > { %s138_s29 = scalar_lea.hbm %s9999_s1, %s7252_s26  ;;  %s131_s30 = scalar_lea.vmem [#allocation3], %s7241_s25 }
  0x13   : > { %s139_s3 = sshll.u32 %s131_s30, 4  ;;  %p7521_p0 = pnand %p7266_p13, %p7491_p4  ;;  %s140_s3 = int_to_ptr.vmem [resolvable:$true] %s139_s3 }
  0x14   : > { %s128_s5 = scalar_lea.sflag [#allocation4], %s127_s24  ;;  %s7333_s6 = scalar_lea.vmem %s140_s3, 131072 }
  0x15   : > { %p7322_p1 = pneg %p7521_p0  ;;  %p7334_p2 = scmp.ne.s32.totalorder %s140_s3, %s7333_s6 }
  0x16   : > { %s7430_s7 = smov [#allocation3]  }
  0x17   : > { %p7336_p3 = pnand %p7334_p2, %p7322_p1  ;;  %s7338_s8 = sshll.u32 %s7430_s7, 4  ;;  %s7339_s8 = int_to_ptr.vmem [resolvable:$false] %s7338_s8 }
  0x18   : > { %s7340_s14 = scalar_lea.vmem %s7339_s8, 262144  ;;  %p7341_p6 = scmp.lt.s32.totalorder %s140_s3, %s7339_s8 }
  0x19   : > { %p7337_p5 = pneg %p7336_p3  ;;  %p7342_p7 = scmp.lt.s32.totalorder %s7340_s14, %s7333_s6 }
  0x1b   : > { %p7343_p10 = por %p7342_p7, %p7341_p6 }
  0x1d   : > { %p7344_p12 = pnand %p7343_p10, %p7337_p5 }
  0x1f   : > { %7347 = shalt.err (!%p7344_p12)
}
  0x20   : > { %s7431_s15 = smov 1024   ;;  %s7432_s17 = smov 512  }
  0x21   : > { %s7433_s18 = smov 32   ;;  %p7244_p4 = scmp.ge.s32.totalorder %s7428_s0, 1 }
  0x22   : > { %7261 = dma.hbm_to_vmem [thread:$0]  (!%p7521_p0), %s138_s29, 131072, %s140_s3, %s128_s5, %s7431_s15, %s7432_s17, %s7433_s18  }
  0x23   : > { %p147_p13 = scmp.lt.s32.totalorder %s7428_s0, 3 }
  0x25   : > { %p148_p1 = pnand %p7244_p4, %p147_p13 }
  0x27   : > { %151 = sbr.rel (%p148_p1) target bundleno = 1177 (0x499), region = 28 }
  0x2c   : > { %s7532_s19 = sand.u32 1, %s7412_s10  }
  0x2d   : > { %s7245_s24 = sshll.u32 %s7532_s19, 13  ;;  %s154_s25 = scalar_lea.sflag [#allocation4], %s7532_s19 }
  0x2e   : > { %s7536_s26 = scalar_lea.vmem [#allocation3], %s7245_s24 }
  0x2f   : > { %7399 = dma.done.wait (%p7497_p8), %s154_s25, 131072  }
  0x30   : > { %7401 = vsyncadd (%p7497_p8), %s154_s25, 4294836224  ;;  %v194_v0 = vld [vmem:[%s7536_s26 + $0x40] sm:$0xff]  ;;  %v195_v1 = vld [vmem:[%s7536_s26 + $0x48] sm:$0xff]  ;;  %vm5831_vm0 = vcmask 130112   ;;  %vm5838_vm1 = vcmask 195712   ;;  %vm5845_vm2 = vcmask 261312  }
  0x31   : > { %v196_v2 = vld [vmem:[%s7536_s26 + $0x50] sm:$0xff]  ;;  %v197_v3 = vld [vmem:[%s7536_s26 + $0x58] sm:$0xff]  ;;  %v1218_v4 = vmax.f32 %v194_v0, 1e-06  ;;  %v1219_v5 = vmax.f32 %v195_v1, 1e-06 }
  0x32   : > { %v186_v6 = vld [vmem:[%s7536_s26] sm:$0xff]  ;;  %v1220_v7 = vmax.f32 %v196_v2, 1e-06  ;;  %v1221_v8 = vmax.f32 %v197_v3, 1e-06  ;;  %v187_v9 = vld [vmem:[%s7536_s26 + $0x8] sm:$0xff] }
  0x33   : > { %v188_v10 = vld [vmem:[%s7536_s26 + $0x10] sm:$0xff]  ;;  %v2242_v11 = vmul.f32 %v1218_v4, %v1218_v4  ;;  %v2243_v12 = vmul.f32 %v1219_v5, %v1219_v5  ;;  %v189_v13 = vld [vmem:[%s7536_s26 + $0x18] sm:$0xff]  ;;  %v1210_v14 = vmax.f32 %v186_v6, 1e-06  ;;  %v1211_v15 = vmax.f32 %v187_v9, 1e-06 }
  0x34   : > { %v2244_v16 = vmul.f32 %v1220_v7, %v1220_v7  ;;  %v2245_v17 = vmul.f32 %v1221_v8, %v1221_v8  ;;  %v1212_v18 = vmax.f32 %v188_v10, 1e-06  ;;  %v1213_v19 = vmax.f32 %v189_v13, 1e-06  ;;  %v198_v20 = vld [vmem:[%s7536_s26 + $0x60] sm:$0xff]  ;;  %v199_v25 = vld [vmem:[%s7536_s26 + $0x68] sm:$0xff] }
  0x35   : > { %v3266_v21 = vmul.f32 %v2242_v11, %v1218_v4  ;;  %v3267_v22 = vmul.f32 %v2243_v12, %v1219_v5  ;;  %v2234_v23 = vmul.f32 %v1210_v14, %v1210_v14  ;;  %v2235_v24 = vmul.f32 %v1211_v15, %v1211_v15  ;;  %v200_v26 = vld [vmem:[%s7536_s26 + $0x70] sm:$0xff]  ;;  %v201_v31 = vld [vmem:[%s7536_s26 + $0x78] sm:$0xff]  ;;  %v190_v36 = vld [vmem:[%s7536_s26 + $0x20] sm:$0xff]  ;;  %s7246_s20 = sshll.u32 %s7532_s19, 4  ;;  %s7253_s27 = sshll.u32 %s7420_s12, 8 }
  0x36   : > { %v3268_v27 = vmul.f32 %v2244_v16, %v1220_v7  ;;  %v3269_v28 = vmul.f32 %v2245_v17, %v1221_v8  ;;  %v2236_v29 = vmul.f32 %v1212_v18, %v1212_v18  ;;  %v2237_v30 = vmul.f32 %v1213_v19, %v1213_v19  ;;  %v191_v37 = vld [vmem:[%s7536_s26 + $0x28] sm:$0xff]  ;;  %v192_v46 = vld [vmem:[%s7536_s26 + $0x30] sm:$0xff]  ;;  %v193_v47 = vld [vmem:[%s7536_s26 + $0x38] sm:$0xff]  ;;  %s177_s28 = scalar_lea.vmem [#allocation6], %s7246_s20  ;;  %s7156_s4 = scalar_lea.hbm %s10000_s2, %s7253_s27 }
  0x37   : > { %v4294_v32 = vadd.f32 %v3267_v22, %v3266_v21  ;;  %v3258_v33 = vmul.f32 %v2234_v23, %v1210_v14  ;;  %v3259_v34 = vmul.f32 %v2235_v24, %v1211_v15  ;;  %v1222_v35 = vmax.f32 %v198_v20, 1e-06  ;;  %v206_v56 = vld [vmem:[%s7536_s26 + $0xa0] sm:$0xff]  ;;  %v207_v61 = vld [vmem:[%s7536_s26 + $0xa8] sm:$0xff]  ;;  %v208_v62 = vld [vmem:[%s7536_s26 + $0xb0] sm:$0xff]  ;;  %s7158_s29 = sshll.u32 %s177_s28, 4  ;;  %s7159_s29 = int_to_ptr.vmem [resolvable:$true] %s7158_s29 }
  0x38   : > { %v3260_v38 = vmul.f32 %v2236_v29, %v1212_v18  ;;  %v3261_v39 = vmul.f32 %v2237_v30, %v1213_v19  ;;  %v1223_v40 = vmax.f32 %v199_v25, 1e-06  ;;  %v1224_v41 = vmax.f32 %v200_v26, 1e-06  ;;  %v209_v3 = vld [vmem:[%s7536_s26 + $0xb8] sm:$0xff]  ;;  %v202_v12 = vld [vmem:[%s7536_s26 + $0x80] sm:$0xff] }
  0x39   : > { %v4295_v42 = vadd.f32 %v4294_v32, %v3268_v27  ;;  %v4284_v43 = vadd.f32 %v3259_v34, %v3258_v33  ;;  %v1225_v44 = vmax.f32 %v201_v31, 1e-06  ;;  %v2246_v45 = vmul.f32 %v1222_v35, %v1222_v35  ;;  %v203_v13 = vld [vmem:[%s7536_s26 + $0x88] sm:$0xff]  ;;  %v204_v22 = vld [vmem:[%s7536_s26 + $0x90] sm:$0xff]  ;;  %v205_v23 = vld [vmem:[%s7536_s26 + $0x98] sm:$0xff]  ;;  %s7144_s5 = scalar_lea.sflag [#allocation5], %s7532_s19 }
  0x3a   : > { %v2247_v48 = vmul.f32 %v1223_v40, %v1223_v40  ;;  %v2248_v49 = vmul.f32 %v1224_v41, %v1224_v41  ;;  %v1214_v50 = vmax.f32 %v190_v36, 1e-06  ;;  %v1215_v51 = vmax.f32 %v191_v37, 1e-06  ;;  %v215_v33 = vld [vmem:[%s7536_s26 + $0xe8] sm:$0xff]  ;;  %s7348_s6 = scalar_lea.vmem %s7159_s29, 256 }
  0x3b   : > { %v4296_v52 = vadd.f32 %v4295_v42, %v3269_v28  ;;  %v4285_v53 = vadd.f32 %v4284_v43, %v3260_v38  ;;  %v2249_v54 = vmul.f32 %v1225_v44, %v1225_v44  ;;  %v3270_v55 = vmul.f32 %v2246_v45, %v1222_v35  ;;  %v214_v28 = vld [vmem:[%s7536_s26 + $0xe0] sm:$0xff]  ;;  %v216_v38 = vld [vmem:[%s7536_s26 + $0xf0] sm:$0xff]  ;;  %p7349_p8 = scmp.ne.s32.totalorder %s7159_s29, %s7348_s6  ;;  %s7434_s12 = smov [#allocation6]  }
  0x3c   : > { %v3271_v57 = vmul.f32 %v2247_v48, %v1223_v40  ;;  %v3272_v58 = vmul.f32 %v2248_v49, %v1224_v41  ;;  %v1216_v59 = vmax.f32 %v192_v46, 1e-06  ;;  %v1217_v60 = vmax.f32 %v193_v47, 1e-06  ;;  %s7352_s7 = sshll.u32 %s7434_s12, 4  ;;  %s7353_s7 = int_to_ptr.vmem [resolvable:$false] %s7352_s7 }
  0x3d   : > { %4297 = vadd.xlane.f32.xlu1 %v4296_v52  ;;  %v4286_v63 = vadd.f32 %v4285_v53, %v3261_v39  ;;  %v3273_v0 = vmul.f32 %v2249_v54, %v1225_v44  ;;  %v2238_v1 = vmul.f32 %v1214_v50, %v1214_v50  ;;  %v2239_v2 = vmul.f32 %v1215_v51, %v1215_v51  ;;  %v217_v39 = vld [vmem:[%s7536_s26 + $0xf8] sm:$0xff]  ;;  %v210_v52 = vld [vmem:[%s7536_s26 + $0xc0] sm:$0xff]  ;;  %v211_v53 = vld [vmem:[%s7536_s26 + $0xc8] sm:$0xff]  ;;  %p7350_p12 = pnand %p7349_p8, %p7501_p9  ;;  %s7354_s8 = scalar_lea.vmem %s7353_s7, 512 }
  0x3e   : > { %v4299_v4 = vadd.f32 %v3271_v57, %v3270_v55  ;;  %v2240_v5 = vmul.f32 %v1216_v59, %v1216_v59  ;;  %v2241_v6 = vmul.f32 %v1217_v60, %v1217_v60  ;;  %v1230_v7 = vmax.f32 %v206_v56, 1e-06  ;;  %p7355_p2 = scmp.lt.s32.totalorder %s7159_s29, %s7353_s7  ;;  %p7356_p3 = scmp.lt.s32.totalorder %s7354_s8, %s7348_s6 }
  0x3f   : > { %4287 = vadd.xlane.f32.xlu0 %v4286_v63  ;;  %v3262_v8 = vmul.f32 %v2238_v1, %v1214_v50  ;;  %v3263_v9 = vmul.f32 %v2239_v2, %v1215_v51  ;;  %v1231_v10 = vmax.f32 %v207_v61, 1e-06  ;;  %v1232_v11 = vmax.f32 %v208_v62, 1e-06  ;;  %v213_v63 = vld [vmem:[%s7536_s26 + $0xd8] sm:$0xff]  ;;  %p7351_p0 = pneg %p7350_p12 }
  0x40   : > { %v4300_v14 = vadd.f32 %v4299_v4, %v3272_v58  ;;  %v3264_v15 = vmul.f32 %v2240_v5, %v1216_v59  ;;  %v3265_v16 = vmul.f32 %v2241_v6, %v1217_v60  ;;  %v1233_v17 = vmax.f32 %v209_v3, 1e-06  ;;  %v212_v58 = vld [vmem:[%s7536_s26 + $0xd0] sm:$0xff]  ;;  %v222_v4 = vld [vmem:[%s7536_s26 + $0x120] sm:$0xff]  ;;  %v223_v5 = vld [vmem:[%s7536_s26 + $0x128] sm:$0xff]  ;;  %p7357_p5 = por %p7356_p3, %p7355_p2 }
  0x41   : > { %v4289_v18 = vadd.f32 %v3263_v9, %v3262_v8  ;;  %v2254_v19 = vmul.f32 %v1230_v7, %v1230_v7  ;;  %v2255_v20 = vmul.f32 %v1231_v10, %v1231_v10  ;;  %v2256_v21 = vmul.f32 %v1232_v11, %v1232_v11 }
  0x42   : > { %v4301_v24 = vadd.f32 %v4300_v14, %v3273_v0  ;;  %v2257_v25 = vmul.f32 %v1233_v17, %v1233_v17  ;;  %v1226_v26 = vmax.f32 %v202_v12, 1e-06  ;;  %v1227_v27 = vmax.f32 %v203_v13, 1e-06  ;;  %v224_v14 = vld [vmem:[%s7536_s26 + $0x130] sm:$0xff]  ;;  %p7358_p6 = pnand %p7357_p5, %p7351_p0 }
  0x43   : > { %v4290_v29 = vadd.f32 %v4289_v18, %v3264_v15  ;;  %v3278_v30 = vmul.f32 %v2254_v19, %v1230_v7  ;;  %v3279_v31 = vmul.f32 %v2255_v20, %v1231_v10  ;;  %v3280_v32 = vmul.f32 %v2256_v21, %v1232_v11  ;;  %v225_v15 = vld [vmem:[%s7536_s26 + $0x138] sm:$0xff] }
  0x44   : > { %4302 = vadd.xlane.f32.xlu1 %v4301_v24  ;;  %v3281_v34 = vmul.f32 %v2257_v25, %v1233_v17  ;;  %v1228_v35 = vmax.f32 %v204_v22, 1e-06  ;;  %v1229_v36 = vmax.f32 %v205_v23, 1e-06  ;;  %v2250_v37 = vmul.f32 %v1226_v26, %v1226_v26  ;;  %v218_v24 = vld [vmem:[%s7536_s26 + $0x100] sm:$0xff] }
  0x45   : > { %v4291_v40 = vadd.f32 %v4290_v29, %v3265_v16  ;;  %v4309_v41 = vadd.f32 %v3279_v31, %v3278_v30  ;;  %v2251_v42 = vmul.f32 %v1227_v27, %v1227_v27  ;;  %v1238_v43 = vmax.f32 %v214_v28, 1e-06  ;;  %v219_v29 = vld [vmem:[%s7536_s26 + $0x108] sm:$0xff]  ;;  %v220_v30 = vld [vmem:[%s7536_s26 + $0x110] sm:$0xff] }
  0x46   : > { %v2252_v44 = vmul.f32 %v1228_v35, %v1228_v35  ;;  %v2253_v45 = vmul.f32 %v1229_v36, %v1229_v36  ;;  %v3274_v46 = vmul.f32 %v2250_v37, %v1226_v26  ;;  %v1239_v47 = vmax.f32 %v215_v33, 1e-06 }
  0x47   : > { %4292 = vadd.xlane.f32.xlu0 %v4291_v40  ;;  %v4310_v48 = vadd.f32 %v4309_v41, %v3280_v32  ;;  %v3275_v49 = vmul.f32 %v2251_v42, %v1227_v27  ;;  %v1240_v50 = vmax.f32 %v216_v38, 1e-06  ;;  %v1241_v51 = vmax.f32 %v217_v39, 1e-06 }
  0x48   : > { %v3276_v54 = vmul.f32 %v2252_v44, %v1228_v35  ;;  %v3277_v55 = vmul.f32 %v2253_v45, %v1229_v36  ;;  %v2262_v56 = vmul.f32 %v1238_v43, %v1238_v43  ;;  %v2263_v57 = vmul.f32 %v1239_v47, %v1239_v47  ;;  %v221_v35 = vld [vmem:[%s7536_s26 + $0x118] sm:$0xff]  ;;  %v230_v44 = vld [vmem:[%s7536_s26 + $0x160] sm:$0xff]  ;;  %v231_v45 = vld [vmem:[%s7536_s26 + $0x168] sm:$0xff] }
  0x49   : > { %v4311_v59 = vadd.f32 %v4310_v48, %v3281_v34  ;;  %v4304_v60 = vadd.f32 %v3275_v49, %v3274_v46  ;;  %v2264_v61 = vmul.f32 %v1240_v50, %v1240_v50  ;;  %v2265_v62 = vmul.f32 %v1241_v51, %v1241_v51 }
  0x4a   : > { %v3286_v0 = vmul.f32 %v2262_v56, %v1238_v43  ;;  %v3287_v1 = vmul.f32 %v2263_v57, %v1239_v47  ;;  %v1234_v2 = vmax.f32 %v210_v52, 1e-06  ;;  %v1235_v3 = vmax.f32 %v211_v53, 1e-06 }
  0x4b   : > { %4312 = vadd.xlane.f32.xlu1 %v4311_v59  ;;  %v4305_v6 = vadd.f32 %v4304_v60, %v3276_v54  ;;  %v3288_v7 = vmul.f32 %v2264_v61, %v1240_v50  ;;  %v3289_v8 = vmul.f32 %v2265_v62, %v1241_v51  ;;  %v1236_v9 = vmax.f32 %v212_v58, 1e-06  ;;  %v232_v50 = vld [vmem:[%s7536_s26 + $0x170] sm:$0xff]  ;;  %v226_v60 = vld [vmem:[%s7536_s26 + $0x140] sm:$0xff] }
  0x4c   : > { %v4319_v10 = vadd.f32 %v3287_v1, %v3286_v0  ;;  %v1237_v11 = vmax.f32 %v213_v63, 1e-06  ;;  %v2258_v12 = vmul.f32 %v1234_v2, %v1234_v2  ;;  %v2259_v13 = vmul.f32 %v1235_v3, %v1235_v3  ;;  %v227_v1 = vld [vmem:[%s7536_s26 + $0x148] sm:$0xff] }
  0x4d   : > { %v4306_v16 = vadd.f32 %v4305_v6, %v3277_v55  ;;  %v2260_v17 = vmul.f32 %v1236_v9, %v1236_v9  ;;  %v1246_v18 = vmax.f32 %v222_v4, 1e-06  ;;  %v1247_v19 = vmax.f32 %v223_v5, 1e-06  ;;  %v233_v55 = vld [vmem:[%s7536_s26 + $0x178] sm:$0xff]  ;;  %v228_v6 = vld [vmem:[%s7536_s26 + $0x150] sm:$0xff] }
  0x4e   : > { %v4320_v20 = vadd.f32 %v4319_v10, %v3288_v7  ;;  %v2261_v21 = vmul.f32 %v1237_v11, %v1237_v11  ;;  %v3282_v22 = vmul.f32 %v2258_v12, %v1234_v2  ;;  %v3283_v23 = vmul.f32 %v2259_v13, %v1235_v3  ;;  %v229_v7 = vld [vmem:[%s7536_s26 + $0x158] sm:$0xff] }
  0x4f   : > { %4307 = vadd.xlane.f32.xlu0 %v4306_v16  ;;  %v3284_v25 = vmul.f32 %v2260_v17, %v1236_v9  ;;  %v1248_v26 = vmax.f32 %v224_v14, 1e-06  ;;  %v1249_v27 = vmax.f32 %v225_v15, 1e-06  ;;  %v2270_v28 = vmul.f32 %v1246_v18, %v1246_v18  ;;  %v238_v16 = vld [vmem:[%s7536_s26 + $0x1a0] sm:$0xff] }
  0x50   : > { %v4321_v31 = vadd.f32 %v4320_v20, %v3289_v8  ;;  %v3285_v32 = vmul.f32 %v2261_v21, %v1237_v11  ;;  %v4314_v33 = vadd.f32 %v3283_v23, %v3282_v22  ;;  %v2271_v34 = vmul.f32 %v1247_v19, %v1247_v19  ;;  %v239_v21 = vld [vmem:[%s7536_s26 + $0x1a8] sm:$0xff] }
  0x51   : > { %v2272_v36 = vmul.f32 %v1248_v26, %v1248_v26  ;;  %v2273_v37 = vmul.f32 %v1249_v27, %v1249_v27  ;;  %v3294_v38 = vmul.f32 %v2270_v28, %v1246_v18  ;;  %v1242_v39 = vmax.f32 %v218_v24, 1e-06 }
  0x52   : > { %4322 = vadd.xlane.f32.xlu1 %v4321_v31  ;;  %v4315_v40 = vadd.f32 %v4314_v33, %v3284_v25  ;;  %v3295_v41 = vmul.f32 %v2271_v34, %v1247_v19  ;;  %v1243_v42 = vmax.f32 %v219_v29, 1e-06  ;;  %v1244_v43 = vmax.f32 %v220_v30, 1e-06 }
  0x53   : > { %v3296_v46 = vmul.f32 %v2272_v36, %v1248_v26  ;;  %v3297_v47 = vmul.f32 %v2273_v37, %v1249_v27  ;;  %v1245_v48 = vmax.f32 %v221_v35, 1e-06  ;;  %v2266_v49 = vmul.f32 %v1242_v39, %v1242_v39  ;;  %v240_v26 = vld [vmem:[%s7536_s26 + $0x1b0] sm:$0xff]  ;;  %v241_v27 = vld [vmem:[%s7536_s26 + $0x1b8] sm:$0xff]  ;;  %v234_v36 = vld [vmem:[%s7536_s26 + $0x180] sm:$0xff] }
  0x54   : > { %v4316_v51 = vadd.f32 %v4315_v40, %v3285_v32  ;;  %v4329_v52 = vadd.f32 %v3295_v41, %v3294_v38  ;;  %v2267_v53 = vmul.f32 %v1243_v42, %v1243_v42  ;;  %v2268_v54 = vmul.f32 %v1244_v43, %v1244_v43  ;;  %v235_v37 = vld [vmem:[%s7536_s26 + $0x188] sm:$0xff] }
  0x55   : > { %v2269_v56 = vmul.f32 %v1245_v48, %v1245_v48  ;;  %v3290_v57 = vmul.f32 %v2266_v49, %v1242_v39  ;;  %v1254_v58 = vmax.f32 %v230_v44, 1e-06  ;;  %v1255_v59 = vmax.f32 %v231_v45, 1e-06 }
  0x56   : > { %4317 = vadd.xlane.f32.xlu0 %v4316_v51  ;;  %v4330_v61 = vadd.f32 %v4329_v52, %v3296_v46  ;;  %v3291_v62 = vmul.f32 %v2267_v53, %v1243_v42  ;;  %v3292_v63 = vmul.f32 %v2268_v54, %v1244_v43  ;;  %v1256_v0 = vmax.f32 %v232_v50, 1e-06  ;;  %v236_v42 = vld [vmem:[%s7536_s26 + $0x190] sm:$0xff] }
  0x57   : > { %v3293_v2 = vmul.f32 %v2269_v56, %v1245_v48  ;;  %v1257_v3 = vmax.f32 %v233_v55, 1e-06  ;;  %v2278_v4 = vmul.f32 %v1254_v58, %v1254_v58  ;;  %v2279_v5 = vmul.f32 %v1255_v59, %v1255_v59  ;;  %v246_v56 = vld [vmem:[%s7536_s26 + $0x1e0] sm:$0xff] }
  0x58   : > { %v4331_v8 = vadd.f32 %v4330_v61, %v3297_v47  ;;  %v4324_v9 = vadd.f32 %v3291_v62, %v3290_v57  ;;  %v2280_v10 = vmul.f32 %v1256_v0, %v1256_v0  ;;  %v1250_v11 = vmax.f32 %v226_v60, 1e-06  ;;  %v237_v47 = vld [vmem:[%s7536_s26 + $0x198] sm:$0xff]  ;;  %v247_v57 = vld [vmem:[%s7536_s26 + $0x1e8] sm:$0xff]  ;;  %v248_v62 = vld [vmem:[%s7536_s26 + $0x1f0] sm:$0xff] }
  0x59   : > { %v2281_v12 = vmul.f32 %v1257_v3, %v1257_v3  ;;  %v3302_v13 = vmul.f32 %v2278_v4, %v1254_v58  ;;  %v3303_v14 = vmul.f32 %v2279_v5, %v1255_v59  ;;  %v1251_v15 = vmax.f32 %v227_v1, 1e-06 }
  0x5a   : > { %4332 = vadd.xlane.f32.xlu1 %v4331_v8  ;;  %v4325_v17 = vadd.f32 %v4324_v9, %v3292_v63  ;;  %v3304_v18 = vmul.f32 %v2280_v10, %v1256_v0  ;;  %v1252_v19 = vmax.f32 %v228_v6, 1e-06  ;;  %v1253_v20 = vmax.f32 %v229_v7, 1e-06  ;;  %v242_v8 = vld [vmem:[%s7536_s26 + $0x1c0] sm:$0xff] }
  0x5b   : > { %v3305_v22 = vmul.f32 %v2281_v12, %v1257_v3  ;;  %v4339_v23 = vadd.f32 %v3303_v14, %v3302_v13  ;;  %v2274_v24 = vmul.f32 %v1250_v11, %v1250_v11  ;;  %v2275_v25 = vmul.f32 %v1251_v15, %v1251_v15  ;;  %v249_v3 = vld [vmem:[%s7536_s26 + $0x1f8] sm:$0xff]  ;;  %v243_v13 = vld [vmem:[%s7536_s26 + $0x1c8] sm:$0xff] }
  0x5c   : > { %v4326_v28 = vadd.f32 %v4325_v17, %v3293_v2  ;;  %v2276_v29 = vmul.f32 %v1252_v19, %v1252_v19  ;;  %v2277_v30 = vmul.f32 %v1253_v20, %v1253_v20  ;;  %v1262_v31 = vmax.f32 %v238_v16, 1e-06 }
  0x5d   : > { %v4340_v32 = vadd.f32 %v4339_v23, %v3304_v18  ;;  %v3298_v33 = vmul.f32 %v2274_v24, %v1250_v11  ;;  %v3299_v34 = vmul.f32 %v2275_v25, %v1251_v15  ;;  %v1263_v35 = vmax.f32 %v239_v21, 1e-06  ;;  %v244_v18 = vld [vmem:[%s7536_s26 + $0x1d0] sm:$0xff] }
  0x5e   : > { %4327 = vadd.xlane.f32.xlu0 %v4326_v28  ;;  %v3300_v38 = vmul.f32 %v2276_v29, %v1252_v19  ;;  %v3301_v39 = vmul.f32 %v2277_v30, %v1253_v20  ;;  %v1264_v40 = vmax.f32 %v240_v26, 1e-06  ;;  %v1265_v41 = vmax.f32 %v241_v27, 1e-06  ;;  %v245_v19 = vld [vmem:[%s7536_s26 + $0x1d8] sm:$0xff]  ;;  %v254_v28 = vld [vmem:[%s7536_s26 + $0x220] sm:$0xff] }
  0x5f   : > { %v4341_v43 = vadd.f32 %v4340_v32, %v3305_v22  ;;  %v4334_v44 = vadd.f32 %v3299_v34, %v3298_v33  ;;  %v2286_v45 = vmul.f32 %v1262_v31, %v1262_v31  ;;  %v2287_v46 = vmul.f32 %v1263_v35, %v1263_v35  ;;  %v255_v33 = vld [vmem:[%s7536_s26 + $0x228] sm:$0xff] }
  0x60   : > { %v2288_v48 = vmul.f32 %v1264_v40, %v1264_v40  ;;  %v2289_v49 = vmul.f32 %v1265_v41, %v1265_v41  ;;  %v1258_v50 = vmax.f32 %v234_v36, 1e-06  ;;  %v1259_v51 = vmax.f32 %v235_v37, 1e-06 }
  0x61   : > { %4342 = vadd.xlane.f32.xlu1 %v4341_v43  ;;  %v4335_v52 = vadd.f32 %v4334_v44, %v3300_v38  ;;  %v3310_v53 = vmul.f32 %v2286_v45, %v1262_v31  ;;  %v3311_v54 = vmul.f32 %v2287_v46, %v1263_v35  ;;  %v1260_v55 = vmax.f32 %v236_v42, 1e-06  ;;  %v256_v38 = vld [vmem:[%s7536_s26 + $0x230] sm:$0xff] }
  0x62   : > { %v3312_v58 = vmul.f32 %v2288_v48, %v1264_v40  ;;  %v3313_v59 = vmul.f32 %v2289_v49, %v1265_v41  ;;  %v1261_v60 = vmax.f32 %v237_v47, 1e-06  ;;  %v2282_v61 = vmul.f32 %v1258_v50, %v1258_v50  ;;  %v250_v48 = vld [vmem:[%s7536_s26 + $0x200] sm:$0xff]  ;;  %v251_v49 = vld [vmem:[%s7536_s26 + $0x208] sm:$0xff] }
  0x63   : > { %v4336_v63 = vadd.f32 %v4335_v52, %v3301_v39  ;;  %v4349_v0 = vadd.f32 %v3311_v54, %v3310_v53  ;;  %v2283_v1 = vmul.f32 %v1259_v51, %v1259_v51  ;;  %v2284_v2 = vmul.f32 %v1260_v55, %v1260_v55  ;;  %v257_v39 = vld [vmem:[%s7536_s26 + $0x238] sm:$0xff]  ;;  %v252_v54 = vld [vmem:[%s7536_s26 + $0x210] sm:$0xff] }
  0x64   : > { %v2285_v4 = vmul.f32 %v1261_v60, %v1261_v60  ;;  %v3306_v5 = vmul.f32 %v2282_v61, %v1258_v50  ;;  %v1270_v6 = vmax.f32 %v246_v56, 1e-06  ;;  %v1271_v7 = vmax.f32 %v247_v57, 1e-06 }
  0x65   : > { %4337 = vadd.xlane.f32.xlu0 %v4336_v63  ;;  %v4350_v9 = vadd.f32 %v4349_v0, %v3312_v58  ;;  %v3307_v10 = vmul.f32 %v2283_v1, %v1259_v51  ;;  %v3308_v11 = vmul.f32 %v2284_v2, %v1260_v55  ;;  %v1272_v12 = vmax.f32 %v248_v62, 1e-06 }
  0x66   : > { %v3309_v14 = vmul.f32 %v2285_v4, %v1261_v60  ;;  %v1273_v15 = vmax.f32 %v249_v3, 1e-06  ;;  %v2294_v16 = vmul.f32 %v1270_v6, %v1270_v6  ;;  %v2295_v17 = vmul.f32 %v1271_v7, %v1271_v7  ;;  %v262_v4 = vld [vmem:[%s7536_s26 + $0x260] sm:$0xff] }
  0x67   : > { %v4351_v20 = vadd.f32 %v4350_v9, %v3313_v59  ;;  %v4344_v21 = vadd.f32 %v3307_v10, %v3306_v5  ;;  %v2296_v22 = vmul.f32 %v1272_v12, %v1272_v12  ;;  %v1266_v23 = vmax.f32 %v242_v8, 1e-06  ;;  %v253_v59 = vld [vmem:[%s7536_s26 + $0x218] sm:$0xff]  ;;  %v263_v5 = vld [vmem:[%s7536_s26 + $0x268] sm:$0xff]  ;;  %v264_v10 = vld [vmem:[%s7536_s26 + $0x270] sm:$0xff] }
  0x68   : > { %v2297_v24 = vmul.f32 %v1273_v15, %v1273_v15  ;;  %v3318_v25 = vmul.f32 %v2294_v16, %v1270_v6  ;;  %v3319_v26 = vmul.f32 %v2295_v17, %v1271_v7  ;;  %v1267_v27 = vmax.f32 %v243_v13, 1e-06 }
  0x69   : > { %4352 = vadd.xlane.f32.xlu1 %v4351_v20  ;;  %v4345_v29 = vadd.f32 %v4344_v21, %v3308_v11  ;;  %v3320_v30 = vmul.f32 %v2296_v22, %v1272_v12  ;;  %v1268_v31 = vmax.f32 %v244_v18, 1e-06  ;;  %v1269_v32 = vmax.f32 %v245_v19, 1e-06  ;;  %v258_v20 = vld [vmem:[%s7536_s26 + $0x240] sm:$0xff] }
  0x6a   : > { %v3321_v34 = vmul.f32 %v2297_v24, %v1273_v15  ;;  %v4359_v35 = vadd.f32 %v3319_v26, %v3318_v25  ;;  %v2290_v36 = vmul.f32 %v1266_v23, %v1266_v23  ;;  %v2291_v37 = vmul.f32 %v1267_v27, %v1267_v27  ;;  %v265_v15 = vld [vmem:[%s7536_s26 + $0x278] sm:$0xff]  ;;  %v259_v25 = vld [vmem:[%s7536_s26 + $0x248] sm:$0xff] }
  0x6b   : > { %v4346_v40 = vadd.f32 %v4345_v29, %v3309_v14  ;;  %v2292_v41 = vmul.f32 %v1268_v31, %v1268_v31  ;;  %v2293_v42 = vmul.f32 %v1269_v32, %v1269_v32  ;;  %v1278_v43 = vmax.f32 %v254_v28, 1e-06 }
  0x6c   : > { %v4360_v44 = vadd.f32 %v4359_v35, %v3320_v30  ;;  %v3314_v45 = vmul.f32 %v2290_v36, %v1266_v23  ;;  %v3315_v46 = vmul.f32 %v2291_v37, %v1267_v27  ;;  %v1279_v47 = vmax.f32 %v255_v33, 1e-06  ;;  %v260_v30 = vld [vmem:[%s7536_s26 + $0x250] sm:$0xff] }
  0x6d   : > { %4347 = vadd.xlane.f32.xlu0 %v4346_v40  ;;  %v3316_v50 = vmul.f32 %v2292_v41, %v1268_v31  ;;  %v3317_v51 = vmul.f32 %v2293_v42, %v1269_v32  ;;  %v1280_v52 = vmax.f32 %v256_v38, 1e-06  ;;  %v1281_v53 = vmax.f32 %v257_v39, 1e-06  ;;  %v261_v31 = vld [vmem:[%s7536_s26 + $0x258] sm:$0xff]  ;;  %v270_v40 = vld [vmem:[%s7536_s26 + $0x2a0] sm:$0xff] }
  0x6e   : > { %v4361_v55 = vadd.f32 %v4360_v44, %v3321_v34  ;;  %v4354_v56 = vadd.f32 %v3315_v46, %v3314_v45  ;;  %v2302_v57 = vmul.f32 %v1278_v43, %v1278_v43  ;;  %v2303_v58 = vmul.f32 %v1279_v47, %v1279_v47  ;;  %v271_v45 = vld [vmem:[%s7536_s26 + $0x2a8] sm:$0xff] }
  0x6f   : > { %v2304_v60 = vmul.f32 %v1280_v52, %v1280_v52  ;;  %v2305_v61 = vmul.f32 %v1281_v53, %v1281_v53  ;;  %v1274_v62 = vmax.f32 %v250_v48, 1e-06  ;;  %v1275_v63 = vmax.f32 %v251_v49, 1e-06 }
  0x70   : > { %4362 = vadd.xlane.f32.xlu1 %v4361_v55  ;;  %v4355_v0 = vadd.f32 %v4354_v56, %v3316_v50  ;;  %v3326_v1 = vmul.f32 %v2302_v57, %v1278_v43  ;;  %v3327_v2 = vmul.f32 %v2303_v58, %v1279_v47  ;;  %v1276_v3 = vmax.f32 %v252_v54, 1e-06  ;;  %v272_v50 = vld [vmem:[%s7536_s26 + $0x2b0] sm:$0xff] }
  0x71   : > { %v3328_v6 = vmul.f32 %v2304_v60, %v1280_v52  ;;  %v3329_v7 = vmul.f32 %v2305_v61, %v1281_v53  ;;  %v1277_v8 = vmax.f32 %v253_v59, 1e-06  ;;  %v2298_v9 = vmul.f32 %v1274_v62, %v1274_v62  ;;  %v266_v60 = vld [vmem:[%s7536_s26 + $0x280] sm:$0xff]  ;;  %v267_v61 = vld [vmem:[%s7536_s26 + $0x288] sm:$0xff] }
  0x72   : > { %v4356_v11 = vadd.f32 %v4355_v0, %v3317_v51  ;;  %v4369_v12 = vadd.f32 %v3327_v2, %v3326_v1  ;;  %v2299_v13 = vmul.f32 %v1275_v63, %v1275_v63  ;;  %v2300_v14 = vmul.f32 %v1276_v3, %v1276_v3  ;;  %v273_v51 = vld [vmem:[%s7536_s26 + $0x2b8] sm:$0xff]  ;;  %v268_v2 = vld [vmem:[%s7536_s26 + $0x290] sm:$0xff] }
  0x73   : > { %v2301_v16 = vmul.f32 %v1277_v8, %v1277_v8  ;;  %v3322_v17 = vmul.f32 %v2298_v9, %v1274_v62  ;;  %v1286_v18 = vmax.f32 %v262_v4, 1e-06  ;;  %v1287_v19 = vmax.f32 %v263_v5, 1e-06 }
  0x74   : > { %4357 = vadd.xlane.f32.xlu0 %v4356_v11  ;;  %v4370_v21 = vadd.f32 %v4369_v12, %v3328_v6  ;;  %v3323_v22 = vmul.f32 %v2299_v13, %v1275_v63  ;;  %v3324_v23 = vmul.f32 %v2300_v14, %v1276_v3  ;;  %v1288_v24 = vmax.f32 %v264_v10, 1e-06 }
  0x75   : > { %v3325_v26 = vmul.f32 %v2301_v16, %v1277_v8  ;;  %v1289_v27 = vmax.f32 %v265_v15, 1e-06  ;;  %v2310_v28 = vmul.f32 %v1286_v18, %v1286_v18  ;;  %v2311_v29 = vmul.f32 %v1287_v19, %v1287_v19  ;;  %v278_v16 = vld [vmem:[%s7536_s26 + $0x2e0] sm:$0xff] }
  0x76   : > { %v4371_v32 = vadd.f32 %v4370_v21, %v3329_v7  ;;  %v4364_v33 = vadd.f32 %v3323_v22, %v3322_v17  ;;  %v2312_v34 = vmul.f32 %v1288_v24, %v1288_v24  ;;  %v1282_v35 = vmax.f32 %v258_v20, 1e-06  ;;  %v269_v7 = vld [vmem:[%s7536_s26 + $0x298] sm:$0xff]  ;;  %v279_v17 = vld [vmem:[%s7536_s26 + $0x2e8] sm:$0xff]  ;;  %v280_v22 = vld [vmem:[%s7536_s26 + $0x2f0] sm:$0xff] }
  0x77   : > { %v2313_v36 = vmul.f32 %v1289_v27, %v1289_v27  ;;  %v3334_v37 = vmul.f32 %v2310_v28, %v1286_v18  ;;  %v3335_v38 = vmul.f32 %v2311_v29, %v1287_v19  ;;  %v1283_v39 = vmax.f32 %v259_v25, 1e-06 }
  0x78   : > { %4372 = vadd.xlane.f32.xlu1 %v4371_v32  ;;  %v4365_v41 = vadd.f32 %v4364_v33, %v3324_v23  ;;  %v3336_v42 = vmul.f32 %v2312_v34, %v1288_v24  ;;  %v1284_v43 = vmax.f32 %v260_v30, 1e-06  ;;  %v1285_v44 = vmax.f32 %v261_v31, 1e-06  ;;  %v274_v32 = vld [vmem:[%s7536_s26 + $0x2c0] sm:$0xff] }
  0x79   : > { %v3337_v46 = vmul.f32 %v2313_v36, %v1289_v27  ;;  %v4379_v47 = vadd.f32 %v3335_v38, %v3334_v37  ;;  %v2306_v48 = vmul.f32 %v1282_v35, %v1282_v35  ;;  %v2307_v49 = vmul.f32 %v1283_v39, %v1283_v39  ;;  %v281_v27 = vld [vmem:[%s7536_s26 + $0x2f8] sm:$0xff]  ;;  %v275_v37 = vld [vmem:[%s7536_s26 + $0x2c8] sm:$0xff] }
  0x7a   : > { %v4366_v52 = vadd.f32 %v4365_v41, %v3325_v26  ;;  %v2308_v53 = vmul.f32 %v1284_v43, %v1284_v43  ;;  %v2309_v54 = vmul.f32 %v1285_v44, %v1285_v44  ;;  %v1294_v55 = vmax.f32 %v270_v40, 1e-06 }
  0x7b   : > { %v4380_v56 = vadd.f32 %v4379_v47, %v3336_v42  ;;  %v3330_v57 = vmul.f32 %v2306_v48, %v1282_v35  ;;  %v3331_v58 = vmul.f32 %v2307_v49, %v1283_v39  ;;  %v1295_v59 = vmax.f32 %v271_v45, 1e-06  ;;  %v276_v42 = vld [vmem:[%s7536_s26 + $0x2d0] sm:$0xff] }
  0x7c   : > { %4367 = vadd.xlane.f32.xlu0 %v4366_v52  ;;  %v3332_v62 = vmul.f32 %v2308_v53, %v1284_v43  ;;  %v3333_v63 = vmul.f32 %v2309_v54, %v1285_v44  ;;  %v1296_v0 = vmax.f32 %v272_v50, 1e-06  ;;  %v1297_v1 = vmax.f32 %v273_v51, 1e-06  ;;  %v277_v43 = vld [vmem:[%s7536_s26 + $0x2d8] sm:$0xff]  ;;  %v286_v52 = vld [vmem:[%s7536_s26 + $0x320] sm:$0xff] }
  0x7d   : > { %v4381_v3 = vadd.f32 %v4380_v56, %v3337_v46  ;;  %v4374_v4 = vadd.f32 %v3331_v58, %v3330_v57  ;;  %v2318_v5 = vmul.f32 %v1294_v55, %v1294_v55  ;;  %v2319_v6 = vmul.f32 %v1295_v59, %v1295_v59  ;;  %v287_v57 = vld [vmem:[%s7536_s26 + $0x328] sm:$0xff] }
  0x7e   : > { %v2320_v8 = vmul.f32 %v1296_v0, %v1296_v0  ;;  %v2321_v9 = vmul.f32 %v1297_v1, %v1297_v1  ;;  %v1290_v10 = vmax.f32 %v266_v60, 1e-06  ;;  %v1291_v11 = vmax.f32 %v267_v61, 1e-06 }
  0x7f   : > { %4382 = vadd.xlane.f32.xlu1 %v4381_v3  ;;  %v4375_v12 = vadd.f32 %v4374_v4, %v3332_v62  ;;  %v3342_v13 = vmul.f32 %v2318_v5, %v1294_v55  ;;  %v3343_v14 = vmul.f32 %v2319_v6, %v1295_v59  ;;  %v1292_v15 = vmax.f32 %v268_v2, 1e-06  ;;  %v288_v62 = vld [vmem:[%s7536_s26 + $0x330] sm:$0xff] }
  0x80   : > { %v3344_v18 = vmul.f32 %v2320_v8, %v1296_v0  ;;  %v3345_v19 = vmul.f32 %v2321_v9, %v1297_v1  ;;  %v1293_v20 = vmax.f32 %v269_v7, 1e-06  ;;  %v2314_v21 = vmul.f32 %v1290_v10, %v1290_v10  ;;  %v282_v8 = vld [vmem:[%s7536_s26 + $0x300] sm:$0xff]  ;;  %v283_v9 = vld [vmem:[%s7536_s26 + $0x308] sm:$0xff] }
  0x81   : > { %v4376_v23 = vadd.f32 %v4375_v12, %v3333_v63  ;;  %v4389_v24 = vadd.f32 %v3343_v14, %v3342_v13  ;;  %v2315_v25 = vmul.f32 %v1291_v11, %v1291_v11  ;;  %v2316_v26 = vmul.f32 %v1292_v15, %v1292_v15  ;;  %v289_v63 = vld [vmem:[%s7536_s26 + $0x338] sm:$0xff]  ;;  %v284_v14 = vld [vmem:[%s7536_s26 + $0x310] sm:$0xff] }
  0x82   : > { %v2317_v28 = vmul.f32 %v1293_v20, %v1293_v20  ;;  %v3338_v29 = vmul.f32 %v2314_v21, %v1290_v10  ;;  %v1302_v30 = vmax.f32 %v278_v16, 1e-06  ;;  %v1303_v31 = vmax.f32 %v279_v17, 1e-06 }
  0x83   : > { %4377 = vadd.xlane.f32.xlu0 %v4376_v23  ;;  %v4390_v33 = vadd.f32 %v4389_v24, %v3344_v18  ;;  %v3339_v34 = vmul.f32 %v2315_v25, %v1291_v11  ;;  %v3340_v35 = vmul.f32 %v2316_v26, %v1292_v15  ;;  %v1304_v36 = vmax.f32 %v280_v22, 1e-06 }
  0x84   : > { %v3341_v38 = vmul.f32 %v2317_v28, %v1293_v20  ;;  %v1305_v39 = vmax.f32 %v281_v27, 1e-06  ;;  %v2326_v40 = vmul.f32 %v1302_v30, %v1302_v30  ;;  %v2327_v41 = vmul.f32 %v1303_v31, %v1303_v31  ;;  %v294_v28 = vld [vmem:[%s7536_s26 + $0x360] sm:$0xff] }
  0x85   : > { %v4391_v44 = vadd.f32 %v4390_v33, %v3345_v19  ;;  %v4384_v45 = vadd.f32 %v3339_v34, %v3338_v29  ;;  %v2328_v46 = vmul.f32 %v1304_v36, %v1304_v36  ;;  %v1298_v47 = vmax.f32 %v274_v32, 1e-06  ;;  %v285_v19 = vld [vmem:[%s7536_s26 + $0x318] sm:$0xff]  ;;  %v295_v29 = vld [vmem:[%s7536_s26 + $0x368] sm:$0xff]  ;;  %v296_v34 = vld [vmem:[%s7536_s26 + $0x370] sm:$0xff] }
  0x86   : > { %v2329_v48 = vmul.f32 %v1305_v39, %v1305_v39  ;;  %v3350_v49 = vmul.f32 %v2326_v40, %v1302_v30  ;;  %v3351_v50 = vmul.f32 %v2327_v41, %v1303_v31  ;;  %v1299_v51 = vmax.f32 %v275_v37, 1e-06 }
  0x87   : > { %4392 = vadd.xlane.f32.xlu1 %v4391_v44  ;;  %v4385_v53 = vadd.f32 %v4384_v45, %v3340_v35  ;;  %v3352_v54 = vmul.f32 %v2328_v46, %v1304_v36  ;;  %v1300_v55 = vmax.f32 %v276_v42, 1e-06  ;;  %v1301_v56 = vmax.f32 %v277_v43, 1e-06  ;;  %v290_v44 = vld [vmem:[%s7536_s26 + $0x340] sm:$0xff] }
  0x88   : > { %v3353_v58 = vmul.f32 %v2329_v48, %v1305_v39  ;;  %v4399_v59 = vadd.f32 %v3351_v50, %v3350_v49  ;;  %v2322_v60 = vmul.f32 %v1298_v47, %v1298_v47  ;;  %v2323_v61 = vmul.f32 %v1299_v51, %v1299_v51  ;;  %v297_v39 = vld [vmem:[%s7536_s26 + $0x378] sm:$0xff]  ;;  %v291_v49 = vld [vmem:[%s7536_s26 + $0x348] sm:$0xff] }
  0x89   : > { %v4386_v0 = vadd.f32 %v4385_v53, %v3341_v38  ;;  %v2324_v1 = vmul.f32 %v1300_v55, %v1300_v55  ;;  %v2325_v2 = vmul.f32 %v1301_v56, %v1301_v56  ;;  %v1310_v3 = vmax.f32 %v286_v52, 1e-06 }
  0x8a   : > { %v4400_v4 = vadd.f32 %v4399_v59, %v3352_v54  ;;  %v3346_v5 = vmul.f32 %v2322_v60, %v1298_v47  ;;  %v3347_v6 = vmul.f32 %v2323_v61, %v1299_v51  ;;  %v1311_v7 = vmax.f32 %v287_v57, 1e-06  ;;  %v292_v54 = vld [vmem:[%s7536_s26 + $0x350] sm:$0xff] }
  0x8b   : > { %4387 = vadd.xlane.f32.xlu0 %v4386_v0  ;;  %v3348_v10 = vmul.f32 %v2324_v1, %v1300_v55  ;;  %v3349_v11 = vmul.f32 %v2325_v2, %v1301_v56  ;;  %v1312_v12 = vmax.f32 %v288_v62, 1e-06  ;;  %v1313_v13 = vmax.f32 %v289_v63, 1e-06  ;;  %v293_v55 = vld [vmem:[%s7536_s26 + $0x358] sm:$0xff]  ;;  %v302_v0 = vld [vmem:[%s7536_s26 + $0x3a0] sm:$0xff] }
  0x8c   : > { %v4401_v15 = vadd.f32 %v4400_v4, %v3353_v58  ;;  %v4394_v16 = vadd.f32 %v3347_v6, %v3346_v5  ;;  %v2334_v17 = vmul.f32 %v1310_v3, %v1310_v3  ;;  %v2335_v18 = vmul.f32 %v1311_v7, %v1311_v7  ;;  %v303_v5 = vld [vmem:[%s7536_s26 + $0x3a8] sm:$0xff] }
  0x8d   : > { %v2336_v20 = vmul.f32 %v1312_v12, %v1312_v12  ;;  %v2337_v21 = vmul.f32 %v1313_v13, %v1313_v13  ;;  %v1306_v22 = vmax.f32 %v282_v8, 1e-06  ;;  %v1307_v23 = vmax.f32 %v283_v9, 1e-06 }
  0x8e   : > { %4402 = vadd.xlane.f32.xlu1 %v4401_v15  ;;  %v4395_v24 = vadd.f32 %v4394_v16, %v3348_v10  ;;  %v3358_v25 = vmul.f32 %v2334_v17, %v1310_v3  ;;  %v3359_v26 = vmul.f32 %v2335_v18, %v1311_v7  ;;  %v1308_v27 = vmax.f32 %v284_v14, 1e-06  ;;  %v304_v10 = vld [vmem:[%s7536_s26 + $0x3b0] sm:$0xff] }
  0x8f   : > { %v3360_v30 = vmul.f32 %v2336_v20, %v1312_v12  ;;  %v3361_v31 = vmul.f32 %v2337_v21, %v1313_v13  ;;  %v1309_v32 = vmax.f32 %v285_v19, 1e-06  ;;  %v2330_v33 = vmul.f32 %v1306_v22, %v1306_v22  ;;  %v298_v20 = vld [vmem:[%s7536_s26 + $0x380] sm:$0xff]  ;;  %v299_v21 = vld [vmem:[%s7536_s26 + $0x388] sm:$0xff] }
  0x90   : > { %v4396_v35 = vadd.f32 %v4395_v24, %v3349_v11  ;;  %v4409_v36 = vadd.f32 %v3359_v26, %v3358_v25  ;;  %v2331_v37 = vmul.f32 %v1307_v23, %v1307_v23  ;;  %v2332_v38 = vmul.f32 %v1308_v27, %v1308_v27  ;;  %v305_v11 = vld [vmem:[%s7536_s26 + $0x3b8] sm:$0xff]  ;;  %v300_v26 = vld [vmem:[%s7536_s26 + $0x390] sm:$0xff] }
  0x91   : > { %v2333_v40 = vmul.f32 %v1309_v32, %v1309_v32  ;;  %v3354_v41 = vmul.f32 %v2330_v33, %v1306_v22  ;;  %v1318_v42 = vmax.f32 %v294_v28, 1e-06  ;;  %v1319_v43 = vmax.f32 %v295_v29, 1e-06 }
  0x92   : > { %4397 = vadd.xlane.f32.xlu0 %v4396_v35  ;;  %v4410_v45 = vadd.f32 %v4409_v36, %v3360_v30  ;;  %v3355_v46 = vmul.f32 %v2331_v37, %v1307_v23  ;;  %v3356_v47 = vmul.f32 %v2332_v38, %v1308_v27  ;;  %v1320_v48 = vmax.f32 %v296_v34, 1e-06 }
  0x93   : > { %v3357_v50 = vmul.f32 %v2333_v40, %v1309_v32  ;;  %v1321_v51 = vmax.f32 %v297_v39, 1e-06  ;;  %v2342_v52 = vmul.f32 %v1318_v42, %v1318_v42  ;;  %v2343_v53 = vmul.f32 %v1319_v43, %v1319_v43  ;;  %v310_v40 = vld [vmem:[%s7536_s26 + $0x3e0] sm:$0xff] }
  0x94   : > { %v4411_v56 = vadd.f32 %v4410_v45, %v3361_v31  ;;  %v4404_v57 = vadd.f32 %v3355_v46, %v3354_v41  ;;  %v2344_v58 = vmul.f32 %v1320_v48, %v1320_v48  ;;  %v1314_v59 = vmax.f32 %v290_v44, 1e-06  ;;  %v301_v31 = vld [vmem:[%s7536_s26 + $0x398] sm:$0xff]  ;;  %v311_v41 = vld [vmem:[%s7536_s26 + $0x3e8] sm:$0xff]  ;;  %v312_v46 = vld [vmem:[%s7536_s26 + $0x3f0] sm:$0xff] }
  0x95   : > { %v2345_v60 = vmul.f32 %v1321_v51, %v1321_v51  ;;  %v3366_v61 = vmul.f32 %v2342_v52, %v1318_v42  ;;  %v3367_v62 = vmul.f32 %v2343_v53, %v1319_v43  ;;  %v1315_v63 = vmax.f32 %v291_v49, 1e-06 }
  0x96   : > { %4412 = vadd.xlane.f32.xlu1 %v4411_v56  ;;  %v4405_v1 = vadd.f32 %v4404_v57, %v3356_v47  ;;  %v3368_v2 = vmul.f32 %v2344_v58, %v1320_v48  ;;  %v1316_v3 = vmax.f32 %v292_v54, 1e-06  ;;  %v1317_v4 = vmax.f32 %v293_v55, 1e-06  ;;  %v306_v56 = vld [vmem:[%s7536_s26 + $0x3c0] sm:$0xff] }
  0x97   : > { %v3369_v6 = vmul.f32 %v2345_v60, %v1321_v51  ;;  %v4419_v7 = vadd.f32 %v3367_v62, %v3366_v61  ;;  %v2338_v8 = vmul.f32 %v1314_v59, %v1314_v59  ;;  %v2339_v9 = vmul.f32 %v1315_v63, %v1315_v63  ;;  %v313_v51 = vld [vmem:[%s7536_s26 + $0x3f8] sm:$0xff]  ;;  %v307_v61 = vld [vmem:[%s7536_s26 + $0x3c8] sm:$0xff] }
  0x98   : > { %v4406_v12 = vadd.f32 %v4405_v1, %v3357_v50  ;;  %v2340_v13 = vmul.f32 %v1316_v3, %v1316_v3  ;;  %v2341_v14 = vmul.f32 %v1317_v4, %v1317_v4  ;;  %v1326_v15 = vmax.f32 %v302_v0, 1e-06 }
  0x99   : > { %v4420_v16 = vadd.f32 %v4419_v7, %v3368_v2  ;;  %v3362_v17 = vmul.f32 %v2338_v8, %v1314_v59  ;;  %v3363_v18 = vmul.f32 %v2339_v9, %v1315_v63  ;;  %v1327_v19 = vmax.f32 %v303_v5, 1e-06  ;;  %v308_v2 = vld [vmem:[%s7536_s26 + $0x3d0] sm:$0xff] }
  0x9a   : > { %4407 = vadd.xlane.f32.xlu0 %v4406_v12  ;;  %v3364_v22 = vmul.f32 %v2340_v13, %v1316_v3  ;;  %v3365_v23 = vmul.f32 %v2341_v14, %v1317_v4  ;;  %v1328_v24 = vmax.f32 %v304_v10, 1e-06  ;;  %v1329_v25 = vmax.f32 %v305_v11, 1e-06  ;;  %v309_v3 = vld [vmem:[%s7536_s26 + $0x3d8] sm:$0xff]  ;;  %v318_v12 = vld [vmem:[%s7536_s26 + $0x420] sm:$0xff] }
  0x9b   : > { %v4421_v27 = vadd.f32 %v4420_v16, %v3369_v6  ;;  %v4414_v28 = vadd.f32 %v3363_v18, %v3362_v17  ;;  %v2350_v29 = vmul.f32 %v1326_v15, %v1326_v15  ;;  %v2351_v30 = vmul.f32 %v1327_v19, %v1327_v19  ;;  %v319_v17 = vld [vmem:[%s7536_s26 + $0x428] sm:$0xff] }
  0x9c   : > { %v2352_v32 = vmul.f32 %v1328_v24, %v1328_v24  ;;  %v2353_v33 = vmul.f32 %v1329_v25, %v1329_v25  ;;  %v1322_v34 = vmax.f32 %v298_v20, 1e-06  ;;  %v1323_v35 = vmax.f32 %v299_v21, 1e-06 }
  0x9d   : > { %4422 = vadd.xlane.f32.xlu1 %v4421_v27  ;;  %v4415_v36 = vadd.f32 %v4414_v28, %v3364_v22  ;;  %v3374_v37 = vmul.f32 %v2350_v29, %v1326_v15  ;;  %v3375_v38 = vmul.f32 %v2351_v30, %v1327_v19  ;;  %v1324_v39 = vmax.f32 %v300_v26, 1e-06  ;;  %v320_v22 = vld [vmem:[%s7536_s26 + $0x430] sm:$0xff] }
  0x9e   : > { %v3376_v42 = vmul.f32 %v2352_v32, %v1328_v24  ;;  %v3377_v43 = vmul.f32 %v2353_v33, %v1329_v25  ;;  %v1325_v44 = vmax.f32 %v301_v31, 1e-06  ;;  %v2346_v45 = vmul.f32 %v1322_v34, %v1322_v34  ;;  %v314_v32 = vld [vmem:[%s7536_s26 + $0x400] sm:$0xff]  ;;  %v315_v33 = vld [vmem:[%s7536_s26 + $0x408] sm:$0xff] }
  0x9f   : > { %v4416_v47 = vadd.f32 %v4415_v36, %v3365_v23  ;;  %v4429_v48 = vadd.f32 %v3375_v38, %v3374_v37  ;;  %v2347_v49 = vmul.f32 %v1323_v35, %v1323_v35  ;;  %v2348_v50 = vmul.f32 %v1324_v39, %v1324_v39  ;;  %v321_v23 = vld [vmem:[%s7536_s26 + $0x438] sm:$0xff]  ;;  %v316_v38 = vld [vmem:[%s7536_s26 + $0x410] sm:$0xff] }
  0xa0   : > { %v2349_v52 = vmul.f32 %v1325_v44, %v1325_v44  ;;  %v3370_v53 = vmul.f32 %v2346_v45, %v1322_v34  ;;  %v1334_v54 = vmax.f32 %v310_v40, 1e-06  ;;  %v1335_v55 = vmax.f32 %v311_v41, 1e-06 }
  0xa1   : > { %4417 = vadd.xlane.f32.xlu0 %v4416_v47  ;;  %v4430_v57 = vadd.f32 %v4429_v48, %v3376_v42  ;;  %v3371_v58 = vmul.f32 %v2347_v49, %v1323_v35  ;;  %v3372_v59 = vmul.f32 %v2348_v50, %v1324_v39  ;;  %v1336_v60 = vmax.f32 %v312_v46, 1e-06 }
  0xa2   : > { %v3373_v62 = vmul.f32 %v2349_v52, %v1325_v44  ;;  %v1337_v63 = vmax.f32 %v313_v51, 1e-06  ;;  %v2358_v0 = vmul.f32 %v1334_v54, %v1334_v54  ;;  %v2359_v1 = vmul.f32 %v1335_v55, %v1335_v55  ;;  %v326_v52 = vld [vmem:[%s7536_s26 + $0x460] sm:$0xff] }
  0xa3   : > { %v4431_v4 = vadd.f32 %v4430_v57, %v3377_v43  ;;  %v4424_v5 = vadd.f32 %v3371_v58, %v3370_v53  ;;  %v2360_v6 = vmul.f32 %v1336_v60, %v1336_v60  ;;  %v1330_v7 = vmax.f32 %v306_v56, 1e-06  ;;  %v317_v43 = vld [vmem:[%s7536_s26 + $0x418] sm:$0xff]  ;;  %v327_v53 = vld [vmem:[%s7536_s26 + $0x468] sm:$0xff]  ;;  %v328_v58 = vld [vmem:[%s7536_s26 + $0x470] sm:$0xff] }
  0xa4   : > { %v2361_v8 = vmul.f32 %v1337_v63, %v1337_v63  ;;  %v3382_v9 = vmul.f32 %v2358_v0, %v1334_v54  ;;  %v3383_v10 = vmul.f32 %v2359_v1, %v1335_v55  ;;  %v1331_v11 = vmax.f32 %v307_v61, 1e-06 }
  0xa5   : > { %4432 = vadd.xlane.f32.xlu1 %v4431_v4  ;;  %v4425_v13 = vadd.f32 %v4424_v5, %v3372_v59  ;;  %v3384_v14 = vmul.f32 %v2360_v6, %v1336_v60  ;;  %v1332_v15 = vmax.f32 %v308_v2, 1e-06  ;;  %v1333_v16 = vmax.f32 %v309_v3, 1e-06  ;;  %v322_v4 = vld [vmem:[%s7536_s26 + $0x440] sm:$0xff] }
  0xa6   : > { %v3385_v18 = vmul.f32 %v2361_v8, %v1337_v63  ;;  %v4439_v19 = vadd.f32 %v3383_v10, %v3382_v9  ;;  %v2354_v20 = vmul.f32 %v1330_v7, %v1330_v7  ;;  %v2355_v21 = vmul.f32 %v1331_v11, %v1331_v11  ;;  %v329_v63 = vld [vmem:[%s7536_s26 + $0x478] sm:$0xff]  ;;  %v323_v9 = vld [vmem:[%s7536_s26 + $0x448] sm:$0xff] }
  0xa7   : > { %v4426_v24 = vadd.f32 %v4425_v13, %v3373_v62  ;;  %v2356_v25 = vmul.f32 %v1332_v15, %v1332_v15  ;;  %v2357_v26 = vmul.f32 %v1333_v16, %v1333_v16  ;;  %v1342_v27 = vmax.f32 %v318_v12, 1e-06 }
  0xa8   : > { %v4440_v28 = vadd.f32 %v4439_v19, %v3384_v14  ;;  %v3378_v29 = vmul.f32 %v2354_v20, %v1330_v7  ;;  %v3379_v30 = vmul.f32 %v2355_v21, %v1331_v11  ;;  %v1343_v31 = vmax.f32 %v319_v17, 1e-06  ;;  %v324_v14 = vld [vmem:[%s7536_s26 + $0x450] sm:$0xff] }
  0xa9   : > { %4427 = vadd.xlane.f32.xlu0 %v4426_v24  ;;  %v3380_v34 = vmul.f32 %v2356_v25, %v1332_v15  ;;  %v3381_v35 = vmul.f32 %v2357_v26, %v1333_v16  ;;  %v1344_v36 = vmax.f32 %v320_v22, 1e-06  ;;  %v1345_v37 = vmax.f32 %v321_v23, 1e-06  ;;  %v325_v15 = vld [vmem:[%s7536_s26 + $0x458] sm:$0xff]  ;;  %v334_v24 = vld [vmem:[%s7536_s26 + $0x4a0] sm:$0xff] }
  0xaa   : > { %v4441_v39 = vadd.f32 %v4440_v28, %v3385_v18  ;;  %v4434_v40 = vadd.f32 %v3379_v30, %v3378_v29  ;;  %v2366_v41 = vmul.f32 %v1342_v27, %v1342_v27  ;;  %v2367_v42 = vmul.f32 %v1343_v31, %v1343_v31  ;;  %v335_v29 = vld [vmem:[%s7536_s26 + $0x4a8] sm:$0xff] }
  0xab   : > { %v2368_v44 = vmul.f32 %v1344_v36, %v1344_v36  ;;  %v2369_v45 = vmul.f32 %v1345_v37, %v1345_v37  ;;  %v1338_v46 = vmax.f32 %v314_v32, 1e-06  ;;  %v1339_v47 = vmax.f32 %v315_v33, 1e-06 }
  0xac   : > { %4442 = vadd.xlane.f32.xlu1 %v4441_v39  ;;  %v4435_v48 = vadd.f32 %v4434_v40, %v3380_v34  ;;  %v3390_v49 = vmul.f32 %v2366_v41, %v1342_v27  ;;  %v3391_v50 = vmul.f32 %v2367_v42, %v1343_v31  ;;  %v1340_v51 = vmax.f32 %v316_v38, 1e-06  ;;  %v336_v34 = vld [vmem:[%s7536_s26 + $0x4b0] sm:$0xff] }
  0xad   : > { %v3392_v54 = vmul.f32 %v2368_v44, %v1344_v36  ;;  %v3393_v55 = vmul.f32 %v2369_v45, %v1345_v37  ;;  %v1341_v56 = vmax.f32 %v317_v43, 1e-06  ;;  %v2362_v57 = vmul.f32 %v1338_v46, %v1338_v46  ;;  %v330_v44 = vld [vmem:[%s7536_s26 + $0x480] sm:$0xff]  ;;  %v331_v45 = vld [vmem:[%s7536_s26 + $0x488] sm:$0xff] }
  0xae   : > { %v4436_v59 = vadd.f32 %v4435_v48, %v3381_v35  ;;  %v4449_v60 = vadd.f32 %v3391_v50, %v3390_v49  ;;  %v2363_v61 = vmul.f32 %v1339_v47, %v1339_v47  ;;  %v2364_v62 = vmul.f32 %v1340_v51, %v1340_v51  ;;  %v337_v35 = vld [vmem:[%s7536_s26 + $0x4b8] sm:$0xff]  ;;  %v332_v50 = vld [vmem:[%s7536_s26 + $0x490] sm:$0xff] }
  0xaf   : > { %v2365_v0 = vmul.f32 %v1341_v56, %v1341_v56  ;;  %v3386_v1 = vmul.f32 %v2362_v57, %v1338_v46  ;;  %v1350_v2 = vmax.f32 %v326_v52, 1e-06  ;;  %v1351_v3 = vmax.f32 %v327_v53, 1e-06 }
  0xb0   : > { %4437 = vadd.xlane.f32.xlu0 %v4436_v59  ;;  %v4450_v5 = vadd.f32 %v4449_v60, %v3392_v54  ;;  %v3387_v6 = vmul.f32 %v2363_v61, %v1339_v47  ;;  %v3388_v7 = vmul.f32 %v2364_v62, %v1340_v51  ;;  %v1352_v8 = vmax.f32 %v328_v58, 1e-06 }
  0xb1   : > { %v3389_v10 = vmul.f32 %v2365_v0, %v1341_v56  ;;  %v1353_v11 = vmax.f32 %v329_v63, 1e-06  ;;  %v2374_v12 = vmul.f32 %v1350_v2, %v1350_v2  ;;  %v2375_v13 = vmul.f32 %v1351_v3, %v1351_v3  ;;  %v342_v0 = vld [vmem:[%s7536_s26 + $0x4e0] sm:$0xff] }
  0xb2   : > { %v4451_v16 = vadd.f32 %v4450_v5, %v3393_v55  ;;  %v4444_v17 = vadd.f32 %v3387_v6, %v3386_v1  ;;  %v2376_v18 = vmul.f32 %v1352_v8, %v1352_v8  ;;  %v1346_v19 = vmax.f32 %v322_v4, 1e-06  ;;  %v333_v55 = vld [vmem:[%s7536_s26 + $0x498] sm:$0xff]  ;;  %v343_v1 = vld [vmem:[%s7536_s26 + $0x4e8] sm:$0xff]  ;;  %v344_v6 = vld [vmem:[%s7536_s26 + $0x4f0] sm:$0xff] }
  0xb3   : > { %v2377_v20 = vmul.f32 %v1353_v11, %v1353_v11  ;;  %v3398_v21 = vmul.f32 %v2374_v12, %v1350_v2  ;;  %v3399_v22 = vmul.f32 %v2375_v13, %v1351_v3  ;;  %v1347_v23 = vmax.f32 %v323_v9, 1e-06 }
  0xb4   : > { %4452 = vadd.xlane.f32.xlu1 %v4451_v16  ;;  %v4445_v25 = vadd.f32 %v4444_v17, %v3388_v7  ;;  %v3400_v26 = vmul.f32 %v2376_v18, %v1352_v8  ;;  %v1348_v27 = vmax.f32 %v324_v14, 1e-06  ;;  %v1349_v28 = vmax.f32 %v325_v15, 1e-06  ;;  %v338_v16 = vld [vmem:[%s7536_s26 + $0x4c0] sm:$0xff] }
  0xb5   : > { %v3401_v30 = vmul.f32 %v2377_v20, %v1353_v11  ;;  %v4459_v31 = vadd.f32 %v3399_v22, %v3398_v21  ;;  %v2370_v32 = vmul.f32 %v1346_v19, %v1346_v19  ;;  %v2371_v33 = vmul.f32 %v1347_v23, %v1347_v23  ;;  %v345_v11 = vld [vmem:[%s7536_s26 + $0x4f8] sm:$0xff]  ;;  %v339_v21 = vld [vmem:[%s7536_s26 + $0x4c8] sm:$0xff] }
  0xb6   : > { %v4446_v36 = vadd.f32 %v4445_v25, %v3389_v10  ;;  %v2372_v37 = vmul.f32 %v1348_v27, %v1348_v27  ;;  %v2373_v38 = vmul.f32 %v1349_v28, %v1349_v28  ;;  %v1358_v39 = vmax.f32 %v334_v24, 1e-06 }
  0xb7   : > { %v4460_v40 = vadd.f32 %v4459_v31, %v3400_v26  ;;  %v3394_v41 = vmul.f32 %v2370_v32, %v1346_v19  ;;  %v3395_v42 = vmul.f32 %v2371_v33, %v1347_v23  ;;  %v1359_v43 = vmax.f32 %v335_v29, 1e-06  ;;  %v340_v26 = vld [vmem:[%s7536_s26 + $0x4d0] sm:$0xff] }
  0xb8   : > { %4447 = vadd.xlane.f32.xlu0 %v4446_v36  ;;  %v3396_v46 = vmul.f32 %v2372_v37, %v1348_v27  ;;  %v3397_v47 = vmul.f32 %v2373_v38, %v1349_v28  ;;  %v1360_v48 = vmax.f32 %v336_v34, 1e-06  ;;  %v1361_v49 = vmax.f32 %v337_v35, 1e-06  ;;  %v341_v27 = vld [vmem:[%s7536_s26 + $0x4d8] sm:$0xff]  ;;  %v350_v36 = vld [vmem:[%s7536_s26 + $0x520] sm:$0xff] }
  0xb9   : > { %v4461_v51 = vadd.f32 %v4460_v40, %v3401_v30  ;;  %v4454_v52 = vadd.f32 %v3395_v42, %v3394_v41  ;;  %v2382_v53 = vmul.f32 %v1358_v39, %v1358_v39  ;;  %v2383_v54 = vmul.f32 %v1359_v43, %v1359_v43  ;;  %v351_v41 = vld [vmem:[%s7536_s26 + $0x528] sm:$0xff] }
  0xba   : > { %v2384_v56 = vmul.f32 %v1360_v48, %v1360_v48  ;;  %v2385_v57 = vmul.f32 %v1361_v49, %v1361_v49  ;;  %v1354_v58 = vmax.f32 %v330_v44, 1e-06  ;;  %v1355_v59 = vmax.f32 %v331_v45, 1e-06 }
  0xbb   : > { %4462 = vadd.xlane.f32.xlu1 %v4461_v51  ;;  %v4455_v60 = vadd.f32 %v4454_v52, %v3396_v46  ;;  %v3406_v61 = vmul.f32 %v2382_v53, %v1358_v39  ;;  %v3407_v62 = vmul.f32 %v2383_v54, %v1359_v43  ;;  %v1356_v63 = vmax.f32 %v332_v50, 1e-06  ;;  %v352_v46 = vld [vmem:[%s7536_s26 + $0x530] sm:$0xff] }
  0xbc   : > { %v3408_v2 = vmul.f32 %v2384_v56, %v1360_v48  ;;  %v3409_v3 = vmul.f32 %v2385_v57, %v1361_v49  ;;  %v1357_v4 = vmax.f32 %v333_v55, 1e-06  ;;  %v2378_v5 = vmul.f32 %v1354_v58, %v1354_v58  ;;  %v346_v56 = vld [vmem:[%s7536_s26 + $0x500] sm:$0xff]  ;;  %v347_v57 = vld [vmem:[%s7536_s26 + $0x508] sm:$0xff] }
  0xbd   : > { %v4456_v7 = vadd.f32 %v4455_v60, %v3397_v47  ;;  %v4469_v8 = vadd.f32 %v3407_v62, %v3406_v61  ;;  %v2379_v9 = vmul.f32 %v1355_v59, %v1355_v59  ;;  %v2380_v10 = vmul.f32 %v1356_v63, %v1356_v63  ;;  %v353_v47 = vld [vmem:[%s7536_s26 + $0x538] sm:$0xff]  ;;  %v348_v62 = vld [vmem:[%s7536_s26 + $0x510] sm:$0xff] }
  0xbe   : > { %v2381_v12 = vmul.f32 %v1357_v4, %v1357_v4  ;;  %v3402_v13 = vmul.f32 %v2378_v5, %v1354_v58  ;;  %v1366_v14 = vmax.f32 %v342_v0, 1e-06  ;;  %v1367_v15 = vmax.f32 %v343_v1, 1e-06 }
  0xbf   : > { %4457 = vadd.xlane.f32.xlu0 %v4456_v7  ;;  %v4470_v17 = vadd.f32 %v4469_v8, %v3408_v2  ;;  %v3403_v18 = vmul.f32 %v2379_v9, %v1355_v59  ;;  %v3404_v19 = vmul.f32 %v2380_v10, %v1356_v63  ;;  %v1368_v20 = vmax.f32 %v344_v6, 1e-06 }
  0xc0   : > { %v3405_v22 = vmul.f32 %v2381_v12, %v1357_v4  ;;  %v1369_v23 = vmax.f32 %v345_v11, 1e-06  ;;  %v2390_v24 = vmul.f32 %v1366_v14, %v1366_v14  ;;  %v2391_v25 = vmul.f32 %v1367_v15, %v1367_v15  ;;  %v358_v12 = vld [vmem:[%s7536_s26 + $0x560] sm:$0xff] }
  0xc1   : > { %v4471_v28 = vadd.f32 %v4470_v17, %v3409_v3  ;;  %v4464_v29 = vadd.f32 %v3403_v18, %v3402_v13  ;;  %v2392_v30 = vmul.f32 %v1368_v20, %v1368_v20  ;;  %v1362_v31 = vmax.f32 %v338_v16, 1e-06  ;;  %v349_v3 = vld [vmem:[%s7536_s26 + $0x518] sm:$0xff]  ;;  %v359_v13 = vld [vmem:[%s7536_s26 + $0x568] sm:$0xff]  ;;  %v360_v18 = vld [vmem:[%s7536_s26 + $0x570] sm:$0xff] }
  0xc2   : > { %v2393_v32 = vmul.f32 %v1369_v23, %v1369_v23  ;;  %v3414_v33 = vmul.f32 %v2390_v24, %v1366_v14  ;;  %v3415_v34 = vmul.f32 %v2391_v25, %v1367_v15  ;;  %v1363_v35 = vmax.f32 %v339_v21, 1e-06 }
  0xc3   : > { %4472 = vadd.xlane.f32.xlu1 %v4471_v28  ;;  %v4465_v37 = vadd.f32 %v4464_v29, %v3404_v19  ;;  %v3416_v38 = vmul.f32 %v2392_v30, %v1368_v20  ;;  %v1364_v39 = vmax.f32 %v340_v26, 1e-06  ;;  %v1365_v40 = vmax.f32 %v341_v27, 1e-06  ;;  %v354_v28 = vld [vmem:[%s7536_s26 + $0x540] sm:$0xff] }
  0xc4   : > { %v3417_v42 = vmul.f32 %v2393_v32, %v1369_v23  ;;  %v4479_v43 = vadd.f32 %v3415_v34, %v3414_v33  ;;  %v2386_v44 = vmul.f32 %v1362_v31, %v1362_v31  ;;  %v2387_v45 = vmul.f32 %v1363_v35, %v1363_v35  ;;  %v361_v23 = vld [vmem:[%s7536_s26 + $0x578] sm:$0xff]  ;;  %v355_v33 = vld [vmem:[%s7536_s26 + $0x548] sm:$0xff] }
  0xc5   : > { %v4466_v48 = vadd.f32 %v4465_v37, %v3405_v22  ;;  %v2388_v49 = vmul.f32 %v1364_v39, %v1364_v39  ;;  %v2389_v50 = vmul.f32 %v1365_v40, %v1365_v40  ;;  %v1374_v51 = vmax.f32 %v350_v36, 1e-06 }
  0xc6   : > { %v4480_v52 = vadd.f32 %v4479_v43, %v3416_v38  ;;  %v3410_v53 = vmul.f32 %v2386_v44, %v1362_v31  ;;  %v3411_v54 = vmul.f32 %v2387_v45, %v1363_v35  ;;  %v1375_v55 = vmax.f32 %v351_v41, 1e-06  ;;  %v356_v38 = vld [vmem:[%s7536_s26 + $0x550] sm:$0xff] }
  0xc7   : > { %4467 = vadd.xlane.f32.xlu0 %v4466_v48  ;;  %v3412_v58 = vmul.f32 %v2388_v49, %v1364_v39  ;;  %v3413_v59 = vmul.f32 %v2389_v50, %v1365_v40  ;;  %v1376_v60 = vmax.f32 %v352_v46, 1e-06  ;;  %v1377_v61 = vmax.f32 %v353_v47, 1e-06  ;;  %v357_v39 = vld [vmem:[%s7536_s26 + $0x558] sm:$0xff]  ;;  %v366_v48 = vld [vmem:[%s7536_s26 + $0x5a0] sm:$0xff] }
  0xc8   : > { %v4481_v63 = vadd.f32 %v4480_v52, %v3417_v42  ;;  %v4474_v0 = vadd.f32 %v3411_v54, %v3410_v53  ;;  %v2398_v1 = vmul.f32 %v1374_v51, %v1374_v51  ;;  %v2399_v2 = vmul.f32 %v1375_v55, %v1375_v55  ;;  %v367_v53 = vld [vmem:[%s7536_s26 + $0x5a8] sm:$0xff] }
  0xc9   : > { %v2400_v4 = vmul.f32 %v1376_v60, %v1376_v60  ;;  %v2401_v5 = vmul.f32 %v1377_v61, %v1377_v61  ;;  %v1370_v6 = vmax.f32 %v346_v56, 1e-06  ;;  %v1371_v7 = vmax.f32 %v347_v57, 1e-06 }
  0xca   : > { %4482 = vadd.xlane.f32.xlu1 %v4481_v63  ;;  %v4475_v8 = vadd.f32 %v4474_v0, %v3412_v58  ;;  %v3422_v9 = vmul.f32 %v2398_v1, %v1374_v51  ;;  %v3423_v10 = vmul.f32 %v2399_v2, %v1375_v55  ;;  %v1372_v11 = vmax.f32 %v348_v62, 1e-06  ;;  %v368_v58 = vld [vmem:[%s7536_s26 + $0x5b0] sm:$0xff] }
  0xcb   : > { %v3424_v14 = vmul.f32 %v2400_v4, %v1376_v60  ;;  %v3425_v15 = vmul.f32 %v2401_v5, %v1377_v61  ;;  %v1373_v16 = vmax.f32 %v349_v3, 1e-06  ;;  %v2394_v17 = vmul.f32 %v1370_v6, %v1370_v6  ;;  %v362_v4 = vld [vmem:[%s7536_s26 + $0x580] sm:$0xff]  ;;  %v363_v5 = vld [vmem:[%s7536_s26 + $0x588] sm:$0xff] }
  0xcc   : > { %v4476_v19 = vadd.f32 %v4475_v8, %v3413_v59  ;;  %v4489_v20 = vadd.f32 %v3423_v10, %v3422_v9  ;;  %v2395_v21 = vmul.f32 %v1371_v7, %v1371_v7  ;;  %v2396_v22 = vmul.f32 %v1372_v11, %v1372_v11  ;;  %v369_v59 = vld [vmem:[%s7536_s26 + $0x5b8] sm:$0xff]  ;;  %v364_v10 = vld [vmem:[%s7536_s26 + $0x590] sm:$0xff] }
  0xcd   : > { %v2397_v24 = vmul.f32 %v1373_v16, %v1373_v16  ;;  %v3418_v25 = vmul.f32 %v2394_v17, %v1370_v6  ;;  %v1382_v26 = vmax.f32 %v358_v12, 1e-06  ;;  %v1383_v27 = vmax.f32 %v359_v13, 1e-06 }
  0xce   : > { %4477 = vadd.xlane.f32.xlu0 %v4476_v19  ;;  %v4490_v29 = vadd.f32 %v4489_v20, %v3424_v14  ;;  %v3419_v30 = vmul.f32 %v2395_v21, %v1371_v7  ;;  %v3420_v31 = vmul.f32 %v2396_v22, %v1372_v11  ;;  %v1384_v32 = vmax.f32 %v360_v18, 1e-06 }
  0xcf   : > { %v3421_v34 = vmul.f32 %v2397_v24, %v1373_v16  ;;  %v1385_v35 = vmax.f32 %v361_v23, 1e-06  ;;  %v2406_v36 = vmul.f32 %v1382_v26, %v1382_v26  ;;  %v2407_v37 = vmul.f32 %v1383_v27, %v1383_v27  ;;  %v374_v24 = vld [vmem:[%s7536_s26 + $0x5e0] sm:$0xff] }
  0xd0   : > { %v4491_v40 = vadd.f32 %v4490_v29, %v3425_v15  ;;  %v4484_v41 = vadd.f32 %v3419_v30, %v3418_v25  ;;  %v2408_v42 = vmul.f32 %v1384_v32, %v1384_v32  ;;  %v1378_v43 = vmax.f32 %v354_v28, 1e-06  ;;  %v365_v15 = vld [vmem:[%s7536_s26 + $0x598] sm:$0xff]  ;;  %v375_v25 = vld [vmem:[%s7536_s26 + $0x5e8] sm:$0xff]  ;;  %v376_v30 = vld [vmem:[%s7536_s26 + $0x5f0] sm:$0xff] }
  0xd1   : > { %v2409_v44 = vmul.f32 %v1385_v35, %v1385_v35  ;;  %v3430_v45 = vmul.f32 %v2406_v36, %v1382_v26  ;;  %v3431_v46 = vmul.f32 %v2407_v37, %v1383_v27  ;;  %v1379_v47 = vmax.f32 %v355_v33, 1e-06 }
  0xd2   : > { %4492 = vadd.xlane.f32.xlu1 %v4491_v40  ;;  %v4485_v49 = vadd.f32 %v4484_v41, %v3420_v31  ;;  %v3432_v50 = vmul.f32 %v2408_v42, %v1384_v32  ;;  %v1380_v51 = vmax.f32 %v356_v38, 1e-06  ;;  %v1381_v52 = vmax.f32 %v357_v39, 1e-06  ;;  %v370_v40 = vld [vmem:[%s7536_s26 + $0x5c0] sm:$0xff] }
  0xd3   : > { %v3433_v54 = vmul.f32 %v2409_v44, %v1385_v35  ;;  %v4499_v55 = vadd.f32 %v3431_v46, %v3430_v45  ;;  %v2402_v56 = vmul.f32 %v1378_v43, %v1378_v43  ;;  %v2403_v57 = vmul.f32 %v1379_v47, %v1379_v47  ;;  %v377_v35 = vld [vmem:[%s7536_s26 + $0x5f8] sm:$0xff]  ;;  %v371_v45 = vld [vmem:[%s7536_s26 + $0x5c8] sm:$0xff] }
  0xd4   : > { %v4486_v60 = vadd.f32 %v4485_v49, %v3421_v34  ;;  %v2404_v61 = vmul.f32 %v1380_v51, %v1380_v51  ;;  %v2405_v62 = vmul.f32 %v1381_v52, %v1381_v52  ;;  %v1390_v63 = vmax.f32 %v366_v48, 1e-06 }
  0xd5   : > { %v4500_v0 = vadd.f32 %v4499_v55, %v3432_v50  ;;  %v3426_v1 = vmul.f32 %v2402_v56, %v1378_v43  ;;  %v3427_v2 = vmul.f32 %v2403_v57, %v1379_v47  ;;  %v1391_v3 = vmax.f32 %v367_v53, 1e-06  ;;  %v372_v50 = vld [vmem:[%s7536_s26 + $0x5d0] sm:$0xff] }
  0xd6   : > { %4487 = vadd.xlane.f32.xlu0 %v4486_v60  ;;  %v3428_v6 = vmul.f32 %v2404_v61, %v1380_v51  ;;  %v3429_v7 = vmul.f32 %v2405_v62, %v1381_v52  ;;  %v1392_v8 = vmax.f32 %v368_v58, 1e-06  ;;  %v1393_v9 = vmax.f32 %v369_v59, 1e-06  ;;  %v373_v51 = vld [vmem:[%s7536_s26 + $0x5d8] sm:$0xff]  ;;  %v382_v60 = vld [vmem:[%s7536_s26 + $0x620] sm:$0xff] }
  0xd7   : > { %v4501_v11 = vadd.f32 %v4500_v0, %v3433_v54  ;;  %v4494_v12 = vadd.f32 %v3427_v2, %v3426_v1  ;;  %v2414_v13 = vmul.f32 %v1390_v63, %v1390_v63  ;;  %v2415_v14 = vmul.f32 %v1391_v3, %v1391_v3  ;;  %v383_v1 = vld [vmem:[%s7536_s26 + $0x628] sm:$0xff] }
  0xd8   : > { %v2416_v16 = vmul.f32 %v1392_v8, %v1392_v8  ;;  %v2417_v17 = vmul.f32 %v1393_v9, %v1393_v9  ;;  %v1386_v18 = vmax.f32 %v362_v4, 1e-06  ;;  %v1387_v19 = vmax.f32 %v363_v5, 1e-06 }
  0xd9   : > { %4502 = vadd.xlane.f32.xlu1 %v4501_v11  ;;  %v4495_v20 = vadd.f32 %v4494_v12, %v3428_v6  ;;  %v3438_v21 = vmul.f32 %v2414_v13, %v1390_v63  ;;  %v3439_v22 = vmul.f32 %v2415_v14, %v1391_v3  ;;  %v1388_v23 = vmax.f32 %v364_v10, 1e-06  ;;  %v384_v6 = vld [vmem:[%s7536_s26 + $0x630] sm:$0xff] }
  0xda   : > { %v3440_v26 = vmul.f32 %v2416_v16, %v1392_v8  ;;  %v3441_v27 = vmul.f32 %v2417_v17, %v1393_v9  ;;  %v1389_v28 = vmax.f32 %v365_v15, 1e-06  ;;  %v2410_v29 = vmul.f32 %v1386_v18, %v1386_v18  ;;  %v378_v16 = vld [vmem:[%s7536_s26 + $0x600] sm:$0xff]  ;;  %v379_v17 = vld [vmem:[%s7536_s26 + $0x608] sm:$0xff] }
  0xdb   : > { %v4496_v31 = vadd.f32 %v4495_v20, %v3429_v7  ;;  %v4509_v32 = vadd.f32 %v3439_v22, %v3438_v21  ;;  %v2411_v33 = vmul.f32 %v1387_v19, %v1387_v19  ;;  %v2412_v34 = vmul.f32 %v1388_v23, %v1388_v23  ;;  %v385_v7 = vld [vmem:[%s7536_s26 + $0x638] sm:$0xff]  ;;  %v380_v22 = vld [vmem:[%s7536_s26 + $0x610] sm:$0xff] }
  0xdc   : > { %v2413_v36 = vmul.f32 %v1389_v28, %v1389_v28  ;;  %v3434_v37 = vmul.f32 %v2410_v29, %v1386_v18  ;;  %v1398_v38 = vmax.f32 %v374_v24, 1e-06  ;;  %v1399_v39 = vmax.f32 %v375_v25, 1e-06 }
  0xdd   : > { %4497 = vadd.xlane.f32.xlu0 %v4496_v31  ;;  %v4510_v41 = vadd.f32 %v4509_v32, %v3440_v26  ;;  %v3435_v42 = vmul.f32 %v2411_v33, %v1387_v19  ;;  %v3436_v43 = vmul.f32 %v2412_v34, %v1388_v23  ;;  %v1400_v44 = vmax.f32 %v376_v30, 1e-06 }
  0xde   : > { %v3437_v46 = vmul.f32 %v2413_v36, %v1389_v28  ;;  %v1401_v47 = vmax.f32 %v377_v35, 1e-06  ;;  %v2422_v48 = vmul.f32 %v1398_v38, %v1398_v38  ;;  %v2423_v49 = vmul.f32 %v1399_v39, %v1399_v39  ;;  %v390_v36 = vld [vmem:[%s7536_s26 + $0x660] sm:$0xff] }
  0xdf   : > { %v4511_v52 = vadd.f32 %v4510_v41, %v3441_v27  ;;  %v4504_v53 = vadd.f32 %v3435_v42, %v3434_v37  ;;  %v2424_v54 = vmul.f32 %v1400_v44, %v1400_v44  ;;  %v1394_v55 = vmax.f32 %v370_v40, 1e-06  ;;  %v381_v27 = vld [vmem:[%s7536_s26 + $0x618] sm:$0xff]  ;;  %v391_v37 = vld [vmem:[%s7536_s26 + $0x668] sm:$0xff]  ;;  %v392_v42 = vld [vmem:[%s7536_s26 + $0x670] sm:$0xff] }
  0xe0   : > { %v2425_v56 = vmul.f32 %v1401_v47, %v1401_v47  ;;  %v3446_v57 = vmul.f32 %v2422_v48, %v1398_v38  ;;  %v3447_v58 = vmul.f32 %v2423_v49, %v1399_v39  ;;  %v1395_v59 = vmax.f32 %v371_v45, 1e-06 }
  0xe1   : > { %4512 = vadd.xlane.f32.xlu1 %v4511_v52  ;;  %v4505_v61 = vadd.f32 %v4504_v53, %v3436_v43  ;;  %v3448_v62 = vmul.f32 %v2424_v54, %v1400_v44  ;;  %v1396_v63 = vmax.f32 %v372_v50, 1e-06  ;;  %v1397_v0 = vmax.f32 %v373_v51, 1e-06  ;;  %v386_v52 = vld [vmem:[%s7536_s26 + $0x640] sm:$0xff] }
  0xe2   : > { %v3449_v2 = vmul.f32 %v2425_v56, %v1401_v47  ;;  %v4519_v3 = vadd.f32 %v3447_v58, %v3446_v57  ;;  %v2418_v4 = vmul.f32 %v1394_v55, %v1394_v55  ;;  %v2419_v5 = vmul.f32 %v1395_v59, %v1395_v59  ;;  %v393_v47 = vld [vmem:[%s7536_s26 + $0x678] sm:$0xff]  ;;  %v387_v57 = vld [vmem:[%s7536_s26 + $0x648] sm:$0xff] }
  0xe3   : > { %v4506_v8 = vadd.f32 %v4505_v61, %v3437_v46  ;;  %v2420_v9 = vmul.f32 %v1396_v63, %v1396_v63  ;;  %v2421_v10 = vmul.f32 %v1397_v0, %v1397_v0  ;;  %v1406_v11 = vmax.f32 %v382_v60, 1e-06 }
  0xe4   : > { %v4520_v12 = vadd.f32 %v4519_v3, %v3448_v62  ;;  %v3442_v13 = vmul.f32 %v2418_v4, %v1394_v55  ;;  %v3443_v14 = vmul.f32 %v2419_v5, %v1395_v59  ;;  %v1407_v15 = vmax.f32 %v383_v1, 1e-06  ;;  %v388_v62 = vld [vmem:[%s7536_s26 + $0x650] sm:$0xff] }
  0xe5   : > { %4507 = vadd.xlane.f32.xlu0 %v4506_v8  ;;  %v3444_v18 = vmul.f32 %v2420_v9, %v1396_v63  ;;  %v3445_v19 = vmul.f32 %v2421_v10, %v1397_v0  ;;  %v1408_v20 = vmax.f32 %v384_v6, 1e-06  ;;  %v1409_v21 = vmax.f32 %v385_v7, 1e-06  ;;  %v389_v63 = vld [vmem:[%s7536_s26 + $0x658] sm:$0xff]  ;;  %v398_v8 = vld [vmem:[%s7536_s26 + $0x6a0] sm:$0xff] }
  0xe6   : > { %v4521_v23 = vadd.f32 %v4520_v12, %v3449_v2  ;;  %v4514_v24 = vadd.f32 %v3443_v14, %v3442_v13  ;;  %v2430_v25 = vmul.f32 %v1406_v11, %v1406_v11  ;;  %v2431_v26 = vmul.f32 %v1407_v15, %v1407_v15  ;;  %v399_v13 = vld [vmem:[%s7536_s26 + $0x6a8] sm:$0xff] }
  0xe7   : > { %v2432_v28 = vmul.f32 %v1408_v20, %v1408_v20  ;;  %v2433_v29 = vmul.f32 %v1409_v21, %v1409_v21  ;;  %v1402_v30 = vmax.f32 %v378_v16, 1e-06  ;;  %v1403_v31 = vmax.f32 %v379_v17, 1e-06 }
  0xe8   : > { %4522 = vadd.xlane.f32.xlu1 %v4521_v23  ;;  %v4515_v32 = vadd.f32 %v4514_v24, %v3444_v18  ;;  %v3454_v33 = vmul.f32 %v2430_v25, %v1406_v11  ;;  %v3455_v34 = vmul.f32 %v2431_v26, %v1407_v15  ;;  %v1404_v35 = vmax.f32 %v380_v22, 1e-06  ;;  %v400_v18 = vld [vmem:[%s7536_s26 + $0x6b0] sm:$0xff] }
  0xe9   : > { %v3456_v38 = vmul.f32 %v2432_v28, %v1408_v20  ;;  %v3457_v39 = vmul.f32 %v2433_v29, %v1409_v21  ;;  %v1405_v40 = vmax.f32 %v381_v27, 1e-06  ;;  %v2426_v41 = vmul.f32 %v1402_v30, %v1402_v30  ;;  %v394_v28 = vld [vmem:[%s7536_s26 + $0x680] sm:$0xff]  ;;  %v395_v29 = vld [vmem:[%s7536_s26 + $0x688] sm:$0xff] }
  0xea   : > { %v4516_v43 = vadd.f32 %v4515_v32, %v3445_v19  ;;  %v4529_v44 = vadd.f32 %v3455_v34, %v3454_v33  ;;  %v2427_v45 = vmul.f32 %v1403_v31, %v1403_v31  ;;  %v2428_v46 = vmul.f32 %v1404_v35, %v1404_v35  ;;  %v401_v19 = vld [vmem:[%s7536_s26 + $0x6b8] sm:$0xff]  ;;  %v396_v34 = vld [vmem:[%s7536_s26 + $0x690] sm:$0xff] }
  0xeb   : > { %v2429_v48 = vmul.f32 %v1405_v40, %v1405_v40  ;;  %v3450_v49 = vmul.f32 %v2426_v41, %v1402_v30  ;;  %v1414_v50 = vmax.f32 %v390_v36, 1e-06  ;;  %v1415_v51 = vmax.f32 %v391_v37, 1e-06 }
  0xec   : > { %4517 = vadd.xlane.f32.xlu0 %v4516_v43  ;;  %v4530_v53 = vadd.f32 %v4529_v44, %v3456_v38  ;;  %v3451_v54 = vmul.f32 %v2427_v45, %v1403_v31  ;;  %v3452_v55 = vmul.f32 %v2428_v46, %v1404_v35  ;;  %v1416_v56 = vmax.f32 %v392_v42, 1e-06 }
  0xed   : > { %v3453_v58 = vmul.f32 %v2429_v48, %v1405_v40  ;;  %v1417_v59 = vmax.f32 %v393_v47, 1e-06  ;;  %v2438_v60 = vmul.f32 %v1414_v50, %v1414_v50  ;;  %v2439_v61 = vmul.f32 %v1415_v51, %v1415_v51  ;;  %v406_v48 = vld [vmem:[%s7536_s26 + $0x6e0] sm:$0xff] }
  0xee   : > { %v4531_v0 = vadd.f32 %v4530_v53, %v3457_v39  ;;  %v4524_v1 = vadd.f32 %v3451_v54, %v3450_v49  ;;  %v2440_v2 = vmul.f32 %v1416_v56, %v1416_v56  ;;  %v1410_v3 = vmax.f32 %v386_v52, 1e-06  ;;  %v397_v39 = vld [vmem:[%s7536_s26 + $0x698] sm:$0xff]  ;;  %v407_v49 = vld [vmem:[%s7536_s26 + $0x6e8] sm:$0xff]  ;;  %v408_v54 = vld [vmem:[%s7536_s26 + $0x6f0] sm:$0xff] }
  0xef   : > { %v2441_v4 = vmul.f32 %v1417_v59, %v1417_v59  ;;  %v3462_v5 = vmul.f32 %v2438_v60, %v1414_v50  ;;  %v3463_v6 = vmul.f32 %v2439_v61, %v1415_v51  ;;  %v1411_v7 = vmax.f32 %v387_v57, 1e-06 }
  0xf0   : > { %4532 = vadd.xlane.f32.xlu1 %v4531_v0  ;;  %v4525_v9 = vadd.f32 %v4524_v1, %v3452_v55  ;;  %v3464_v10 = vmul.f32 %v2440_v2, %v1416_v56  ;;  %v1412_v11 = vmax.f32 %v388_v62, 1e-06  ;;  %v1413_v12 = vmax.f32 %v389_v63, 1e-06  ;;  %v402_v0 = vld [vmem:[%s7536_s26 + $0x6c0] sm:$0xff] }
  0xf1   : > { %v3465_v14 = vmul.f32 %v2441_v4, %v1417_v59  ;;  %v4539_v15 = vadd.f32 %v3463_v6, %v3462_v5  ;;  %v2434_v16 = vmul.f32 %v1410_v3, %v1410_v3  ;;  %v2435_v17 = vmul.f32 %v1411_v7, %v1411_v7  ;;  %v409_v59 = vld [vmem:[%s7536_s26 + $0x6f8] sm:$0xff]  ;;  %v403_v5 = vld [vmem:[%s7536_s26 + $0x6c8] sm:$0xff] }
  0xf2   : > { %v4526_v20 = vadd.f32 %v4525_v9, %v3453_v58  ;;  %v2436_v21 = vmul.f32 %v1412_v11, %v1412_v11  ;;  %v2437_v22 = vmul.f32 %v1413_v12, %v1413_v12  ;;  %v1422_v23 = vmax.f32 %v398_v8, 1e-06 }
  0xf3   : > { %v4540_v24 = vadd.f32 %v4539_v15, %v3464_v10  ;;  %v3458_v25 = vmul.f32 %v2434_v16, %v1410_v3  ;;  %v3459_v26 = vmul.f32 %v2435_v17, %v1411_v7  ;;  %v1423_v27 = vmax.f32 %v399_v13, 1e-06  ;;  %v404_v10 = vld [vmem:[%s7536_s26 + $0x6d0] sm:$0xff] }
  0xf4   : > { %4527 = vadd.xlane.f32.xlu0 %v4526_v20  ;;  %v3460_v30 = vmul.f32 %v2436_v21, %v1412_v11  ;;  %v3461_v31 = vmul.f32 %v2437_v22, %v1413_v12  ;;  %v1424_v32 = vmax.f32 %v400_v18, 1e-06  ;;  %v1425_v33 = vmax.f32 %v401_v19, 1e-06  ;;  %v405_v11 = vld [vmem:[%s7536_s26 + $0x6d8] sm:$0xff]  ;;  %v414_v20 = vld [vmem:[%s7536_s26 + $0x720] sm:$0xff] }
  0xf5   : > { %v4541_v35 = vadd.f32 %v4540_v24, %v3465_v14  ;;  %v4534_v36 = vadd.f32 %v3459_v26, %v3458_v25  ;;  %v2446_v37 = vmul.f32 %v1422_v23, %v1422_v23  ;;  %v2447_v38 = vmul.f32 %v1423_v27, %v1423_v27  ;;  %v415_v25 = vld [vmem:[%s7536_s26 + $0x728] sm:$0xff] }
  0xf6   : > { %v2448_v40 = vmul.f32 %v1424_v32, %v1424_v32  ;;  %v2449_v41 = vmul.f32 %v1425_v33, %v1425_v33  ;;  %v1418_v42 = vmax.f32 %v394_v28, 1e-06  ;;  %v1419_v43 = vmax.f32 %v395_v29, 1e-06 }
  0xf7   : > { %4542 = vadd.xlane.f32.xlu1 %v4541_v35  ;;  %v4535_v44 = vadd.f32 %v4534_v36, %v3460_v30  ;;  %v3470_v45 = vmul.f32 %v2446_v37, %v1422_v23  ;;  %v3471_v46 = vmul.f32 %v2447_v38, %v1423_v27  ;;  %v1420_v47 = vmax.f32 %v396_v34, 1e-06  ;;  %v416_v30 = vld [vmem:[%s7536_s26 + $0x730] sm:$0xff] }
  0xf8   : > { %v3472_v50 = vmul.f32 %v2448_v40, %v1424_v32  ;;  %v3473_v51 = vmul.f32 %v2449_v41, %v1425_v33  ;;  %v1421_v52 = vmax.f32 %v397_v39, 1e-06  ;;  %v2442_v53 = vmul.f32 %v1418_v42, %v1418_v42  ;;  %v410_v40 = vld [vmem:[%s7536_s26 + $0x700] sm:$0xff]  ;;  %v411_v41 = vld [vmem:[%s7536_s26 + $0x708] sm:$0xff] }
  0xf9   : > { %v4536_v55 = vadd.f32 %v4535_v44, %v3461_v31  ;;  %v4549_v56 = vadd.f32 %v3471_v46, %v3470_v45  ;;  %v2443_v57 = vmul.f32 %v1419_v43, %v1419_v43  ;;  %v2444_v58 = vmul.f32 %v1420_v47, %v1420_v47  ;;  %v417_v31 = vld [vmem:[%s7536_s26 + $0x738] sm:$0xff]  ;;  %v412_v46 = vld [vmem:[%s7536_s26 + $0x710] sm:$0xff] }
  0xfa   : > { %v2445_v60 = vmul.f32 %v1421_v52, %v1421_v52  ;;  %v3466_v61 = vmul.f32 %v2442_v53, %v1418_v42  ;;  %v1430_v62 = vmax.f32 %v406_v48, 1e-06  ;;  %v1431_v63 = vmax.f32 %v407_v49, 1e-06 }
  0xfb   : > { %4537 = vadd.xlane.f32.xlu0 %v4536_v55  ;;  %v4550_v1 = vadd.f32 %v4549_v56, %v3472_v50  ;;  %v3467_v2 = vmul.f32 %v2443_v57, %v1419_v43  ;;  %v3468_v3 = vmul.f32 %v2444_v58, %v1420_v47  ;;  %v1432_v4 = vmax.f32 %v408_v54, 1e-06 }
  0xfc   : > { %v3469_v6 = vmul.f32 %v2445_v60, %v1421_v52  ;;  %v1433_v7 = vmax.f32 %v409_v59, 1e-06  ;;  %v2454_v8 = vmul.f32 %v1430_v62, %v1430_v62  ;;  %v2455_v9 = vmul.f32 %v1431_v63, %v1431_v63  ;;  %v422_v60 = vld [vmem:[%s7536_s26 + $0x760] sm:$0xff] }
  0xfd   : > { %v4551_v12 = vadd.f32 %v4550_v1, %v3473_v51  ;;  %v4544_v13 = vadd.f32 %v3467_v2, %v3466_v61  ;;  %v2456_v14 = vmul.f32 %v1432_v4, %v1432_v4  ;;  %v1426_v15 = vmax.f32 %v402_v0, 1e-06  ;;  %v413_v51 = vld [vmem:[%s7536_s26 + $0x718] sm:$0xff]  ;;  %v423_v61 = vld [vmem:[%s7536_s26 + $0x768] sm:$0xff]  ;;  %v424_v2 = vld [vmem:[%s7536_s26 + $0x770] sm:$0xff] }
  0xfe   : > { %v2457_v16 = vmul.f32 %v1433_v7, %v1433_v7  ;;  %v3478_v17 = vmul.f32 %v2454_v8, %v1430_v62  ;;  %v3479_v18 = vmul.f32 %v2455_v9, %v1431_v63  ;;  %v1427_v19 = vmax.f32 %v403_v5, 1e-06 }
  0xff   : > { %4552 = vadd.xlane.f32.xlu1 %v4551_v12  ;;  %v4545_v21 = vadd.f32 %v4544_v13, %v3468_v3  ;;  %v3480_v22 = vmul.f32 %v2456_v14, %v1432_v4  ;;  %v1428_v23 = vmax.f32 %v404_v10, 1e-06  ;;  %v1429_v24 = vmax.f32 %v405_v11, 1e-06  ;;  %v418_v12 = vld [vmem:[%s7536_s26 + $0x740] sm:$0xff] }
 0x100   : > { %v3481_v26 = vmul.f32 %v2457_v16, %v1433_v7  ;;  %v4559_v27 = vadd.f32 %v3479_v18, %v3478_v17  ;;  %v2450_v28 = vmul.f32 %v1426_v15, %v1426_v15  ;;  %v2451_v29 = vmul.f32 %v1427_v19, %v1427_v19  ;;  %v425_v7 = vld [vmem:[%s7536_s26 + $0x778] sm:$0xff]  ;;  %v419_v17 = vld [vmem:[%s7536_s26 + $0x748] sm:$0xff] }
 0x101   : > { %v4546_v32 = vadd.f32 %v4545_v21, %v3469_v6  ;;  %v2452_v33 = vmul.f32 %v1428_v23, %v1428_v23  ;;  %v2453_v34 = vmul.f32 %v1429_v24, %v1429_v24  ;;  %v1438_v35 = vmax.f32 %v414_v20, 1e-06 }
 0x102   : > { %v4560_v36 = vadd.f32 %v4559_v27, %v3480_v22  ;;  %v3474_v37 = vmul.f32 %v2450_v28, %v1426_v15  ;;  %v3475_v38 = vmul.f32 %v2451_v29, %v1427_v19  ;;  %v1439_v39 = vmax.f32 %v415_v25, 1e-06  ;;  %v420_v22 = vld [vmem:[%s7536_s26 + $0x750] sm:$0xff] }
 0x103   : > { %4547 = vadd.xlane.f32.xlu0 %v4546_v32  ;;  %v3476_v42 = vmul.f32 %v2452_v33, %v1428_v23  ;;  %v3477_v43 = vmul.f32 %v2453_v34, %v1429_v24  ;;  %v1440_v44 = vmax.f32 %v416_v30, 1e-06  ;;  %v1441_v45 = vmax.f32 %v417_v31, 1e-06  ;;  %v421_v23 = vld [vmem:[%s7536_s26 + $0x758] sm:$0xff]  ;;  %v430_v32 = vld [vmem:[%s7536_s26 + $0x7a0] sm:$0xff] }
 0x104   : > { %v4561_v47 = vadd.f32 %v4560_v36, %v3481_v26  ;;  %v4554_v48 = vadd.f32 %v3475_v38, %v3474_v37  ;;  %v2462_v49 = vmul.f32 %v1438_v35, %v1438_v35  ;;  %v2463_v50 = vmul.f32 %v1439_v39, %v1439_v39  ;;  %v431_v37 = vld [vmem:[%s7536_s26 + $0x7a8] sm:$0xff] }
 0x105   : > { %v2464_v52 = vmul.f32 %v1440_v44, %v1440_v44  ;;  %v2465_v53 = vmul.f32 %v1441_v45, %v1441_v45  ;;  %v1434_v54 = vmax.f32 %v410_v40, 1e-06  ;;  %v1435_v55 = vmax.f32 %v411_v41, 1e-06 }
 0x106   : > { %4562 = vadd.xlane.f32.xlu1 %v4561_v47  ;;  %v4555_v56 = vadd.f32 %v4554_v48, %v3476_v42  ;;  %v3486_v57 = vmul.f32 %v2462_v49, %v1438_v35  ;;  %v3487_v58 = vmul.f32 %v2463_v50, %v1439_v39  ;;  %v1436_v59 = vmax.f32 %v412_v46, 1e-06  ;;  %v432_v42 = vld [vmem:[%s7536_s26 + $0x7b0] sm:$0xff] }
 0x107   : > { %v3488_v62 = vmul.f32 %v2464_v52, %v1440_v44  ;;  %v3489_v63 = vmul.f32 %v2465_v53, %v1441_v45  ;;  %v1437_v0 = vmax.f32 %v413_v51, 1e-06  ;;  %v2458_v1 = vmul.f32 %v1434_v54, %v1434_v54  ;;  %v426_v52 = vld [vmem:[%s7536_s26 + $0x780] sm:$0xff]  ;;  %v427_v53 = vld [vmem:[%s7536_s26 + $0x788] sm:$0xff] }
 0x108   : > { %v4556_v3 = vadd.f32 %v4555_v56, %v3477_v43  ;;  %v4569_v4 = vadd.f32 %v3487_v58, %v3486_v57  ;;  %v2459_v5 = vmul.f32 %v1435_v55, %v1435_v55  ;;  %v2460_v6 = vmul.f32 %v1436_v59, %v1436_v59  ;;  %v433_v43 = vld [vmem:[%s7536_s26 + $0x7b8] sm:$0xff]  ;;  %v428_v58 = vld [vmem:[%s7536_s26 + $0x790] sm:$0xff] }
 0x109   : > { %v2461_v8 = vmul.f32 %v1437_v0, %v1437_v0  ;;  %v3482_v9 = vmul.f32 %v2458_v1, %v1434_v54  ;;  %v1446_v10 = vmax.f32 %v422_v60, 1e-06  ;;  %v1447_v11 = vmax.f32 %v423_v61, 1e-06 }
 0x10a   : > { %4557 = vadd.xlane.f32.xlu0 %v4556_v3  ;;  %v4570_v13 = vadd.f32 %v4569_v4, %v3488_v62  ;;  %v3483_v14 = vmul.f32 %v2459_v5, %v1435_v55  ;;  %v3484_v15 = vmul.f32 %v2460_v6, %v1436_v59  ;;  %v1448_v16 = vmax.f32 %v424_v2, 1e-06 }
 0x10b   : > { %v3485_v18 = vmul.f32 %v2461_v8, %v1437_v0  ;;  %v1449_v19 = vmax.f32 %v425_v7, 1e-06  ;;  %v2470_v20 = vmul.f32 %v1446_v10, %v1446_v10  ;;  %v2471_v21 = vmul.f32 %v1447_v11, %v1447_v11  ;;  %v438_v8 = vld [vmem:[%s7536_s26 + $0x7e0] sm:$0xff] }
 0x10c   : > { %v4571_v24 = vadd.f32 %v4570_v13, %v3489_v63  ;;  %v4564_v25 = vadd.f32 %v3483_v14, %v3482_v9  ;;  %v2472_v26 = vmul.f32 %v1448_v16, %v1448_v16  ;;  %v1442_v27 = vmax.f32 %v418_v12, 1e-06  ;;  %v429_v63 = vld [vmem:[%s7536_s26 + $0x798] sm:$0xff]  ;;  %v439_v9 = vld [vmem:[%s7536_s26 + $0x7e8] sm:$0xff]  ;;  %v440_v14 = vld [vmem:[%s7536_s26 + $0x7f0] sm:$0xff] }
 0x10d   : > { %v2473_v28 = vmul.f32 %v1449_v19, %v1449_v19  ;;  %v3494_v29 = vmul.f32 %v2470_v20, %v1446_v10  ;;  %v3495_v30 = vmul.f32 %v2471_v21, %v1447_v11  ;;  %v1443_v31 = vmax.f32 %v419_v17, 1e-06 }
 0x10e   : > { %4572 = vadd.xlane.f32.xlu1 %v4571_v24  ;;  %v4565_v33 = vadd.f32 %v4564_v25, %v3484_v15  ;;  %v3496_v34 = vmul.f32 %v2472_v26, %v1448_v16  ;;  %v1444_v35 = vmax.f32 %v420_v22, 1e-06  ;;  %v1445_v36 = vmax.f32 %v421_v23, 1e-06  ;;  %v434_v24 = vld [vmem:[%s7536_s26 + $0x7c0] sm:$0xff] }
 0x10f   : > { %v3497_v38 = vmul.f32 %v2473_v28, %v1449_v19  ;;  %v4579_v39 = vadd.f32 %v3495_v30, %v3494_v29  ;;  %v2466_v40 = vmul.f32 %v1442_v27, %v1442_v27  ;;  %v2467_v41 = vmul.f32 %v1443_v31, %v1443_v31  ;;  %v441_v19 = vld [vmem:[%s7536_s26 + $0x7f8] sm:$0xff]  ;;  %v435_v29 = vld [vmem:[%s7536_s26 + $0x7c8] sm:$0xff] }
 0x110   : > { %v4566_v44 = vadd.f32 %v4565_v33, %v3485_v18  ;;  %v2468_v45 = vmul.f32 %v1444_v35, %v1444_v35  ;;  %v2469_v46 = vmul.f32 %v1445_v36, %v1445_v36  ;;  %v1454_v47 = vmax.f32 %v430_v32, 1e-06 }
 0x111   : > { %v4580_v48 = vadd.f32 %v4579_v39, %v3496_v34  ;;  %v3490_v49 = vmul.f32 %v2466_v40, %v1442_v27  ;;  %v3491_v50 = vmul.f32 %v2467_v41, %v1443_v31  ;;  %v1455_v51 = vmax.f32 %v431_v37, 1e-06  ;;  %v436_v34 = vld [vmem:[%s7536_s26 + $0x7d0] sm:$0xff] }
 0x112   : > { %4567 = vadd.xlane.f32.xlu0 %v4566_v44  ;;  %v3492_v54 = vmul.f32 %v2468_v45, %v1444_v35  ;;  %v3493_v55 = vmul.f32 %v2469_v46, %v1445_v36  ;;  %v1456_v56 = vmax.f32 %v432_v42, 1e-06  ;;  %v1457_v57 = vmax.f32 %v433_v43, 1e-06  ;;  %v437_v35 = vld [vmem:[%s7536_s26 + $0x7d8] sm:$0xff]  ;;  %v446_v44 = vld [vmem:[%s7536_s26 + $0x820] sm:$0xff] }
 0x113   : > { %v4581_v59 = vadd.f32 %v4580_v48, %v3497_v38  ;;  %v4574_v60 = vadd.f32 %v3491_v50, %v3490_v49  ;;  %v2478_v61 = vmul.f32 %v1454_v47, %v1454_v47  ;;  %v2479_v62 = vmul.f32 %v1455_v51, %v1455_v51  ;;  %v447_v49 = vld [vmem:[%s7536_s26 + $0x828] sm:$0xff] }
 0x114   : > { %v2480_v0 = vmul.f32 %v1456_v56, %v1456_v56  ;;  %v2481_v1 = vmul.f32 %v1457_v57, %v1457_v57  ;;  %v1450_v2 = vmax.f32 %v426_v52, 1e-06  ;;  %v1451_v3 = vmax.f32 %v427_v53, 1e-06 }
 0x115   : > { %4582 = vadd.xlane.f32.xlu1 %v4581_v59  ;;  %v4575_v4 = vadd.f32 %v4574_v60, %v3492_v54  ;;  %v3502_v5 = vmul.f32 %v2478_v61, %v1454_v47  ;;  %v3503_v6 = vmul.f32 %v2479_v62, %v1455_v51  ;;  %v1452_v7 = vmax.f32 %v428_v58, 1e-06  ;;  %v448_v54 = vld [vmem:[%s7536_s26 + $0x830] sm:$0xff] }
 0x116   : > { %v3504_v10 = vmul.f32 %v2480_v0, %v1456_v56  ;;  %v3505_v11 = vmul.f32 %v2481_v1, %v1457_v57  ;;  %v1453_v12 = vmax.f32 %v429_v63, 1e-06  ;;  %v2474_v13 = vmul.f32 %v1450_v2, %v1450_v2  ;;  %v442_v0 = vld [vmem:[%s7536_s26 + $0x800] sm:$0xff]  ;;  %v443_v1 = vld [vmem:[%s7536_s26 + $0x808] sm:$0xff] }
 0x117   : > { %v4576_v15 = vadd.f32 %v4575_v4, %v3493_v55  ;;  %v4589_v16 = vadd.f32 %v3503_v6, %v3502_v5  ;;  %v2475_v17 = vmul.f32 %v1451_v3, %v1451_v3  ;;  %v2476_v18 = vmul.f32 %v1452_v7, %v1452_v7  ;;  %v449_v55 = vld [vmem:[%s7536_s26 + $0x838] sm:$0xff]  ;;  %v444_v6 = vld [vmem:[%s7536_s26 + $0x810] sm:$0xff] }
 0x118   : > { %v2477_v20 = vmul.f32 %v1453_v12, %v1453_v12  ;;  %v3498_v21 = vmul.f32 %v2474_v13, %v1450_v2  ;;  %v1462_v22 = vmax.f32 %v438_v8, 1e-06  ;;  %v1463_v23 = vmax.f32 %v439_v9, 1e-06 }
 0x119   : > { %4577 = vadd.xlane.f32.xlu0 %v4576_v15  ;;  %v4590_v25 = vadd.f32 %v4589_v16, %v3504_v10  ;;  %v3499_v26 = vmul.f32 %v2475_v17, %v1451_v3  ;;  %v3500_v27 = vmul.f32 %v2476_v18, %v1452_v7  ;;  %v1464_v28 = vmax.f32 %v440_v14, 1e-06 }
 0x11a   : > { %v3501_v30 = vmul.f32 %v2477_v20, %v1453_v12  ;;  %v1465_v31 = vmax.f32 %v441_v19, 1e-06  ;;  %v2486_v32 = vmul.f32 %v1462_v22, %v1462_v22  ;;  %v2487_v33 = vmul.f32 %v1463_v23, %v1463_v23  ;;  %v454_v20 = vld [vmem:[%s7536_s26 + $0x860] sm:$0xff] }
 0x11b   : > { %v4591_v36 = vadd.f32 %v4590_v25, %v3505_v11  ;;  %v4584_v37 = vadd.f32 %v3499_v26, %v3498_v21  ;;  %v2488_v38 = vmul.f32 %v1464_v28, %v1464_v28  ;;  %v1458_v39 = vmax.f32 %v434_v24, 1e-06  ;;  %v445_v11 = vld [vmem:[%s7536_s26 + $0x818] sm:$0xff]  ;;  %v455_v21 = vld [vmem:[%s7536_s26 + $0x868] sm:$0xff]  ;;  %v456_v26 = vld [vmem:[%s7536_s26 + $0x870] sm:$0xff] }
 0x11c   : > { %v2489_v40 = vmul.f32 %v1465_v31, %v1465_v31  ;;  %v3510_v41 = vmul.f32 %v2486_v32, %v1462_v22  ;;  %v3511_v42 = vmul.f32 %v2487_v33, %v1463_v23  ;;  %v1459_v43 = vmax.f32 %v435_v29, 1e-06 }
 0x11d   : > { %4592 = vadd.xlane.f32.xlu1 %v4591_v36  ;;  %v4585_v45 = vadd.f32 %v4584_v37, %v3500_v27  ;;  %v3512_v46 = vmul.f32 %v2488_v38, %v1464_v28  ;;  %v1460_v47 = vmax.f32 %v436_v34, 1e-06  ;;  %v1461_v48 = vmax.f32 %v437_v35, 1e-06  ;;  %v450_v36 = vld [vmem:[%s7536_s26 + $0x840] sm:$0xff] }
 0x11e   : > { %v3513_v50 = vmul.f32 %v2489_v40, %v1465_v31  ;;  %v4599_v51 = vadd.f32 %v3511_v42, %v3510_v41  ;;  %v2482_v52 = vmul.f32 %v1458_v39, %v1458_v39  ;;  %v2483_v53 = vmul.f32 %v1459_v43, %v1459_v43  ;;  %v457_v31 = vld [vmem:[%s7536_s26 + $0x878] sm:$0xff]  ;;  %v451_v41 = vld [vmem:[%s7536_s26 + $0x848] sm:$0xff] }
 0x11f   : > { %v4586_v56 = vadd.f32 %v4585_v45, %v3501_v30  ;;  %v2484_v57 = vmul.f32 %v1460_v47, %v1460_v47  ;;  %v2485_v58 = vmul.f32 %v1461_v48, %v1461_v48  ;;  %v1470_v59 = vmax.f32 %v446_v44, 1e-06 }
 0x120   : > { %v4600_v60 = vadd.f32 %v4599_v51, %v3512_v46  ;;  %v3506_v61 = vmul.f32 %v2482_v52, %v1458_v39  ;;  %v3507_v62 = vmul.f32 %v2483_v53, %v1459_v43  ;;  %v1471_v63 = vmax.f32 %v447_v49, 1e-06  ;;  %v452_v46 = vld [vmem:[%s7536_s26 + $0x850] sm:$0xff] }
 0x121   : > { %4587 = vadd.xlane.f32.xlu0 %v4586_v56  ;;  %v3508_v2 = vmul.f32 %v2484_v57, %v1460_v47  ;;  %v3509_v3 = vmul.f32 %v2485_v58, %v1461_v48  ;;  %v1472_v4 = vmax.f32 %v448_v54, 1e-06  ;;  %v1473_v5 = vmax.f32 %v449_v55, 1e-06  ;;  %v453_v47 = vld [vmem:[%s7536_s26 + $0x858] sm:$0xff]  ;;  %v462_v56 = vld [vmem:[%s7536_s26 + $0x8a0] sm:$0xff] }
 0x122   : > { %v4601_v7 = vadd.f32 %v4600_v60, %v3513_v50  ;;  %v4594_v8 = vadd.f32 %v3507_v62, %v3506_v61  ;;  %v2494_v9 = vmul.f32 %v1470_v59, %v1470_v59  ;;  %v2495_v10 = vmul.f32 %v1471_v63, %v1471_v63  ;;  %v463_v61 = vld [vmem:[%s7536_s26 + $0x8a8] sm:$0xff] }
 0x123   : > { %v2496_v12 = vmul.f32 %v1472_v4, %v1472_v4  ;;  %v2497_v13 = vmul.f32 %v1473_v5, %v1473_v5  ;;  %v1466_v14 = vmax.f32 %v442_v0, 1e-06  ;;  %v1467_v15 = vmax.f32 %v443_v1, 1e-06 }
 0x124   : > { %4602 = vadd.xlane.f32.xlu1 %v4601_v7  ;;  %v4595_v16 = vadd.f32 %v4594_v8, %v3508_v2  ;;  %v3518_v17 = vmul.f32 %v2494_v9, %v1470_v59  ;;  %v3519_v18 = vmul.f32 %v2495_v10, %v1471_v63  ;;  %v1468_v19 = vmax.f32 %v444_v6, 1e-06  ;;  %v464_v2 = vld [vmem:[%s7536_s26 + $0x8b0] sm:$0xff] }
 0x125   : > { %v3520_v22 = vmul.f32 %v2496_v12, %v1472_v4  ;;  %v3521_v23 = vmul.f32 %v2497_v13, %v1473_v5  ;;  %v1469_v24 = vmax.f32 %v445_v11, 1e-06  ;;  %v2490_v25 = vmul.f32 %v1466_v14, %v1466_v14  ;;  %v458_v12 = vld [vmem:[%s7536_s26 + $0x880] sm:$0xff]  ;;  %v459_v13 = vld [vmem:[%s7536_s26 + $0x888] sm:$0xff] }
 0x126   : > { %v4596_v27 = vadd.f32 %v4595_v16, %v3509_v3  ;;  %v4609_v28 = vadd.f32 %v3519_v18, %v3518_v17  ;;  %v2491_v29 = vmul.f32 %v1467_v15, %v1467_v15  ;;  %v2492_v30 = vmul.f32 %v1468_v19, %v1468_v19  ;;  %v465_v3 = vld [vmem:[%s7536_s26 + $0x8b8] sm:$0xff]  ;;  %v460_v18 = vld [vmem:[%s7536_s26 + $0x890] sm:$0xff] }
 0x127   : > { %v2493_v32 = vmul.f32 %v1469_v24, %v1469_v24  ;;  %v3514_v33 = vmul.f32 %v2490_v25, %v1466_v14  ;;  %v1478_v34 = vmax.f32 %v454_v20, 1e-06  ;;  %v1479_v35 = vmax.f32 %v455_v21, 1e-06 }
 0x128   : > { %4597 = vadd.xlane.f32.xlu0 %v4596_v27  ;;  %v4610_v37 = vadd.f32 %v4609_v28, %v3520_v22  ;;  %v3515_v38 = vmul.f32 %v2491_v29, %v1467_v15  ;;  %v3516_v39 = vmul.f32 %v2492_v30, %v1468_v19  ;;  %v1480_v40 = vmax.f32 %v456_v26, 1e-06 }
 0x129   : > { %v3517_v42 = vmul.f32 %v2493_v32, %v1469_v24  ;;  %v1481_v43 = vmax.f32 %v457_v31, 1e-06  ;;  %v2502_v44 = vmul.f32 %v1478_v34, %v1478_v34  ;;  %v2503_v45 = vmul.f32 %v1479_v35, %v1479_v35  ;;  %v470_v32 = vld [vmem:[%s7536_s26 + $0x8e0] sm:$0xff] }
 0x12a   : > { %v4611_v48 = vadd.f32 %v4610_v37, %v3521_v23  ;;  %v4604_v49 = vadd.f32 %v3515_v38, %v3514_v33  ;;  %v2504_v50 = vmul.f32 %v1480_v40, %v1480_v40  ;;  %v1474_v51 = vmax.f32 %v450_v36, 1e-06  ;;  %v461_v23 = vld [vmem:[%s7536_s26 + $0x898] sm:$0xff]  ;;  %v471_v37 = vld [vmem:[%s7536_s26 + $0x8e8] sm:$0xff] }
 0x12b   : > { %v2505_v52 = vmul.f32 %v1481_v43, %v1481_v43  ;;  %v3526_v53 = vmul.f32 %v2502_v44, %v1478_v34  ;;  %v3527_v54 = vmul.f32 %v2503_v45, %v1479_v35  ;;  %v1475_v55 = vmax.f32 %v451_v41, 1e-06  ;;  %v473_v45 = vld [vmem:[%s7536_s26 + $0x8f8] sm:$0xff] }
 0x12c   : > { %4612 = vadd.xlane.f32.xlu1 %v4611_v48  ;;  %v4605_v57 = vadd.f32 %v4604_v49, %v3516_v39  ;;  %v3528_v58 = vmul.f32 %v2504_v50, %v1480_v40  ;;  %v1476_v59 = vmax.f32 %v452_v46, 1e-06  ;;  %v1477_v60 = vmax.f32 %v453_v47, 1e-06 }
 0x12d   : > { %v3529_v62 = vmul.f32 %v2505_v52, %v1481_v43  ;;  %v4619_v63 = vadd.f32 %v3527_v54, %v3526_v53  ;;  %v2498_v0 = vmul.f32 %v1474_v51, %v1474_v51  ;;  %v2499_v1 = vmul.f32 %v1475_v55, %v1475_v55  ;;  %v466_v53 = vld [vmem:[%s7536_s26 + $0x8c0] sm:$0xff] }
 0x12e   : > { %v4606_v4 = vadd.f32 %v4605_v57, %v3517_v42  ;;  %v2500_v5 = vmul.f32 %v1476_v59, %v1476_v59  ;;  %v2501_v6 = vmul.f32 %v1477_v60, %v1477_v60  ;;  %v1486_v7 = vmax.f32 %v462_v56, 1e-06  ;;  %v472_v42 = vld [vmem:[%s7536_s26 + $0x8f0] sm:$0xff] }
 0x12f   : > { %v4620_v8 = vadd.f32 %v4619_v63, %v3528_v58  ;;  %v3522_v9 = vmul.f32 %v2498_v0, %v1474_v51  ;;  %v3523_v10 = vmul.f32 %v2499_v1, %v1475_v55  ;;  %v1487_v11 = vmax.f32 %v463_v61, 1e-06  ;;  %v468_v61 = vld [vmem:[%s7536_s26 + $0x8d0] sm:$0xff]  ;;  %v469_v1 = vld [vmem:[%s7536_s26 + $0x8d8] sm:$0xff] }
 0x130   : > { %4607 = vadd.xlane.f32.xlu0 %v4606_v4  ;;  %v3524_v14 = vmul.f32 %v2500_v5, %v1476_v59  ;;  %v3525_v15 = vmul.f32 %v2501_v6, %v1477_v60  ;;  %v1488_v16 = vmax.f32 %v464_v2, 1e-06  ;;  %v1489_v17 = vmax.f32 %v465_v3, 1e-06  ;;  %v467_v60 = vld [vmem:[%s7536_s26 + $0x8c8] sm:$0xff] }
 0x131   : > { %v4621_v19 = vadd.f32 %v4620_v8, %v3529_v62  ;;  %v4614_v20 = vadd.f32 %v3523_v10, %v3522_v9  ;;  %v2510_v21 = vmul.f32 %v1486_v7, %v1486_v7  ;;  %v2511_v22 = vmul.f32 %v1487_v11, %v1487_v11 }
 0x132   : > { %v2512_v24 = vmul.f32 %v1488_v16, %v1488_v16  ;;  %v2513_v25 = vmul.f32 %v1489_v17, %v1489_v17  ;;  %v1482_v26 = vmax.f32 %v458_v12, 1e-06  ;;  %v1483_v27 = vmax.f32 %v459_v13, 1e-06 }
 0x133   : > { %4622 = vadd.xlane.f32.xlu1 %v4621_v19  ;;  %v4615_v28 = vadd.f32 %v4614_v20, %v3524_v14  ;;  %v3534_v29 = vmul.f32 %v2510_v21, %v1486_v7  ;;  %v3535_v30 = vmul.f32 %v2511_v22, %v1487_v11  ;;  %v1484_v31 = vmax.f32 %v460_v18, 1e-06  ;;  %v478_v14 = vld [vmem:[%s7536_s26 + $0x920] sm:$0xff]  ;;  %v479_v18 = vld [vmem:[%s7536_s26 + $0x928] sm:$0xff]  ;;  %v480_v21 = vld [vmem:[%s7536_s26 + $0x930] sm:$0xff] }
 0x134   : > { %v3536_v33 = vmul.f32 %v2512_v24, %v1488_v16  ;;  %v3537_v34 = vmul.f32 %v2513_v25, %v1489_v17  ;;  %v1485_v35 = vmax.f32 %v461_v23, 1e-06  ;;  %v2506_v36 = vmul.f32 %v1482_v26, %v1482_v26  ;;  %v481_v22 = vld [vmem:[%s7536_s26 + $0x938] sm:$0xff]  ;;  %v474_v23 = vld [vmem:[%s7536_s26 + $0x900] sm:$0xff] }
 0x135   : > { %v4616_v38 = vadd.f32 %v4615_v28, %v3525_v15  ;;  %v4629_v39 = vadd.f32 %v3535_v30, %v3534_v29  ;;  %v2507_v40 = vmul.f32 %v1483_v27, %v1483_v27  ;;  %v2508_v41 = vmul.f32 %v1484_v31, %v1484_v31  ;;  %v476_v30 = vld [vmem:[%s7536_s26 + $0x910] sm:$0xff] }
 0x136   : > { %v2509_v43 = vmul.f32 %v1485_v35, %v1485_v35  ;;  %v3530_v44 = vmul.f32 %v2506_v36, %v1482_v26  ;;  %v1494_v46 = vmax.f32 %v470_v32, 1e-06  ;;  %v1495_v50 = vmax.f32 %v471_v37, 1e-06  ;;  %v475_v26 = vld [vmem:[%s7536_s26 + $0x908] sm:$0xff] }
 0x137   : > { %4617 = vadd.xlane.f32.xlu0 %v4616_v38  ;;  %v4630_v47 = vadd.f32 %v4629_v39, %v3536_v33  ;;  %v3531_v48 = vmul.f32 %v2507_v40, %v1483_v27  ;;  %v3532_v49 = vmul.f32 %v2508_v41, %v1484_v31  ;;  %v1496_v52 = vmax.f32 %v472_v42, 1e-06  ;;  %v477_v31 = vld [vmem:[%s7536_s26 + $0x918] sm:$0xff] }
 0x138   : > { %v3533_v51 = vmul.f32 %v2509_v43, %v1485_v35  ;;  %v1497_v56 = vmax.f32 %v473_v45, 1e-06  ;;  %v2518_v57 = vmul.f32 %v1494_v46, %v1494_v46  ;;  %v2519_v58 = vmul.f32 %v1495_v50, %v1495_v50 }
 0x139   : > { %v4631_v54 = vadd.f32 %v4630_v47, %v3537_v34  ;;  %v4624_v55 = vadd.f32 %v3531_v48, %v3530_v44  ;;  %v2520_v59 = vmul.f32 %v1496_v52, %v1496_v52  ;;  %v1490_v2 = vmax.f32 %v466_v53, 1e-06 }
 0x13a   : > { %v2521_v63 = vmul.f32 %v1497_v56, %v1497_v56  ;;  %v3542_v0 = vmul.f32 %v2518_v57, %v1494_v46  ;;  %v3543_v3 = vmul.f32 %v2519_v58, %v1495_v50  ;;  %v1491_v6 = vmax.f32 %v467_v60, 1e-06  ;;  %v489_v60 = vld [vmem:[%s7536_s26 + $0x978] sm:$0xff] }
 0x13b   : > { %4632 = vadd.xlane.f32.xlu1 %v4631_v54  ;;  %v4625_v62 = vadd.f32 %v4624_v55, %v3532_v49  ;;  %v3544_v4 = vmul.f32 %v2520_v59, %v1496_v52  ;;  %v1492_v7 = vmax.f32 %v468_v61, 1e-06  ;;  %v1493_v10 = vmax.f32 %v469_v1, 1e-06  ;;  %v486_v55 = vld [vmem:[%s7536_s26 + $0x960] sm:$0xff]  ;;  %v488_v59 = vld [vmem:[%s7536_s26 + $0x970] sm:$0xff] }
 0x13c   : > { %v3545_v8 = vmul.f32 %v2521_v63, %v1497_v56  ;;  %v4639_v9 = vadd.f32 %v3543_v3, %v3542_v0  ;;  %v2514_v11 = vmul.f32 %v1490_v2, %v1490_v2  ;;  %v2515_v12 = vmul.f32 %v1491_v6, %v1491_v6  ;;  %v487_v56 = vld [vmem:[%s7536_s26 + $0x968] sm:$0xff]  ;;  %v482_v63 = vld [vmem:[%s7536_s26 + $0x940] sm:$0xff] }
 0x13d   : > { %v4626_v5 = vadd.f32 %v4625_v62, %v3533_v51  ;;  %v2516_v13 = vmul.f32 %v1492_v7, %v1492_v7  ;;  %v2517_v16 = vmul.f32 %v1493_v10, %v1493_v10  ;;  %v1502_v25 = vmax.f32 %v478_v14, 1e-06  ;;  %v483_v0 = vld [vmem:[%s7536_s26 + $0x948] sm:$0xff] }
 0x13e   : > { %v4640_v15 = vadd.f32 %v4639_v9, %v3544_v4  ;;  %v3538_v17 = vmul.f32 %v2514_v11, %v1490_v2  ;;  %v3539_v19 = vmul.f32 %v2515_v12, %v1491_v6  ;;  %v1503_v29 = vmax.f32 %v479_v18, 1e-06 }
 0x13f   : > { %4627 = vadd.xlane.f32.xlu0 %v4626_v5  ;;  %v3540_v20 = vmul.f32 %v2516_v13, %v1492_v7  ;;  %v3541_v27 = vmul.f32 %v2517_v16, %v1493_v10  ;;  %v1504_v32 = vmax.f32 %v480_v21, 1e-06  ;;  %v1505_v33 = vmax.f32 %v481_v22, 1e-06  ;;  %v484_v7 = vld [vmem:[%s7536_s26 + $0x950] sm:$0xff] }
 0x140   : > { %v4641_v24 = vadd.f32 %v4640_v15, %v3545_v8  ;;  %v4634_v28 = vadd.f32 %v3539_v19, %v3538_v17  ;;  %v2526_v34 = vmul.f32 %v1502_v25, %v1502_v25  ;;  %v1498_v35 = vmax.f32 %v474_v23, 1e-06  ;;  %v485_v8 = vld [vmem:[%s7536_s26 + $0x958] sm:$0xff] }
 0x141   : > { %v2527_v37 = vmul.f32 %v1503_v29, %v1503_v29  ;;  %v1499_v38 = vmax.f32 %v475_v26, 1e-06  ;;  %v2528_v39 = vmul.f32 %v1504_v32, %v1504_v32  ;;  %v2529_v40 = vmul.f32 %v1505_v33, %v1505_v33 }
 0x142   : > { %4642 = vadd.xlane.f32.xlu1 %v4641_v24  ;;  %v4635_v36 = vadd.f32 %v4634_v28, %v3540_v20  ;;  %v3550_v41 = vmul.f32 %v2526_v34, %v1502_v25  ;;  %v1500_v44 = vmax.f32 %v476_v30, 1e-06  ;;  %v1501_v45 = vmax.f32 %v477_v31, 1e-06  ;;  %v495_v30 = vld [vmem:[%s7536_s26 + $0x9a8] sm:$0xff]  ;;  %v497_v34 = vld [vmem:[%s7536_s26 + $0x9b8] sm:$0xff] }
 0x143   : > { %v3551_v43 = vmul.f32 %v2527_v37, %v1503_v29  ;;  %v3552_v46 = vmul.f32 %v2528_v39, %v1504_v32  ;;  %v2522_v47 = vmul.f32 %v1498_v35, %v1498_v35  ;;  %v2523_v48 = vmul.f32 %v1499_v38, %v1499_v38  ;;  %v494_v29 = vld [vmem:[%s7536_s26 + $0x9a0] sm:$0xff] }
 0x144   : > { %v4636_v42 = vadd.f32 %v4635_v36, %v3541_v27  ;;  %v3553_v49 = vmul.f32 %v2529_v40, %v1505_v33  ;;  %v2524_v51 = vmul.f32 %v1500_v44, %v1500_v44  ;;  %v2525_v52 = vmul.f32 %v1501_v45, %v1501_v45  ;;  %v496_v33 = vld [vmem:[%s7536_s26 + $0x9b0] sm:$0xff]  ;;  %v490_v37 = vld [vmem:[%s7536_s26 + $0x980] sm:$0xff] }
 0x145   : > { %v4649_v50 = vadd.f32 %v3551_v43, %v3550_v41  ;;  %v3546_v53 = vmul.f32 %v2522_v47, %v1498_v35  ;;  %v3547_v54 = vmul.f32 %v2523_v48, %v1499_v38  ;;  %v1510_v2 = vmax.f32 %v486_v55, 1e-06  ;;  %v491_v38 = vld [vmem:[%s7536_s26 + $0x988] sm:$0xff] }
 0x146   : > { %4637 = vadd.xlane.f32.xlu0 %v4636_v42  ;;  %v3548_v58 = vmul.f32 %v2524_v51, %v1500_v44  ;;  %v3549_v61 = vmul.f32 %v2525_v52, %v1501_v45  ;;  %v1511_v3 = vmax.f32 %v487_v56, 1e-06  ;;  %v1512_v5 = vmax.f32 %v488_v59, 1e-06  ;;  %v492_v45 = vld [vmem:[%s7536_s26 + $0x990] sm:$0xff] }
 0x147   : > { %v4650_v57 = vadd.f32 %v4649_v50, %v3552_v46  ;;  %v4644_v62 = vadd.f32 %v3547_v54, %v3546_v53  ;;  %v1513_v6 = vmax.f32 %v489_v60, 1e-06  ;;  %v2534_v9 = vmul.f32 %v1510_v2, %v1510_v2  ;;  %v493_v46 = vld [vmem:[%s7536_s26 + $0x998] sm:$0xff] }
 0x148   : > { %v2535_v10 = vmul.f32 %v1511_v3, %v1511_v3  ;;  %v1506_v11 = vmax.f32 %v482_v63, 1e-06  ;;  %v1507_v12 = vmax.f32 %v483_v0, 1e-06  ;;  %v2536_v14 = vmul.f32 %v1512_v5, %v1512_v5 }
 0x149   : > { %v4651_v1 = vadd.f32 %v4650_v57, %v3553_v49  ;;  %v4645_v4 = vadd.f32 %v4644_v62, %v3548_v58  ;;  %v2537_v15 = vmul.f32 %v1513_v6, %v1513_v6  ;;  %v3558_v16 = vmul.f32 %v2534_v9, %v1510_v2 }
 0x14a   : > { %v3559_v17 = vmul.f32 %v2535_v10, %v1511_v3  ;;  %v1508_v18 = vmax.f32 %v484_v7, 1e-06  ;;  %v1509_v19 = vmax.f32 %v485_v8, 1e-06  ;;  %v3560_v20 = vmul.f32 %v2536_v14, %v1512_v5  ;;  %v502_v3 = vld [vmem:[%s7536_s26 + $0x9e0] sm:$0xff]  ;;  %v504_v7 = vld [vmem:[%s7536_s26 + $0x9f0] sm:$0xff] }
 0x14b   : > { %4652 = vadd.xlane.f32.xlu1 %v4651_v1  ;;  %v4646_v13 = vadd.f32 %v4645_v4, %v3549_v61  ;;  %v2530_v21 = vmul.f32 %v1506_v11, %v1506_v11  ;;  %v2531_v22 = vmul.f32 %v1507_v12, %v1507_v12  ;;  %v3561_v23 = vmul.f32 %v2537_v15, %v1513_v6  ;;  %v503_v4 = vld [vmem:[%s7536_s26 + $0x9e8] sm:$0xff]  ;;  %v505_v8 = vld [vmem:[%s7536_s26 + $0x9f8] sm:$0xff] }
 0x14c   : > { %v4659_v24 = vadd.f32 %v3559_v17, %v3558_v16  ;;  %v2532_v25 = vmul.f32 %v1508_v18, %v1508_v18  ;;  %v2533_v26 = vmul.f32 %v1509_v19, %v1509_v19  ;;  %v1518_v40 = vmax.f32 %v494_v29, 1e-06 }
 0x14d   : > { %4647 = vadd.xlane.f32.xlu0 %v4646_v13  ;;  %v3554_v27 = vmul.f32 %v2530_v21, %v1506_v11  ;;  %v3555_v28 = vmul.f32 %v2531_v22, %v1507_v12  ;;  %v1519_v41 = vmax.f32 %v495_v30, 1e-06  ;;  %v1520_v43 = vmax.f32 %v496_v33, 1e-06  ;;  %v498_v11 = vld [vmem:[%s7536_s26 + $0x9c0] sm:$0xff]  ;;  %v499_v12 = vld [vmem:[%s7536_s26 + $0x9c8] sm:$0xff] }
 0x14e   : > { %v4660_v31 = vadd.f32 %v4659_v24, %v3560_v20  ;;  %v3556_v32 = vmul.f32 %v2532_v25, %v1508_v18  ;;  %v3557_v35 = vmul.f32 %v2533_v26, %v1509_v19  ;;  %v1521_v44 = vmax.f32 %v497_v34, 1e-06  ;;  %v500_v19 = vld [vmem:[%s7536_s26 + $0x9d0] sm:$0xff]  ;;  %v501_v20 = vld [vmem:[%s7536_s26 + $0x9d8] sm:$0xff] }
 0x14f   : > { %v4654_v36 = vadd.f32 %v3555_v28, %v3554_v27  ;;  %v2542_v47 = vmul.f32 %v1518_v40, %v1518_v40  ;;  %v2543_v48 = vmul.f32 %v1519_v41, %v1519_v41  ;;  %v1514_v49 = vmax.f32 %v490_v37, 1e-06 }
 0x150   : > { %v4661_v39 = vadd.f32 %v4660_v31, %v3561_v23  ;;  %v1515_v50 = vmax.f32 %v491_v38, 1e-06  ;;  %v2544_v52 = vmul.f32 %v1520_v43, %v1520_v43  ;;  %v2545_v53 = vmul.f32 %v1521_v44, %v1521_v44 }
 0x151   : > { %v4655_v42 = vadd.f32 %v4654_v36, %v3556_v32  ;;  %v3566_v54 = vmul.f32 %v2542_v47, %v1518_v40  ;;  %v3567_v55 = vmul.f32 %v2543_v48, %v1519_v41  ;;  %v1516_v56 = vmax.f32 %v492_v45, 1e-06  ;;  %v510_v41 = vld [vmem:[%s7536_s26 + $0xa20] sm:$0xff]  ;;  %v512_v45 = vld [vmem:[%s7536_s26 + $0xa30] sm:$0xff] }
 0x152   : > { %4662 = vadd.xlane.f32.xlu1 %v4661_v39  ;;  %v1517_v57 = vmax.f32 %v493_v46, 1e-06  ;;  %v3568_v58 = vmul.f32 %v2544_v52, %v1520_v43  ;;  %v2538_v59 = vmul.f32 %v1514_v49, %v1514_v49  ;;  %v2539_v60 = vmul.f32 %v1515_v50, %v1515_v50  ;;  %v513_v46 = vld [vmem:[%s7536_s26 + $0xa38] sm:$0xff] }
 0x153   : > { %v4656_v51 = vadd.f32 %v4655_v42, %v3557_v35  ;;  %v3569_v61 = vmul.f32 %v2545_v53, %v1521_v44  ;;  %v4669_v62 = vadd.f32 %v3567_v55, %v3566_v54  ;;  %v2540_v63 = vmul.f32 %v1516_v56, %v1516_v56  ;;  %v511_v42 = vld [vmem:[%s7536_s26 + $0xa28] sm:$0xff] }
 0x154   : > { %v2541_v0 = vmul.f32 %v1517_v57, %v1517_v57  ;;  %v3562_v1 = vmul.f32 %v2538_v59, %v1514_v49  ;;  %v3563_v2 = vmul.f32 %v2539_v60, %v1515_v50  ;;  %v1526_v14 = vmax.f32 %v502_v3, 1e-06  ;;  %v506_v49 = vld [vmem:[%s7536_s26 + $0xa00] sm:$0xff]  ;;  %v507_v50 = vld [vmem:[%s7536_s26 + $0xa08] sm:$0xff] }
 0x155   : > { %4657 = vadd.xlane.f32.xlu0 %v4656_v51  ;;  %v4670_v5 = vadd.f32 %v4669_v62, %v3568_v58  ;;  %v3564_v6 = vmul.f32 %v2540_v63, %v1516_v56  ;;  %v1527_v15 = vmax.f32 %v503_v4, 1e-06  ;;  %v1528_v17 = vmax.f32 %v504_v7, 1e-06  ;;  %v509_v58 = vld [vmem:[%s7536_s26 + $0xa18] sm:$0xff] }
 0x156   : > { %v3565_v9 = vmul.f32 %v2541_v0, %v1517_v57  ;;  %v4664_v10 = vadd.f32 %v3563_v2, %v3562_v1  ;;  %v1529_v18 = vmax.f32 %v505_v8, 1e-06  ;;  %v2550_v21 = vmul.f32 %v1526_v14, %v1526_v14  ;;  %v508_v57 = vld [vmem:[%s7536_s26 + $0xa10] sm:$0xff] }
 0x157   : > { %v4671_v13 = vadd.f32 %v4670_v5, %v3569_v61  ;;  %v2551_v22 = vmul.f32 %v1527_v15, %v1527_v15  ;;  %v1522_v23 = vmax.f32 %v498_v11, 1e-06  ;;  %v1523_v24 = vmax.f32 %v499_v12, 1e-06 }
 0x158   : > { %v4665_v16 = vadd.f32 %v4664_v10, %v3564_v6  ;;  %v2552_v26 = vmul.f32 %v1528_v17, %v1528_v17  ;;  %v2553_v27 = vmul.f32 %v1529_v18, %v1529_v18  ;;  %v3574_v28 = vmul.f32 %v2550_v21, %v1526_v14 }
 0x159   : > { %4672 = vadd.xlane.f32.xlu1 %v4671_v13  ;;  %v3575_v29 = vmul.f32 %v2551_v22, %v1527_v15  ;;  %v1524_v30 = vmax.f32 %v500_v19, 1e-06  ;;  %v1525_v31 = vmax.f32 %v501_v20, 1e-06  ;;  %v2546_v33 = vmul.f32 %v1522_v23, %v1522_v23  ;;  %v518_v15 = vld [vmem:[%s7536_s26 + $0xa60] sm:$0xff]  ;;  %v520_v19 = vld [vmem:[%s7536_s26 + $0xa70] sm:$0xff] }
 0x15a   : > { %v4666_v25 = vadd.f32 %v4665_v16, %v3565_v9  ;;  %v3576_v32 = vmul.f32 %v2552_v26, %v1528_v17  ;;  %v2547_v34 = vmul.f32 %v1523_v24, %v1523_v24  ;;  %v3577_v35 = vmul.f32 %v2553_v27, %v1529_v18  ;;  %v519_v16 = vld [vmem:[%s7536_s26 + $0xa68] sm:$0xff]  ;;  %v521_v20 = vld [vmem:[%s7536_s26 + $0xa78] sm:$0xff] }
 0x15b   : > { %v4679_v36 = vadd.f32 %v3575_v29, %v3574_v28  ;;  %v2548_v37 = vmul.f32 %v1524_v30, %v1524_v30  ;;  %v2549_v38 = vmul.f32 %v1525_v31, %v1525_v31  ;;  %v3570_v39 = vmul.f32 %v2546_v33, %v1522_v23  ;;  %v514_v23 = vld [vmem:[%s7536_s26 + $0xa40] sm:$0xff] }
 0x15c   : > { %4667 = vadd.xlane.f32.xlu0 %v4666_v25  ;;  %v3571_v40 = vmul.f32 %v2547_v34, %v1523_v24  ;;  %v1534_v52 = vmax.f32 %v510_v41, 1e-06  ;;  %v1535_v53 = vmax.f32 %v511_v42, 1e-06  ;;  %v1536_v55 = vmax.f32 %v512_v45, 1e-06 }
 0x15d   : > { %v4680_v43 = vadd.f32 %v4679_v36, %v3576_v32  ;;  %v3572_v44 = vmul.f32 %v2548_v37, %v1524_v30  ;;  %v3573_v47 = vmul.f32 %v2549_v38, %v1525_v31  ;;  %v1537_v56 = vmax.f32 %v513_v46, 1e-06  ;;  %v515_v24 = vld [vmem:[%s7536_s26 + $0xa48] sm:$0xff]  ;;  %v516_v31 = vld [vmem:[%s7536_s26 + $0xa50] sm:$0xff]  ;;  %v517_v32 = vld [vmem:[%s7536_s26 + $0xa58] sm:$0xff] }
 0x15e   : > { %v4674_v48 = vadd.f32 %v3571_v40, %v3570_v39  ;;  %v2558_v59 = vmul.f32 %v1534_v52, %v1534_v52  ;;  %v2559_v60 = vmul.f32 %v1535_v53, %v1535_v53  ;;  %v1530_v61 = vmax.f32 %v506_v49, 1e-06 }
 0x15f   : > { %v4681_v51 = vadd.f32 %v4680_v43, %v3577_v35  ;;  %v1531_v62 = vmax.f32 %v507_v50, 1e-06  ;;  %v2560_v0 = vmul.f32 %v1536_v55, %v1536_v55  ;;  %v2561_v1 = vmul.f32 %v1537_v56, %v1537_v56 }
 0x160   : > { %v4675_v54 = vadd.f32 %v4674_v48, %v3572_v44  ;;  %v3582_v2 = vmul.f32 %v2558_v59, %v1534_v52  ;;  %v3583_v3 = vmul.f32 %v2559_v60, %v1535_v53  ;;  %v1532_v4 = vmax.f32 %v508_v57, 1e-06  ;;  %v526_v53 = vld [vmem:[%s7536_s26 + $0xaa0] sm:$0xff]  ;;  %v528_v57 = vld [vmem:[%s7536_s26 + $0xab0] sm:$0xff]  ;;  %v529_v60 = vld [vmem:[%s7536_s26 + $0xab8] sm:$0xff] }
 0x161   : > { %4682 = vadd.xlane.f32.xlu1 %v4681_v51  ;;  %v1533_v5 = vmax.f32 %v509_v58, 1e-06  ;;  %v3584_v6 = vmul.f32 %v2560_v0, %v1536_v55  ;;  %v2554_v7 = vmul.f32 %v1530_v61, %v1530_v61  ;;  %v2555_v8 = vmul.f32 %v1531_v62, %v1531_v62 }
 0x162   : > { %v4676_v63 = vadd.f32 %v4675_v54, %v3573_v47  ;;  %v3585_v9 = vmul.f32 %v2561_v1, %v1537_v56  ;;  %v4689_v10 = vadd.f32 %v3583_v3, %v3582_v2  ;;  %v2556_v11 = vmul.f32 %v1532_v4, %v1532_v4  ;;  %v527_v56 = vld [vmem:[%s7536_s26 + $0xaa8] sm:$0xff] }
 0x163   : > { %v2557_v12 = vmul.f32 %v1533_v5, %v1533_v5  ;;  %v3578_v13 = vmul.f32 %v2554_v7, %v1530_v61  ;;  %v3579_v14 = vmul.f32 %v2555_v8, %v1531_v62  ;;  %v1542_v26 = vmax.f32 %v518_v15, 1e-06  ;;  %v522_v61 = vld [vmem:[%s7536_s26 + $0xa80] sm:$0xff]  ;;  %v523_v62 = vld [vmem:[%s7536_s26 + $0xa88] sm:$0xff] }
 0x164   : > { %4677 = vadd.xlane.f32.xlu0 %v4676_v63  ;;  %v4690_v17 = vadd.f32 %v4689_v10, %v3584_v6  ;;  %v3580_v18 = vmul.f32 %v2556_v11, %v1532_v4  ;;  %v1543_v27 = vmax.f32 %v519_v16, 1e-06  ;;  %v1544_v29 = vmax.f32 %v520_v19, 1e-06  ;;  %v524_v4 = vld [vmem:[%s7536_s26 + $0xa90] sm:$0xff] }
 0x165   : > { %v3581_v21 = vmul.f32 %v2557_v12, %v1533_v5  ;;  %v4684_v22 = vadd.f32 %v3579_v14, %v3578_v13  ;;  %v1545_v30 = vmax.f32 %v521_v20, 1e-06  ;;  %v2566_v33 = vmul.f32 %v1542_v26, %v1542_v26  ;;  %v525_v5 = vld [vmem:[%s7536_s26 + $0xa98] sm:$0xff]  ;;  %v534_v20 = vld [vmem:[%s7536_s26 + $0xae0] sm:$0xff] }
 0x166   : > { %v4691_v25 = vadd.f32 %v4690_v17, %v3585_v9  ;;  %v2567_v34 = vmul.f32 %v1543_v27, %v1543_v27  ;;  %v1538_v35 = vmax.f32 %v514_v23, 1e-06  ;;  %v1539_v36 = vmax.f32 %v515_v24, 1e-06  ;;  %v536_v24 = vld [vmem:[%s7536_s26 + $0xaf0] sm:$0xff] }
 0x167   : > { %v4685_v28 = vadd.f32 %v4684_v22, %v3580_v18  ;;  %v2568_v38 = vmul.f32 %v1544_v29, %v1544_v29  ;;  %v2569_v39 = vmul.f32 %v1545_v30, %v1545_v30  ;;  %v3590_v40 = vmul.f32 %v2566_v33, %v1542_v26 }
 0x168   : > { %4692 = vadd.xlane.f32.xlu1 %v4691_v25  ;;  %v3591_v41 = vmul.f32 %v2567_v34, %v1543_v27  ;;  %v1540_v42 = vmax.f32 %v516_v31, 1e-06  ;;  %v1541_v43 = vmax.f32 %v517_v32, 1e-06  ;;  %v2562_v45 = vmul.f32 %v1538_v35, %v1538_v35  ;;  %v530_v34 = vld [vmem:[%s7536_s26 + $0xac0] sm:$0xff] }
 0x169   : > { %v4686_v37 = vadd.f32 %v4685_v28, %v3581_v21  ;;  %v3592_v44 = vmul.f32 %v2568_v38, %v1544_v29  ;;  %v2563_v46 = vmul.f32 %v1539_v36, %v1539_v36  ;;  %v3593_v47 = vmul.f32 %v2569_v39, %v1545_v30  ;;  %v535_v21 = vld [vmem:[%s7536_s26 + $0xae8] sm:$0xff]  ;;  %v537_v29 = vld [vmem:[%s7536_s26 + $0xaf8] sm:$0xff] }
 0x16a   : > { %v4699_v48 = vadd.f32 %v3591_v41, %v3590_v40  ;;  %v2564_v49 = vmul.f32 %v1540_v42, %v1540_v42  ;;  %v2565_v50 = vmul.f32 %v1541_v43, %v1541_v43  ;;  %v3586_v51 = vmul.f32 %v2562_v45, %v1538_v35  ;;  %v531_v35 = vld [vmem:[%s7536_s26 + $0xac8] sm:$0xff] }
 0x16b   : > { %4687 = vadd.xlane.f32.xlu0 %v4686_v37  ;;  %v3587_v52 = vmul.f32 %v2563_v46, %v1539_v36  ;;  %v1550_v0 = vmax.f32 %v526_v53, 1e-06  ;;  %v1551_v2 = vmax.f32 %v527_v56, 1e-06  ;;  %v1552_v3 = vmax.f32 %v528_v57, 1e-06 }
 0x16c   : > { %v4700_v54 = vadd.f32 %v4699_v48, %v3592_v44  ;;  %v3588_v55 = vmul.f32 %v2564_v49, %v1540_v42  ;;  %v3589_v58 = vmul.f32 %v2565_v50, %v1541_v43  ;;  %v1553_v6 = vmax.f32 %v529_v60, 1e-06  ;;  %v532_v43 = vld [vmem:[%s7536_s26 + $0xad0] sm:$0xff]  ;;  %v533_v44 = vld [vmem:[%s7536_s26 + $0xad8] sm:$0xff]  ;;  %v542_v57 = vld [vmem:[%s7536_s26 + $0xb20] sm:$0xff] }
 0x16d   : > { %v4694_v59 = vadd.f32 %v3587_v52, %v3586_v51  ;;  %v2574_v7 = vmul.f32 %v1550_v0, %v1550_v0  ;;  %v1546_v8 = vmax.f32 %v522_v61, 1e-06  ;;  %v1547_v9 = vmax.f32 %v523_v62, 1e-06  ;;  %v543_v62 = vld [vmem:[%s7536_s26 + $0xb28] sm:$0xff] }
 0x16e   : > { %v4701_v63 = vadd.f32 %v4700_v54, %v3593_v47  ;;  %v2575_v11 = vmul.f32 %v1551_v2, %v1551_v2  ;;  %v2576_v12 = vmul.f32 %v1552_v3, %v1552_v3  ;;  %v2577_v13 = vmul.f32 %v1553_v6, %v1553_v6 }
 0x16f   : > { %v4695_v1 = vadd.f32 %v4694_v59, %v3588_v55  ;;  %v3598_v14 = vmul.f32 %v2574_v7, %v1550_v0  ;;  %v1548_v15 = vmax.f32 %v524_v4, 1e-06  ;;  %v1549_v18 = vmax.f32 %v525_v5, 1e-06  ;;  %v538_v7 = vld [vmem:[%s7536_s26 + $0xb00] sm:$0xff] }
 0x170   : > { %4702 = vadd.xlane.f32.xlu1 %v4701_v63  ;;  %v3599_v16 = vmul.f32 %v2575_v11, %v1551_v2  ;;  %v3600_v17 = vmul.f32 %v2576_v12, %v1552_v3  ;;  %v2570_v19 = vmul.f32 %v1546_v8, %v1546_v8  ;;  %v2571_v22 = vmul.f32 %v1547_v9, %v1547_v9  ;;  %v544_v63 = vld [vmem:[%s7536_s26 + $0xb30] sm:$0xff]  ;;  %v545_v3 = vld [vmem:[%s7536_s26 + $0xb38] sm:$0xff]  ;;  %v539_v11 = vld [vmem:[%s7536_s26 + $0xb08] sm:$0xff] }
 0x171   : > { %v4696_v10 = vadd.f32 %v4695_v1, %v3589_v58  ;;  %v2572_v23 = vmul.f32 %v1548_v15, %v1548_v15  ;;  %v3601_v25 = vmul.f32 %v2577_v13, %v1553_v6  ;;  %v2573_v27 = vmul.f32 %v1549_v18, %v1549_v18  ;;  %v540_v12 = vld [vmem:[%s7536_s26 + $0xb10] sm:$0xff] }
 0x172   : > { %v4709_v26 = vadd.f32 %v3599_v16, %v3598_v14  ;;  %v3594_v28 = vmul.f32 %v2570_v19, %v1546_v8  ;;  %v3595_v30 = vmul.f32 %v2571_v22, %v1547_v9  ;;  %v1558_v32 = vmax.f32 %v534_v20, 1e-06 }
 0x173   : > { %4697 = vadd.xlane.f32.xlu0 %v4696_v10  ;;  %v3596_v31 = vmul.f32 %v2572_v23, %v1548_v15  ;;  %v1559_v33 = vmax.f32 %v535_v21, 1e-06  ;;  %v3597_v37 = vmul.f32 %v2573_v27, %v1549_v18  ;;  %v1560_v38 = vmax.f32 %v536_v24, 1e-06 }
 0x174   : > { %v4710_v36 = vadd.f32 %v4709_v26, %v3600_v17  ;;  %v4704_v39 = vadd.f32 %v3595_v30, %v3594_v28  ;;  %v1561_v40 = vmax.f32 %v537_v29, 1e-06  ;;  %v2582_v41 = vmul.f32 %v1558_v32, %v1558_v32  ;;  %v541_v17 = vld [vmem:[%s7536_s26 + $0xb18] sm:$0xff] }
 0x175   : > { %v2583_v42 = vmul.f32 %v1559_v33, %v1559_v33  ;;  %v2584_v46 = vmul.f32 %v1560_v38, %v1560_v38  ;;  %v1554_v47 = vmax.f32 %v530_v34, 1e-06  ;;  %v1555_v48 = vmax.f32 %v531_v35, 1e-06 }
 0x176   : > { %v4711_v45 = vadd.f32 %v4710_v36, %v3601_v25  ;;  %v4705_v49 = vadd.f32 %v4704_v39, %v3596_v31  ;;  %v2585_v50 = vmul.f32 %v1561_v40, %v1561_v40  ;;  %v3606_v51 = vmul.f32 %v2582_v41, %v1558_v32  ;;  %v552_v39 = vld [vmem:[%s7536_s26 + $0xb70] sm:$0xff] }
 0x177   : > { %v3607_v52 = vmul.f32 %v2583_v42, %v1559_v33  ;;  %v3608_v53 = vmul.f32 %v2584_v46, %v1560_v38  ;;  %v1556_v54 = vmax.f32 %v532_v43, 1e-06  ;;  %v1557_v55 = vmax.f32 %v533_v44, 1e-06  ;;  %v550_v33 = vld [vmem:[%s7536_s26 + $0xb60] sm:$0xff]  ;;  %v551_v38 = vld [vmem:[%s7536_s26 + $0xb68] sm:$0xff] }
 0x178   : > { %4712 = vadd.xlane.f32.xlu1 %v4711_v45  ;;  %v2578_v56 = vmul.f32 %v1554_v47, %v1554_v47  ;;  %v4706_v58 = vadd.f32 %v4705_v49, %v3597_v37  ;;  %v3609_v59 = vmul.f32 %v2585_v50, %v1561_v40  ;;  %v2579_v61 = vmul.f32 %v1555_v48, %v1555_v48  ;;  %v553_v42 = vld [vmem:[%s7536_s26 + $0xb78] sm:$0xff]  ;;  %v546_v43 = vld [vmem:[%s7536_s26 + $0xb40] sm:$0xff] }
 0x179   : > { %v4719_v60 = vadd.f32 %v3607_v52, %v3606_v51  ;;  %v2580_v0 = vmul.f32 %v1556_v54, %v1556_v54  ;;  %v2581_v1 = vmul.f32 %v1557_v55, %v1557_v55  ;;  %v1566_v6 = vmax.f32 %v542_v57, 1e-06  ;;  %v548_v52 = vld [vmem:[%s7536_s26 + $0xb50] sm:$0xff] }
 0x17a   : > { %v3602_v2 = vmul.f32 %v2578_v56, %v1554_v47  ;;  %4707 = vadd.xlane.f32.xlu0 %v4706_v58  ;;  %v3603_v5 = vmul.f32 %v2579_v61, %v1555_v48  ;;  %v1567_v9 = vmax.f32 %v543_v62, 1e-06  ;;  %v1568_v10 = vmax.f32 %v544_v63, 1e-06  ;;  %v547_v47 = vld [vmem:[%s7536_s26 + $0xb48] sm:$0xff] }
 0x17b   : > { %v4720_v4 = vadd.f32 %v4719_v60, %v3608_v53  ;;  %v3604_v8 = vmul.f32 %v2580_v0, %v1556_v54  ;;  %v3605_v14 = vmul.f32 %v2581_v1, %v1557_v55  ;;  %v1569_v16 = vmax.f32 %v545_v3, 1e-06  ;;  %v549_v53 = vld [vmem:[%s7536_s26 + $0xb58] sm:$0xff] }
 0x17c   : > { %v4714_v15 = vadd.f32 %v3603_v5, %v3602_v2  ;;  %v2590_v18 = vmul.f32 %v1566_v6, %v1566_v6  ;;  %v2591_v19 = vmul.f32 %v1567_v9, %v1567_v9  ;;  %v2592_v20 = vmul.f32 %v1568_v10, %v1568_v10 }
 0x17d   : > { %v4721_v13 = vadd.f32 %v4720_v4, %v3609_v59  ;;  %v1562_v21 = vmax.f32 %v538_v7, 1e-06  ;;  %v2593_v23 = vmul.f32 %v1569_v16, %v1569_v16  ;;  %v1563_v24 = vmax.f32 %v539_v11, 1e-06  ;;  %v560_v11 = vld [vmem:[%s7536_s26 + $0xbb0] sm:$0xff] }
 0x17e   : > { %v4715_v22 = vadd.f32 %v4714_v15, %v3604_v8  ;;  %v1564_v25 = vmax.f32 %v540_v12, 1e-06  ;;  %v3614_v26 = vmul.f32 %v2590_v18, %v1566_v6  ;;  %v3615_v27 = vmul.f32 %v2591_v19, %v1567_v9  ;;  %v558_v9 = vld [vmem:[%s7536_s26 + $0xba0] sm:$0xff]  ;;  %v561_v15 = vld [vmem:[%s7536_s26 + $0xbb8] sm:$0xff]  ;;  %v555_v19 = vld [vmem:[%s7536_s26 + $0xb88] sm:$0xff] }
 0x17f   : > { %4722 = vadd.xlane.f32.xlu1 %v4721_v13  ;;  %v3616_v28 = vmul.f32 %v2592_v20, %v1568_v10  ;;  %v1565_v29 = vmax.f32 %v541_v17, 1e-06  ;;  %v2586_v31 = vmul.f32 %v1562_v21, %v1562_v21  ;;  %v2587_v32 = vmul.f32 %v1563_v24, %v1563_v24  ;;  %v559_v10 = vld [vmem:[%s7536_s26 + $0xba8] sm:$0xff]  ;;  %v556_v20 = vld [vmem:[%s7536_s26 + $0xb90] sm:$0xff] }
 0x180   : > { %v4716_v30 = vadd.f32 %v4715_v22, %v3605_v14  ;;  %v3617_v34 = vmul.f32 %v2593_v23, %v1569_v16  ;;  %v4729_v35 = vadd.f32 %v3615_v27, %v3614_v26  ;;  %v2588_v36 = vmul.f32 %v1564_v25, %v1564_v25  ;;  %v554_v16 = vld [vmem:[%s7536_s26 + $0xb80] sm:$0xff] }
 0x181   : > { %v2589_v37 = vmul.f32 %v1565_v29, %v1565_v29  ;;  %v3610_v40 = vmul.f32 %v2586_v31, %v1562_v21  ;;  %v3611_v41 = vmul.f32 %v2587_v32, %v1563_v24  ;;  %v1574_v46 = vmax.f32 %v550_v33, 1e-06 }
 0x182   : > { %4717 = vadd.xlane.f32.xlu0 %v4716_v30  ;;  %v4730_v44 = vadd.f32 %v4729_v35, %v3616_v28  ;;  %v3612_v45 = vmul.f32 %v2588_v36, %v1564_v25  ;;  %v1575_v50 = vmax.f32 %v551_v38, 1e-06  ;;  %v1576_v51 = vmax.f32 %v552_v39, 1e-06  ;;  %v557_v28 = vld [vmem:[%s7536_s26 + $0xb98] sm:$0xff] }
 0x183   : > { %v3613_v48 = vmul.f32 %v2589_v37, %v1565_v29  ;;  %v4724_v49 = vadd.f32 %v3611_v41, %v3610_v40  ;;  %v1577_v55 = vmax.f32 %v553_v42, 1e-06  ;;  %v2598_v56 = vmul.f32 %v1574_v46, %v1574_v46 }
 0x184   : > { %v4731_v54 = vadd.f32 %v4730_v44, %v3617_v34  ;;  %v1570_v57 = vmax.f32 %v546_v43, 1e-06  ;;  %v2599_v59 = vmul.f32 %v1575_v50, %v1575_v50  ;;  %v2600_v60 = vmul.f32 %v1576_v51, %v1576_v51 }
 0x185   : > { %v4725_v58 = vadd.f32 %v4724_v49, %v3612_v45  ;;  %v1571_v61 = vmax.f32 %v547_v47, 1e-06  ;;  %v2601_v62 = vmul.f32 %v1577_v55, %v1577_v55  ;;  %v3622_v63 = vmul.f32 %v2598_v56, %v1574_v46  ;;  %v566_v45 = vld [vmem:[%s7536_s26 + $0xbe0] sm:$0xff] }
 0x186   : > { %4732 = vadd.xlane.f32.xlu1 %v4731_v54  ;;  %v1572_v0 = vmax.f32 %v548_v52, 1e-06  ;;  %v1573_v1 = vmax.f32 %v549_v53, 1e-06  ;;  %v3623_v3 = vmul.f32 %v2599_v59, %v1575_v50  ;;  %v3624_v4 = vmul.f32 %v2600_v60, %v1576_v51  ;;  %v567_v50 = vld [vmem:[%s7536_s26 + $0xbe8] sm:$0xff]  ;;  %v568_v51 = vld [vmem:[%s7536_s26 + $0xbf0] sm:$0xff] }
 0x187   : > { %v4726_v2 = vadd.f32 %v4725_v58, %v3613_v48  ;;  %v2594_v5 = vmul.f32 %v1570_v57, %v1570_v57  ;;  %v2595_v6 = vmul.f32 %v1571_v61, %v1571_v61  ;;  %v3625_v12 = vmul.f32 %v2601_v62, %v1577_v55  ;;  %v569_v54 = vld [vmem:[%s7536_s26 + $0xbf8] sm:$0xff]  ;;  %v562_v55 = vld [vmem:[%s7536_s26 + $0xbc0] sm:$0xff]  ;;  %v563_v59 = vld [vmem:[%s7536_s26 + $0xbc8] sm:$0xff] }
 0x188   : > { %v2596_v7 = vmul.f32 %v1572_v0, %v1572_v0  ;;  %v2597_v8 = vmul.f32 %v1573_v1, %v1573_v1  ;;  %v4739_v13 = vadd.f32 %v3623_v3, %v3622_v63  ;;  %v1582_v22 = vmax.f32 %v558_v9, 1e-06 }
 0x189   : > { %4727 = vadd.xlane.f32.xlu0 %v4726_v2  ;;  %v3618_v14 = vmul.f32 %v2594_v5, %v1570_v57  ;;  %v3619_v17 = vmul.f32 %v2595_v6, %v1571_v61  ;;  %v1583_v23 = vmax.f32 %v559_v10, 1e-06  ;;  %v1584_v24 = vmax.f32 %v560_v11, 1e-06 }
 0x18a   : > { %v3620_v18 = vmul.f32 %v2596_v7, %v1572_v0  ;;  %v4740_v21 = vadd.f32 %v4739_v13, %v3624_v4  ;;  %v3621_v25 = vmul.f32 %v2597_v8, %v1573_v1  ;;  %v1585_v27 = vmax.f32 %v561_v15, 1e-06  ;;  %v564_v0 = vld [vmem:[%s7536_s26 + $0xbd0] sm:$0xff]  ;;  %v565_v1 = vld [vmem:[%s7536_s26 + $0xbd8] sm:$0xff] }
 0x18b   : > { %v4734_v26 = vadd.f32 %v3619_v17, %v3618_v14  ;;  %v1578_v29 = vmax.f32 %v554_v16, 1e-06  ;;  %v2606_v31 = vmul.f32 %v1582_v22, %v1582_v22  ;;  %v2607_v32 = vmul.f32 %v1583_v23, %v1583_v23 }
 0x18c   : > { %v4741_v30 = vadd.f32 %v4740_v21, %v3625_v12  ;;  %v2608_v33 = vmul.f32 %v1584_v24, %v1584_v24  ;;  %v2609_v35 = vmul.f32 %v1585_v27, %v1585_v27  ;;  %v1579_v36 = vmax.f32 %v555_v19, 1e-06  ;;  %v574_v21 = vld [vmem:[%s7536_s26 + $0xc20] sm:$0xff] }
 0x18d   : > { %v4735_v34 = vadd.f32 %v4734_v26, %v3620_v18  ;;  %v1580_v37 = vmax.f32 %v556_v20, 1e-06  ;;  %v3630_v38 = vmul.f32 %v2606_v31, %v1582_v22  ;;  %v3631_v39 = vmul.f32 %v2607_v32, %v1583_v23  ;;  %v575_v22 = vld [vmem:[%s7536_s26 + $0xc28] sm:$0xff]  ;;  %v576_v23 = vld [vmem:[%s7536_s26 + $0xc30] sm:$0xff] }
 0x18e   : > { %4742 = vadd.xlane.f32.xlu1 %v4741_v30  ;;  %v3632_v40 = vmul.f32 %v2608_v33, %v1584_v24  ;;  %v1581_v41 = vmax.f32 %v557_v28, 1e-06  ;;  %v2602_v43 = vmul.f32 %v1578_v29, %v1578_v29  ;;  %v2603_v44 = vmul.f32 %v1579_v36, %v1579_v36  ;;  %v570_v28 = vld [vmem:[%s7536_s26 + $0xc00] sm:$0xff]  ;;  %v571_v31 = vld [vmem:[%s7536_s26 + $0xc08] sm:$0xff]  ;;  %v572_v32 = vld [vmem:[%s7536_s26 + $0xc10] sm:$0xff] }
 0x18f   : > { %v4736_v42 = vadd.f32 %v4735_v34, %v3621_v25  ;;  %v3633_v46 = vmul.f32 %v2609_v35, %v1585_v27  ;;  %v4749_v47 = vadd.f32 %v3631_v39, %v3630_v38  ;;  %v2604_v48 = vmul.f32 %v1580_v37, %v1580_v37  ;;  %v577_v27 = vld [vmem:[%s7536_s26 + $0xc38] sm:$0xff] }
 0x190   : > { %v2605_v49 = vmul.f32 %v1581_v41, %v1581_v41  ;;  %v3626_v52 = vmul.f32 %v2602_v43, %v1578_v29  ;;  %v3627_v53 = vmul.f32 %v2603_v44, %v1579_v36  ;;  %v1590_v58 = vmax.f32 %v566_v45, 1e-06 }
 0x191   : > { %4737 = vadd.xlane.f32.xlu0 %v4736_v42  ;;  %v4750_v56 = vadd.f32 %v4749_v47, %v3632_v40  ;;  %v3628_v57 = vmul.f32 %v2604_v48, %v1580_v37  ;;  %v1591_v62 = vmax.f32 %v567_v50, 1e-06  ;;  %v1592_v63 = vmax.f32 %v568_v51, 1e-06  ;;  %v573_v40 = vld [vmem:[%s7536_s26 + $0xc18] sm:$0xff] }
 0x192   : > { %v3629_v60 = vmul.f32 %v2605_v49, %v1581_v41  ;;  %v4744_v61 = vadd.f32 %v3627_v53, %v3626_v52  ;;  %v1593_v3 = vmax.f32 %v569_v54, 1e-06  ;;  %v2614_v4 = vmul.f32 %v1590_v58, %v1590_v58 }
 0x193   : > { %v4751_v2 = vadd.f32 %v4750_v56, %v3633_v46  ;;  %v1586_v5 = vmax.f32 %v562_v55, 1e-06  ;;  %v2615_v7 = vmul.f32 %v1591_v62, %v1591_v62  ;;  %v2616_v8 = vmul.f32 %v1592_v63, %v1592_v63 }
 0x194   : > { %v4745_v6 = vadd.f32 %v4744_v61, %v3628_v57  ;;  %v1587_v9 = vmax.f32 %v563_v59, 1e-06  ;;  %v2617_v10 = vmul.f32 %v1593_v3, %v1593_v3  ;;  %v3638_v11 = vmul.f32 %v2614_v4, %v1590_v58  ;;  %v582_v57 = vld [vmem:[%s7536_s26 + $0xc60] sm:$0xff] }
 0x195   : > { %4752 = vadd.xlane.f32.xlu1 %v4751_v2  ;;  %v1588_v12 = vmax.f32 %v564_v0, 1e-06  ;;  %v1589_v13 = vmax.f32 %v565_v1, 1e-06  ;;  %v3639_v15 = vmul.f32 %v2615_v7, %v1591_v62  ;;  %v3640_v16 = vmul.f32 %v2616_v8, %v1592_v63  ;;  %v583_v62 = vld [vmem:[%s7536_s26 + $0xc68] sm:$0xff]  ;;  %v584_v63 = vld [vmem:[%s7536_s26 + $0xc70] sm:$0xff] }
 0x196   : > { %v4746_v14 = vadd.f32 %v4745_v6, %v3629_v60  ;;  %v2610_v17 = vmul.f32 %v1586_v5, %v1586_v5  ;;  %v2611_v18 = vmul.f32 %v1587_v9, %v1587_v9  ;;  %v3641_v24 = vmul.f32 %v2617_v10, %v1593_v3  ;;  %v585_v2 = vld [vmem:[%s7536_s26 + $0xc78] sm:$0xff]  ;;  %v578_v3 = vld [vmem:[%s7536_s26 + $0xc40] sm:$0xff]  ;;  %v579_v7 = vld [vmem:[%s7536_s26 + $0xc48] sm:$0xff] }
 0x197   : > { %v2612_v19 = vmul.f32 %v1588_v12, %v1588_v12  ;;  %v2613_v20 = vmul.f32 %v1589_v13, %v1589_v13  ;;  %v4759_v25 = vadd.f32 %v3639_v15, %v3638_v11  ;;  %v1598_v34 = vmax.f32 %v574_v21, 1e-06 }
 0x198   : > { %4747 = vadd.xlane.f32.xlu0 %v4746_v14  ;;  %v3634_v26 = vmul.f32 %v2610_v17, %v1586_v5  ;;  %v3635_v29 = vmul.f32 %v2611_v18, %v1587_v9  ;;  %v1599_v35 = vmax.f32 %v575_v22, 1e-06  ;;  %v1600_v36 = vmax.f32 %v576_v23, 1e-06 }
 0x199   : > { %v3636_v30 = vmul.f32 %v2612_v19, %v1588_v12  ;;  %v4760_v33 = vadd.f32 %v4759_v25, %v3640_v16  ;;  %v3637_v37 = vmul.f32 %v2613_v20, %v1589_v13  ;;  %v1601_v39 = vmax.f32 %v577_v27, 1e-06  ;;  %v580_v12 = vld [vmem:[%s7536_s26 + $0xc50] sm:$0xff]  ;;  %v581_v13 = vld [vmem:[%s7536_s26 + $0xc58] sm:$0xff] }
 0x19a   : > { %v4754_v38 = vadd.f32 %v3635_v29, %v3634_v26  ;;  %v1594_v41 = vmax.f32 %v570_v28, 1e-06  ;;  %v2622_v43 = vmul.f32 %v1598_v34, %v1598_v34  ;;  %v2623_v44 = vmul.f32 %v1599_v35, %v1599_v35 }
 0x19b   : > { %v4761_v42 = vadd.f32 %v4760_v33, %v3641_v24  ;;  %v2624_v45 = vmul.f32 %v1600_v36, %v1600_v36  ;;  %v2625_v47 = vmul.f32 %v1601_v39, %v1601_v39  ;;  %v1595_v48 = vmax.f32 %v571_v31, 1e-06  ;;  %v590_v33 = vld [vmem:[%s7536_s26 + $0xca0] sm:$0xff] }
 0x19c   : > { %v4755_v46 = vadd.f32 %v4754_v38, %v3636_v30  ;;  %v1596_v49 = vmax.f32 %v572_v32, 1e-06  ;;  %v3646_v50 = vmul.f32 %v2622_v43, %v1598_v34  ;;  %v3647_v51 = vmul.f32 %v2623_v44, %v1599_v35  ;;  %v591_v34 = vld [vmem:[%s7536_s26 + $0xca8] sm:$0xff]  ;;  %v592_v35 = vld [vmem:[%s7536_s26 + $0xcb0] sm:$0xff] }
 0x19d   : > { %4762 = vadd.xlane.f32.xlu1 %v4761_v42  ;;  %v3648_v52 = vmul.f32 %v2624_v45, %v1600_v36  ;;  %v1597_v53 = vmax.f32 %v573_v40, 1e-06  ;;  %v2618_v55 = vmul.f32 %v1594_v41, %v1594_v41  ;;  %v2619_v56 = vmul.f32 %v1595_v48, %v1595_v48  ;;  %v586_v40 = vld [vmem:[%s7536_s26 + $0xc80] sm:$0xff]  ;;  %v587_v43 = vld [vmem:[%s7536_s26 + $0xc88] sm:$0xff] }
 0x19e   : > { %v4756_v54 = vadd.f32 %v4755_v46, %v3637_v37  ;;  %v3649_v58 = vmul.f32 %v2625_v47, %v1601_v39  ;;  %v4769_v59 = vadd.f32 %v3647_v51, %v3646_v50  ;;  %v2620_v60 = vmul.f32 %v1596_v49, %v1596_v49  ;;  %v593_v39 = vld [vmem:[%s7536_s26 + $0xcb8] sm:$0xff]  ;;  %v588_v51 = vld [vmem:[%s7536_s26 + $0xc90] sm:$0xff] }
 0x19f   : > { %v2621_v61 = vmul.f32 %v1597_v53, %v1597_v53  ;;  %v3642_v0 = vmul.f32 %v2618_v55, %v1594_v41  ;;  %v3643_v1 = vmul.f32 %v2619_v56, %v1595_v48  ;;  %v1606_v6 = vmax.f32 %v582_v57, 1e-06 }
 0x1a0   : > { %4757 = vadd.xlane.f32.xlu0 %v4756_v54  ;;  %v4770_v4 = vadd.f32 %v4769_v59, %v3648_v52  ;;  %v3644_v5 = vmul.f32 %v2620_v60, %v1596_v49  ;;  %v1607_v10 = vmax.f32 %v583_v62, 1e-06  ;;  %v1608_v11 = vmax.f32 %v584_v63, 1e-06  ;;  %v589_v52 = vld [vmem:[%s7536_s26 + $0xc98] sm:$0xff] }
 0x1a1   : > { %v3645_v8 = vmul.f32 %v2621_v61, %v1597_v53  ;;  %v4764_v9 = vadd.f32 %v3643_v1, %v3642_v0  ;;  %v1609_v15 = vmax.f32 %v585_v2, 1e-06  ;;  %v2630_v16 = vmul.f32 %v1606_v6, %v1606_v6  ;;  %v7950_v61 = vpop.xlane.xlu1 %4297  ;;  %v598_v2 = vld [vmem:[%s7536_s26 + $0xce0] sm:$0xff] }
 0x1a2   : > { %v4771_v14 = vadd.f32 %v4770_v4, %v3649_v58  ;;  %v1602_v17 = vmax.f32 %v578_v3, 1e-06  ;;  %v2631_v19 = vmul.f32 %v1607_v10, %v1607_v10  ;;  %v2632_v20 = vmul.f32 %v1608_v11, %v1608_v11 }
 0x1a3   : > { %v4765_v18 = vadd.f32 %v4764_v9, %v3644_v5  ;;  %v1603_v21 = vmax.f32 %v579_v7, 1e-06  ;;  %v2633_v22 = vmul.f32 %v1609_v15, %v1609_v15  ;;  %v3654_v23 = vmul.f32 %v2630_v16, %v1606_v6 }
 0x1a4   : > { %4772 = vadd.xlane.f32.xlu1 %v4771_v14  ;;  %v1604_v24 = vmax.f32 %v580_v12, 1e-06  ;;  %v1605_v25 = vmax.f32 %v581_v13, 1e-06  ;;  %v3655_v27 = vmul.f32 %v2631_v19, %v1607_v10  ;;  %v3656_v28 = vmul.f32 %v2632_v20, %v1608_v11  ;;  %v599_v11 = vld [vmem:[%s7536_s26 + $0xce8] sm:$0xff]  ;;  %v600_v12 = vld [vmem:[%s7536_s26 + $0xcf0] sm:$0xff]  ;;  %v7956_v14 = vpop.xlane.xlu0 %4287 }
 0x1a5   : > { %v4766_v26 = vadd.f32 %v4765_v18, %v3645_v8  ;;  %v2626_v29 = vmul.f32 %v1602_v17, %v1602_v17  ;;  %v2627_v30 = vmul.f32 %v1603_v21, %v1603_v21  ;;  %v3657_v36 = vmul.f32 %v2633_v22, %v1609_v15  ;;  %v601_v13 = vld [vmem:[%s7536_s26 + $0xcf8] sm:$0xff]  ;;  %v596_v22 = vld [vmem:[%s7536_s26 + $0xcd0] sm:$0xff] }
 0x1a6   : > { %v2628_v31 = vmul.f32 %v1604_v24, %v1604_v24  ;;  %v2629_v32 = vmul.f32 %v1605_v25, %v1605_v25  ;;  %v4779_v37 = vadd.f32 %v3655_v27, %v3654_v23  ;;  %v1614_v45 = vmax.f32 %v590_v33, 1e-06  ;;  %v597_v23 = vld [vmem:[%s7536_s26 + $0xcd8] sm:$0xff] }
 0x1a7   : > { %4767 = vadd.xlane.f32.xlu0 %v4766_v26  ;;  %v3650_v38 = vmul.f32 %v2626_v29, %v1602_v17  ;;  %v3651_v41 = vmul.f32 %v2627_v30, %v1603_v21  ;;  %v1615_v46 = vmax.f32 %v591_v34, 1e-06  ;;  %v1616_v47 = vmax.f32 %v592_v35, 1e-06  ;;  %v594_v17 = vld [vmem:[%s7536_s26 + $0xcc0] sm:$0xff]  ;;  %v595_v21 = vld [vmem:[%s7536_s26 + $0xcc8] sm:$0xff] }
 0x1a8   : > { %v3652_v42 = vmul.f32 %v2628_v31, %v1604_v24  ;;  %v4780_v44 = vadd.f32 %v4779_v37, %v3656_v28  ;;  %v3653_v48 = vmul.f32 %v2629_v32, %v1605_v25  ;;  %v1617_v50 = vmax.f32 %v593_v39, 1e-06 }
 0x1a9   : > { %v4774_v49 = vadd.f32 %v3651_v41, %v3650_v38  ;;  %v1610_v53 = vmax.f32 %v586_v40, 1e-06  ;;  %v2638_v55 = vmul.f32 %v1614_v45, %v1614_v45  ;;  %v2639_v56 = vmul.f32 %v1615_v46, %v1615_v46 }
 0x1aa   : > { %v4781_v54 = vadd.f32 %v4780_v44, %v3657_v36  ;;  %v2640_v58 = vmul.f32 %v1616_v47, %v1616_v47  ;;  %v2641_v59 = vmul.f32 %v1617_v50, %v1617_v50  ;;  %v1611_v60 = vmax.f32 %v587_v43, 1e-06  ;;  %v7962_v36 = vpop.xlane.xlu1 %4302  ;;  %v606_v44 = vld [vmem:[%s7536_s26 + $0xd20] sm:$0xff] }
 0x1ab   : > { %v4775_v57 = vadd.f32 %v4774_v49, %v3652_v42  ;;  %v3662_v62 = vmul.f32 %v2638_v55, %v1614_v45  ;;  %v3663_v63 = vmul.f32 %v2639_v56, %v1615_v46  ;;  %v1612_v0 = vmax.f32 %v588_v51, 1e-06  ;;  %10014 = vst [vmem:[#allocation9_spill] sm:$0xff] %v7962_v36  ;;  %v607_v49 = vld [vmem:[%s7536_s26 + $0xd28] sm:$0xff]  ;;  %v602_v55 = vld [vmem:[%s7536_s26 + $0xd00] sm:$0xff]  ;;  %v7969_v56 = vpop.xlane.xlu0 %4292 }
 0x1ac   : > { %4782 = vadd.xlane.f32.xlu1 %v4781_v54  ;;  %v1613_v1 = vmax.f32 %v589_v52, 1e-06  ;;  %v3664_v4 = vmul.f32 %v2640_v58, %v1616_v47  ;;  %v3665_v5 = vmul.f32 %v2641_v59, %v1617_v50  ;;  %v2634_v6 = vmul.f32 %v1610_v53, %v1610_v53  ;;  %v608_v50 = vld [vmem:[%s7536_s26 + $0xd30] sm:$0xff]  ;;  %v609_v54 = vld [vmem:[%s7536_s26 + $0xd38] sm:$0xff] }
 0x1ad   : > { %v4776_v3 = vadd.f32 %v4775_v57, %v3653_v48  ;;  %v4789_v7 = vadd.f32 %v3663_v63, %v3662_v62  ;;  %v2635_v8 = vmul.f32 %v1611_v60, %v1611_v60  ;;  %v2636_v9 = vmul.f32 %v1612_v0, %v1612_v0 }
 0x1ae   : > { %v2637_v10 = vmul.f32 %v1613_v1, %v1613_v1  ;;  %v3658_v15 = vmul.f32 %v2634_v6, %v1610_v53  ;;  %v1622_v16 = vmax.f32 %v598_v2, 1e-06  ;;  %v1623_v25 = vmax.f32 %v599_v11, 1e-06  ;;  %v604_v2 = vld [vmem:[%s7536_s26 + $0xd10] sm:$0xff]  ;;  %v605_v6 = vld [vmem:[%s7536_s26 + $0xd18] sm:$0xff] }
 0x1af   : > { %4777 = vadd.xlane.f32.xlu0 %v4776_v3  ;;  %v4790_v18 = vadd.f32 %v4789_v7, %v3664_v4  ;;  %v3659_v19 = vmul.f32 %v2635_v8, %v1611_v60  ;;  %v3660_v20 = vmul.f32 %v2636_v9, %v1612_v0  ;;  %v1624_v26 = vmax.f32 %v600_v12, 1e-06  ;;  %v603_v60 = vld [vmem:[%s7536_s26 + $0xd08] sm:$0xff] }
 0x1b0   : > { %v3661_v24 = vmul.f32 %v2637_v10, %v1613_v1  ;;  %v1625_v27 = vmax.f32 %v601_v13, 1e-06  ;;  %v2646_v30 = vmul.f32 %v1622_v16, %v1622_v16  ;;  %v1618_v31 = vmax.f32 %v594_v17, 1e-06  ;;  %v7974_v17 = vpop.xlane.xlu1 %4312 }
 0x1b1   : > { %v4791_v28 = vadd.f32 %v4790_v18, %v3665_v5  ;;  %v4784_v29 = vadd.f32 %v3659_v19, %v3658_v15  ;;  %v2647_v32 = vmul.f32 %v1623_v25, %v1623_v25  ;;  %v2648_v33 = vmul.f32 %v1624_v26, %v1624_v26  ;;  %10015 = vst [vmem:[#allocation10_spill] sm:$0xff] %v7974_v17 }
 0x1b2   : > { %v2649_v34 = vmul.f32 %v1625_v27, %v1625_v27  ;;  %v1619_v35 = vmax.f32 %v595_v21, 1e-06  ;;  %v3670_v38 = vmul.f32 %v2646_v30, %v1622_v16  ;;  %v1620_v39 = vmax.f32 %v596_v22, 1e-06 }
 0x1b3   : > { %4792 = vadd.xlane.f32.xlu1 %v4791_v28  ;;  %v4785_v37 = vadd.f32 %v4784_v29, %v3660_v20  ;;  %v1621_v40 = vmax.f32 %v597_v23, 1e-06  ;;  %v3671_v41 = vmul.f32 %v2647_v32, %v1623_v25  ;;  %v3672_v42 = vmul.f32 %v2648_v33, %v1624_v26  ;;  %v614_v25 = vld [vmem:[%s7536_s26 + $0xd60] sm:$0xff]  ;;  %v615_v26 = vld [vmem:[%s7536_s26 + $0xd68] sm:$0xff]  ;;  %v617_v32 = vld [vmem:[%s7536_s26 + $0xd78] sm:$0xff]  ;;  %v7980_v33 = vpop.xlane.xlu0 %4307 }
 0x1b4   : > { %v2642_v43 = vmul.f32 %v1618_v31, %v1618_v31  ;;  %v2643_v46 = vmul.f32 %v1619_v35, %v1619_v35  ;;  %v2644_v47 = vmul.f32 %v1620_v39, %v1620_v39  ;;  %v3673_v51 = vmul.f32 %v2649_v34, %v1625_v27  ;;  %10016 = vst [vmem:[#allocation11_spill] sm:$0xff] %v7980_v33 }
 0x1b5   : > { %v4786_v45 = vadd.f32 %v4785_v37, %v3661_v24  ;;  %v2645_v48 = vmul.f32 %v1621_v40, %v1621_v40  ;;  %v4799_v52 = vadd.f32 %v3671_v41, %v3670_v38  ;;  %v1630_v59 = vmax.f32 %v606_v44, 1e-06  ;;  %v610_v37 = vld [vmem:[%s7536_s26 + $0xd40] sm:$0xff]  ;;  %v611_v41 = vld [vmem:[%s7536_s26 + $0xd48] sm:$0xff] }
 0x1b6   : > { %v3666_v53 = vmul.f32 %v2642_v43, %v1618_v31  ;;  %v3667_v57 = vmul.f32 %v2643_v46, %v1619_v35  ;;  %v3668_v58 = vmul.f32 %v2644_v47, %v1620_v39  ;;  %v1631_v0 = vmax.f32 %v607_v49, 1e-06  ;;  %v616_v31 = vld [vmem:[%s7536_s26 + $0xd70] sm:$0xff]  ;;  %v613_v47 = vld [vmem:[%s7536_s26 + $0xd58] sm:$0xff] }
 0x1b7   : > { %4787 = vadd.xlane.f32.xlu0 %v4786_v45  ;;  %v4800_v62 = vadd.f32 %v4799_v52, %v3672_v42  ;;  %v3669_v63 = vmul.f32 %v2645_v48, %v1621_v40  ;;  %v1632_v1 = vmax.f32 %v608_v50, 1e-06  ;;  %v1633_v4 = vmax.f32 %v609_v54, 1e-06  ;;  %v612_v46 = vld [vmem:[%s7536_s26 + $0xd50] sm:$0xff] }
 0x1b8   : > { %v4794_v3 = vadd.f32 %v3667_v57, %v3666_v53  ;;  %v2654_v5 = vmul.f32 %v1630_v59, %v1630_v59  ;;  %v1626_v7 = vmax.f32 %v602_v55, 1e-06  ;;  %v2655_v9 = vmul.f32 %v1631_v0, %v1631_v0  ;;  %v7986_v57 = vpop.xlane.xlu1 %4322 }
 0x1b9   : > { %v4801_v8 = vadd.f32 %v4800_v62, %v3673_v51  ;;  %v2656_v10 = vmul.f32 %v1632_v1, %v1632_v1  ;;  %v1627_v11 = vmax.f32 %v603_v60, 1e-06  ;;  %v2657_v13 = vmul.f32 %v1633_v4, %v1633_v4  ;;  %10017 = vst [vmem:[#allocation12_spill] sm:$0xff] %v7986_v57 }
 0x1ba   : > { %v4795_v12 = vadd.f32 %v4794_v3, %v3668_v58  ;;  %v3678_v15 = vmul.f32 %v2654_v5, %v1630_v59  ;;  %v1628_v16 = vmax.f32 %v604_v2, 1e-06  ;;  %v3679_v18 = vmul.f32 %v2655_v9, %v1631_v0  ;;  %v624_v9 = vld [vmem:[%s7536_s26 + $0xdb0] sm:$0xff] }
 0x1bb   : > { %4802 = vadd.xlane.f32.xlu1 %v4801_v8  ;;  %v3680_v19 = vmul.f32 %v2656_v10, %v1632_v1  ;;  %v1629_v20 = vmax.f32 %v605_v6, 1e-06  ;;  %v2650_v21 = vmul.f32 %v1626_v7, %v1626_v7  ;;  %v2651_v23 = vmul.f32 %v1627_v11, %v1627_v11  ;;  %v623_v8 = vld [vmem:[%s7536_s26 + $0xda8] sm:$0xff]  ;;  %v7991_v10 = vpop.xlane.xlu0 %4317 }
 0x1bc   : > { %v4796_v22 = vadd.f32 %v4795_v12, %v3669_v63  ;;  %v2652_v24 = vmul.f32 %v1628_v16, %v1628_v16  ;;  %v3681_v27 = vmul.f32 %v2657_v13, %v1633_v4  ;;  %v4809_v28 = vadd.f32 %v3679_v18, %v3678_v15  ;;  %10018 = vst [vmem:[#allocation13_spill] sm:$0xff] %v7991_v10  ;;  %v625_v12 = vld [vmem:[%s7536_s26 + $0xdb8] sm:$0xff]  ;;  %v618_v13 = vld [vmem:[%s7536_s26 + $0xd80] sm:$0xff] }
 0x1bd   : > { %v2653_v29 = vmul.f32 %v1629_v20, %v1629_v20  ;;  %v3674_v30 = vmul.f32 %v2650_v21, %v1626_v7  ;;  %v3675_v34 = vmul.f32 %v2651_v23, %v1627_v11  ;;  %v1638_v39 = vmax.f32 %v614_v25, 1e-06  ;;  %v622_v7 = vld [vmem:[%s7536_s26 + $0xda0] sm:$0xff]  ;;  %v621_v21 = vld [vmem:[%s7536_s26 + $0xd98] sm:$0xff] }
 0x1be   : > { %4797 = vadd.xlane.f32.xlu0 %v4796_v22  ;;  %v3676_v35 = vmul.f32 %v2652_v24, %v1628_v16  ;;  %v4810_v38 = vadd.f32 %v4809_v28, %v3680_v19  ;;  %v1639_v40 = vmax.f32 %v615_v26, 1e-06  ;;  %v1640_v44 = vmax.f32 %v616_v31, 1e-06  ;;  %v619_v19 = vld [vmem:[%s7536_s26 + $0xd88] sm:$0xff]  ;;  %v1145_v10 = vld [vmem:[%s7536_s26 + $0x1df8] sm:$0xff] }
 0x1bf   : > { %v3677_v42 = vmul.f32 %v2653_v29, %v1629_v20  ;;  %v4804_v43 = vadd.f32 %v3675_v34, %v3674_v30  ;;  %v1641_v45 = vmax.f32 %v617_v32, 1e-06  ;;  %v2662_v49 = vmul.f32 %v1638_v39, %v1638_v39  ;;  %v620_v20 = vld [vmem:[%s7536_s26 + $0xd90] sm:$0xff] }
 0x1c0   : > { %v4811_v48 = vadd.f32 %v4810_v38, %v3681_v27  ;;  %v2663_v50 = vmul.f32 %v1639_v40, %v1639_v40  ;;  %v1634_v51 = vmax.f32 %v610_v37, 1e-06  ;;  %v2664_v53 = vmul.f32 %v1640_v44, %v1640_v44 }
 0x1c1   : > { %v4805_v52 = vadd.f32 %v4804_v43, %v3676_v35  ;;  %v2665_v54 = vmul.f32 %v1641_v45, %v1641_v45  ;;  %v1635_v55 = vmax.f32 %v611_v41, 1e-06  ;;  %v3686_v58 = vmul.f32 %v2662_v49, %v1638_v39  ;;  %v7998_v35 = vpop.xlane.xlu1 %4332  ;;  %v631_v49 = vld [vmem:[%s7536_s26 + $0xde8] sm:$0xff] }
 0x1c2   : > { %4812 = vadd.xlane.f32.xlu1 %v4811_v48  ;;  %v3687_v59 = vmul.f32 %v2663_v50, %v1639_v40  ;;  %v1636_v60 = vmax.f32 %v612_v46, 1e-06  ;;  %v1637_v62 = vmax.f32 %v613_v47, 1e-06  ;;  %v3688_v0 = vmul.f32 %v2664_v53, %v1640_v44  ;;  %10019 = vst [vmem:[#allocation14_spill] sm:$0xff] %v7998_v35  ;;  %v630_v48 = vld [vmem:[%s7536_s26 + $0xde0] sm:$0xff] }
 0x1c3   : > { %v4806_v63 = vadd.f32 %v4805_v52, %v3677_v42  ;;  %v3689_v1 = vmul.f32 %v2665_v54, %v1641_v45  ;;  %v2658_v2 = vmul.f32 %v1634_v51, %v1634_v51  ;;  %v2659_v4 = vmul.f32 %v1635_v55, %v1635_v55  ;;  %v632_v54 = vld [vmem:[%s7536_s26 + $0xdf0] sm:$0xff]  ;;  %v1201_v35 = vld [vmem:[%s7536_s26 + $0x1fb8] sm:$0xff] }
 0x1c4   : > { %v4819_v3 = vadd.f32 %v3687_v59, %v3686_v58  ;;  %v2660_v5 = vmul.f32 %v1636_v60, %v1636_v60  ;;  %v2661_v6 = vmul.f32 %v1637_v62, %v1637_v62  ;;  %v1646_v23 = vmax.f32 %v622_v7, 1e-06  ;;  %v8004_v58 = vpop.xlane.xlu0 %4327  ;;  %v628_v7 = vld [vmem:[%s7536_s26 + $0xdd0] sm:$0xff] }
 0x1c5   : > { %4807 = vadd.xlane.f32.xlu0 %v4806_v63  ;;  %v3682_v11 = vmul.f32 %v2658_v2, %v1634_v51  ;;  %v3683_v16 = vmul.f32 %v2659_v4, %v1635_v55  ;;  %v1647_v24 = vmax.f32 %v623_v8, 1e-06  ;;  %v1648_v25 = vmax.f32 %v624_v9, 1e-06  ;;  %v633_v55 = vld [vmem:[%s7536_s26 + $0xdf8] sm:$0xff]  ;;  %10020 = vst [vmem:[#allocation15_spill] sm:$0xff] %v8004_v58 }
 0x1c6   : > { %v4820_v15 = vadd.f32 %v4819_v3, %v3688_v0  ;;  %v3684_v18 = vmul.f32 %v2660_v5, %v1636_v60  ;;  %v3685_v22 = vmul.f32 %v2661_v6, %v1637_v62  ;;  %v1649_v28 = vmax.f32 %v625_v12, 1e-06  ;;  %v626_v62 = vld [vmem:[%s7536_s26 + $0xdc0] sm:$0xff]  ;;  %v627_v2 = vld [vmem:[%s7536_s26 + $0xdc8] sm:$0xff]  ;;  %v629_v8 = vld [vmem:[%s7536_s26 + $0xdd8] sm:$0xff] }
 0x1c7   : > { %v4814_v27 = vadd.f32 %v3683_v16, %v3682_v11  ;;  %v1642_v29 = vmax.f32 %v618_v13, 1e-06  ;;  %v2670_v30 = vmul.f32 %v1646_v23, %v1646_v23  ;;  %v2671_v31 = vmul.f32 %v1647_v24, %v1647_v24 }
 0x1c8   : > { %v4821_v26 = vadd.f32 %v4820_v15, %v3689_v1  ;;  %v2672_v32 = vmul.f32 %v1648_v25, %v1648_v25  ;;  %v1643_v34 = vmax.f32 %v619_v19, 1e-06  ;;  %v2673_v38 = vmul.f32 %v1649_v28, %v1649_v28 }
 0x1c9   : > { %v4815_v37 = vadd.f32 %v4814_v27, %v3684_v18  ;;  %v1644_v39 = vmax.f32 %v620_v20, 1e-06  ;;  %v1645_v40 = vmax.f32 %v621_v21, 1e-06  ;;  %v3694_v41 = vmul.f32 %v2670_v30, %v1646_v23  ;;  %v8010_v20 = vpop.xlane.xlu1 %4342 }
 0x1ca   : > { %4822 = vadd.xlane.f32.xlu1 %v4821_v26  ;;  %v3695_v42 = vmul.f32 %v2671_v31, %v1647_v24  ;;  %v3696_v43 = vmul.f32 %v2672_v32, %v1648_v25  ;;  %v2666_v44 = vmul.f32 %v1642_v29, %v1642_v29  ;;  %v2667_v46 = vmul.f32 %v1643_v34, %v1643_v34 }
 0x1cb   : > { %v4816_v45 = vadd.f32 %v4815_v37, %v3685_v22  ;;  %v2668_v47 = vmul.f32 %v1644_v39, %v1644_v39  ;;  %v3697_v50 = vmul.f32 %v2673_v38, %v1649_v28  ;;  %v2669_v52 = vmul.f32 %v1645_v40, %v1645_v40  ;;  %10021 = vst [vmem:[#allocation16_spill] sm:$0xff] %v8010_v20  ;;  %v639_v37 = vld [vmem:[%s7536_s26 + $0xe28] sm:$0xff]  ;;  %v640_v38 = vld [vmem:[%s7536_s26 + $0xe30] sm:$0xff] }
 0x1cc   : > { %v4829_v51 = vadd.f32 %v3695_v42, %v3694_v41  ;;  %v3690_v53 = vmul.f32 %v2666_v44, %v1642_v29  ;;  %v3691_v59 = vmul.f32 %v2667_v46, %v1643_v34  ;;  %v1654_v0 = vmax.f32 %v630_v48, 1e-06  ;;  %v638_v34 = vld [vmem:[%s7536_s26 + $0xe20] sm:$0xff]  ;;  %v641_v41 = vld [vmem:[%s7536_s26 + $0xe38] sm:$0xff]  ;;  %v635_v46 = vld [vmem:[%s7536_s26 + $0xe08] sm:$0xff] }
 0x1cd   : > { %4817 = vadd.xlane.f32.xlu0 %v4816_v45  ;;  %v3692_v60 = vmul.f32 %v2668_v47, %v1644_v39  ;;  %v1655_v1 = vmax.f32 %v631_v49, 1e-06  ;;  %v3693_v3 = vmul.f32 %v2669_v52, %v1645_v40  ;;  %v1656_v5 = vmax.f32 %v632_v54, 1e-06  ;;  %v8015_v39 = vpop.xlane.xlu0 %4337  ;;  %v634_v42 = vld [vmem:[%s7536_s26 + $0xe00] sm:$0xff]  ;;  %v636_v47 = vld [vmem:[%s7536_s26 + $0xe10] sm:$0xff] }
 0x1ce   : > { %v4830_v63 = vadd.f32 %v4829_v51, %v3696_v43  ;;  %v4824_v4 = vadd.f32 %v3691_v59, %v3690_v53  ;;  %v1657_v6 = vmax.f32 %v633_v55, 1e-06  ;;  %v2678_v11 = vmul.f32 %v1654_v0, %v1654_v0  ;;  %10022 = vst [vmem:[#allocation17_spill] sm:$0xff] %v8015_v39  ;;  %v637_v48 = vld [vmem:[%s7536_s26 + $0xe18] sm:$0xff] }
 0x1cf   : > { %v2679_v12 = vmul.f32 %v1655_v1, %v1655_v1  ;;  %v1650_v13 = vmax.f32 %v626_v62, 1e-06  ;;  %v2680_v16 = vmul.f32 %v1656_v5, %v1656_v5  ;;  %v1651_v19 = vmax.f32 %v627_v2, 1e-06 }
 0x1d0   : > { %v4831_v9 = vadd.f32 %v4830_v63, %v3697_v50  ;;  %v4825_v15 = vadd.f32 %v4824_v4, %v3692_v60  ;;  %v2681_v18 = vmul.f32 %v1657_v6, %v1657_v6  ;;  %v3702_v21 = vmul.f32 %v2678_v11, %v1654_v0 }
 0x1d1   : > { %v3703_v22 = vmul.f32 %v2679_v12, %v1655_v1  ;;  %v1652_v23 = vmax.f32 %v628_v7, 1e-06  ;;  %v1653_v24 = vmax.f32 %v629_v8, 1e-06  ;;  %v3704_v26 = vmul.f32 %v2680_v16, %v1656_v5  ;;  %v8022_v1 = vpop.xlane.xlu1 %4352  ;;  %v647_v16 = vld [vmem:[%s7536_s26 + $0xe68] sm:$0xff] }
 0x1d2   : > { %4832 = vadd.xlane.f32.xlu1 %v4831_v9  ;;  %v4826_v25 = vadd.f32 %v4825_v15, %v3693_v3  ;;  %v3705_v27 = vmul.f32 %v2681_v18, %v1657_v6  ;;  %v2674_v28 = vmul.f32 %v1650_v13, %v1650_v13  ;;  %v2675_v30 = vmul.f32 %v1651_v19, %v1651_v19  ;;  %v646_v15 = vld [vmem:[%s7536_s26 + $0xe60] sm:$0xff] }
 0x1d3   : > { %v4839_v29 = vadd.f32 %v3703_v22, %v3702_v21  ;;  %v2676_v31 = vmul.f32 %v1652_v23, %v1652_v23  ;;  %v2677_v32 = vmul.f32 %v1653_v24, %v1653_v24  ;;  %v1662_v50 = vmax.f32 %v638_v34, 1e-06  ;;  %10023 = vst [vmem:[#allocation18_spill] sm:$0xff] %v8022_v1 }
 0x1d4   : > { %4827 = vadd.xlane.f32.xlu0 %v4826_v25  ;;  %v3698_v40 = vmul.f32 %v2674_v28, %v1650_v13  ;;  %v3699_v44 = vmul.f32 %v2675_v30, %v1651_v19  ;;  %v1663_v51 = vmax.f32 %v639_v37, 1e-06  ;;  %v1664_v52 = vmax.f32 %v640_v38, 1e-06  ;;  %v8028_v25 = vpop.xlane.xlu0 %4347  ;;  %v642_v28 = vld [vmem:[%s7536_s26 + $0xe40] sm:$0xff] }
 0x1d5   : > { %v4840_v43 = vadd.f32 %v4839_v29, %v3704_v26  ;;  %v3700_v45 = vmul.f32 %v2676_v31, %v1652_v23  ;;  %v3701_v49 = vmul.f32 %v2677_v32, %v1653_v24  ;;  %v1665_v55 = vmax.f32 %v641_v41, 1e-06  ;;  %v648_v23 = vld [vmem:[%s7536_s26 + $0xe70] sm:$0xff]  ;;  %v649_v24 = vld [vmem:[%s7536_s26 + $0xe78] sm:$0xff]  ;;  %10024 = vst [vmem:[#allocation19_spill] sm:$0xff] %v8028_v25  ;;  %v643_v32 = vld [vmem:[%s7536_s26 + $0xe48] sm:$0xff] }
 0x1d6   : > { %v4834_v54 = vadd.f32 %v3699_v44, %v3698_v40  ;;  %v1658_v59 = vmax.f32 %v634_v42, 1e-06  ;;  %v2686_v60 = vmul.f32 %v1662_v50, %v1662_v50  ;;  %v2687_v62 = vmul.f32 %v1663_v51, %v1663_v51  ;;  %v644_v41 = vld [vmem:[%s7536_s26 + $0xe50] sm:$0xff]  ;;  %v645_v42 = vld [vmem:[%s7536_s26 + $0xe58] sm:$0xff] }
 0x1d7   : > { %v4841_v53 = vadd.f32 %v4840_v43, %v3705_v27  ;;  %v2688_v63 = vmul.f32 %v1664_v52, %v1664_v52  ;;  %v1659_v0 = vmax.f32 %v635_v46, 1e-06  ;;  %v2689_v3 = vmul.f32 %v1665_v55, %v1665_v55 }
 0x1d8   : > { %v4835_v2 = vadd.f32 %v4834_v54, %v3700_v45  ;;  %v1660_v4 = vmax.f32 %v636_v47, 1e-06  ;;  %v1661_v5 = vmax.f32 %v637_v48, 1e-06  ;;  %v3710_v6 = vmul.f32 %v2686_v60, %v1662_v50 }
 0x1d9   : > { %4842 = vadd.xlane.f32.xlu1 %v4841_v53  ;;  %v3711_v7 = vmul.f32 %v2687_v62, %v1663_v51  ;;  %v3712_v8 = vmul.f32 %v2688_v63, %v1664_v52  ;;  %v2682_v9 = vmul.f32 %v1658_v59, %v1658_v59  ;;  %v2683_v12 = vmul.f32 %v1659_v0, %v1659_v0  ;;  %v8034_v51 = vpop.xlane.xlu1 %4362 }
 0x1da   : > { %v4836_v11 = vadd.f32 %v4835_v2, %v3701_v49  ;;  %v2684_v13 = vmul.f32 %v1660_v4, %v1660_v4  ;;  %v3713_v18 = vmul.f32 %v2689_v3, %v1665_v55  ;;  %v2685_v21 = vmul.f32 %v1661_v5, %v1661_v5  ;;  %10025 = vst [vmem:[#allocation20_spill] sm:$0xff] %v8034_v51 }
 0x1db   : > { %v4849_v19 = vadd.f32 %v3711_v7, %v3710_v6  ;;  %v3706_v22 = vmul.f32 %v2682_v9, %v1658_v59  ;;  %v3707_v26 = vmul.f32 %v2683_v12, %v1659_v0  ;;  %v1670_v30 = vmax.f32 %v646_v15, 1e-06  ;;  %v655_v6 = vld [vmem:[%s7536_s26 + $0xea8] sm:$0xff]  ;;  %v656_v7 = vld [vmem:[%s7536_s26 + $0xeb0] sm:$0xff] }
 0x1dc   : > { %4837 = vadd.xlane.f32.xlu0 %v4836_v11  ;;  %v3708_v27 = vmul.f32 %v2684_v13, %v1660_v4  ;;  %v1671_v31 = vmax.f32 %v647_v16, 1e-06  ;;  %v3709_v34 = vmul.f32 %v2685_v21, %v1661_v5  ;;  %v1672_v38 = vmax.f32 %v648_v23, 1e-06  ;;  %v654_v5 = vld [vmem:[%s7536_s26 + $0xea0] sm:$0xff]  ;;  %v657_v11 = vld [vmem:[%s7536_s26 + $0xeb8] sm:$0xff] }
 0x1dd   : > { %v4850_v29 = vadd.f32 %v4849_v19, %v3712_v8  ;;  %v4844_v37 = vadd.f32 %v3707_v26, %v3706_v22  ;;  %v1673_v40 = vmax.f32 %v649_v24, 1e-06  ;;  %v2694_v44 = vmul.f32 %v1670_v30, %v1670_v30  ;;  %v8039_v8 = vpop.xlane.xlu0 %4357  ;;  %v650_v16 = vld [vmem:[%s7536_s26 + $0xe80] sm:$0xff] }
 0x1de   : > { %v2695_v45 = vmul.f32 %v1671_v31, %v1671_v31  ;;  %v1666_v46 = vmax.f32 %v642_v28, 1e-06  ;;  %v2696_v48 = vmul.f32 %v1672_v38, %v1672_v38  ;;  %v1667_v50 = vmax.f32 %v643_v32, 1e-06  ;;  %10026 = vst [vmem:[#allocation21_spill] sm:$0xff] %v8039_v8  ;;  %v653_v32 = vld [vmem:[%s7536_s26 + $0xe98] sm:$0xff] }
 0x1df   : > { %v4851_v43 = vadd.f32 %v4850_v29, %v3713_v18  ;;  %v4845_v47 = vadd.f32 %v4844_v37, %v3708_v27  ;;  %v2697_v49 = vmul.f32 %v1673_v40, %v1673_v40  ;;  %v3718_v52 = vmul.f32 %v2694_v44, %v1670_v30  ;;  %v651_v18 = vld [vmem:[%s7536_s26 + $0xe88] sm:$0xff]  ;;  %v8046_v37 = vpop.xlane.xlu1 %4372 }
 0x1e0   : > { %v3719_v53 = vmul.f32 %v2695_v45, %v1671_v31  ;;  %v1668_v54 = vmax.f32 %v644_v41, 1e-06  ;;  %v1669_v55 = vmax.f32 %v645_v42, 1e-06  ;;  %v3720_v60 = vmul.f32 %v2696_v48, %v1672_v38  ;;  %v652_v31 = vld [vmem:[%s7536_s26 + $0xe90] sm:$0xff]  ;;  %10027 = vst [vmem:[#allocation22_spill] sm:$0xff] %v8046_v37 }
 0x1e1   : > { %4852 = vadd.xlane.f32.xlu1 %v4851_v43  ;;  %v4846_v59 = vadd.f32 %v4845_v47, %v3709_v34  ;;  %v3721_v62 = vmul.f32 %v2697_v49, %v1673_v40  ;;  %v2690_v63 = vmul.f32 %v1666_v46, %v1666_v46  ;;  %v2691_v2 = vmul.f32 %v1667_v50, %v1667_v50  ;;  %v662_v45 = vld [vmem:[%s7536_s26 + $0xee0] sm:$0xff]  ;;  %v663_v49 = vld [vmem:[%s7536_s26 + $0xee8] sm:$0xff]  ;;  %v1144_v37 = vld [vmem:[%s7536_s26 + $0x1df0] sm:$0xff] }
 0x1e2   : > { %v4859_v0 = vadd.f32 %v3719_v53, %v3718_v52  ;;  %v2692_v3 = vmul.f32 %v1668_v54, %v1668_v54  ;;  %v2693_v4 = vmul.f32 %v1669_v55, %v1669_v55  ;;  %v1678_v19 = vmax.f32 %v654_v5, 1e-06 }
 0x1e3   : > { %4847 = vadd.xlane.f32.xlu0 %v4846_v59  ;;  %v3714_v9 = vmul.f32 %v2690_v63, %v1666_v46  ;;  %v3715_v13 = vmul.f32 %v2691_v2, %v1667_v50  ;;  %v1679_v21 = vmax.f32 %v655_v6, 1e-06  ;;  %v1680_v22 = vmax.f32 %v656_v7, 1e-06  ;;  %v8051_v59 = vpop.xlane.xlu0 %4367  ;;  %v665_v63 = vld [vmem:[%s7536_s26 + $0xef8] sm:$0xff]  ;;  %v658_v6 = vld [vmem:[%s7536_s26 + $0xec0] sm:$0xff] }
 0x1e4   : > { %v4860_v12 = vadd.f32 %v4859_v0, %v3720_v60  ;;  %v3716_v15 = vmul.f32 %v2692_v3, %v1668_v54  ;;  %v3717_v24 = vmul.f32 %v2693_v4, %v1669_v55  ;;  %v1681_v27 = vmax.f32 %v657_v11, 1e-06  ;;  %v664_v55 = vld [vmem:[%s7536_s26 + $0xef0] sm:$0xff]  ;;  %10028 = vst [vmem:[#allocation23_spill] sm:$0xff] %v8051_v59  ;;  %v659_v7 = vld [vmem:[%s7536_s26 + $0xec8] sm:$0xff] }
 0x1e5   : > { %v4854_v26 = vadd.f32 %v3715_v13, %v3714_v9  ;;  %v2702_v28 = vmul.f32 %v1678_v19, %v1678_v19  ;;  %v2703_v29 = vmul.f32 %v1679_v21, %v1679_v21  ;;  %v2704_v30 = vmul.f32 %v1680_v22, %v1680_v22  ;;  %v660_v13 = vld [vmem:[%s7536_s26 + $0xed0] sm:$0xff] }
 0x1e6   : > { %v4861_v23 = vadd.f32 %v4860_v12, %v3721_v62  ;;  %v1674_v34 = vmax.f32 %v650_v16, 1e-06  ;;  %v2705_v40 = vmul.f32 %v1681_v27, %v1681_v27  ;;  %v1675_v41 = vmax.f32 %v651_v18, 1e-06 }
 0x1e7   : > { %v4855_v38 = vadd.f32 %v4854_v26, %v3716_v15  ;;  %v3726_v42 = vmul.f32 %v2702_v28, %v1678_v19  ;;  %v3727_v43 = vmul.f32 %v2703_v29, %v1679_v21  ;;  %v3728_v44 = vmul.f32 %v2704_v30, %v1680_v22  ;;  %v661_v21 = vld [vmem:[%s7536_s26 + $0xed8] sm:$0xff] }
 0x1e8   : > { %4862 = vadd.xlane.f32.xlu1 %v4861_v23  ;;  %v1676_v47 = vmax.f32 %v652_v31, 1e-06  ;;  %v1677_v48 = vmax.f32 %v653_v32, 1e-06  ;;  %v3729_v50 = vmul.f32 %v2705_v40, %v1681_v27  ;;  %v2698_v53 = vmul.f32 %v1674_v34, %v1674_v34  ;;  %v8058_v27 = vpop.xlane.xlu1 %4382 }
 0x1e9   : > { %v4856_v46 = vadd.f32 %v4855_v38, %v3717_v24  ;;  %v4869_v52 = vadd.f32 %v3727_v43, %v3726_v42  ;;  %v2699_v54 = vmul.f32 %v1675_v41, %v1675_v41  ;;  %v1686_v0 = vmax.f32 %v662_v45, 1e-06  ;;  %10029 = vst [vmem:[#allocation24_spill] sm:$0xff] %v8058_v27  ;;  %v671_v45 = vld [vmem:[%s7536_s26 + $0xf28] sm:$0xff] }
 0x1ea   : > { %v2700_v60 = vmul.f32 %v1676_v47, %v1676_v47  ;;  %v2701_v62 = vmul.f32 %v1677_v48, %v1677_v48  ;;  %v3722_v3 = vmul.f32 %v2698_v53, %v1674_v34  ;;  %v1687_v5 = vmax.f32 %v663_v49, 1e-06  ;;  %v8064_v53 = vpop.xlane.xlu0 %4377 }
 0x1eb   : > { %4857 = vadd.xlane.f32.xlu0 %v4856_v46  ;;  %v4870_v2 = vadd.f32 %v4869_v52, %v3728_v44  ;;  %v3723_v4 = vmul.f32 %v2699_v54, %v1675_v41  ;;  %v1688_v12 = vmax.f32 %v664_v55, 1e-06  ;;  %v1689_v18 = vmax.f32 %v665_v63, 1e-06  ;;  %v670_v41 = vld [vmem:[%s7536_s26 + $0xf20] sm:$0xff]  ;;  %v672_v46 = vld [vmem:[%s7536_s26 + $0xf30] sm:$0xff] }
 0x1ec   : > { %v3724_v9 = vmul.f32 %v2700_v60, %v1676_v47  ;;  %v3725_v11 = vmul.f32 %v2701_v62, %v1677_v48  ;;  %v2710_v19 = vmul.f32 %v1686_v0, %v1686_v0  ;;  %v2711_v22 = vmul.f32 %v1687_v5, %v1687_v5  ;;  %v673_v52 = vld [vmem:[%s7536_s26 + $0xf38] sm:$0xff]  ;;  %10030 = vst [vmem:[#allocation25_spill] sm:$0xff] %v8064_v53  ;;  %v666_v62 = vld [vmem:[%s7536_s26 + $0xf00] sm:$0xff] }
 0x1ed   : > { %v4871_v15 = vadd.f32 %v4870_v2, %v3729_v50  ;;  %v4864_v16 = vadd.f32 %v3723_v4, %v3722_v3  ;;  %v2712_v23 = vmul.f32 %v1688_v12, %v1688_v12  ;;  %v1682_v24 = vmax.f32 %v658_v6, 1e-06  ;;  %v667_v3 = vld [vmem:[%s7536_s26 + $0xf08] sm:$0xff] }
 0x1ee   : > { %v1683_v26 = vmax.f32 %v659_v7, 1e-06  ;;  %v2713_v29 = vmul.f32 %v1689_v18, %v1689_v18  ;;  %v3734_v30 = vmul.f32 %v2710_v19, %v1686_v0  ;;  %v1684_v31 = vmax.f32 %v660_v13, 1e-06 }
 0x1ef   : > { %4872 = vadd.xlane.f32.xlu1 %v4871_v15  ;;  %v4865_v28 = vadd.f32 %v4864_v16, %v3724_v9  ;;  %v3735_v32 = vmul.f32 %v2711_v22, %v1687_v5  ;;  %v3736_v34 = vmul.f32 %v2712_v23, %v1688_v12  ;;  %v1685_v38 = vmax.f32 %v661_v21, 1e-06  ;;  %v668_v9 = vld [vmem:[%s7536_s26 + $0xf10] sm:$0xff]  ;;  %v8070_v23 = vpop.xlane.xlu1 %4392 }
 0x1f0   : > { %v2706_v40 = vmul.f32 %v1682_v24, %v1682_v24  ;;  %v2707_v43 = vmul.f32 %v1683_v26, %v1683_v26  ;;  %v2708_v44 = vmul.f32 %v1684_v31, %v1684_v31  ;;  %v3737_v47 = vmul.f32 %v2713_v29, %v1689_v18  ;;  %10031 = vst [vmem:[#allocation26_spill] sm:$0xff] %v8070_v23 }
 0x1f1   : > { %v4866_v42 = vadd.f32 %v4865_v28, %v3725_v11  ;;  %v4879_v48 = vadd.f32 %v3735_v32, %v3734_v30  ;;  %v2709_v49 = vmul.f32 %v1685_v38, %v1685_v38  ;;  %v1694_v60 = vmax.f32 %v670_v41, 1e-06  ;;  %v669_v11 = vld [vmem:[%s7536_s26 + $0xf18] sm:$0xff] }
 0x1f2   : > { %v3730_v50 = vmul.f32 %v2706_v40, %v1682_v24  ;;  %v3731_v54 = vmul.f32 %v2707_v43, %v1683_v26  ;;  %v3732_v55 = vmul.f32 %v2708_v44, %v1684_v31  ;;  %v1695_v0 = vmax.f32 %v671_v45, 1e-06  ;;  %v679_v43 = vld [vmem:[%s7536_s26 + $0xf68] sm:$0xff]  ;;  %v680_v44 = vld [vmem:[%s7536_s26 + $0xf70] sm:$0xff]  ;;  %v8075_v45 = vpop.xlane.xlu0 %4387 }
 0x1f3   : > { %4867 = vadd.xlane.f32.xlu0 %v4866_v42  ;;  %v4880_v63 = vadd.f32 %v4879_v48, %v3736_v34  ;;  %v1696_v2 = vmax.f32 %v672_v46, 1e-06  ;;  %v3733_v4 = vmul.f32 %v2709_v49, %v1685_v38  ;;  %v1697_v6 = vmax.f32 %v673_v52, 1e-06  ;;  %v678_v34 = vld [vmem:[%s7536_s26 + $0xf60] sm:$0xff]  ;;  %10032 = vst [vmem:[#allocation27_spill] sm:$0xff] %v8075_v45 }
 0x1f4   : > { %v4874_v5 = vadd.f32 %v3731_v54, %v3730_v50  ;;  %v2718_v7 = vmul.f32 %v1694_v60, %v1694_v60  ;;  %v2719_v13 = vmul.f32 %v1695_v0, %v1695_v0  ;;  %v1690_v16 = vmax.f32 %v666_v62, 1e-06  ;;  %v681_v48 = vld [vmem:[%s7536_s26 + $0xf78] sm:$0xff]  ;;  %v674_v49 = vld [vmem:[%s7536_s26 + $0xf40] sm:$0xff]  ;;  %v1200_v45 = vld [vmem:[%s7536_s26 + $0x1fb0] sm:$0xff] }
 0x1f5   : > { %v4881_v12 = vadd.f32 %v4880_v63, %v3737_v47  ;;  %v2720_v15 = vmul.f32 %v1696_v2, %v1696_v2  ;;  %v2721_v19 = vmul.f32 %v1697_v6, %v1697_v6  ;;  %v1691_v22 = vmax.f32 %v667_v3, 1e-06  ;;  %v677_v3 = vld [vmem:[%s7536_s26 + $0xf58] sm:$0xff] }
 0x1f6   : > { %v4875_v18 = vadd.f32 %v4874_v5, %v3732_v55  ;;  %v3742_v21 = vmul.f32 %v2718_v7, %v1694_v60  ;;  %v3743_v24 = vmul.f32 %v2719_v13, %v1695_v0  ;;  %v1692_v28 = vmax.f32 %v668_v9, 1e-06  ;;  %v675_v55 = vld [vmem:[%s7536_s26 + $0xf48] sm:$0xff]  ;;  %v8082_v9 = vpop.xlane.xlu1 %4402 }
 0x1f7   : > { %4882 = vadd.xlane.f32.xlu1 %v4881_v12  ;;  %v3744_v26 = vmul.f32 %v2720_v15, %v1696_v2  ;;  %v1693_v29 = vmax.f32 %v669_v11, 1e-06  ;;  %v2714_v31 = vmul.f32 %v1690_v16, %v1690_v16  ;;  %v2715_v32 = vmul.f32 %v1691_v22, %v1691_v22  ;;  %v676_v2 = vld [vmem:[%s7536_s26 + $0xf50] sm:$0xff]  ;;  %10033 = vst [vmem:[#allocation28_spill] sm:$0xff] %v8082_v9 }
 0x1f8   : > { %v4876_v30 = vadd.f32 %v4875_v18, %v3733_v4  ;;  %v3745_v38 = vmul.f32 %v2721_v19, %v1697_v6  ;;  %v4889_v40 = vadd.f32 %v3743_v24, %v3742_v21  ;;  %v2716_v41 = vmul.f32 %v1692_v28, %v1692_v28 }
 0x1f9   : > { %v2717_v42 = vmul.f32 %v1693_v29, %v1693_v29  ;;  %v3738_v46 = vmul.f32 %v2714_v31, %v1690_v16  ;;  %v3739_v47 = vmul.f32 %v2715_v32, %v1691_v22  ;;  %v1702_v54 = vmax.f32 %v678_v34, 1e-06  ;;  %v686_v32 = vld [vmem:[%s7536_s26 + $0xfa0] sm:$0xff]  ;;  %v687_v34 = vld [vmem:[%s7536_s26 + $0xfa8] sm:$0xff] }
 0x1fa   : > { %4877 = vadd.xlane.f32.xlu0 %v4876_v30  ;;  %v4890_v50 = vadd.f32 %v4889_v40, %v3744_v26  ;;  %v3740_v52 = vmul.f32 %v2716_v41, %v1692_v28  ;;  %v1703_v63 = vmax.f32 %v679_v43, 1e-06  ;;  %v1704_v0 = vmax.f32 %v680_v44, 1e-06  ;;  %v8087_v40 = vpop.xlane.xlu0 %4397  ;;  %v689_v44 = vld [vmem:[%s7536_s26 + $0xfb8] sm:$0xff] }
 0x1fb   : > { %v3741_v60 = vmul.f32 %v2717_v42, %v1693_v29  ;;  %v4884_v62 = vadd.f32 %v3739_v47, %v3738_v46  ;;  %v1705_v5 = vmax.f32 %v681_v48, 1e-06  ;;  %v2726_v6 = vmul.f32 %v1702_v54, %v1702_v54  ;;  %10034 = vst [vmem:[#allocation29_spill] sm:$0xff] %v8087_v40  ;;  %v682_v46 = vld [vmem:[%s7536_s26 + $0xf80] sm:$0xff]  ;;  %v1076_v40 = vld [vmem:[%s7536_s26 + $0x1bd0] sm:$0xff] }
 0x1fc   : > { %v4891_v4 = vadd.f32 %v4890_v50, %v3745_v38  ;;  %v1698_v7 = vmax.f32 %v674_v49, 1e-06  ;;  %v2727_v12 = vmul.f32 %v1703_v63, %v1703_v63  ;;  %v2728_v13 = vmul.f32 %v1704_v0, %v1704_v0  ;;  %v688_v38 = vld [vmem:[%s7536_s26 + $0xfb0] sm:$0xff]  ;;  %v683_v49 = vld [vmem:[%s7536_s26 + $0xf88] sm:$0xff] }
 0x1fd   : > { %v4885_v11 = vadd.f32 %v4884_v62, %v3740_v52  ;;  %v1699_v15 = vmax.f32 %v675_v55, 1e-06  ;;  %v2729_v16 = vmul.f32 %v1705_v5, %v1705_v5  ;;  %v3750_v18 = vmul.f32 %v2726_v6, %v1702_v54  ;;  %v684_v50 = vld [vmem:[%s7536_s26 + $0xf90] sm:$0xff]  ;;  %v8093_v52 = vpop.xlane.xlu1 %4412 }
 0x1fe   : > { %4892 = vadd.xlane.f32.xlu1 %v4891_v4  ;;  %v1700_v19 = vmax.f32 %v676_v2, 1e-06  ;;  %v1701_v21 = vmax.f32 %v677_v3, 1e-06  ;;  %v3751_v24 = vmul.f32 %v2727_v12, %v1703_v63  ;;  %v3752_v26 = vmul.f32 %v2728_v13, %v1704_v0  ;;  %10035 = vst [vmem:[#allocation30_spill] sm:$0xff] %v8093_v52  ;;  %v685_v3 = vld [vmem:[%s7536_s26 + $0xf98] sm:$0xff] }
 0x1ff   : > { %v4886_v22 = vadd.f32 %v4885_v11, %v3741_v60  ;;  %v2722_v28 = vmul.f32 %v1698_v7, %v1698_v7  ;;  %v2723_v29 = vmul.f32 %v1699_v15, %v1699_v15  ;;  %v3753_v41 = vmul.f32 %v2729_v16, %v1705_v5 }
 0x200   : > { %v2724_v30 = vmul.f32 %v1700_v19, %v1700_v19  ;;  %v2725_v31 = vmul.f32 %v1701_v21, %v1701_v21  ;;  %v4899_v42 = vadd.f32 %v3751_v24, %v3750_v18  ;;  %v1710_v55 = vmax.f32 %v686_v32, 1e-06  ;;  %v8096_v24 = vpop.xlane.xlu0 %4407 }
 0x201   : > { %4887 = vadd.xlane.f32.xlu0 %v4886_v22  ;;  %v3746_v43 = vmul.f32 %v2722_v28, %v1698_v7  ;;  %v3747_v47 = vmul.f32 %v2723_v29, %v1699_v15  ;;  %v1711_v60 = vmax.f32 %v687_v34, 1e-06  ;;  %v1712_v62 = vmax.f32 %v688_v38, 1e-06  ;;  %10036 = vst [vmem:[#allocation31_spill] sm:$0xff] %v8096_v24  ;;  %v749_v24 = vld [vmem:[%s7536_s26 + $0x1198] sm:$0xff] }
 0x202   : > { %v3748_v48 = vmul.f32 %v2724_v30, %v1700_v19  ;;  %v4900_v54 = vadd.f32 %v4899_v42, %v3752_v26  ;;  %v3749_v63 = vmul.f32 %v2725_v31, %v1701_v21  ;;  %v1713_v2 = vmax.f32 %v689_v44, 1e-06  ;;  %v694_v30 = vld [vmem:[%s7536_s26 + $0xfe0] sm:$0xff]  ;;  %v8099_v31 = vpop.xlane.xlu1 %4422  ;;  %v695_v42 = vld [vmem:[%s7536_s26 + $0xfe8] sm:$0xff] }
 0x203   : > { %v4894_v0 = vadd.f32 %v3747_v47, %v3746_v43  ;;  %v1706_v4 = vmax.f32 %v682_v46, 1e-06  ;;  %v2734_v6 = vmul.f32 %v1710_v55, %v1710_v55  ;;  %v2735_v7 = vmul.f32 %v1711_v60, %v1711_v60  ;;  %10037 = vst [vmem:[#allocation32_spill] sm:$0xff] %v8099_v31  ;;  %v696_v43 = vld [vmem:[%s7536_s26 + $0xff0] sm:$0xff]  ;;  %v697_v47 = vld [vmem:[%s7536_s26 + $0xff8] sm:$0xff] }
 0x204   : > { %v4901_v5 = vadd.f32 %v4900_v54, %v3753_v41  ;;  %v2736_v11 = vmul.f32 %v1712_v62, %v1712_v62  ;;  %v2737_v13 = vmul.f32 %v1713_v2, %v1713_v2  ;;  %v1707_v15 = vmax.f32 %v683_v49, 1e-06 }
 0x205   : > { %v4895_v12 = vadd.f32 %v4894_v0, %v3748_v48  ;;  %v1708_v16 = vmax.f32 %v684_v50, 1e-06  ;;  %v3758_v18 = vmul.f32 %v2734_v6, %v1710_v55  ;;  %v3759_v19 = vmul.f32 %v2735_v7, %v1711_v60  ;;  %v690_v48 = vld [vmem:[%s7536_s26 + $0xfc0] sm:$0xff]  ;;  %v691_v55 = vld [vmem:[%s7536_s26 + $0xfc8] sm:$0xff] }
 0x206   : > { %4902 = vadd.xlane.f32.xlu1 %v4901_v5  ;;  %v3760_v22 = vmul.f32 %v2736_v11, %v1712_v62  ;;  %v1709_v21 = vmax.f32 %v685_v3, 1e-06  ;;  %v2730_v28 = vmul.f32 %v1706_v4, %v1706_v4  ;;  %v2731_v29 = vmul.f32 %v1707_v15, %v1707_v15  ;;  %v693_v3 = vld [vmem:[%s7536_s26 + $0xfd8] sm:$0xff] }
 0x207   : > { %v4896_v26 = vadd.f32 %v4895_v12, %v3749_v63  ;;  %v3761_v32 = vmul.f32 %v2737_v13, %v1713_v2  ;;  %v4909_v34 = vadd.f32 %v3759_v19, %v3758_v18  ;;  %v2732_v38 = vmul.f32 %v1708_v16, %v1708_v16  ;;  %v692_v2 = vld [vmem:[%s7536_s26 + $0xfd0] sm:$0xff]  ;;  %v8108_v12 = vpop.xlane.xlu0 %4417  ;;  %v8110_v18 = vpop.xlane.xlu1 %4432 }
 0x208   : > { %v2733_v41 = vmul.f32 %v1709_v21, %v1709_v21  ;;  %v3754_v44 = vmul.f32 %v2730_v28, %v1706_v4  ;;  %v3755_v46 = vmul.f32 %v2731_v29, %v1707_v15  ;;  %v1718_v54 = vmax.f32 %v694_v30, 1e-06  ;;  %10038 = vst [vmem:[#allocation33_spill] sm:$0xff] %v8108_v12  ;;  %10039 = vst [vmem:[#allocation34_spill] sm:$0xff] %v8110_v18  ;;  %v725_v12 = vld [vmem:[%s7536_s26 + $0x10d8] sm:$0xff] }
 0x209   : > { %4897 = vadd.xlane.f32.xlu0 %v4896_v26  ;;  %v4910_v49 = vadd.f32 %v4909_v34, %v3760_v22  ;;  %v3756_v50 = vmul.f32 %v2732_v38, %v1708_v16  ;;  %v1719_v63 = vmax.f32 %v695_v42, 1e-06  ;;  %v1720_v0 = vmax.f32 %v696_v43, 1e-06  ;;  %v702_v42 = vld [vmem:[%s7536_s26 + $0x1020] sm:$0xff]  ;;  %v703_v43 = vld [vmem:[%s7536_s26 + $0x1028] sm:$0xff] }
 0x20a   : > { %v3757_v60 = vmul.f32 %v2733_v41, %v1709_v21  ;;  %v4904_v62 = vadd.f32 %v3755_v46, %v3754_v44  ;;  %v1721_v6 = vmax.f32 %v697_v47, 1e-06  ;;  %v2742_v7 = vmul.f32 %v1718_v54, %v1718_v54  ;;  %v704_v44 = vld [vmem:[%s7536_s26 + $0x1030] sm:$0xff] }
 0x20b   : > { %v4911_v5 = vadd.f32 %v4910_v49, %v3761_v32  ;;  %v1714_v11 = vmax.f32 %v690_v48, 1e-06  ;;  %v2743_v13 = vmul.f32 %v1719_v63, %v1719_v63  ;;  %v2744_v15 = vmul.f32 %v1720_v0, %v1720_v0  ;;  %v705_v49 = vld [vmem:[%s7536_s26 + $0x1038] sm:$0xff] }
 0x20c   : > { %v4905_v4 = vadd.f32 %v4904_v62, %v3756_v50  ;;  %v1715_v16 = vmax.f32 %v691_v55, 1e-06  ;;  %v2745_v19 = vmul.f32 %v1721_v6, %v1721_v6  ;;  %v3766_v22 = vmul.f32 %v2742_v7, %v1718_v54  ;;  %v698_v50 = vld [vmem:[%s7536_s26 + $0x1000] sm:$0xff]  ;;  %v700_v62 = vld [vmem:[%s7536_s26 + $0x1010] sm:$0xff]  ;;  %v8121_v7 = vpop.xlane.xlu1 %4442 }
 0x20d   : > { %4912 = vadd.xlane.f32.xlu1 %v4911_v5  ;;  %v1716_v21 = vmax.f32 %v692_v2, 1e-06  ;;  %v1717_v26 = vmax.f32 %v693_v3, 1e-06  ;;  %v3767_v29 = vmul.f32 %v2743_v13, %v1719_v63  ;;  %v3768_v30 = vmul.f32 %v2744_v15, %v1720_v0  ;;  %v8119_v63 = vpop.xlane.xlu0 %4427  ;;  %10041 = vst [vmem:[#allocation36_spill] sm:$0xff] %v8121_v7  ;;  %v701_v15 = vld [vmem:[%s7536_s26 + $0x1018] sm:$0xff] }
 0x20e   : > { %v4906_v28 = vadd.f32 %v4905_v4, %v3757_v60  ;;  %v2738_v32 = vmul.f32 %v1714_v11, %v1714_v11  ;;  %v2739_v34 = vmul.f32 %v1715_v16, %v1715_v16  ;;  %v3769_v46 = vmul.f32 %v2745_v19, %v1721_v6  ;;  %v699_v60 = vld [vmem:[%s7536_s26 + $0x1008] sm:$0xff]  ;;  %10040 = vst [vmem:[#allocation35_spill] sm:$0xff] %v8119_v63 }
 0x20f   : > { %v2740_v38 = vmul.f32 %v1716_v21, %v1716_v21  ;;  %v2741_v41 = vmul.f32 %v1717_v26, %v1717_v26  ;;  %v4919_v47 = vadd.f32 %v3767_v29, %v3766_v22  ;;  %v1726_v2 = vmax.f32 %v702_v42, 1e-06 }
 0x210   : > { %4907 = vadd.xlane.f32.xlu0 %v4906_v28  ;;  %v3762_v48 = vmul.f32 %v2738_v32, %v1714_v11  ;;  %v3763_v54 = vmul.f32 %v2739_v34, %v1715_v16  ;;  %v1727_v3 = vmax.f32 %v703_v43, 1e-06  ;;  %v1728_v5 = vmax.f32 %v704_v44, 1e-06 }
 0x211   : > { %v3764_v55 = vmul.f32 %v2740_v38, %v1716_v21  ;;  %v4920_v0 = vadd.f32 %v4919_v47, %v3768_v30  ;;  %v3765_v4 = vmul.f32 %v2741_v41, %v1717_v26  ;;  %v1729_v6 = vmax.f32 %v705_v49, 1e-06  ;;  %v8125_v47 = vpop.xlane.xlu0 %4437 }
 0x212   : > { %v4914_v13 = vadd.f32 %v3763_v54, %v3762_v48  ;;  %v1722_v11 = vmax.f32 %v698_v50, 1e-06  ;;  %v2750_v22 = vmul.f32 %v1726_v2, %v1726_v2  ;;  %v2751_v16 = vmul.f32 %v1727_v3, %v1727_v3  ;;  %10042 = vst [vmem:[#allocation37_spill] sm:$0xff] %v8125_v47 }
 0x213   : > { %v4921_v19 = vadd.f32 %v4920_v0, %v3769_v46  ;;  %v2752_v21 = vmul.f32 %v1728_v5, %v1728_v5  ;;  %v2753_v29 = vmul.f32 %v1729_v6, %v1729_v6  ;;  %v1723_v32 = vmax.f32 %v699_v60, 1e-06  ;;  %v710_v46 = vld [vmem:[%s7536_s26 + $0x1060] sm:$0xff]  ;;  %v712_v60 = vld [vmem:[%s7536_s26 + $0x1070] sm:$0xff] }
 0x214   : > { %v4915_v28 = vadd.f32 %v4914_v13, %v3764_v55  ;;  %v1724_v30 = vmax.f32 %v700_v62, 1e-06  ;;  %v3774_v34 = vmul.f32 %v2750_v22, %v1726_v2  ;;  %v3775_v38 = vmul.f32 %v2751_v16, %v1727_v3  ;;  %v711_v55 = vld [vmem:[%s7536_s26 + $0x1068] sm:$0xff]  ;;  %v8129_v62 = vpop.xlane.xlu1 %4452  ;;  %v713_v3 = vld [vmem:[%s7536_s26 + $0x1078] sm:$0xff] }
 0x215   : > { %4922 = vadd.xlane.f32.xlu1 %v4921_v19  ;;  %v3776_v42 = vmul.f32 %v2752_v21, %v1728_v5  ;;  %v1725_v26 = vmax.f32 %v701_v15, 1e-06  ;;  %v2746_v43 = vmul.f32 %v1722_v11, %v1722_v11  ;;  %v2747_v44 = vmul.f32 %v1723_v32, %v1723_v32  ;;  %10043 = vst [vmem:[#allocation38_spill] sm:$0xff] %v8129_v62  ;;  %v706_v5 = vld [vmem:[%s7536_s26 + $0x1040] sm:$0xff]  ;;  %v707_v19 = vld [vmem:[%s7536_s26 + $0x1048] sm:$0xff] }
 0x216   : > { %v4916_v41 = vadd.f32 %v4915_v28, %v3765_v4  ;;  %v3777_v48 = vmul.f32 %v2753_v29, %v1729_v6  ;;  %v4929_v49 = vadd.f32 %v3775_v38, %v3774_v34  ;;  %v2748_v50 = vmul.f32 %v1724_v30, %v1724_v30  ;;  %v708_v28 = vld [vmem:[%s7536_s26 + $0x1050] sm:$0xff]  ;;  %v709_v29 = vld [vmem:[%s7536_s26 + $0x1058] sm:$0xff] }
 0x217   : > { %v2749_v54 = vmul.f32 %v1725_v26, %v1725_v26  ;;  %v3770_v0 = vmul.f32 %v2746_v43, %v1722_v11  ;;  %v3771_v2 = vmul.f32 %v2747_v44, %v1723_v32  ;;  %v1734_v15 = vmax.f32 %v710_v46, 1e-06 }
 0x218   : > { %4917 = vadd.xlane.f32.xlu0 %v4916_v41  ;;  %v4930_v4 = vadd.f32 %v4929_v49, %v3776_v42  ;;  %v3772_v13 = vmul.f32 %v2748_v50, %v1724_v30  ;;  %v1735_v16 = vmax.f32 %v711_v55, 1e-06  ;;  %v1736_v21 = vmax.f32 %v712_v60, 1e-06  ;;  %v8136_v42 = vpop.xlane.xlu0 %4447  ;;  %v8138_v46 = vpop.xlane.xlu1 %4462 }
 0x219   : > { %v3773_v22 = vmul.f32 %v2749_v54, %v1725_v26  ;;  %v4924_v6 = vadd.f32 %v3771_v2, %v3770_v0  ;;  %v1737_v38 = vmax.f32 %v713_v3, 1e-06  ;;  %v2758_v7 = vmul.f32 %v1734_v15, %v1734_v15  ;;  %10044 = vst [vmem:[#allocation39_spill] sm:$0xff] %v8136_v42  ;;  %10045 = vst [vmem:[#allocation40_spill] sm:$0xff] %v8138_v46  ;;  %v718_v2 = vld [vmem:[%s7536_s26 + $0x10a0] sm:$0xff]  ;;  %v719_v3 = vld [vmem:[%s7536_s26 + $0x10a8] sm:$0xff] }
 0x21a   : > { %v4931_v34 = vadd.f32 %v4930_v4, %v3777_v48  ;;  %v1730_v47 = vmax.f32 %v706_v5, 1e-06  ;;  %v2759_v41 = vmul.f32 %v1735_v16, %v1735_v16  ;;  %v2760_v11 = vmul.f32 %v1736_v21, %v1736_v21  ;;  %v720_v5 = vld [vmem:[%s7536_s26 + $0x10b0] sm:$0xff] }
 0x21b   : > { %v4925_v63 = vadd.f32 %v4924_v6, %v3772_v13  ;;  %v1731_v32 = vmax.f32 %v707_v19, 1e-06  ;;  %v2761_v30 = vmul.f32 %v1737_v38, %v1737_v38  ;;  %v3782_v26 = vmul.f32 %v2758_v7, %v1734_v15  ;;  %v721_v15 = vld [vmem:[%s7536_s26 + $0x10b8] sm:$0xff] }
 0x21c   : > { %4932 = vadd.xlane.f32.xlu1 %v4931_v34  ;;  %v1732_v43 = vmax.f32 %v708_v28, 1e-06  ;;  %v1733_v44 = vmax.f32 %v709_v29, 1e-06  ;;  %v3783_v49 = vmul.f32 %v2759_v41, %v1735_v16  ;;  %v3784_v50 = vmul.f32 %v2760_v11, %v1736_v21  ;;  %v8145_v29 = vpop.xlane.xlu0 %4457 }
 0x21d   : > { %v4926_v48 = vadd.f32 %v4925_v63, %v3773_v22  ;;  %v2754_v54 = vmul.f32 %v1730_v47, %v1730_v47  ;;  %v2755_v55 = vmul.f32 %v1731_v32, %v1731_v32  ;;  %v3785_v4 = vmul.f32 %v2761_v30, %v1737_v38  ;;  %v714_v63 = vld [vmem:[%s7536_s26 + $0x1080] sm:$0xff]  ;;  %10046 = vst [vmem:[#allocation41_spill] sm:$0xff] %v8145_v29  ;;  %v716_v38 = vld [vmem:[%s7536_s26 + $0x1090] sm:$0xff]  ;;  %v8149_v30 = vpop.xlane.xlu1 %4472 }
 0x21e   : > { %v2756_v60 = vmul.f32 %v1732_v43, %v1732_v43  ;;  %v2757_v0 = vmul.f32 %v1733_v44, %v1733_v44  ;;  %v4939_v7 = vadd.f32 %v3783_v49, %v3782_v26  ;;  %v1742_v16 = vmax.f32 %v718_v2, 1e-06  ;;  %10047 = vst [vmem:[#allocation42_spill] sm:$0xff] %v8149_v30 }
 0x21f   : > { %4927 = vadd.xlane.f32.xlu0 %v4926_v48  ;;  %v3778_v13 = vmul.f32 %v2754_v54, %v1730_v47  ;;  %v3779_v19 = vmul.f32 %v2755_v55, %v1731_v32  ;;  %v1743_v21 = vmax.f32 %v719_v3, 1e-06  ;;  %v1744_v28 = vmax.f32 %v720_v5, 1e-06  ;;  %v715_v48 = vld [vmem:[%s7536_s26 + $0x1088] sm:$0xff]  ;;  %v726_v3 = vld [vmem:[%s7536_s26 + $0x10e0] sm:$0xff] }
 0x220   : > { %v3780_v6 = vmul.f32 %v2756_v60, %v1732_v43  ;;  %v4940_v22 = vadd.f32 %v4939_v7, %v3784_v50  ;;  %v3781_v34 = vmul.f32 %v2757_v0, %v1733_v44  ;;  %v1745_v11 = vmax.f32 %v721_v15, 1e-06  ;;  %v717_v43 = vld [vmem:[%s7536_s26 + $0x1098] sm:$0xff] }
 0x221   : > { %v4934_v41 = vadd.f32 %v3779_v19, %v3778_v13  ;;  %v2766_v26 = vmul.f32 %v1742_v16, %v1742_v16  ;;  %v2767_v32 = vmul.f32 %v1743_v21, %v1743_v21  ;;  %v1738_v49 = vmax.f32 %v714_v63, 1e-06 }
 0x222   : > { %v4941_v47 = vadd.f32 %v4940_v22, %v3785_v4  ;;  %v2768_v50 = vmul.f32 %v1744_v28, %v1744_v28  ;;  %v2769_v55 = vmul.f32 %v1745_v11, %v1745_v11  ;;  %v1739_v0 = vmax.f32 %v715_v48, 1e-06  ;;  %v727_v22 = vld [vmem:[%s7536_s26 + $0x10e8] sm:$0xff] }
 0x223   : > { %v4935_v54 = vadd.f32 %v4934_v41, %v3780_v6  ;;  %v3790_v60 = vmul.f32 %v2766_v26, %v1742_v16  ;;  %v3791_v44 = vmul.f32 %v2767_v32, %v1743_v21  ;;  %v1740_v2 = vmax.f32 %v716_v38, 1e-06  ;;  %v728_v41 = vld [vmem:[%s7536_s26 + $0x10f0] sm:$0xff]  ;;  %v729_v21 = vld [vmem:[%s7536_s26 + $0x10f8] sm:$0xff]  ;;  %v722_v32 = vld [vmem:[%s7536_s26 + $0x10c0] sm:$0xff] }
 0x224   : > { %4942 = vadd.xlane.f32.xlu1 %v4941_v47  ;;  %v3792_v7 = vmul.f32 %v2768_v50, %v1744_v28  ;;  %v3793_v13 = vmul.f32 %v2769_v55, %v1745_v11  ;;  %v1741_v4 = vmax.f32 %v717_v43, 1e-06  ;;  %v2762_v19 = vmul.f32 %v1738_v49, %v1738_v49  ;;  %v8155_v47 = vpop.xlane.xlu0 %4467  ;;  %v723_v43 = vld [vmem:[%s7536_s26 + $0x10c8] sm:$0xff] }
 0x225   : > { %v4936_v5 = vadd.f32 %v4935_v54, %v3781_v34  ;;  %v4949_v15 = vadd.f32 %v3791_v44, %v3790_v60  ;;  %v2763_v6 = vmul.f32 %v1739_v0, %v1739_v0  ;;  %v2764_v63 = vmul.f32 %v1740_v2, %v1740_v2  ;;  %10048 = vst [vmem:[#allocation43_spill] sm:$0xff] %v8155_v47  ;;  %v8158_v34 = vpop.xlane.xlu1 %4482  ;;  %v724_v60 = vld [vmem:[%s7536_s26 + $0x10d0] sm:$0xff] }
 0x226   : > { %v2765_v16 = vmul.f32 %v1741_v4, %v1741_v4  ;;  %v1750_v48 = vmax.f32 %v726_v3, 1e-06  ;;  %10049 = vst [vmem:[#allocation44_spill] sm:$0xff] %v8158_v34  ;;  %v3786_v11 = vmul.f32 %v2762_v19, %v1738_v49  ;;  %v1751_v50 = vmax.f32 %v727_v22, 1e-06 }
 0x227   : > { %4937 = vadd.xlane.f32.xlu0 %v4936_v5  ;;  %v4950_v28 = vadd.f32 %v4949_v15, %v3792_v7  ;;  %v3787_v38 = vmul.f32 %v2763_v6, %v1739_v0  ;;  %v3788_v26 = vmul.f32 %v2764_v63, %v1740_v2  ;;  %v1752_v55 = vmax.f32 %v728_v41, 1e-06  ;;  %v734_v63 = vld [vmem:[%s7536_s26 + $0x1120] sm:$0xff] }
 0x228   : > { %v3789_v54 = vmul.f32 %v2765_v16, %v1741_v4  ;;  %v1753_v31 = vmax.f32 %v729_v21, 1e-06  ;;  %v2774_v5 = vmul.f32 %v1750_v48, %v1750_v48  ;;  %v2775_v3 = vmul.f32 %v1751_v50, %v1751_v50  ;;  %v8164_v4 = vpop.xlane.xlu0 %4477 }
 0x229   : > { %v4951_v44 = vadd.f32 %v4950_v28, %v3793_v13  ;;  %v4944_v18 = vadd.f32 %v3787_v38, %v3786_v11  ;;  %v2776_v51 = vmul.f32 %v1752_v55, %v1752_v55  ;;  %v1746_v52 = vmax.f32 %v722_v32, 1e-06  ;;  %10050 = vst [vmem:[#allocation45_spill] sm:$0xff] %v8164_v4  ;;  %v8167_v22 = vpop.xlane.xlu1 %4492  ;;  %v735_v28 = vld [vmem:[%s7536_s26 + $0x1128] sm:$0xff]  ;;  %v737_v32 = vld [vmem:[%s7536_s26 + $0x1138] sm:$0xff] }
 0x22a   : > { %v1747_v34 = vmax.f32 %v723_v43, 1e-06  ;;  %v2777_v0 = vmul.f32 %v1753_v31, %v1753_v31  ;;  %v3798_v2 = vmul.f32 %v2774_v5, %v1750_v48  ;;  %v1748_v7 = vmax.f32 %v724_v60, 1e-06  ;;  %10051 = vst [vmem:[#allocation46_spill] sm:$0xff] %v8167_v22 }
 0x22b   : > { %4952 = vadd.xlane.f32.xlu1 %v4951_v44  ;;  %v4945_v49 = vadd.f32 %v4944_v18, %v3788_v26  ;;  %v3799_v13 = vmul.f32 %v2775_v3, %v1751_v50  ;;  %v3800_v15 = vmul.f32 %v2776_v51, %v1752_v55  ;;  %v1749_v19 = vmax.f32 %v725_v12, 1e-06  ;;  %v736_v18 = vld [vmem:[%s7536_s26 + $0x1130] sm:$0xff]  ;;  %v730_v50 = vld [vmem:[%s7536_s26 + $0x1100] sm:$0xff]  ;;  %v731_v44 = vld [vmem:[%s7536_s26 + $0x1108] sm:$0xff] }
 0x22c   : > { %v2770_v6 = vmul.f32 %v1746_v52, %v1746_v52  ;;  %v2771_v16 = vmul.f32 %v1747_v34, %v1747_v34  ;;  %v2772_v21 = vmul.f32 %v1748_v7, %v1748_v7  ;;  %v3801_v11 = vmul.f32 %v2777_v0, %v1753_v31  ;;  %v732_v31 = vld [vmem:[%s7536_s26 + $0x1110] sm:$0xff]  ;;  %v733_v0 = vld [vmem:[%s7536_s26 + $0x1118] sm:$0xff] }
 0x22d   : > { %v4946_v41 = vadd.f32 %v4945_v49, %v3789_v54  ;;  %v4959_v48 = vadd.f32 %v3799_v13, %v3798_v2  ;;  %v2773_v38 = vmul.f32 %v1749_v19, %v1749_v19  ;;  %v1758_v43 = vmax.f32 %v734_v63, 1e-06  ;;  %v8176_v2 = vpop.xlane.xlu0 %4487 }
 0x22e   : > { %v3794_v26 = vmul.f32 %v2770_v6, %v1746_v52  ;;  %v3795_v51 = vmul.f32 %v2771_v16, %v1747_v34  ;;  %v3796_v12 = vmul.f32 %v2772_v21, %v1748_v7  ;;  %v1759_v60 = vmax.f32 %v735_v28, 1e-06  ;;  %10052 = vst [vmem:[#allocation47_spill] sm:$0xff] %v8176_v2  ;;  %v8178_v7 = vpop.xlane.xlu1 %4502 }
 0x22f   : > { %4947 = vadd.xlane.f32.xlu0 %v4946_v41  ;;  %v4960_v55 = vadd.f32 %v4959_v48, %v3800_v15  ;;  %v1760_v54 = vmax.f32 %v736_v18, 1e-06  ;;  %v3797_v5 = vmul.f32 %v2773_v38, %v1749_v19  ;;  %v1761_v49 = vmax.f32 %v737_v32, 1e-06  ;;  %10053 = vst [vmem:[#allocation48_spill] sm:$0xff] %v8178_v7 }
 0x230   : > { %v4954_v3 = vadd.f32 %v3795_v51, %v3794_v26  ;;  %v2782_v22 = vmul.f32 %v1758_v43, %v1758_v43  ;;  %v2783_v13 = vmul.f32 %v1759_v60, %v1759_v60  ;;  %v1754_v34 = vmax.f32 %v730_v50, 1e-06  ;;  %v742_v26 = vld [vmem:[%s7536_s26 + $0x1160] sm:$0xff] }
 0x231   : > { %v4961_v52 = vadd.f32 %v4960_v55, %v3801_v11  ;;  %v2784_v6 = vmul.f32 %v1760_v54, %v1760_v54  ;;  %v2785_v15 = vmul.f32 %v1761_v49, %v1761_v49  ;;  %v1755_v19 = vmax.f32 %v731_v44, 1e-06  ;;  %v743_v55 = vld [vmem:[%s7536_s26 + $0x1168] sm:$0xff]  ;;  %v738_v44 = vld [vmem:[%s7536_s26 + $0x1140] sm:$0xff] }
 0x232   : > { %v4955_v63 = vadd.f32 %v4954_v3, %v3796_v12  ;;  %v3806_v41 = vmul.f32 %v2782_v22, %v1758_v43  ;;  %v3807_v16 = vmul.f32 %v2783_v13, %v1759_v60  ;;  %v1756_v28 = vmax.f32 %v732_v31, 1e-06  ;;  %v744_v22 = vld [vmem:[%s7536_s26 + $0x1170] sm:$0xff]  ;;  %v8185_v3 = vpop.xlane.xlu0 %4497  ;;  %v8188_v13 = vpop.xlane.xlu1 %4512 }
 0x233   : > { %4962 = vadd.xlane.f32.xlu1 %v4961_v52  ;;  %v3808_v21 = vmul.f32 %v2784_v6, %v1760_v54  ;;  %v1757_v18 = vmax.f32 %v733_v0, 1e-06  ;;  %v2778_v48 = vmul.f32 %v1754_v34, %v1754_v34  ;;  %v2779_v38 = vmul.f32 %v1755_v19, %v1755_v19  ;;  %v745_v54 = vld [vmem:[%s7536_s26 + $0x1178] sm:$0xff]  ;;  %10054 = vst [vmem:[#allocation49_spill] sm:$0xff] %v8185_v3  ;;  %v739_v52 = vld [vmem:[%s7536_s26 + $0x1148] sm:$0xff] }
 0x234   : > { %v4956_v11 = vadd.f32 %v4955_v63, %v3797_v5  ;;  %v3809_v32 = vmul.f32 %v2785_v15, %v1761_v49  ;;  %v4969_v51 = vadd.f32 %v3807_v16, %v3806_v41  ;;  %v2780_v12 = vmul.f32 %v1756_v28, %v1756_v28  ;;  %10055 = vst [vmem:[#allocation50_spill] sm:$0xff] %v8188_v13  ;;  %v740_v41 = vld [vmem:[%s7536_s26 + $0x1150] sm:$0xff]  ;;  %v741_v16 = vld [vmem:[%s7536_s26 + $0x1158] sm:$0xff] }
 0x235   : > { %v2781_v50 = vmul.f32 %v1757_v18, %v1757_v18  ;;  %v3802_v43 = vmul.f32 %v2778_v48, %v1754_v34  ;;  %v3803_v60 = vmul.f32 %v2779_v38, %v1755_v19  ;;  %v1766_v0 = vmax.f32 %v742_v26, 1e-06 }
 0x236   : > { %4957 = vadd.xlane.f32.xlu0 %v4956_v11  ;;  %v4970_v5 = vadd.f32 %v4969_v51, %v3808_v21  ;;  %v3804_v31 = vmul.f32 %v2780_v12, %v1756_v28  ;;  %v1767_v63 = vmax.f32 %v743_v55, 1e-06  ;;  %v1768_v15 = vmax.f32 %v744_v22, 1e-06  ;;  %v8192_v22 = vpop.xlane.xlu0 %4507 }
 0x237   : > { %v3805_v49 = vmul.f32 %v2781_v50, %v1757_v18  ;;  %v4964_v6 = vadd.f32 %v3803_v60, %v3802_v43  ;;  %v1769_v7 = vmax.f32 %v745_v54, 1e-06  ;;  %v2790_v34 = vmul.f32 %v1766_v0, %v1766_v0  ;;  %10056 = vst [vmem:[#allocation51_spill] sm:$0xff] %v8192_v22 }
 0x238   : > { %v4971_v11 = vadd.f32 %v4970_v5, %v3809_v32  ;;  %v1762_v19 = vmax.f32 %v738_v44, 1e-06  ;;  %v2791_v38 = vmul.f32 %v1767_v63, %v1767_v63  ;;  %v2792_v3 = vmul.f32 %v1768_v15, %v1768_v15  ;;  %v750_v44 = vld [vmem:[%s7536_s26 + $0x11a0] sm:$0xff]  ;;  %v751_v5 = vld [vmem:[%s7536_s26 + $0x11a8] sm:$0xff] }
 0x239   : > { %v4965_v48 = vadd.f32 %v4964_v6, %v3804_v31  ;;  %v1763_v21 = vmax.f32 %v739_v52, 1e-06  ;;  %v2793_v28 = vmul.f32 %v1769_v7, %v1769_v7  ;;  %v3814_v26 = vmul.f32 %v2790_v34, %v1766_v0  ;;  %v752_v31 = vld [vmem:[%s7536_s26 + $0x11b0] sm:$0xff]  ;;  %v8197_v52 = vpop.xlane.xlu1 %4522 }
 0x23a   : > { %4972 = vadd.xlane.f32.xlu1 %v4971_v11  ;;  %v1764_v18 = vmax.f32 %v740_v41, 1e-06  ;;  %v1765_v51 = vmax.f32 %v741_v16, 1e-06  ;;  %v3815_v50 = vmul.f32 %v2791_v38, %v1767_v63  ;;  %v3816_v32 = vmul.f32 %v2792_v3, %v1768_v15  ;;  %10057 = vst [vmem:[#allocation52_spill] sm:$0xff] %v8197_v52  ;;  %v753_v63 = vld [vmem:[%s7536_s26 + $0x11b8] sm:$0xff] }
 0x23b   : > { %v4966_v12 = vadd.f32 %v4965_v48, %v3805_v49  ;;  %v2786_v55 = vmul.f32 %v1762_v19, %v1762_v19  ;;  %v2787_v43 = vmul.f32 %v1763_v21, %v1763_v21  ;;  %v3817_v0 = vmul.f32 %v2793_v28, %v1769_v7  ;;  %v746_v3 = vld [vmem:[%s7536_s26 + $0x1180] sm:$0xff]  ;;  %v747_v16 = vld [vmem:[%s7536_s26 + $0x1188] sm:$0xff]  ;;  %v748_v11 = vld [vmem:[%s7536_s26 + $0x1190] sm:$0xff] }
 0x23c   : > { %v2788_v60 = vmul.f32 %v1764_v18, %v1764_v18  ;;  %v2789_v54 = vmul.f32 %v1765_v51, %v1765_v51  ;;  %v4979_v49 = vadd.f32 %v3815_v50, %v3814_v26  ;;  %v1774_v48 = vmax.f32 %v750_v44, 1e-06  ;;  %v8204_v26 = vpop.xlane.xlu0 %4517 }
 0x23d   : > { %4967 = vadd.xlane.f32.xlu0 %v4966_v12  ;;  %v3810_v6 = vmul.f32 %v2786_v55, %v1762_v19  ;;  %v3811_v15 = vmul.f32 %v2787_v43, %v1763_v21  ;;  %v1775_v38 = vmax.f32 %v751_v5, 1e-06  ;;  %v1776_v13 = vmax.f32 %v752_v31, 1e-06  ;;  %10058 = vst [vmem:[#allocation53_spill] sm:$0xff] %v8204_v26  ;;  %v8206_v55 = vpop.xlane.xlu1 %4532 }
 0x23e   : > { %v3812_v41 = vmul.f32 %v2788_v60, %v1764_v18  ;;  %v4980_v34 = vadd.f32 %v4979_v49, %v3816_v32  ;;  %v3813_v22 = vmul.f32 %v2789_v54, %v1765_v51  ;;  %v1777_v8 = vmax.f32 %v753_v63, 1e-06  ;;  %10059 = vst [vmem:[#allocation54_spill] sm:$0xff] %v8206_v55  ;;  %v1133_v55 = vld [vmem:[%s7536_s26 + $0x1d98] sm:$0xff] }
 0x23f   : > { %v4974_v2 = vadd.f32 %v3811_v15, %v3810_v6  ;;  %v1770_v52 = vmax.f32 %v746_v3, 1e-06  ;;  %v2798_v7 = vmul.f32 %v1774_v48, %v1774_v48  ;;  %v2799_v28 = vmul.f32 %v1775_v38, %v1775_v38  ;;  %v759_v3 = vld [vmem:[%s7536_s26 + $0x11e8] sm:$0xff]  ;;  %v760_v15 = vld [vmem:[%s7536_s26 + $0x11f0] sm:$0xff] }
 0x240   : > { %v4981_v12 = vadd.f32 %v4980_v34, %v3817_v0  ;;  %v2800_v19 = vmul.f32 %v1776_v13, %v1776_v13  ;;  %v2801_v18 = vmul.f32 %v1777_v8, %v1777_v8  ;;  %v1771_v50 = vmax.f32 %v747_v16, 1e-06  ;;  %v758_v0 = vld [vmem:[%s7536_s26 + $0x11e0] sm:$0xff] }
 0x241   : > { %v4975_v21 = vadd.f32 %v4974_v2, %v3812_v41  ;;  %v1772_v32 = vmax.f32 %v748_v11, 1e-06  ;;  %v3822_v51 = vmul.f32 %v2798_v7, %v1774_v48  ;;  %v3823_v43 = vmul.f32 %v2799_v28, %v1775_v38  ;;  %v761_v11 = vld [vmem:[%s7536_s26 + $0x11f8] sm:$0xff]  ;;  %v755_v48 = vld [vmem:[%s7536_s26 + $0x11c8] sm:$0xff]  ;;  %v8214_v38 = vpop.xlane.xlu0 %4527 }
 0x242   : > { %4982 = vadd.xlane.f32.xlu1 %v4981_v12  ;;  %v3824_v60 = vmul.f32 %v2800_v19, %v1776_v13  ;;  %v1773_v54 = vmax.f32 %v749_v24, 1e-06  ;;  %v2794_v5 = vmul.f32 %v1770_v52, %v1770_v52  ;;  %v2795_v31 = vmul.f32 %v1771_v50, %v1771_v50  ;;  %v754_v13 = vld [vmem:[%s7536_s26 + $0x11c0] sm:$0xff]  ;;  %10060 = vst [vmem:[#allocation55_spill] sm:$0xff] %v8214_v38  ;;  %v756_v19 = vld [vmem:[%s7536_s26 + $0x11d0] sm:$0xff] }
 0x243   : > { %v4976_v44 = vadd.f32 %v4975_v21, %v3813_v22  ;;  %v3825_v2 = vmul.f32 %v2801_v18, %v1777_v8  ;;  %v4989_v49 = vadd.f32 %v3823_v43, %v3822_v51  ;;  %v2796_v6 = vmul.f32 %v1772_v32, %v1772_v32  ;;  %v757_v21 = vld [vmem:[%s7536_s26 + $0x11d8] sm:$0xff]  ;;  %v8218_v18 = vpop.xlane.xlu1 %4542 }
 0x244   : > { %v2797_v63 = vmul.f32 %v1773_v54, %v1773_v54  ;;  %v3818_v41 = vmul.f32 %v2794_v5, %v1770_v52  ;;  %v3819_v16 = vmul.f32 %v2795_v31, %v1771_v50  ;;  %v1782_v22 = vmax.f32 %v758_v0, 1e-06  ;;  %10061 = vst [vmem:[#allocation56_spill] sm:$0xff] %v8218_v18 }
 0x245   : > { %4977 = vadd.xlane.f32.xlu0 %v4976_v44  ;;  %v4990_v34 = vadd.f32 %v4989_v49, %v3824_v60  ;;  %v3820_v24 = vmul.f32 %v2796_v6, %v1772_v32  ;;  %v1783_v7 = vmax.f32 %v759_v3, 1e-06  ;;  %v1784_v28 = vmax.f32 %v760_v15, 1e-06 }
 0x246   : > { %v3821_v12 = vmul.f32 %v2797_v63, %v1773_v54  ;;  %v4984_v8 = vadd.f32 %v3819_v16, %v3818_v41  ;;  %v1785_v43 = vmax.f32 %v761_v11, 1e-06  ;;  %v2806_v52 = vmul.f32 %v1782_v22, %v1782_v22  ;;  %v766_v11 = vld [vmem:[%s7536_s26 + $0x1220] sm:$0xff] }
 0x247   : > { %v4991_v51 = vadd.f32 %v4990_v34, %v3825_v2  ;;  %v1778_v50 = vmax.f32 %v754_v13, 1e-06  ;;  %v2807_v60 = vmul.f32 %v1783_v7, %v1783_v7  ;;  %v2808_v32 = vmul.f32 %v1784_v28, %v1784_v28  ;;  %v767_v13 = vld [vmem:[%s7536_s26 + $0x1228] sm:$0xff]  ;;  %v768_v34 = vld [vmem:[%s7536_s26 + $0x1230] sm:$0xff] }
 0x248   : > { %v4985_v44 = vadd.f32 %v4984_v8, %v3820_v24  ;;  %v1779_v5 = vmax.f32 %v755_v48, 1e-06  ;;  %v2809_v54 = vmul.f32 %v1785_v43, %v1785_v43  ;;  %v3830_v31 = vmul.f32 %v2806_v52, %v1782_v22  ;;  %v8223_v24 = vpop.xlane.xlu0 %4537  ;;  %v764_v52 = vld [vmem:[%s7536_s26 + $0x1210] sm:$0xff] }
 0x249   : > { %4992 = vadd.xlane.f32.xlu1 %v4991_v51  ;;  %v1780_v0 = vmax.f32 %v756_v19, 1e-06  ;;  %v1781_v49 = vmax.f32 %v757_v21, 1e-06  ;;  %v3831_v63 = vmul.f32 %v2807_v60, %v1783_v7  ;;  %v3832_v2 = vmul.f32 %v2808_v32, %v1784_v28  ;;  %10062 = vst [vmem:[#allocation57_spill] sm:$0xff] %v8223_v24  ;;  %v762_v19 = vld [vmem:[%s7536_s26 + $0x1200] sm:$0xff]  ;;  %v8227_v7 = vpop.xlane.xlu1 %4552 }
 0x24a   : > { %v4986_v6 = vadd.f32 %v4985_v44, %v3821_v12  ;;  %v2802_v3 = vmul.f32 %v1778_v50, %v1778_v50  ;;  %v2803_v15 = vmul.f32 %v1779_v5, %v1779_v5  ;;  %v3833_v22 = vmul.f32 %v2809_v54, %v1785_v43  ;;  %v769_v12 = vld [vmem:[%s7536_s26 + $0x1238] sm:$0xff]  ;;  %10063 = vst [vmem:[#allocation58_spill] sm:$0xff] %v8227_v7  ;;  %v763_v51 = vld [vmem:[%s7536_s26 + $0x1208] sm:$0xff] }
 0x24b   : > { %v2804_v41 = vmul.f32 %v1780_v0, %v1780_v0  ;;  %v2805_v16 = vmul.f32 %v1781_v49, %v1781_v49  ;;  %v4999_v48 = vadd.f32 %v3831_v63, %v3830_v31  ;;  %v1790_v60 = vmax.f32 %v766_v11, 1e-06 }
 0x24c   : > { %4987 = vadd.xlane.f32.xlu0 %v4986_v6  ;;  %v3826_v8 = vmul.f32 %v2802_v3, %v1778_v50  ;;  %v3827_v28 = vmul.f32 %v2803_v15, %v1779_v5  ;;  %v1791_v32 = vmax.f32 %v767_v13, 1e-06  ;;  %v1792_v26 = vmax.f32 %v768_v34, 1e-06  ;;  %v765_v6 = vld [vmem:[%s7536_s26 + $0x1218] sm:$0xff]  ;;  %v8232_v15 = vpop.xlane.xlu0 %4547 }
 0x24d   : > { %v3828_v21 = vmul.f32 %v2804_v41, %v1780_v0  ;;  %v5000_v44 = vadd.f32 %v4999_v48, %v3832_v2  ;;  %v3829_v18 = vmul.f32 %v2805_v16, %v1781_v49  ;;  %v1793_v4 = vmax.f32 %v769_v12, 1e-06  ;;  %10064 = vst [vmem:[#allocation59_spill] sm:$0xff] %v8232_v15  ;;  %v8234_v11 = vpop.xlane.xlu1 %4562 }
 0x24e   : > { %v4994_v1 = vadd.f32 %v3827_v28, %v3826_v8  ;;  %v1786_v43 = vmax.f32 %v762_v19, 1e-06  ;;  %v2814_v31 = vmul.f32 %v1790_v60, %v1790_v60  ;;  %v2815_v50 = vmul.f32 %v1791_v32, %v1791_v32  ;;  %10065 = vst [vmem:[#allocation60_spill] sm:$0xff] %v8234_v11  ;;  %v775_v28 = vld [vmem:[%s7536_s26 + $0x1268] sm:$0xff] }
 0x24f   : > { %v5001_v54 = vadd.f32 %v5000_v44, %v3833_v22  ;;  %v2816_v63 = vmul.f32 %v1792_v26, %v1792_v26  ;;  %v2817_v7 = vmul.f32 %v1793_v4, %v1793_v4  ;;  %v1787_v5 = vmax.f32 %v763_v51, 1e-06  ;;  %v770_v44 = vld [vmem:[%s7536_s26 + $0x1240] sm:$0xff] }
 0x250   : > { %v4995_v3 = vadd.f32 %v4994_v1, %v3828_v21  ;;  %v1788_v0 = vmax.f32 %v764_v52, 1e-06  ;;  %v3838_v2 = vmul.f32 %v2814_v31, %v1790_v60  ;;  %v3839_v49 = vmul.f32 %v2815_v50, %v1791_v32  ;;  %v774_v1 = vld [vmem:[%s7536_s26 + $0x1260] sm:$0xff]  ;;  %v776_v21 = vld [vmem:[%s7536_s26 + $0x1270] sm:$0xff]  ;;  %v777_v52 = vld [vmem:[%s7536_s26 + $0x1278] sm:$0xff] }
 0x251   : > { %5002 = vadd.xlane.f32.xlu1 %v5001_v54  ;;  %v3840_v41 = vmul.f32 %v2816_v63, %v1792_v26  ;;  %v1789_v16 = vmax.f32 %v765_v6, 1e-06  ;;  %v2810_v34 = vmul.f32 %v1786_v43, %v1786_v43  ;;  %v2811_v22 = vmul.f32 %v1787_v5, %v1787_v5  ;;  %v771_v6 = vld [vmem:[%s7536_s26 + $0x1248] sm:$0xff]  ;;  %v773_v63 = vld [vmem:[%s7536_s26 + $0x1258] sm:$0xff] }
 0x252   : > { %v4996_v13 = vadd.f32 %v4995_v3, %v3829_v18  ;;  %v3841_v48 = vmul.f32 %v2817_v7, %v1793_v4  ;;  %v5009_v8 = vadd.f32 %v3839_v49, %v3838_v2  ;;  %v2812_v12 = vmul.f32 %v1788_v0, %v1788_v0  ;;  %v772_v7 = vld [vmem:[%s7536_s26 + $0x1250] sm:$0xff]  ;;  %v8244_v3 = vpop.xlane.xlu0 %4557 }
 0x253   : > { %v2813_v19 = vmul.f32 %v1789_v16, %v1789_v16  ;;  %v3834_v26 = vmul.f32 %v2810_v34, %v1786_v43  ;;  %v3835_v51 = vmul.f32 %v2811_v22, %v1787_v5  ;;  %v1798_v18 = vmax.f32 %v774_v1, 1e-06  ;;  %10066 = vst [vmem:[#allocation61_spill] sm:$0xff] %v8244_v3  ;;  %v8246_v43 = vpop.xlane.xlu1 %4572 }
 0x254   : > { %4997 = vadd.xlane.f32.xlu0 %v4996_v13  ;;  %v5010_v60 = vadd.f32 %v5009_v8, %v3840_v41  ;;  %v3836_v32 = vmul.f32 %v2812_v12, %v1788_v0  ;;  %v1799_v50 = vmax.f32 %v775_v28, 1e-06  ;;  %v1800_v4 = vmax.f32 %v776_v21, 1e-06  ;;  %10067 = vst [vmem:[#allocation62_spill] sm:$0xff] %v8246_v43 }
 0x255   : > { %v3837_v54 = vmul.f32 %v2813_v19, %v1789_v16  ;;  %v5004_v31 = vadd.f32 %v3835_v51, %v3834_v26  ;;  %v1801_v49 = vmax.f32 %v777_v52, 1e-06  ;;  %v2822_v11 = vmul.f32 %v1798_v18, %v1798_v18  ;;  %v782_v52 = vld [vmem:[%s7536_s26 + $0x12a0] sm:$0xff] }
 0x256   : > { %v5011_v2 = vadd.f32 %v5010_v60, %v3841_v48  ;;  %v1794_v13 = vmax.f32 %v770_v44, 1e-06  ;;  %v2823_v41 = vmul.f32 %v1799_v50, %v1799_v50  ;;  %v2824_v0 = vmul.f32 %v1800_v4, %v1800_v4  ;;  %v783_v44 = vld [vmem:[%s7536_s26 + $0x12a8] sm:$0xff] }
 0x257   : > { %v5005_v5 = vadd.f32 %v5004_v31, %v3836_v32  ;;  %v1795_v34 = vmax.f32 %v771_v6, 1e-06  ;;  %v2825_v16 = vmul.f32 %v1801_v49, %v1801_v49  ;;  %v3846_v22 = vmul.f32 %v2822_v11, %v1798_v18  ;;  %v784_v11 = vld [vmem:[%s7536_s26 + $0x12b0] sm:$0xff]  ;;  %v785_v18 = vld [vmem:[%s7536_s26 + $0x12b8] sm:$0xff]  ;;  %v8252_v31 = vpop.xlane.xlu0 %4567 }
 0x258   : > { %5012 = vadd.xlane.f32.xlu1 %v5011_v2  ;;  %v1796_v1 = vmax.f32 %v772_v7, 1e-06  ;;  %v1797_v8 = vmax.f32 %v773_v63, 1e-06  ;;  %v3847_v48 = vmul.f32 %v2823_v41, %v1799_v50  ;;  %v3848_v19 = vmul.f32 %v2824_v0, %v1800_v4  ;;  %10068 = vst [vmem:[#allocation63_spill] sm:$0xff] %v8252_v31  ;;  %v778_v4 = vld [vmem:[%s7536_s26 + $0x1280] sm:$0xff]  ;;  %v8255_v7 = vpop.xlane.xlu1 %4582 }
 0x259   : > { %v5006_v12 = vadd.f32 %v5005_v5, %v3837_v54  ;;  %v2818_v28 = vmul.f32 %v1794_v13, %v1794_v13  ;;  %v2819_v21 = vmul.f32 %v1795_v34, %v1795_v34  ;;  %v3849_v60 = vmul.f32 %v2825_v16, %v1801_v49  ;;  %10069 = vst [vmem:[#allocation64_spill] sm:$0xff] %v8255_v7 }
 0x25a   : > { %v2820_v26 = vmul.f32 %v1796_v1, %v1796_v1  ;;  %v2821_v51 = vmul.f32 %v1797_v8, %v1797_v8  ;;  %v5019_v32 = vadd.f32 %v3847_v48, %v3846_v22  ;;  %v1806_v2 = vmax.f32 %v782_v52, 1e-06 }
 0x25b   : > { %5007 = vadd.xlane.f32.xlu0 %v5006_v12  ;;  %v3842_v6 = vmul.f32 %v2818_v28, %v1794_v13  ;;  %v3843_v54 = vmul.f32 %v2819_v21, %v1795_v34  ;;  %v1807_v5 = vmax.f32 %v783_v44, 1e-06  ;;  %v1808_v49 = vmax.f32 %v784_v11, 1e-06  ;;  %v779_v13 = vld [vmem:[%s7536_s26 + $0x1288] sm:$0xff]  ;;  %v780_v28 = vld [vmem:[%s7536_s26 + $0x1290] sm:$0xff]  ;;  %v8261_v44 = vpop.xlane.xlu0 %4577 }
 0x25c   : > { %v3844_v50 = vmul.f32 %v2820_v26, %v1796_v1  ;;  %v5020_v63 = vadd.f32 %v5019_v32, %v3848_v19  ;;  %v3845_v41 = vmul.f32 %v2821_v51, %v1797_v8  ;;  %v1809_v16 = vmax.f32 %v785_v18, 1e-06  ;;  %v781_v26 = vld [vmem:[%s7536_s26 + $0x1298] sm:$0xff]  ;;  %v790_v51 = vld [vmem:[%s7536_s26 + $0x12e0] sm:$0xff]  ;;  %10070 = vst [vmem:[#allocation65_spill] sm:$0xff] %v8261_v44  ;;  %v8263_v18 = vpop.xlane.xlu1 %4592 }
 0x25d   : > { %v5014_v0 = vadd.f32 %v3843_v54, %v3842_v6  ;;  %v2830_v12 = vmul.f32 %v1806_v2, %v1806_v2  ;;  %v2831_v48 = vmul.f32 %v1807_v5, %v1807_v5  ;;  %v1802_v43 = vmax.f32 %v778_v4, 1e-06  ;;  %10071 = vst [vmem:[#allocation66_spill] sm:$0xff] %v8263_v18  ;;  %v789_v44 = vld [vmem:[%s7536_s26 + $0x12d8] sm:$0xff] }
 0x25e   : > { %v5021_v22 = vadd.f32 %v5020_v63, %v3849_v60  ;;  %v2832_v1 = vmul.f32 %v1808_v49, %v1808_v49  ;;  %v2833_v21 = vmul.f32 %v1809_v16, %v1809_v16  ;;  %v1803_v8 = vmax.f32 %v779_v13, 1e-06  ;;  %v793_v13 = vld [vmem:[%s7536_s26 + $0x12f8] sm:$0xff] }
 0x25f   : > { %v5015_v34 = vadd.f32 %v5014_v0, %v3844_v50  ;;  %v3854_v19 = vmul.f32 %v2830_v12, %v1806_v2  ;;  %v3855_v52 = vmul.f32 %v2831_v48, %v1807_v5  ;;  %v1804_v11 = vmax.f32 %v780_v28, 1e-06  ;;  %v791_v2 = vld [vmem:[%s7536_s26 + $0x12e8] sm:$0xff]  ;;  %v792_v5 = vld [vmem:[%s7536_s26 + $0x12f0] sm:$0xff]  ;;  %v786_v48 = vld [vmem:[%s7536_s26 + $0x12c0] sm:$0xff] }
 0x260   : > { %5022 = vadd.xlane.f32.xlu1 %v5021_v22  ;;  %v3856_v60 = vmul.f32 %v2832_v1, %v1808_v49  ;;  %v3857_v6 = vmul.f32 %v2833_v21, %v1809_v16  ;;  %v1805_v50 = vmax.f32 %v781_v26, 1e-06  ;;  %v2826_v4 = vmul.f32 %v1802_v43, %v1802_v43  ;;  %v787_v21 = vld [vmem:[%s7536_s26 + $0x12c8] sm:$0xff]  ;;  %v788_v26 = vld [vmem:[%s7536_s26 + $0x12d0] sm:$0xff] }
 0x261   : > { %v5016_v32 = vadd.f32 %v5015_v34, %v3845_v41  ;;  %v5029_v54 = vadd.f32 %v3855_v52, %v3854_v19  ;;  %v2827_v63 = vmul.f32 %v1803_v8, %v1803_v8  ;;  %v2828_v0 = vmul.f32 %v1804_v11, %v1804_v11 }
 0x262   : > { %v1814_v22 = vmax.f32 %v790_v51, 1e-06  ;;  %v2829_v49 = vmul.f32 %v1805_v50, %v1805_v50  ;;  %v3850_v16 = vmul.f32 %v2826_v4, %v1802_v43  ;;  %v1815_v34 = vmax.f32 %v791_v2, 1e-06 }
 0x263   : > { %5017 = vadd.xlane.f32.xlu0 %v5016_v32  ;;  %v5030_v41 = vadd.f32 %v5029_v54, %v3856_v60  ;;  %v3851_v12 = vmul.f32 %v2827_v63, %v1803_v8  ;;  %v3852_v28 = vmul.f32 %v2828_v0, %v1804_v11  ;;  %v1816_v1 = vmax.f32 %v792_v5, 1e-06  ;;  %v8272_v32 = vpop.xlane.xlu0 %4587  ;;  %v8274_v8 = vpop.xlane.xlu1 %4602  ;;  %v798_v0 = vld [vmem:[%s7536_s26 + $0x1320] sm:$0xff] }
 0x264   : > { %v3853_v52 = vmul.f32 %v2829_v49, %v1805_v50  ;;  %v1817_v7 = vmax.f32 %v793_v13, 1e-06  ;;  %10072 = vst [vmem:[#allocation67_spill] sm:$0xff] %v8272_v32  ;;  %v2838_v31 = vmul.f32 %v1814_v22, %v1814_v22  ;;  %v2839_v51 = vmul.f32 %v1815_v34, %v1815_v34  ;;  %10073 = vst [vmem:[#allocation68_spill] sm:$0xff] %v8274_v8  ;;  %v801_v8 = vld [vmem:[%s7536_s26 + $0x1338] sm:$0xff] }
 0x265   : > { %v5031_v19 = vadd.f32 %v5030_v41, %v3857_v6  ;;  %v5024_v18 = vadd.f32 %v3851_v12, %v3850_v16  ;;  %v2840_v60 = vmul.f32 %v1816_v1, %v1816_v1  ;;  %v1810_v43 = vmax.f32 %v786_v48, 1e-06  ;;  %v799_v16 = vld [vmem:[%s7536_s26 + $0x1328] sm:$0xff]  ;;  %v797_v32 = vld [vmem:[%s7536_s26 + $0x1318] sm:$0xff] }
 0x266   : > { %v2841_v54 = vmul.f32 %v1817_v7, %v1817_v7  ;;  %v1811_v4 = vmax.f32 %v787_v21, 1e-06  ;;  %v1812_v6 = vmax.f32 %v788_v26, 1e-06  ;;  %v3862_v50 = vmul.f32 %v2838_v31, %v1814_v22 }
 0x267   : > { %5032 = vadd.xlane.f32.xlu1 %v5031_v19  ;;  %v5025_v11 = vadd.f32 %v5024_v18, %v3852_v28  ;;  %v3863_v63 = vmul.f32 %v2839_v51, %v1815_v34  ;;  %v3864_v2 = vmul.f32 %v2840_v60, %v1816_v1  ;;  %v1813_v5 = vmax.f32 %v789_v44, 1e-06  ;;  %v800_v28 = vld [vmem:[%s7536_s26 + $0x1330] sm:$0xff]  ;;  %v794_v44 = vld [vmem:[%s7536_s26 + $0x1300] sm:$0xff]  ;;  %v8281_v1 = vpop.xlane.xlu0 %4597  ;;  %v795_v51 = vld [vmem:[%s7536_s26 + $0x1308] sm:$0xff]  ;;  %v8284_v60 = vpop.xlane.xlu1 %4612 }
 0x268   : > { %v2834_v41 = vmul.f32 %v1810_v43, %v1810_v43  ;;  %v2835_v49 = vmul.f32 %v1811_v4, %v1811_v4  ;;  %v3865_v12 = vmul.f32 %v2841_v54, %v1817_v7  ;;  %v2836_v19 = vmul.f32 %v1812_v6, %v1812_v6  ;;  %10074 = vst [vmem:[#allocation69_spill] sm:$0xff] %v8281_v1 }
 0x269   : > { %v5026_v13 = vadd.f32 %v5025_v11, %v3853_v52  ;;  %v5039_v48 = vadd.f32 %v3863_v63, %v3862_v50  ;;  %v2837_v18 = vmul.f32 %v1813_v5, %v1813_v5  ;;  %v1822_v34 = vmax.f32 %v798_v0, 1e-06  ;;  %10075 = vst [vmem:[#allocation70_spill] sm:$0xff] %v8284_v60  ;;  %v796_v63 = vld [vmem:[%s7536_s26 + $0x1310] sm:$0xff] }
 0x26a   : > { %v3858_v31 = vmul.f32 %v2834_v41, %v1810_v43  ;;  %v3859_v22 = vmul.f32 %v2835_v49, %v1811_v4  ;;  %v3860_v26 = vmul.f32 %v2836_v19, %v1812_v6  ;;  %v1823_v52 = vmax.f32 %v799_v16, 1e-06 }
 0x26b   : > { %5027 = vadd.xlane.f32.xlu0 %v5026_v13  ;;  %v5040_v21 = vadd.f32 %v5039_v48, %v3864_v2  ;;  %v3861_v7 = vmul.f32 %v2837_v18, %v1813_v5  ;;  %v1824_v54 = vmax.f32 %v800_v28, 1e-06  ;;  %v1825_v50 = vmax.f32 %v801_v8, 1e-06  ;;  %v8288_v28 = vpop.xlane.xlu0 %4607 }
 0x26c   : > { %v5034_v11 = vadd.f32 %v3859_v22, %v3858_v31  ;;  %v2846_v3 = vmul.f32 %v1822_v34, %v1822_v34  ;;  %v2847_v43 = vmul.f32 %v1823_v52, %v1823_v52  ;;  %v1818_v4 = vmax.f32 %v794_v44, 1e-06  ;;  %10076 = vst [vmem:[#allocation71_spill] sm:$0xff] %v8288_v28 }
 0x26d   : > { %v5041_v13 = vadd.f32 %v5040_v21, %v3865_v12  ;;  %v2848_v41 = vmul.f32 %v1824_v54, %v1824_v54  ;;  %v2849_v49 = vmul.f32 %v1825_v50, %v1825_v50  ;;  %v1819_v2 = vmax.f32 %v795_v51, 1e-06  ;;  %v809_v51 = vld [vmem:[%s7536_s26 + $0x1378] sm:$0xff] }
 0x26e   : > { %v5035_v0 = vadd.f32 %v5034_v11, %v3860_v26  ;;  %v3870_v6 = vmul.f32 %v2846_v3, %v1822_v34  ;;  %v3871_v16 = vmul.f32 %v2847_v43, %v1823_v52  ;;  %v1820_v5 = vmax.f32 %v796_v63, 1e-06  ;;  %v806_v26 = vld [vmem:[%s7536_s26 + $0x1360] sm:$0xff]  ;;  %v807_v3 = vld [vmem:[%s7536_s26 + $0x1368] sm:$0xff]  ;;  %v808_v34 = vld [vmem:[%s7536_s26 + $0x1370] sm:$0xff]  ;;  %v8293_v52 = vpop.xlane.xlu1 %4622 }
 0x26f   : > { %5042 = vadd.xlane.f32.xlu1 %v5041_v13  ;;  %v1821_v48 = vmax.f32 %v797_v32, 1e-06  ;;  %v3872_v19 = vmul.f32 %v2848_v41, %v1824_v54  ;;  %v3873_v12 = vmul.f32 %v2849_v49, %v1825_v50  ;;  %v2842_v18 = vmul.f32 %v1818_v4, %v1818_v4  ;;  %10077 = vst [vmem:[#allocation72_spill] sm:$0xff] %v8293_v52  ;;  %v803_v63 = vld [vmem:[%s7536_s26 + $0x1348] sm:$0xff]  ;;  %v804_v13 = vld [vmem:[%s7536_s26 + $0x1350] sm:$0xff]  ;;  %v805_v43 = vld [vmem:[%s7536_s26 + $0x1358] sm:$0xff] }
 0x270   : > { %v5036_v8 = vadd.f32 %v5035_v0, %v3861_v7  ;;  %v5049_v31 = vadd.f32 %v3871_v16, %v3870_v6  ;;  %v2843_v22 = vmul.f32 %v1819_v2, %v1819_v2  ;;  %v2844_v44 = vmul.f32 %v1820_v5, %v1820_v5  ;;  %v802_v7 = vld [vmem:[%s7536_s26 + $0x1340] sm:$0xff] }
 0x271   : > { %v2845_v21 = vmul.f32 %v1821_v48, %v1821_v48  ;;  %v3866_v32 = vmul.f32 %v2842_v18, %v1818_v4  ;;  %v1830_v41 = vmax.f32 %v806_v26, 1e-06  ;;  %v1831_v49 = vmax.f32 %v807_v3, 1e-06 }
 0x272   : > { %5037 = vadd.xlane.f32.xlu0 %v5036_v8  ;;  %v5050_v11 = vadd.f32 %v5049_v31, %v3872_v19  ;;  %v3867_v54 = vmul.f32 %v2843_v22, %v1819_v2  ;;  %v3868_v50 = vmul.f32 %v2844_v44, %v1820_v5  ;;  %v1832_v6 = vmax.f32 %v808_v34, 1e-06  ;;  %v8300_v19 = vpop.xlane.xlu0 %4617  ;;  %v8302_v31 = vpop.xlane.xlu1 %4632 }
 0x273   : > { %v3869_v0 = vmul.f32 %v2845_v21, %v1821_v48  ;;  %v1833_v28 = vmax.f32 %v809_v51, 1e-06  ;;  %v1826_v60 = vmax.f32 %v802_v7, 1e-06  ;;  %v2854_v15 = vmul.f32 %v1830_v41, %v1830_v41  ;;  %10078 = vst [vmem:[#allocation73_spill] sm:$0xff] %v8300_v19  ;;  %10079 = vst [vmem:[#allocation74_spill] sm:$0xff] %v8302_v31 }
 0x274   : > { %v5051_v16 = vadd.f32 %v5050_v11, %v3873_v12  ;;  %v5044_v1 = vadd.f32 %v3867_v54, %v3866_v32  ;;  %v2855_v52 = vmul.f32 %v1831_v49, %v1831_v49  ;;  %v2856_v8 = vmul.f32 %v1832_v6, %v1832_v6  ;;  %v814_v32 = vld [vmem:[%s7536_s26 + $0x13a0] sm:$0xff]  ;;  %v815_v51 = vld [vmem:[%s7536_s26 + $0x13a8] sm:$0xff] }
 0x275   : > { %v1827_v4 = vmax.f32 %v803_v63, 1e-06  ;;  %v2857_v5 = vmul.f32 %v1833_v28, %v1833_v28  ;;  %v1828_v18 = vmax.f32 %v804_v13, 1e-06  ;;  %v1829_v48 = vmax.f32 %v805_v43, 1e-06 }
 0x276   : > { %5052 = vadd.xlane.f32.xlu1 %v5051_v16  ;;  %v5045_v2 = vadd.f32 %v5044_v1, %v3868_v50  ;;  %v3878_v12 = vmul.f32 %v2854_v15, %v1830_v41  ;;  %v3879_v22 = vmul.f32 %v2855_v52, %v1831_v49  ;;  %v3880_v44 = vmul.f32 %v2856_v8, %v1832_v6  ;;  %v816_v50 = vld [vmem:[%s7536_s26 + $0x13b0] sm:$0xff]  ;;  %v817_v63 = vld [vmem:[%s7536_s26 + $0x13b8] sm:$0xff]  ;;  %v810_v13 = vld [vmem:[%s7536_s26 + $0x1380] sm:$0xff]  ;;  %v8310_v6 = vpop.xlane.xlu0 %4627 }
 0x277   : > { %v2850_v21 = vmul.f32 %v1826_v60, %v1826_v60  ;;  %v2851_v3 = vmul.f32 %v1827_v4, %v1827_v4  ;;  %v2852_v34 = vmul.f32 %v1828_v18, %v1828_v18  ;;  %v3881_v7 = vmul.f32 %v2857_v5, %v1833_v28  ;;  %v811_v49 = vld [vmem:[%s7536_s26 + $0x1388] sm:$0xff]  ;;  %10080 = vst [vmem:[#allocation75_spill] sm:$0xff] %v8310_v6  ;;  %v812_v5 = vld [vmem:[%s7536_s26 + $0x1390] sm:$0xff] }
 0x278   : > { %v5046_v26 = vadd.f32 %v5045_v2, %v3869_v0  ;;  %v5059_v1 = vadd.f32 %v3879_v22, %v3878_v12  ;;  %v2853_v11 = vmul.f32 %v1829_v48, %v1829_v48  ;;  %v1838_v41 = vmax.f32 %v814_v32, 1e-06  ;;  %v8314_v12 = vpop.xlane.xlu1 %4642 }
 0x279   : > { %v3874_v54 = vmul.f32 %v2850_v21, %v1826_v60  ;;  %v3875_v15 = vmul.f32 %v2851_v3, %v1827_v4  ;;  %v3876_v52 = vmul.f32 %v2852_v34, %v1828_v18  ;;  %v1839_v0 = vmax.f32 %v815_v51, 1e-06  ;;  %v813_v60 = vld [vmem:[%s7536_s26 + $0x1398] sm:$0xff]  ;;  %10081 = vst [vmem:[#allocation76_spill] sm:$0xff] %v8314_v12 }
 0x27a   : > { %5047 = vadd.xlane.f32.xlu0 %v5046_v26  ;;  %v5060_v43 = vadd.f32 %v5059_v1, %v3880_v44  ;;  %v3877_v16 = vmul.f32 %v2853_v11, %v1829_v48  ;;  %v1840_v28 = vmax.f32 %v816_v50, 1e-06  ;;  %v1841_v2 = vmax.f32 %v817_v63, 1e-06 }
 0x27b   : > { %v5054_v8 = vadd.f32 %v3875_v15, %v3874_v54  ;;  %v2862_v21 = vmul.f32 %v1838_v41, %v1838_v41  ;;  %v2863_v26 = vmul.f32 %v1839_v0, %v1839_v0  ;;  %v1834_v4 = vmax.f32 %v810_v13, 1e-06 }
 0x27c   : > { %v5061_v22 = vadd.f32 %v5060_v43, %v3881_v7  ;;  %v2864_v3 = vmul.f32 %v1840_v28, %v1840_v28  ;;  %v2865_v44 = vmul.f32 %v1841_v2, %v1841_v2  ;;  %v1835_v34 = vmax.f32 %v811_v49, 1e-06  ;;  %v822_v43 = vld [vmem:[%s7536_s26 + $0x13e0] sm:$0xff]  ;;  %v823_v49 = vld [vmem:[%s7536_s26 + $0x13e8] sm:$0xff] }
 0x27d   : > { %v5055_v18 = vadd.f32 %v5054_v8, %v3876_v52  ;;  %v3886_v48 = vmul.f32 %v2862_v21, %v1838_v41  ;;  %v3887_v32 = vmul.f32 %v2863_v26, %v1839_v0  ;;  %v1836_v51 = vmax.f32 %v812_v5, 1e-06  ;;  %v824_v8 = vld [vmem:[%s7536_s26 + $0x13f0] sm:$0xff]  ;;  %v8319_v41 = vpop.xlane.xlu0 %4637  ;;  %v825_v5 = vld [vmem:[%s7536_s26 + $0x13f8] sm:$0xff]  ;;  %v819_v21 = vld [vmem:[%s7536_s26 + $0x13c8] sm:$0xff] }
 0x27e   : > { %5062 = vadd.xlane.f32.xlu1 %v5061_v22  ;;  %v1837_v1 = vmax.f32 %v813_v60, 1e-06  ;;  %v3888_v54 = vmul.f32 %v2864_v3, %v1840_v28  ;;  %v3889_v7 = vmul.f32 %v2865_v44, %v1841_v2  ;;  %v2858_v50 = vmul.f32 %v1834_v4, %v1834_v4  ;;  %10082 = vst [vmem:[#allocation77_spill] sm:$0xff] %v8319_v41  ;;  %v818_v60 = vld [vmem:[%s7536_s26 + $0x13c0] sm:$0xff]  ;;  %v820_v26 = vld [vmem:[%s7536_s26 + $0x13d0] sm:$0xff] }
 0x27f   : > { %v5056_v11 = vadd.f32 %v5055_v18, %v3877_v16  ;;  %v5069_v63 = vadd.f32 %v3887_v32, %v3886_v48  ;;  %v2859_v15 = vmul.f32 %v1835_v34, %v1835_v34  ;;  %v2860_v52 = vmul.f32 %v1836_v51, %v1836_v51  ;;  %v8323_v16 = vpop.xlane.xlu1 %4652  ;;  %v821_v18 = vld [vmem:[%s7536_s26 + $0x13d8] sm:$0xff] }
 0x280   : > { %v2861_v13 = vmul.f32 %v1837_v1, %v1837_v1  ;;  %v3882_v0 = vmul.f32 %v2858_v50, %v1834_v4  ;;  %10083 = vst [vmem:[#allocation78_spill] sm:$0xff] %v8323_v16  ;;  %v1846_v44 = vmax.f32 %v822_v43, 1e-06  ;;  %v1847_v48 = vmax.f32 %v823_v49, 1e-06 }
 0x281   : > { %5057 = vadd.xlane.f32.xlu0 %v5056_v11  ;;  %v5070_v28 = vadd.f32 %v5069_v63, %v3888_v54  ;;  %v3883_v2 = vmul.f32 %v2859_v15, %v1835_v34  ;;  %v3884_v22 = vmul.f32 %v2860_v52, %v1836_v51  ;;  %v1848_v32 = vmax.f32 %v824_v8, 1e-06 }
 0x282   : > { %v3885_v3 = vmul.f32 %v2861_v13, %v1837_v1  ;;  %v1849_v6 = vmax.f32 %v825_v5, 1e-06  ;;  %v1842_v41 = vmax.f32 %v818_v60, 1e-06  ;;  %v2870_v11 = vmul.f32 %v1846_v44, %v1846_v44  ;;  %v8328_v1 = vpop.xlane.xlu0 %4647 }
 0x283   : > { %v5071_v12 = vadd.f32 %v5070_v28, %v3889_v7  ;;  %v5064_v31 = vadd.f32 %v3883_v2, %v3882_v0  ;;  %v2871_v4 = vmul.f32 %v1847_v48, %v1847_v48  ;;  %v2872_v50 = vmul.f32 %v1848_v32, %v1848_v32  ;;  %10084 = vst [vmem:[#allocation79_spill] sm:$0xff] %v8328_v1  ;;  %v8330_v43 = vpop.xlane.xlu1 %4662 }
 0x284   : > { %v1843_v19 = vmax.f32 %v819_v21, 1e-06  ;;  %v2873_v51 = vmul.f32 %v1849_v6, %v1849_v6  ;;  %v1844_v54 = vmax.f32 %v820_v26, 1e-06  ;;  %v1845_v63 = vmax.f32 %v821_v18, 1e-06 }
 0x285   : > { %5072 = vadd.xlane.f32.xlu1 %v5071_v12  ;;  %v5065_v34 = vadd.f32 %v5064_v31, %v3884_v22  ;;  %v3894_v15 = vmul.f32 %v2870_v11, %v1846_v44  ;;  %v3895_v7 = vmul.f32 %v2871_v4, %v1847_v48  ;;  %v3896_v52 = vmul.f32 %v2872_v50, %v1848_v32  ;;  %v830_v12 = vld [vmem:[%s7536_s26 + $0x1420] sm:$0xff]  ;;  %v831_v31 = vld [vmem:[%s7536_s26 + $0x1428] sm:$0xff]  ;;  %v832_v22 = vld [vmem:[%s7536_s26 + $0x1430] sm:$0xff] }
 0x286   : > { %v2866_v13 = vmul.f32 %v1842_v41, %v1842_v41  ;;  %10085 = vst [vmem:[#allocation80_spill] sm:$0xff] %v8330_v43  ;;  %v2867_v8 = vmul.f32 %v1843_v19, %v1843_v19  ;;  %v2868_v0 = vmul.f32 %v1844_v54, %v1844_v54  ;;  %v3897_v5 = vmul.f32 %v2873_v51, %v1849_v6  ;;  %v833_v21 = vld [vmem:[%s7536_s26 + $0x1438] sm:$0xff]  ;;  %v826_v44 = vld [vmem:[%s7536_s26 + $0x1400] sm:$0xff]  ;;  %v827_v11 = vld [vmem:[%s7536_s26 + $0x1408] sm:$0xff] }
 0x287   : > { %v5066_v49 = vadd.f32 %v5065_v34, %v3885_v3  ;;  %v5079_v60 = vadd.f32 %v3895_v7, %v3894_v15  ;;  %v2869_v28 = vmul.f32 %v1845_v63, %v1845_v63  ;;  %v1854_v32 = vmax.f32 %v830_v12, 1e-06  ;;  %v828_v6 = vld [vmem:[%s7536_s26 + $0x1410] sm:$0xff]  ;;  %v829_v51 = vld [vmem:[%s7536_s26 + $0x1418] sm:$0xff]  ;;  %v8340_v15 = vpop.xlane.xlu0 %4657 }
 0x288   : > { %v3890_v2 = vmul.f32 %v2866_v13, %v1842_v41  ;;  %v3891_v26 = vmul.f32 %v2867_v8, %v1843_v19  ;;  %v3892_v18 = vmul.f32 %v2868_v0, %v1844_v54  ;;  %v1855_v3 = vmax.f32 %v831_v31, 1e-06  ;;  %10086 = vst [vmem:[#allocation81_spill] sm:$0xff] %v8340_v15 }
 0x289   : > { %5067 = vadd.xlane.f32.xlu0 %v5066_v49  ;;  %v5080_v48 = vadd.f32 %v5079_v60, %v3896_v52  ;;  %v3893_v4 = vmul.f32 %v2869_v28, %v1845_v63  ;;  %v1856_v34 = vmax.f32 %v832_v22, 1e-06  ;;  %v1857_v43 = vmax.f32 %v833_v21, 1e-06  ;;  %v8342_v49 = vpop.xlane.xlu1 %4672 }
 0x28a   : > { %v5074_v50 = vadd.f32 %v3891_v26, %v3890_v2  ;;  %v2878_v7 = vmul.f32 %v1854_v32, %v1854_v32  ;;  %v2879_v13 = vmul.f32 %v1855_v3, %v1855_v3  ;;  %v1850_v16 = vmax.f32 %v826_v44, 1e-06  ;;  %10087 = vst [vmem:[#allocation82_spill] sm:$0xff] %v8342_v49  ;;  %v838_v44 = vld [vmem:[%s7536_s26 + $0x1460] sm:$0xff] }
 0x28b   : > { %v5081_v41 = vadd.f32 %v5080_v48, %v3897_v5  ;;  %v2880_v54 = vmul.f32 %v1856_v34, %v1856_v34  ;;  %v2881_v52 = vmul.f32 %v1857_v43, %v1857_v43  ;;  %v1851_v8 = vmax.f32 %v827_v11, 1e-06  ;;  %v839_v48 = vld [vmem:[%s7536_s26 + $0x1468] sm:$0xff]  ;;  %v840_v11 = vld [vmem:[%s7536_s26 + $0x1470] sm:$0xff] }
 0x28c   : > { %v5075_v19 = vadd.f32 %v5074_v50, %v3892_v18  ;;  %v3902_v63 = vmul.f32 %v2878_v7, %v1854_v32  ;;  %v3903_v0 = vmul.f32 %v2879_v13, %v1855_v3  ;;  %v1852_v12 = vmax.f32 %v828_v6, 1e-06  ;;  %v841_v3 = vld [vmem:[%s7536_s26 + $0x1478] sm:$0xff]  ;;  %v834_v50 = vld [vmem:[%s7536_s26 + $0x1440] sm:$0xff]  ;;  %v8349_v6 = vpop.xlane.xlu0 %4667 }
 0x28d   : > { %5082 = vadd.xlane.f32.xlu1 %v5081_v41  ;;  %v1853_v31 = vmax.f32 %v829_v51, 1e-06  ;;  %v3904_v60 = vmul.f32 %v2880_v54, %v1856_v34  ;;  %v3905_v28 = vmul.f32 %v2881_v52, %v1857_v43  ;;  %v2874_v2 = vmul.f32 %v1850_v16, %v1850_v16  ;;  %10088 = vst [vmem:[#allocation83_spill] sm:$0xff] %v8349_v6  ;;  %v835_v51 = vld [vmem:[%s7536_s26 + $0x1448] sm:$0xff]  ;;  %v836_v41 = vld [vmem:[%s7536_s26 + $0x1450] sm:$0xff]  ;;  %v837_v7 = vld [vmem:[%s7536_s26 + $0x1458] sm:$0xff]  ;;  %v8354_v13 = vpop.xlane.xlu1 %4682 }
 0x28e   : > { %v5076_v5 = vadd.f32 %v5075_v19, %v3893_v4  ;;  %v5089_v22 = vadd.f32 %v3903_v0, %v3902_v63  ;;  %v2875_v21 = vmul.f32 %v1851_v8, %v1851_v8  ;;  %v2876_v26 = vmul.f32 %v1852_v12, %v1852_v12  ;;  %10089 = vst [vmem:[#allocation84_spill] sm:$0xff] %v8354_v13 }
 0x28f   : > { %v2877_v18 = vmul.f32 %v1853_v31, %v1853_v31  ;;  %v3898_v32 = vmul.f32 %v2874_v2, %v1850_v16  ;;  %v1862_v54 = vmax.f32 %v838_v44, 1e-06  ;;  %v1863_v52 = vmax.f32 %v839_v48, 1e-06 }
 0x290   : > { %5077 = vadd.xlane.f32.xlu0 %v5076_v5  ;;  %v5090_v4 = vadd.f32 %v5089_v22, %v3904_v60  ;;  %v3899_v34 = vmul.f32 %v2875_v21, %v1851_v8  ;;  %v3900_v43 = vmul.f32 %v2876_v26, %v1852_v12  ;;  %v1864_v63 = vmax.f32 %v840_v11, 1e-06  ;;  %v8356_v44 = vpop.xlane.xlu0 %4677 }
 0x291   : > { %v3901_v19 = vmul.f32 %v2877_v18, %v1853_v31  ;;  %v1865_v5 = vmax.f32 %v841_v3, 1e-06  ;;  %v1858_v16 = vmax.f32 %v834_v50, 1e-06  ;;  %v2886_v2 = vmul.f32 %v1862_v54, %v1862_v54  ;;  %10090 = vst [vmem:[#allocation85_spill] sm:$0xff] %v8356_v44  ;;  %v846_v3 = vld [vmem:[%s7536_s26 + $0x14a0] sm:$0xff] }
 0x292   : > { %v5091_v0 = vadd.f32 %v5090_v4, %v3905_v28  ;;  %v5084_v49 = vadd.f32 %v3899_v34, %v3898_v32  ;;  %v2887_v15 = vmul.f32 %v1863_v52, %v1863_v52  ;;  %v2888_v6 = vmul.f32 %v1864_v63, %v1864_v63  ;;  %v847_v50 = vld [vmem:[%s7536_s26 + $0x14a8] sm:$0xff]  ;;  %v8360_v4 = vpop.xlane.xlu1 %4692  ;;  %v856_v44 = vld [vmem:[%s7536_s26 + $0x14f0] sm:$0xff] }
 0x293   : > { %v1859_v8 = vmax.f32 %v835_v51, 1e-06  ;;  %v2889_v60 = vmul.f32 %v1865_v5, %v1865_v5  ;;  %v1860_v22 = vmax.f32 %v836_v41, 1e-06  ;;  %v1861_v21 = vmax.f32 %v837_v7, 1e-06 }
 0x294   : > { %5092 = vadd.xlane.f32.xlu1 %v5091_v0  ;;  %v5085_v12 = vadd.f32 %v5084_v49, %v3900_v43  ;;  %v3910_v31 = vmul.f32 %v2886_v2, %v1862_v54  ;;  %v3911_v26 = vmul.f32 %v2887_v15, %v1863_v52  ;;  %v3912_v18 = vmul.f32 %v2888_v6, %v1864_v63  ;;  %v848_v41 = vld [vmem:[%s7536_s26 + $0x14b0] sm:$0xff]  ;;  %v849_v7 = vld [vmem:[%s7536_s26 + $0x14b8] sm:$0xff]  ;;  %v8367_v13 = vpop.xlane.xlu0 %4687 }
 0x295   : > { %v2882_v28 = vmul.f32 %v1858_v16, %v1858_v16  ;;  %v2883_v11 = vmul.f32 %v1859_v8, %v1859_v8  ;;  %v2884_v32 = vmul.f32 %v1860_v22, %v1860_v22  ;;  %10091 = vst [vmem:[#allocation86_spill] sm:$0xff] %v8360_v4  ;;  %v3913_v34 = vmul.f32 %v2889_v60, %v1865_v5  ;;  %v842_v5 = vld [vmem:[%s7536_s26 + $0x1480] sm:$0xff]  ;;  %v843_v60 = vld [vmem:[%s7536_s26 + $0x1488] sm:$0xff] }
 0x296   : > { %v5086_v48 = vadd.f32 %v5085_v12, %v3901_v19  ;;  %v5099_v49 = vadd.f32 %v3911_v26, %v3910_v31  ;;  %v2885_v43 = vmul.f32 %v1861_v21, %v1861_v21  ;;  %v1870_v19 = vmax.f32 %v846_v3, 1e-06  ;;  %10092 = vst [vmem:[#allocation87_spill] sm:$0xff] %v8367_v13 }
 0x297   : > { %v3906_v51 = vmul.f32 %v2882_v28, %v1858_v16  ;;  %v3907_v15 = vmul.f32 %v2883_v11, %v1859_v8  ;;  %v3908_v6 = vmul.f32 %v2884_v32, %v1860_v22  ;;  %v1871_v52 = vmax.f32 %v847_v50, 1e-06  ;;  %v844_v28 = vld [vmem:[%s7536_s26 + $0x1490] sm:$0xff]  ;;  %v8370_v11 = vpop.xlane.xlu1 %4702 }
 0x298   : > { %5087 = vadd.xlane.f32.xlu0 %v5086_v48  ;;  %v5100_v54 = vadd.f32 %v5099_v49, %v3912_v18  ;;  %v3909_v63 = vmul.f32 %v2885_v43, %v1861_v21  ;;  %v1872_v2 = vmax.f32 %v848_v41, 1e-06  ;;  %v1873_v12 = vmax.f32 %v849_v7, 1e-06  ;;  %v845_v18 = vld [vmem:[%s7536_s26 + $0x1498] sm:$0xff]  ;;  %10093 = vst [vmem:[#allocation88_spill] sm:$0xff] %v8370_v11 }
 0x299   : > { %v5094_v0 = vadd.f32 %v3907_v15, %v3906_v51  ;;  %v2894_v26 = vmul.f32 %v1870_v19, %v1870_v19  ;;  %v2895_v16 = vmul.f32 %v1871_v52, %v1871_v52  ;;  %v1866_v3 = vmax.f32 %v842_v5, 1e-06  ;;  %v861_v11 = vld [vmem:[%s7536_s26 + $0x1518] sm:$0xff] }
 0x29a   : > { %v5101_v31 = vadd.f32 %v5100_v54, %v3913_v34  ;;  %v2896_v8 = vmul.f32 %v1872_v2, %v1872_v2  ;;  %v2897_v22 = vmul.f32 %v1873_v12, %v1873_v12  ;;  %v1867_v50 = vmax.f32 %v843_v60, 1e-06  ;;  %v854_v34 = vld [vmem:[%s7536_s26 + $0x14e0] sm:$0xff] }
 0x29b   : > { %v5095_v48 = vadd.f32 %v5094_v0, %v3908_v6  ;;  %v3918_v21 = vmul.f32 %v2894_v26, %v1870_v19  ;;  %v3919_v32 = vmul.f32 %v2895_v16, %v1871_v52  ;;  %v1868_v41 = vmax.f32 %v844_v28, 1e-06  ;;  %v855_v0 = vld [vmem:[%s7536_s26 + $0x14e8] sm:$0xff]  ;;  %v857_v52 = vld [vmem:[%s7536_s26 + $0x14f8] sm:$0xff]  ;;  %v8377_v26 = vpop.xlane.xlu0 %4697 }
 0x29c   : > { %5102 = vadd.xlane.f32.xlu1 %v5101_v31  ;;  %v3920_v43 = vmul.f32 %v2896_v8, %v1872_v2  ;;  %v3921_v51 = vmul.f32 %v2897_v22, %v1873_v12  ;;  %v1869_v15 = vmax.f32 %v845_v18, 1e-06  ;;  %v2890_v6 = vmul.f32 %v1866_v3, %v1866_v3  ;;  %v850_v12 = vld [vmem:[%s7536_s26 + $0x14c0] sm:$0xff]  ;;  %10094 = vst [vmem:[#allocation89_spill] sm:$0xff] %v8377_v26  ;;  %v851_v8 = vld [vmem:[%s7536_s26 + $0x14c8] sm:$0xff]  ;;  %v852_v22 = vld [vmem:[%s7536_s26 + $0x14d0] sm:$0xff]  ;;  %v8381_v18 = vpop.xlane.xlu1 %4712 }
 0x29d   : > { %v5096_v49 = vadd.f32 %v5095_v48, %v3909_v63  ;;  %v5109_v7 = vadd.f32 %v3919_v32, %v3918_v21  ;;  %v2891_v54 = vmul.f32 %v1867_v50, %v1867_v50  ;;  %v2892_v19 = vmul.f32 %v1868_v41, %v1868_v41  ;;  %10095 = vst [vmem:[#allocation90_spill] sm:$0xff] %v8381_v18 }
 0x29e   : > { %v1878_v31 = vmax.f32 %v854_v34, 1e-06  ;;  %v2893_v60 = vmul.f32 %v1869_v15, %v1869_v15  ;;  %v3914_v63 = vmul.f32 %v2890_v6, %v1866_v3  ;;  %v1879_v28 = vmax.f32 %v855_v0, 1e-06 }
 0x29f   : > { %5097 = vadd.xlane.f32.xlu0 %v5096_v49  ;;  %v5110_v5 = vadd.f32 %v5109_v7, %v3920_v43  ;;  %v3915_v2 = vmul.f32 %v2891_v54, %v1867_v50  ;;  %v3916_v16 = vmul.f32 %v2892_v19, %v1868_v41  ;;  %v1880_v48 = vmax.f32 %v856_v44, 1e-06  ;;  %v853_v43 = vld [vmem:[%s7536_s26 + $0x14d8] sm:$0xff]  ;;  %v8386_v18 = vpop.xlane.xlu0 %4707 }
 0x2a0   : > { %v3917_v32 = vmul.f32 %v2893_v60, %v1869_v15  ;;  %v1881_v34 = vmax.f32 %v857_v52, 1e-06  ;;  %v2902_v7 = vmul.f32 %v1878_v31, %v1878_v31  ;;  %v2903_v1 = vmul.f32 %v1879_v28, %v1879_v28  ;;  %10096 = vst [vmem:[#allocation91_spill] sm:$0xff] %v8386_v18 }
 0x2a1   : > { %v5111_v21 = vadd.f32 %v5110_v5, %v3921_v51  ;;  %v5104_v49 = vadd.f32 %v3915_v2, %v3914_v63  ;;  %v2904_v3 = vmul.f32 %v1880_v48, %v1880_v48  ;;  %v1874_v50 = vmax.f32 %v850_v12, 1e-06  ;;  %v862_v5 = vld [vmem:[%s7536_s26 + $0x1520] sm:$0xff]  ;;  %v863_v2 = vld [vmem:[%s7536_s26 + $0x1528] sm:$0xff] }
 0x2a2   : > { %v2905_v41 = vmul.f32 %v1881_v34, %v1881_v34  ;;  %v1875_v54 = vmax.f32 %v851_v8, 1e-06  ;;  %v1876_v44 = vmax.f32 %v852_v22, 1e-06  ;;  %v3926_v0 = vmul.f32 %v2902_v7, %v1878_v31  ;;  %v865_v22 = vld [vmem:[%s7536_s26 + $0x1538] sm:$0xff] }
 0x2a3   : > { %5112 = vadd.xlane.f32.xlu1 %v5111_v21  ;;  %v5105_v6 = vadd.f32 %v5104_v49, %v3916_v16  ;;  %v3927_v19 = vmul.f32 %v2903_v1, %v1879_v28  ;;  %v3928_v51 = vmul.f32 %v2904_v3, %v1880_v48  ;;  %v1877_v15 = vmax.f32 %v853_v43, 1e-06  ;;  %v864_v49 = vld [vmem:[%s7536_s26 + $0x1530] sm:$0xff]  ;;  %v8390_v1 = vpop.xlane.xlu1 %4722 }
 0x2a4   : > { %v2898_v52 = vmul.f32 %v1874_v50, %v1874_v50  ;;  %v2899_v63 = vmul.f32 %v1875_v54, %v1875_v54  ;;  %v3929_v12 = vmul.f32 %v2905_v41, %v1881_v34  ;;  %v2900_v21 = vmul.f32 %v1876_v44, %v1876_v44  ;;  %10097 = vst [vmem:[#allocation92_spill] sm:$0xff] %v8390_v1 }
 0x2a5   : > { %v5106_v60 = vadd.f32 %v5105_v6, %v3917_v32  ;;  %v5119_v16 = vadd.f32 %v3927_v19, %v3926_v0  ;;  %v2901_v8 = vmul.f32 %v1877_v15, %v1877_v15  ;;  %v1886_v48 = vmax.f32 %v862_v5, 1e-06  ;;  %v858_v32 = vld [vmem:[%s7536_s26 + $0x1500] sm:$0xff]  ;;  %v859_v6 = vld [vmem:[%s7536_s26 + $0x1508] sm:$0xff]  ;;  %v860_v19 = vld [vmem:[%s7536_s26 + $0x1510] sm:$0xff]  ;;  %v8396_v5 = vpop.xlane.xlu0 %4717 }
 0x2a6   : > { %v3922_v31 = vmul.f32 %v2898_v52, %v1874_v50  ;;  %v3923_v28 = vmul.f32 %v2899_v63, %v1875_v54  ;;  %v3924_v7 = vmul.f32 %v2900_v21, %v1876_v44  ;;  %v1887_v3 = vmax.f32 %v863_v2, 1e-06  ;;  %10098 = vst [vmem:[#allocation93_spill] sm:$0xff] %v8396_v5 }
 0x2a7   : > { %5107 = vadd.xlane.f32.xlu0 %v5106_v60  ;;  %v5120_v43 = vadd.f32 %v5119_v16, %v3928_v51  ;;  %v3925_v18 = vmul.f32 %v2901_v8, %v1877_v15  ;;  %v1888_v41 = vmax.f32 %v864_v49, 1e-06  ;;  %v1889_v0 = vmax.f32 %v865_v22, 1e-06  ;;  %v8398_v63 = vpop.xlane.xlu1 %4732 }
 0x2a8   : > { %v5114_v34 = vadd.f32 %v3923_v28, %v3922_v31  ;;  %v2910_v13 = vmul.f32 %v1886_v48, %v1886_v48  ;;  %v2911_v4 = vmul.f32 %v1887_v3, %v1887_v3  ;;  %v1882_v9 = vmax.f32 %v858_v32, 1e-06  ;;  %10099 = vst [vmem:[#allocation94_spill] sm:$0xff] %v8398_v63  ;;  %v870_v31 = vld [vmem:[%s7536_s26 + $0x1560] sm:$0xff] }
 0x2a9   : > { %v5121_v26 = vadd.f32 %v5120_v43, %v3929_v12  ;;  %v2912_v60 = vmul.f32 %v1888_v41, %v1888_v41  ;;  %v2913_v50 = vmul.f32 %v1889_v0, %v1889_v0  ;;  %v1883_v54 = vmax.f32 %v859_v6, 1e-06 }
 0x2aa   : > { %v5115_v1 = vadd.f32 %v5114_v34, %v3924_v7  ;;  %v3934_v44 = vmul.f32 %v2910_v13, %v1886_v48  ;;  %v3935_v51 = vmul.f32 %v2911_v4, %v1887_v3  ;;  %v1884_v15 = vmax.f32 %v860_v19, 1e-06  ;;  %v871_v13 = vld [vmem:[%s7536_s26 + $0x1568] sm:$0xff]  ;;  %v872_v4 = vld [vmem:[%s7536_s26 + $0x1570] sm:$0xff]  ;;  %v866_v48 = vld [vmem:[%s7536_s26 + $0x1540] sm:$0xff]  ;;  %v8408_v19 = vpop.xlane.xlu0 %4727 }
 0x2ab   : > { %5122 = vadd.xlane.f32.xlu1 %v5121_v26  ;;  %v1885_v52 = vmax.f32 %v861_v11, 1e-06  ;;  %v3936_v12 = vmul.f32 %v2912_v60, %v1888_v41  ;;  %v3937_v16 = vmul.f32 %v2913_v50, %v1889_v0  ;;  %v2906_v21 = vmul.f32 %v1882_v9, %v1882_v9  ;;  %v873_v11 = vld [vmem:[%s7536_s26 + $0x1578] sm:$0xff]  ;;  %v868_v7 = vld [vmem:[%s7536_s26 + $0x1550] sm:$0xff]  ;;  %10100 = vst [vmem:[#allocation95_spill] sm:$0xff] %v8408_v19 }
 0x2ac   : > { %v5116_v2 = vadd.f32 %v5115_v1, %v3925_v18  ;;  %v5129_v8 = vadd.f32 %v3935_v51, %v3934_v44  ;;  %v2907_v49 = vmul.f32 %v1883_v54, %v1883_v54  ;;  %v2908_v22 = vmul.f32 %v1884_v15, %v1884_v15  ;;  %v867_v1 = vld [vmem:[%s7536_s26 + $0x1548] sm:$0xff]  ;;  %v869_v3 = vld [vmem:[%s7536_s26 + $0x1558] sm:$0xff] }
 0x2ad   : > { %v2909_v26 = vmul.f32 %v1885_v52, %v1885_v52  ;;  %v3930_v28 = vmul.f32 %v2906_v21, %v1882_v9  ;;  %v1894_v34 = vmax.f32 %v870_v31, 1e-06  ;;  %v1895_v41 = vmax.f32 %v871_v13, 1e-06 }
 0x2ae   : > { %5117 = vadd.xlane.f32.xlu0 %v5116_v2  ;;  %v5130_v32 = vadd.f32 %v5129_v8, %v3936_v12  ;;  %v3931_v43 = vmul.f32 %v2907_v49, %v1883_v54  ;;  %v3932_v18 = vmul.f32 %v2908_v22, %v1884_v15  ;;  %v1896_v0 = vmax.f32 %v872_v4, 1e-06  ;;  %v8410_v2 = vpop.xlane.xlu1 %4742 }
 0x2af   : > { %v3933_v6 = vmul.f32 %v2909_v26, %v1885_v52  ;;  %v1897_v44 = vmax.f32 %v873_v11, 1e-06  ;;  %v1890_v51 = vmax.f32 %v866_v48, 1e-06  ;;  %10101 = vst [vmem:[#allocation96_spill] sm:$0xff] %v8410_v2  ;;  %v2918_v9 = vmul.f32 %v1894_v34, %v1894_v34  ;;  %v878_v11 = vld [vmem:[%s7536_s26 + $0x15a0] sm:$0xff] }
 0x2b0   : > { %v5131_v60 = vadd.f32 %v5130_v32, %v3937_v16  ;;  %v5124_v50 = vadd.f32 %v3931_v43, %v3930_v28  ;;  %v2919_v12 = vmul.f32 %v1895_v41, %v1895_v41  ;;  %v2920_v54 = vmul.f32 %v1896_v0, %v1896_v0  ;;  %v879_v48 = vld [vmem:[%s7536_s26 + $0x15a8] sm:$0xff] }
 0x2b1   : > { %v1891_v15 = vmax.f32 %v867_v1, 1e-06  ;;  %v2921_v52 = vmul.f32 %v1897_v44, %v1897_v44  ;;  %v1892_v8 = vmax.f32 %v868_v7, 1e-06  ;;  %v1893_v49 = vmax.f32 %v869_v3, 1e-06  ;;  %v8416_v3 = vpop.xlane.xlu0 %4737 }
 0x2b2   : > { %5132 = vadd.xlane.f32.xlu1 %v5131_v60  ;;  %v5125_v21 = vadd.f32 %v5124_v50, %v3932_v18  ;;  %v3942_v22 = vmul.f32 %v2918_v9, %v1894_v34  ;;  %v3943_v16 = vmul.f32 %v2919_v12, %v1895_v41  ;;  %v3944_v26 = vmul.f32 %v2920_v54, %v1896_v0  ;;  %v880_v60 = vld [vmem:[%s7536_s26 + $0x15b0] sm:$0xff]  ;;  %v881_v7 = vld [vmem:[%s7536_s26 + $0x15b8] sm:$0xff]  ;;  %v874_v0 = vld [vmem:[%s7536_s26 + $0x1580] sm:$0xff] }
 0x2b3   : > { %v2914_v31 = vmul.f32 %v1890_v51, %v1890_v51  ;;  %v2915_v4 = vmul.f32 %v1891_v15, %v1891_v15  ;;  %v2916_v28 = vmul.f32 %v1892_v8, %v1892_v8  ;;  %v3945_v32 = vmul.f32 %v2921_v52, %v1897_v44  ;;  %10102 = vst [vmem:[#allocation97_spill] sm:$0xff] %v8416_v3  ;;  %v875_v54 = vld [vmem:[%s7536_s26 + $0x1588] sm:$0xff] }
 0x2b4   : > { %v5126_v13 = vadd.f32 %v5125_v21, %v3933_v6  ;;  %v5139_v43 = vadd.f32 %v3943_v16, %v3942_v22  ;;  %v2917_v1 = vmul.f32 %v1893_v49, %v1893_v49  ;;  %v8419_v6 = vpop.xlane.xlu1 %4752  ;;  %v1902_v9 = vmax.f32 %v878_v11, 1e-06  ;;  %v876_v22 = vld [vmem:[%s7536_s26 + $0x1590] sm:$0xff]  ;;  %v877_v16 = vld [vmem:[%s7536_s26 + $0x1598] sm:$0xff] }
 0x2b5   : > { %v3938_v18 = vmul.f32 %v2914_v31, %v1890_v51  ;;  %v3939_v34 = vmul.f32 %v2915_v4, %v1891_v15  ;;  %v3940_v41 = vmul.f32 %v2916_v28, %v1892_v8  ;;  %10103 = vst [vmem:[#allocation98_spill] sm:$0xff] %v8419_v6  ;;  %v1903_v12 = vmax.f32 %v879_v48, 1e-06  ;;  %v8424_v48 = vpop.xlane.xlu0 %4747 }
 0x2b6   : > { %5127 = vadd.xlane.f32.xlu0 %v5126_v13  ;;  %v5140_v50 = vadd.f32 %v5139_v43, %v3944_v26  ;;  %v3941_v44 = vmul.f32 %v2917_v1, %v1893_v49  ;;  %v1904_v52 = vmax.f32 %v880_v60, 1e-06  ;;  %v1905_v51 = vmax.f32 %v881_v7, 1e-06  ;;  %10104 = vst [vmem:[#allocation99_spill] sm:$0xff] %v8424_v48 }
 0x2b7   : > { %v5134_v21 = vadd.f32 %v3939_v34, %v3938_v18  ;;  %v2926_v2 = vmul.f32 %v1902_v9, %v1902_v9  ;;  %v2927_v63 = vmul.f32 %v1903_v12, %v1903_v12  ;;  %v1898_v3 = vmax.f32 %v874_v0, 1e-06  ;;  %v887_v0 = vld [vmem:[%s7536_s26 + $0x15e8] sm:$0xff] }
 0x2b8   : > { %v5141_v31 = vadd.f32 %v5140_v50, %v3945_v32  ;;  %v2928_v15 = vmul.f32 %v1904_v52, %v1904_v52  ;;  %v2929_v8 = vmul.f32 %v1905_v51, %v1905_v51  ;;  %v1899_v4 = vmax.f32 %v875_v54, 1e-06  ;;  %v8426_v60 = vpop.xlane.xlu1 %4762  ;;  %v888_v50 = vld [vmem:[%s7536_s26 + $0x15f0] sm:$0xff]  ;;  %v882_v54 = vld [vmem:[%s7536_s26 + $0x15c0] sm:$0xff] }
 0x2b9   : > { %v5135_v13 = vadd.f32 %v5134_v21, %v3940_v41  ;;  %v3950_v26 = vmul.f32 %v2926_v2, %v1902_v9  ;;  %v3951_v28 = vmul.f32 %v2927_v63, %v1903_v12  ;;  %v1900_v49 = vmax.f32 %v876_v22, 1e-06  ;;  %10105 = vst [vmem:[#allocation100_spill] sm:$0xff] %v8426_v60  ;;  %v886_v63 = vld [vmem:[%s7536_s26 + $0x15e0] sm:$0xff]  ;;  %v889_v12 = vld [vmem:[%s7536_s26 + $0x15f8] sm:$0xff]  ;;  %v884_v22 = vld [vmem:[%s7536_s26 + $0x15d0] sm:$0xff]  ;;  %v8436_v48 = vpop.xlane.xlu0 %4757 }
 0x2ba   : > { %5142 = vadd.xlane.f32.xlu1 %v5141_v31  ;;  %v1901_v11 = vmax.f32 %v877_v16, 1e-06  ;;  %v3952_v43 = vmul.f32 %v2928_v15, %v1904_v52  ;;  %v3953_v1 = vmul.f32 %v2929_v8, %v1905_v51  ;;  %v2922_v18 = vmul.f32 %v1898_v3, %v1898_v3  ;;  %v883_v51 = vld [vmem:[%s7536_s26 + $0x15c8] sm:$0xff]  ;;  %v885_v16 = vld [vmem:[%s7536_s26 + $0x15d8] sm:$0xff]  ;;  %10106 = vst [vmem:[#allocation101_spill] sm:$0xff] %v8436_v48 }
 0x2bb   : > { %v5136_v32 = vadd.f32 %v5135_v13, %v3941_v44  ;;  %v5149_v7 = vadd.f32 %v3951_v28, %v3950_v26  ;;  %v2923_v34 = vmul.f32 %v1899_v4, %v1899_v4  ;;  %v2924_v2 = vmul.f32 %v1900_v49, %v1900_v49 }
 0x2bc   : > { %v2925_v41 = vmul.f32 %v1901_v11, %v1901_v11  ;;  %v3946_v9 = vmul.f32 %v2922_v18, %v1898_v3  ;;  %v1910_v13 = vmax.f32 %v886_v63, 1e-06  ;;  %v1911_v15 = vmax.f32 %v887_v0, 1e-06 }
 0x2bd   : > { %5137 = vadd.xlane.f32.xlu0 %v5136_v32  ;;  %v5150_v44 = vadd.f32 %v5149_v7, %v3952_v43  ;;  %v3947_v21 = vmul.f32 %v2923_v34, %v1899_v4  ;;  %v3948_v52 = vmul.f32 %v2924_v2, %v1900_v49  ;;  %v1912_v8 = vmax.f32 %v888_v50, 1e-06  ;;  %v8438_v49 = vpop.xlane.xlu1 %4772 }
 0x2be   : > { %v3949_v31 = vmul.f32 %v2925_v41, %v1901_v11  ;;  %v1913_v60 = vmax.f32 %v889_v12, 1e-06  ;;  %v1906_v6 = vmax.f32 %v882_v54, 1e-06  ;;  %v2934_v32 = vmul.f32 %v1910_v13, %v1910_v13  ;;  %10107 = vst [vmem:[#allocation102_spill] sm:$0xff] %v8438_v49  ;;  %v894_v12 = vld [vmem:[%s7536_s26 + $0x1620] sm:$0xff] }
 0x2bf   : > { %v5151_v26 = vadd.f32 %v5150_v44, %v3953_v1  ;;  %v5144_v28 = vadd.f32 %v3947_v21, %v3946_v9  ;;  %v2935_v3 = vmul.f32 %v1911_v15, %v1911_v15  ;;  %v2936_v18 = vmul.f32 %v1912_v8, %v1912_v8  ;;  %v895_v54 = vld [vmem:[%s7536_s26 + $0x1628] sm:$0xff] }
 0x2c0   : > { %v1907_v4 = vmax.f32 %v883_v51, 1e-06  ;;  %v2937_v11 = vmul.f32 %v1913_v60, %v1913_v60  ;;  %v1908_v7 = vmax.f32 %v884_v22, 1e-06  ;;  %v1909_v1 = vmax.f32 %v885_v16, 1e-06 }
 0x2c1   : > { %5152 = vadd.xlane.f32.xlu1 %v5151_v26  ;;  %v5145_v43 = vadd.f32 %v5144_v28, %v3948_v52  ;;  %v3958_v34 = vmul.f32 %v2934_v32, %v1910_v13  ;;  %v3959_v2 = vmul.f32 %v2935_v3, %v1911_v15  ;;  %v3960_v41 = vmul.f32 %v2936_v18, %v1912_v8  ;;  %v896_v26 = vld [vmem:[%s7536_s26 + $0x1630] sm:$0xff]  ;;  %v897_v22 = vld [vmem:[%s7536_s26 + $0x1638] sm:$0xff]  ;;  %v890_v15 = vld [vmem:[%s7536_s26 + $0x1600] sm:$0xff]  ;;  %v8445_v8 = vpop.xlane.xlu0 %4767  ;;  %v8448_v18 = vpop.xlane.xlu1 %4782 }
 0x2c2   : > { %v2930_v63 = vmul.f32 %v1906_v6, %v1906_v6  ;;  %v2931_v50 = vmul.f32 %v1907_v4, %v1907_v4  ;;  %v2932_v9 = vmul.f32 %v1908_v7, %v1908_v7  ;;  %v3961_v44 = vmul.f32 %v2937_v11, %v1913_v60  ;;  %10108 = vst [vmem:[#allocation103_spill] sm:$0xff] %v8445_v8  ;;  %v891_v3 = vld [vmem:[%s7536_s26 + $0x1608] sm:$0xff] }
 0x2c3   : > { %v5146_v0 = vadd.f32 %v5145_v43, %v3949_v31  ;;  %v5159_v21 = vadd.f32 %v3959_v2, %v3958_v34  ;;  %v2933_v51 = vmul.f32 %v1909_v1, %v1909_v1  ;;  %v1918_v28 = vmax.f32 %v894_v12, 1e-06  ;;  %10109 = vst [vmem:[#allocation104_spill] sm:$0xff] %v8448_v18  ;;  %v892_v34 = vld [vmem:[%s7536_s26 + $0x1610] sm:$0xff]  ;;  %v893_v2 = vld [vmem:[%s7536_s26 + $0x1618] sm:$0xff] }
 0x2c4   : > { %v3954_v52 = vmul.f32 %v2930_v63, %v1906_v6  ;;  %v3955_v16 = vmul.f32 %v2931_v50, %v1907_v4  ;;  %v3956_v13 = vmul.f32 %v2932_v9, %v1908_v7  ;;  %v1919_v32 = vmax.f32 %v895_v54, 1e-06 }
 0x2c5   : > { %5147 = vadd.xlane.f32.xlu0 %v5146_v0  ;;  %v5160_v31 = vadd.f32 %v5159_v21, %v3960_v41  ;;  %v3957_v60 = vmul.f32 %v2933_v51, %v1909_v1  ;;  %v1920_v11 = vmax.f32 %v896_v26, 1e-06  ;;  %v1921_v6 = vmax.f32 %v897_v22, 1e-06  ;;  %v8452_v22 = vpop.xlane.xlu0 %4777 }
 0x2c6   : > { %v5154_v43 = vadd.f32 %v3955_v16, %v3954_v52  ;;  %v2942_v48 = vmul.f32 %v1918_v28, %v1918_v28  ;;  %v2943_v0 = vmul.f32 %v1919_v32, %v1919_v32  ;;  %v1914_v4 = vmax.f32 %v890_v15, 1e-06  ;;  %10110 = vst [vmem:[#allocation105_spill] sm:$0xff] %v8452_v22 }
 0x2c7   : > { %v5161_v63 = vadd.f32 %v5160_v31, %v3961_v44  ;;  %v2944_v50 = vmul.f32 %v1920_v11, %v1920_v11  ;;  %v2945_v9 = vmul.f32 %v1921_v6, %v1921_v6  ;;  %v1915_v41 = vmax.f32 %v891_v3, 1e-06  ;;  %v902_v3 = vld [vmem:[%s7536_s26 + $0x1660] sm:$0xff] }
 0x2c8   : > { %v5155_v7 = vadd.f32 %v5154_v43, %v3956_v13  ;;  %v3966_v12 = vmul.f32 %v2942_v48, %v1918_v28  ;;  %v3967_v54 = vmul.f32 %v2943_v0, %v1919_v32  ;;  %v1916_v1 = vmax.f32 %v892_v34, 1e-06  ;;  %v903_v48 = vld [vmem:[%s7536_s26 + $0x1668] sm:$0xff]  ;;  %v904_v28 = vld [vmem:[%s7536_s26 + $0x1670] sm:$0xff]  ;;  %v8457_v32 = vpop.xlane.xlu1 %4792  ;;  %v905_v43 = vld [vmem:[%s7536_s26 + $0x1678] sm:$0xff] }
 0x2c9   : > { %5162 = vadd.xlane.f32.xlu1 %v5161_v63  ;;  %v1917_v21 = vmax.f32 %v893_v2, 1e-06  ;;  %v3968_v52 = vmul.f32 %v2944_v50, %v1920_v11  ;;  %v3969_v44 = vmul.f32 %v2945_v9, %v1921_v6  ;;  %v2938_v26 = vmul.f32 %v1914_v4, %v1914_v4  ;;  %10111 = vst [vmem:[#allocation106_spill] sm:$0xff] %v8457_v32  ;;  %v898_v11 = vld [vmem:[%s7536_s26 + $0x1640] sm:$0xff]  ;;  %v899_v63 = vld [vmem:[%s7536_s26 + $0x1648] sm:$0xff]  ;;  %v900_v0 = vld [vmem:[%s7536_s26 + $0x1650] sm:$0xff] }
 0x2ca   : > { %v5156_v51 = vadd.f32 %v5155_v7, %v3957_v60  ;;  %v5169_v16 = vadd.f32 %v3967_v54, %v3966_v12  ;;  %v2939_v13 = vmul.f32 %v1915_v41, %v1915_v41  ;;  %v2940_v15 = vmul.f32 %v1916_v1, %v1916_v1  ;;  %v901_v7 = vld [vmem:[%s7536_s26 + $0x1658] sm:$0xff] }
 0x2cb   : > { %v2941_v31 = vmul.f32 %v1917_v21, %v1917_v21  ;;  %v3962_v60 = vmul.f32 %v2938_v26, %v1914_v4  ;;  %v1926_v9 = vmax.f32 %v902_v3, 1e-06  ;;  %v1927_v12 = vmax.f32 %v903_v48, 1e-06  ;;  %v8464_v26 = vpop.xlane.xlu0 %4787 }
 0x2cc   : > { %5157 = vadd.xlane.f32.xlu0 %v5156_v51  ;;  %v5170_v6 = vadd.f32 %v5169_v16, %v3968_v52  ;;  %v3963_v34 = vmul.f32 %v2939_v13, %v1915_v41  ;;  %v3964_v2 = vmul.f32 %v2940_v15, %v1916_v1  ;;  %v1928_v54 = vmax.f32 %v904_v28, 1e-06  ;;  %10112 = vst [vmem:[#allocation107_spill] sm:$0xff] %v8464_v26  ;;  %v8466_v16 = vpop.xlane.xlu1 %4802 }
 0x2cd   : > { %v3965_v50 = vmul.f32 %v2941_v31, %v1917_v21  ;;  %v1929_v22 = vmax.f32 %v905_v43, 1e-06  ;;  %v1922_v8 = vmax.f32 %v898_v11, 1e-06  ;;  %v2950_v49 = vmul.f32 %v1926_v9, %v1926_v9  ;;  %10113 = vst [vmem:[#allocation108_spill] sm:$0xff] %v8466_v16 }
 0x2ce   : > { %v5171_v18 = vadd.f32 %v5170_v6, %v3969_v44  ;;  %v5164_v19 = vadd.f32 %v3963_v34, %v3962_v60  ;;  %v2951_v32 = vmul.f32 %v1927_v12, %v1927_v12  ;;  %v2952_v51 = vmul.f32 %v1928_v54, %v1928_v54  ;;  %v910_v60 = vld [vmem:[%s7536_s26 + $0x16a0] sm:$0xff]  ;;  %v911_v6 = vld [vmem:[%s7536_s26 + $0x16a8] sm:$0xff]  ;;  %v912_v34 = vld [vmem:[%s7536_s26 + $0x16b0] sm:$0xff] }
 0x2cf   : > { %v1923_v4 = vmax.f32 %v899_v63, 1e-06  ;;  %v2953_v1 = vmul.f32 %v1929_v22, %v1929_v22  ;;  %v1924_v52 = vmax.f32 %v900_v0, 1e-06  ;;  %v1925_v21 = vmax.f32 %v901_v7, 1e-06 }
 0x2d0   : > { %5172 = vadd.xlane.f32.xlu1 %v5171_v18  ;;  %v5165_v41 = vadd.f32 %v5164_v19, %v3964_v2  ;;  %v3974_v44 = vmul.f32 %v2950_v49, %v1926_v9  ;;  %v3975_v13 = vmul.f32 %v2951_v32, %v1927_v12  ;;  %v3976_v15 = vmul.f32 %v2952_v51, %v1928_v54  ;;  %v913_v2 = vld [vmem:[%s7536_s26 + $0x16b8] sm:$0xff]  ;;  %v906_v32 = vld [vmem:[%s7536_s26 + $0x1680] sm:$0xff]  ;;  %v907_v9 = vld [vmem:[%s7536_s26 + $0x1688] sm:$0xff]  ;;  %v8474_v12 = vpop.xlane.xlu0 %4797 }
 0x2d1   : > { %v2946_v31 = vmul.f32 %v1922_v8, %v1922_v8  ;;  %v2947_v48 = vmul.f32 %v1923_v4, %v1923_v4  ;;  %v2948_v28 = vmul.f32 %v1924_v52, %v1924_v52  ;;  %v3977_v18 = vmul.f32 %v2953_v1, %v1929_v22  ;;  %10114 = vst [vmem:[#allocation109_spill] sm:$0xff] %v8474_v12 }
 0x2d2   : > { %v5166_v3 = vadd.f32 %v5165_v41, %v3965_v50  ;;  %v5179_v19 = vadd.f32 %v3975_v13, %v3974_v44  ;;  %v2949_v43 = vmul.f32 %v1925_v21, %v1925_v21  ;;  %v1934_v50 = vmax.f32 %v910_v60, 1e-06  ;;  %v908_v13 = vld [vmem:[%s7536_s26 + $0x1690] sm:$0xff] }
 0x2d3   : > { %v3970_v11 = vmul.f32 %v2946_v31, %v1922_v8  ;;  %v3971_v63 = vmul.f32 %v2947_v48, %v1923_v4  ;;  %v3972_v49 = vmul.f32 %v2948_v28, %v1924_v52  ;;  %v1935_v22 = vmax.f32 %v911_v6, 1e-06  ;;  %v8476_v8 = vpop.xlane.xlu1 %4812  ;;  %v909_v31 = vld [vmem:[%s7536_s26 + $0x1698] sm:$0xff] }
 0x2d4   : > { %5167 = vadd.xlane.f32.xlu0 %v5166_v3  ;;  %v5180_v0 = vadd.f32 %v5179_v19, %v3976_v15  ;;  %v3973_v7 = vmul.f32 %v2949_v43, %v1925_v21  ;;  %v1936_v51 = vmax.f32 %v912_v34, 1e-06  ;;  %v1937_v41 = vmax.f32 %v913_v2, 1e-06  ;;  %10115 = vst [vmem:[#allocation110_spill] sm:$0xff] %v8476_v8 }
 0x2d5   : > { %v5174_v54 = vadd.f32 %v3971_v63, %v3970_v11  ;;  %v2958_v44 = vmul.f32 %v1934_v50, %v1934_v50  ;;  %v1930_v4 = vmax.f32 %v906_v32, 1e-06  ;;  %v2959_v15 = vmul.f32 %v1935_v22, %v1935_v22  ;;  %v919_v63 = vld [vmem:[%s7536_s26 + $0x16e8] sm:$0xff] }
 0x2d6   : > { %v5181_v1 = vadd.f32 %v5180_v0, %v3977_v18  ;;  %v2960_v21 = vmul.f32 %v1936_v51, %v1936_v51  ;;  %v2961_v3 = vmul.f32 %v1937_v41, %v1937_v41  ;;  %v1931_v28 = vmax.f32 %v907_v9, 1e-06  ;;  %v918_v18 = vld [vmem:[%s7536_s26 + $0x16e0] sm:$0xff]  ;;  %v921_v9 = vld [vmem:[%s7536_s26 + $0x16f8] sm:$0xff] }
 0x2d7   : > { %v5175_v52 = vadd.f32 %v5174_v54, %v3972_v49  ;;  %v3982_v48 = vmul.f32 %v2958_v44, %v1934_v50  ;;  %v3983_v19 = vmul.f32 %v2959_v15, %v1935_v22  ;;  %v1932_v11 = vmax.f32 %v908_v13, 1e-06  ;;  %v8482_v49 = vpop.xlane.xlu0 %4807  ;;  %v920_v54 = vld [vmem:[%s7536_s26 + $0x16f0] sm:$0xff]  ;;  %v914_v13 = vld [vmem:[%s7536_s26 + $0x16c0] sm:$0xff] }
 0x2d8   : > { %5182 = vadd.xlane.f32.xlu1 %v5181_v1  ;;  %v3984_v43 = vmul.f32 %v2960_v21, %v1936_v51  ;;  %v1933_v6 = vmax.f32 %v909_v31, 1e-06  ;;  %v2954_v34 = vmul.f32 %v1930_v4, %v1930_v4  ;;  %v2955_v2 = vmul.f32 %v1931_v28, %v1931_v28  ;;  %10116 = vst [vmem:[#allocation111_spill] sm:$0xff] %v8482_v49  ;;  %v915_v31 = vld [vmem:[%s7536_s26 + $0x16c8] sm:$0xff] }
 0x2d9   : > { %v5176_v60 = vadd.f32 %v5175_v52, %v3973_v7  ;;  %v3985_v32 = vmul.f32 %v2961_v3, %v1937_v41  ;;  %v5189_v0 = vadd.f32 %v3983_v19, %v3982_v48  ;;  %v2956_v50 = vmul.f32 %v1932_v11, %v1932_v11  ;;  %v8486_v7 = vpop.xlane.xlu1 %4822  ;;  %v916_v48 = vld [vmem:[%s7536_s26 + $0x16d0] sm:$0xff]  ;;  %v917_v19 = vld [vmem:[%s7536_s26 + $0x16d8] sm:$0xff] }
 0x2da   : > { %10117 = vst [vmem:[#allocation112_spill] sm:$0xff] %v8486_v7  ;;  %v2957_v22 = vmul.f32 %v1933_v6, %v1933_v6  ;;  %v3978_v51 = vmul.f32 %v2954_v34, %v1930_v4  ;;  %v3979_v1 = vmul.f32 %v2955_v2, %v1931_v28  ;;  %v1942_v44 = vmax.f32 %v918_v18, 1e-06 }
 0x2db   : > { %5177 = vadd.xlane.f32.xlu0 %v5176_v60  ;;  %v5190_v52 = vadd.f32 %v5189_v0, %v3984_v43  ;;  %v3980_v15 = vmul.f32 %v2956_v50, %v1932_v11  ;;  %v1943_v21 = vmax.f32 %v919_v63, 1e-06  ;;  %v1944_v41 = vmax.f32 %v920_v54, 1e-06  ;;  %v8492_v34 = vpop.xlane.xlu0 %4817  ;;  %v926_v63 = vld [vmem:[%s7536_s26 + $0x1720] sm:$0xff] }
 0x2dc   : > { %v3981_v8 = vmul.f32 %v2957_v22, %v1933_v6  ;;  %v5184_v60 = vadd.f32 %v3979_v1, %v3978_v51  ;;  %v1945_v3 = vmax.f32 %v921_v9, 1e-06  ;;  %v2966_v16 = vmul.f32 %v1942_v44, %v1942_v44  ;;  %10118 = vst [vmem:[#allocation113_spill] sm:$0xff] %v8492_v34 }
 0x2dd   : > { %v5191_v49 = vadd.f32 %v5190_v52, %v3985_v32  ;;  %v2967_v12 = vmul.f32 %v1943_v21, %v1943_v21  ;;  %v1938_v7 = vmax.f32 %v914_v13, 1e-06  ;;  %v2968_v4 = vmul.f32 %v1944_v41, %v1944_v41  ;;  %v8495_v32 = vpop.xlane.xlu1 %4832 }
 0x2de   : > { %v5185_v26 = vadd.f32 %v5184_v60, %v3980_v15  ;;  %v2969_v28 = vmul.f32 %v1945_v3, %v1945_v3  ;;  %v1939_v18 = vmax.f32 %v915_v31, 1e-06  ;;  %v3990_v43 = vmul.f32 %v2966_v16, %v1942_v44  ;;  %10119 = vst [vmem:[#allocation114_spill] sm:$0xff] %v8495_v32  ;;  %v927_v16 = vld [vmem:[%s7536_s26 + $0x1728] sm:$0xff]  ;;  %v928_v44 = vld [vmem:[%s7536_s26 + $0x1730] sm:$0xff]  ;;  %v922_v15 = vld [vmem:[%s7536_s26 + $0x1700] sm:$0xff] }
 0x2df   : > { %5192 = vadd.xlane.f32.xlu1 %v5191_v49  ;;  %v3991_v11 = vmul.f32 %v2967_v12, %v1943_v21  ;;  %v1940_v6 = vmax.f32 %v916_v48, 1e-06  ;;  %v1941_v2 = vmax.f32 %v917_v19, 1e-06  ;;  %v3992_v50 = vmul.f32 %v2968_v4, %v1944_v41  ;;  %v929_v12 = vld [vmem:[%s7536_s26 + $0x1738] sm:$0xff]  ;;  %v924_v60 = vld [vmem:[%s7536_s26 + $0x1710] sm:$0xff] }
 0x2e0   : > { %v5186_v0 = vadd.f32 %v5185_v26, %v3981_v8  ;;  %v3993_v54 = vmul.f32 %v2969_v28, %v1945_v3  ;;  %v2962_v9 = vmul.f32 %v1938_v7, %v1938_v7  ;;  %v2963_v51 = vmul.f32 %v1939_v18, %v1939_v18  ;;  %v923_v8 = vld [vmem:[%s7536_s26 + $0x1708] sm:$0xff]  ;;  %v925_v41 = vld [vmem:[%s7536_s26 + $0x1718] sm:$0xff]  ;;  %v8504_v28 = vpop.xlane.xlu0 %4827 }
 0x2e1   : > { %v5199_v22 = vadd.f32 %v3991_v11, %v3990_v43  ;;  %v2964_v49 = vmul.f32 %v1940_v6, %v1940_v6  ;;  %v2965_v1 = vmul.f32 %v1941_v2, %v1941_v2  ;;  %v1950_v52 = vmax.f32 %v926_v63, 1e-06  ;;  %10120 = vst [vmem:[#allocation115_spill] sm:$0xff] %v8504_v28 }
 0x2e2   : > { %5187 = vadd.xlane.f32.xlu0 %v5186_v0  ;;  %v3986_v13 = vmul.f32 %v2962_v9, %v1938_v7  ;;  %v3987_v31 = vmul.f32 %v2963_v51, %v1939_v18  ;;  %v1951_v48 = vmax.f32 %v927_v16, 1e-06  ;;  %v1952_v19 = vmax.f32 %v928_v44, 1e-06  ;;  %v8506_v0 = vpop.xlane.xlu1 %4842 }
 0x2e3   : > { %v5200_v21 = vadd.f32 %v5199_v22, %v3992_v50  ;;  %v3988_v26 = vmul.f32 %v2964_v49, %v1940_v6  ;;  %v3989_v3 = vmul.f32 %v2965_v1, %v1941_v2  ;;  %v1953_v4 = vmax.f32 %v929_v12, 1e-06  ;;  %10121 = vst [vmem:[#allocation116_spill] sm:$0xff] %v8506_v0 }
 0x2e4   : > { %v5194_v11 = vadd.f32 %v3987_v31, %v3986_v13  ;;  %v2974_v32 = vmul.f32 %v1950_v52, %v1950_v52  ;;  %v1946_v34 = vmax.f32 %v922_v15, 1e-06  ;;  %v2975_v7 = vmul.f32 %v1951_v48, %v1951_v48  ;;  %v934_v13 = vld [vmem:[%s7536_s26 + $0x1760] sm:$0xff]  ;;  %v935_v15 = vld [vmem:[%s7536_s26 + $0x1768] sm:$0xff] }
 0x2e5   : > { %v5201_v43 = vadd.f32 %v5200_v21, %v3993_v54  ;;  %v2976_v63 = vmul.f32 %v1952_v19, %v1952_v19  ;;  %v2977_v18 = vmul.f32 %v1953_v4, %v1953_v4  ;;  %v1947_v6 = vmax.f32 %v923_v8, 1e-06  ;;  %v936_v21 = vld [vmem:[%s7536_s26 + $0x1770] sm:$0xff] }
 0x2e6   : > { %v5195_v2 = vadd.f32 %v5194_v11, %v3988_v26  ;;  %v3998_v50 = vmul.f32 %v2974_v32, %v1950_v52  ;;  %v1948_v9 = vmax.f32 %v924_v60, 1e-06  ;;  %v1949_v22 = vmax.f32 %v925_v41, 1e-06  ;;  %v937_v32 = vld [vmem:[%s7536_s26 + $0x1778] sm:$0xff]  ;;  %v930_v52 = vld [vmem:[%s7536_s26 + $0x1740] sm:$0xff]  ;;  %v8513_v60 = vpop.xlane.xlu0 %4837 }
 0x2e7   : > { %5202 = vadd.xlane.f32.xlu1 %v5201_v43  ;;  %v3999_v54 = vmul.f32 %v2975_v7, %v1951_v48  ;;  %v4000_v51 = vmul.f32 %v2976_v63, %v1952_v19  ;;  %v2970_v49 = vmul.f32 %v1946_v34, %v1946_v34  ;;  %v2971_v16 = vmul.f32 %v1947_v6, %v1947_v6  ;;  %v932_v19 = vld [vmem:[%s7536_s26 + $0x1750] sm:$0xff]  ;;  %v8517_v43 = vpop.xlane.xlu1 %4852 }
 0x2e8   : > { %v5196_v1 = vadd.f32 %v5195_v2, %v3989_v3  ;;  %v2972_v44 = vmul.f32 %v1948_v9, %v1948_v9  ;;  %v2973_v12 = vmul.f32 %v1949_v22, %v1949_v22  ;;  %v4001_v31 = vmul.f32 %v2977_v18, %v1953_v4  ;;  %10122 = vst [vmem:[#allocation117_spill] sm:$0xff] %v8513_v60  ;;  %v931_v3 = vld [vmem:[%s7536_s26 + $0x1748] sm:$0xff] }
 0x2e9   : > { %v5209_v8 = vadd.f32 %v3999_v54, %v3998_v50  ;;  %v3994_v26 = vmul.f32 %v2970_v49, %v1946_v34  ;;  %v3995_v41 = vmul.f32 %v2971_v16, %v1947_v6  ;;  %10123 = vst [vmem:[#allocation118_spill] sm:$0xff] %v8517_v43  ;;  %v1958_v7 = vmax.f32 %v934_v13, 1e-06  ;;  %v933_v34 = vld [vmem:[%s7536_s26 + $0x1758] sm:$0xff] }
 0x2ea   : > { %5197 = vadd.xlane.f32.xlu0 %v5196_v1  ;;  %v3996_v48 = vmul.f32 %v2972_v44, %v1948_v9  ;;  %v1959_v63 = vmax.f32 %v935_v15, 1e-06  ;;  %v1960_v2 = vmax.f32 %v936_v21, 1e-06  ;;  %v3997_v0 = vmul.f32 %v2973_v12, %v1949_v22  ;;  %v8520_v12 = vpop.xlane.xlu0 %4847 }
 0x2eb   : > { %v5210_v11 = vadd.f32 %v5209_v8, %v4000_v51  ;;  %v5204_v4 = vadd.f32 %v3995_v41, %v3994_v26  ;;  %v1961_v18 = vmax.f32 %v937_v32, 1e-06  ;;  %v1954_v50 = vmax.f32 %v930_v52, 1e-06  ;;  %10124 = vst [vmem:[#allocation119_spill] sm:$0xff] %v8520_v12  ;;  %v942_v26 = vld [vmem:[%s7536_s26 + $0x17a0] sm:$0xff]  ;;  %v8523_v32 = vpop.xlane.xlu1 %4862 }
 0x2ec   : > { %v2982_v49 = vmul.f32 %v1958_v7, %v1958_v7  ;;  %v2983_v60 = vmul.f32 %v1959_v63, %v1959_v63  ;;  %v2984_v1 = vmul.f32 %v1960_v2, %v1960_v2  ;;  %v1955_v16 = vmax.f32 %v931_v3, 1e-06  ;;  %10125 = vst [vmem:[#allocation120_spill] sm:$0xff] %v8523_v32 }
 0x2ed   : > { %v5211_v54 = vadd.f32 %v5210_v11, %v4001_v31  ;;  %v5205_v6 = vadd.f32 %v5204_v4, %v3996_v48  ;;  %v2985_v9 = vmul.f32 %v1961_v18, %v1961_v18  ;;  %v1956_v44 = vmax.f32 %v932_v19, 1e-06  ;;  %v943_v19 = vld [vmem:[%s7536_s26 + $0x17a8] sm:$0xff] }
 0x2ee   : > { %v4006_v51 = vmul.f32 %v2982_v49, %v1958_v7  ;;  %v4007_v13 = vmul.f32 %v2983_v60, %v1959_v63  ;;  %v4008_v15 = vmul.f32 %v2984_v1, %v1960_v2  ;;  %v1957_v22 = vmax.f32 %v933_v34, 1e-06  ;;  %v944_v60 = vld [vmem:[%s7536_s26 + $0x17b0] sm:$0xff]  ;;  %v945_v63 = vld [vmem:[%s7536_s26 + $0x17b8] sm:$0xff]  ;;  %v938_v2 = vld [vmem:[%s7536_s26 + $0x1780] sm:$0xff]  ;;  %v8532_v43 = vpop.xlane.xlu0 %4857 }
 0x2ef   : > { %5212 = vadd.xlane.f32.xlu1 %v5211_v54  ;;  %v5206_v21 = vadd.f32 %v5205_v6, %v3997_v0  ;;  %v2978_v31 = vmul.f32 %v1954_v50, %v1954_v50  ;;  %v2979_v8 = vmul.f32 %v1955_v16, %v1955_v16  ;;  %v4009_v52 = vmul.f32 %v2985_v9, %v1961_v18  ;;  %v939_v54 = vld [vmem:[%s7536_s26 + $0x1788] sm:$0xff]  ;;  %v940_v9 = vld [vmem:[%s7536_s26 + $0x1790] sm:$0xff] }
 0x2f0   : > { %v5219_v41 = vadd.f32 %v4007_v13, %v4006_v51  ;;  %v2980_v48 = vmul.f32 %v1956_v44, %v1956_v44  ;;  %v2981_v3 = vmul.f32 %v1957_v22, %v1957_v22  ;;  %v1966_v34 = vmax.f32 %v942_v26, 1e-06  ;;  %v941_v51 = vld [vmem:[%s7536_s26 + $0x1798] sm:$0xff]  ;;  %10126 = vst [vmem:[#allocation121_spill] sm:$0xff] %v8532_v43 }
 0x2f1   : > { %5207 = vadd.xlane.f32.xlu0 %v5206_v21  ;;  %v4002_v11 = vmul.f32 %v2978_v31, %v1954_v50  ;;  %v4003_v7 = vmul.f32 %v2979_v8, %v1955_v16  ;;  %v1967_v6 = vmax.f32 %v943_v19, 1e-06  ;;  %v1968_v18 = vmax.f32 %v944_v60, 1e-06 }
 0x2f2   : > { %v5220_v0 = vadd.f32 %v5219_v41, %v4008_v15  ;;  %v4004_v4 = vmul.f32 %v2980_v48, %v1956_v44  ;;  %v4005_v49 = vmul.f32 %v2981_v3, %v1957_v22  ;;  %v1969_v28 = vmax.f32 %v945_v63, 1e-06  ;;  %v8534_v15 = vpop.xlane.xlu1 %4872  ;;  %v951_v63 = vld [vmem:[%s7536_s26 + $0x17e8] sm:$0xff] }
 0x2f3   : > { %v5214_v1 = vadd.f32 %v4003_v7, %v4002_v11  ;;  %v2990_v32 = vmul.f32 %v1966_v34, %v1966_v34  ;;  %v1962_v12 = vmax.f32 %v938_v2, 1e-06  ;;  %v2991_v16 = vmul.f32 %v1967_v6, %v1967_v6  ;;  %10127 = vst [vmem:[#allocation122_spill] sm:$0xff] %v8534_v15  ;;  %v950_v7 = vld [vmem:[%s7536_s26 + $0x17e0] sm:$0xff]  ;;  %v952_v2 = vld [vmem:[%s7536_s26 + $0x17f0] sm:$0xff] }
 0x2f4   : > { %v5221_v13 = vadd.f32 %v5220_v0, %v4009_v52  ;;  %v2992_v21 = vmul.f32 %v1968_v18, %v1968_v18  ;;  %v1963_v44 = vmax.f32 %v939_v54, 1e-06  ;;  %v2993_v22 = vmul.f32 %v1969_v28, %v1969_v28  ;;  %v946_v54 = vld [vmem:[%s7536_s26 + $0x17c0] sm:$0xff] }
 0x2f5   : > { %v5215_v50 = vadd.f32 %v5214_v1, %v4004_v4  ;;  %v4014_v31 = vmul.f32 %v2990_v32, %v1966_v34  ;;  %v1964_v8 = vmax.f32 %v940_v9, 1e-06  ;;  %v1965_v26 = vmax.f32 %v941_v51, 1e-06  ;;  %v953_v34 = vld [vmem:[%s7536_s26 + $0x17f8] sm:$0xff]  ;;  %v8543_v9 = vpop.xlane.xlu0 %4867 }
 0x2f6   : > { %5222 = vadd.xlane.f32.xlu1 %v5221_v13  ;;  %v4015_v41 = vmul.f32 %v2991_v16, %v1967_v6  ;;  %v4016_v48 = vmul.f32 %v2992_v21, %v1968_v18  ;;  %v2986_v3 = vmul.f32 %v1962_v12, %v1962_v12  ;;  %v2987_v19 = vmul.f32 %v1963_v44, %v1963_v44  ;;  %v947_v6 = vld [vmem:[%s7536_s26 + $0x17c8] sm:$0xff]  ;;  %v948_v18 = vld [vmem:[%s7536_s26 + $0x17d0] sm:$0xff]  ;;  %v8545_v21 = vpop.xlane.xlu1 %4882 }
 0x2f7   : > { %v5216_v52 = vadd.f32 %v5215_v50, %v4005_v49  ;;  %v2988_v60 = vmul.f32 %v1964_v8, %v1964_v8  ;;  %v2989_v11 = vmul.f32 %v1965_v26, %v1965_v26  ;;  %v4017_v0 = vmul.f32 %v2993_v22, %v1969_v28  ;;  %10128 = vst [vmem:[#allocation123_spill] sm:$0xff] %v8543_v9  ;;  %v949_v22 = vld [vmem:[%s7536_s26 + $0x17d8] sm:$0xff] }
 0x2f8   : > { %v5229_v4 = vadd.f32 %v4015_v41, %v4014_v31  ;;  %v4010_v32 = vmul.f32 %v2986_v3, %v1962_v12  ;;  %v4011_v1 = vmul.f32 %v2987_v19, %v1963_v44  ;;  %v1974_v13 = vmax.f32 %v950_v7, 1e-06  ;;  %10129 = vst [vmem:[#allocation124_spill] sm:$0xff] %v8545_v21 }
 0x2f9   : > { %5217 = vadd.xlane.f32.xlu0 %v5216_v52  ;;  %v4012_v49 = vmul.f32 %v2988_v60, %v1964_v8  ;;  %v1975_v50 = vmax.f32 %v951_v63, 1e-06  ;;  %v1976_v16 = vmax.f32 %v952_v2, 1e-06  ;;  %v4013_v15 = vmul.f32 %v2989_v11, %v1965_v26 }
 0x2fa   : > { %v5230_v51 = vadd.f32 %v5229_v4, %v4016_v48  ;;  %v5224_v52 = vadd.f32 %v4011_v1, %v4010_v32  ;;  %v1977_v28 = vmax.f32 %v953_v34, 1e-06  ;;  %v1970_v12 = vmax.f32 %v946_v54, 1e-06  ;;  %v958_v32 = vld [vmem:[%s7536_s26 + $0x1820] sm:$0xff]  ;;  %v8549_v34 = vpop.xlane.xlu0 %4877 }
 0x2fb   : > { %v2998_v41 = vmul.f32 %v1974_v13, %v1974_v13  ;;  %v2999_v44 = vmul.f32 %v1975_v50, %v1975_v50  ;;  %v3000_v8 = vmul.f32 %v1976_v16, %v1976_v16  ;;  %v1971_v60 = vmax.f32 %v947_v6, 1e-06  ;;  %10130 = vst [vmem:[#allocation125_spill] sm:$0xff] %v8549_v34 }
 0x2fc   : > { %v5231_v31 = vadd.f32 %v5230_v51, %v4017_v0  ;;  %v5225_v3 = vadd.f32 %v5224_v52, %v4012_v49  ;;  %v3001_v19 = vmul.f32 %v1977_v28, %v1977_v28  ;;  %v1972_v48 = vmax.f32 %v948_v18, 1e-06  ;;  %v959_v18 = vld [vmem:[%s7536_s26 + $0x1828] sm:$0xff]  ;;  %v960_v51 = vld [vmem:[%s7536_s26 + $0x1830] sm:$0xff]  ;;  %v954_v52 = vld [vmem:[%s7536_s26 + $0x1800] sm:$0xff] }
 0x2fd   : > { %v4022_v7 = vmul.f32 %v2998_v41, %v1974_v13  ;;  %v4023_v63 = vmul.f32 %v2999_v44, %v1975_v50  ;;  %v4024_v2 = vmul.f32 %v3000_v8, %v1976_v16  ;;  %v1973_v26 = vmax.f32 %v949_v22, 1e-06  ;;  %v8553_v13 = vpop.xlane.xlu1 %4892  ;;  %v961_v16 = vld [vmem:[%s7536_s26 + $0x1838] sm:$0xff]  ;;  %v955_v44 = vld [vmem:[%s7536_s26 + $0x1808] sm:$0xff] }
 0x2fe   : > { %5232 = vadd.xlane.f32.xlu1 %v5231_v31  ;;  %v5226_v11 = vadd.f32 %v5225_v3, %v4013_v15  ;;  %v2994_v4 = vmul.f32 %v1970_v12, %v1970_v12  ;;  %v2995_v0 = vmul.f32 %v1971_v60, %v1971_v60  ;;  %v4025_v54 = vmul.f32 %v3001_v19, %v1977_v28 }
 0x2ff   : > { %v5239_v1 = vadd.f32 %v4023_v63, %v4022_v7  ;;  %v2996_v49 = vmul.f32 %v1972_v48, %v1972_v48  ;;  %v2997_v6 = vmul.f32 %v1973_v26, %v1973_v26  ;;  %10131 = vst [vmem:[#allocation126_spill] sm:$0xff] %v8553_v13  ;;  %v1982_v41 = vmax.f32 %v958_v32, 1e-06  ;;  %v956_v7 = vld [vmem:[%s7536_s26 + $0x1810] sm:$0xff]  ;;  %v957_v63 = vld [vmem:[%s7536_s26 + $0x1818] sm:$0xff] }
 0x300   : > { %5227 = vadd.xlane.f32.xlu0 %v5226_v11  ;;  %v4018_v50 = vmul.f32 %v2994_v4, %v1970_v12  ;;  %v4019_v15 = vmul.f32 %v2995_v0, %v1971_v60  ;;  %v1983_v3 = vmax.f32 %v959_v18, 1e-06  ;;  %v1984_v19 = vmax.f32 %v960_v51, 1e-06 }
 0x301   : > { %v5240_v22 = vadd.f32 %v5239_v1, %v4024_v2  ;;  %v4020_v31 = vmul.f32 %v2996_v49, %v1972_v48  ;;  %v4021_v8 = vmul.f32 %v2997_v6, %v1973_v26  ;;  %v1985_v34 = vmax.f32 %v961_v16, 1e-06  ;;  %v8560_v2 = vpop.xlane.xlu0 %4887  ;;  %v967_v16 = vld [vmem:[%s7536_s26 + $0x1868] sm:$0xff] }
 0x302   : > { %v5234_v28 = vadd.f32 %v4019_v15, %v4018_v50  ;;  %v3006_v9 = vmul.f32 %v1982_v41, %v1982_v41  ;;  %v1978_v11 = vmax.f32 %v954_v52, 1e-06  ;;  %v3007_v13 = vmul.f32 %v1983_v3, %v1983_v3  ;;  %10132 = vst [vmem:[#allocation127_spill] sm:$0xff] %v8560_v2  ;;  %v966_v15 = vld [vmem:[%s7536_s26 + $0x1860] sm:$0xff] }
 0x303   : > { %v5241_v21 = vadd.f32 %v5240_v22, %v4025_v54  ;;  %v3008_v12 = vmul.f32 %v1984_v19, %v1984_v19  ;;  %v1979_v60 = vmax.f32 %v955_v44, 1e-06  ;;  %v3009_v48 = vmul.f32 %v1985_v34, %v1985_v34  ;;  %v8562_v54 = vpop.xlane.xlu1 %4902 }
 0x304   : > { %v5235_v43 = vadd.f32 %v5234_v28, %v4020_v31  ;;  %v4030_v26 = vmul.f32 %v3006_v9, %v1982_v41  ;;  %v1980_v4 = vmax.f32 %v956_v7, 1e-06  ;;  %v1981_v0 = vmax.f32 %v957_v63, 1e-06  ;;  %10133 = vst [vmem:[#allocation128_spill] sm:$0xff] %v8562_v54  ;;  %v962_v31 = vld [vmem:[%s7536_s26 + $0x1840] sm:$0xff] }
 0x305   : > { %5242 = vadd.xlane.f32.xlu1 %v5241_v21  ;;  %v4031_v1 = vmul.f32 %v3007_v13, %v1983_v3  ;;  %v4032_v49 = vmul.f32 %v3008_v12, %v1984_v19  ;;  %v3002_v6 = vmul.f32 %v1978_v11, %v1978_v11  ;;  %v3003_v18 = vmul.f32 %v1979_v60, %v1979_v60  ;;  %v968_v21 = vld [vmem:[%s7536_s26 + $0x1870] sm:$0xff]  ;;  %v963_v13 = vld [vmem:[%s7536_s26 + $0x1848] sm:$0xff]  ;;  %v8571_v63 = vpop.xlane.xlu0 %4897 }
 0x306   : > { %v5236_v32 = vadd.f32 %v5235_v43, %v4021_v8  ;;  %v3004_v51 = vmul.f32 %v1980_v4, %v1980_v4  ;;  %v3005_v50 = vmul.f32 %v1981_v0, %v1981_v0  ;;  %v4033_v9 = vmul.f32 %v3009_v48, %v1985_v34  ;;  %v969_v43 = vld [vmem:[%s7536_s26 + $0x1878] sm:$0xff]  ;;  %v964_v8 = vld [vmem:[%s7536_s26 + $0x1850] sm:$0xff]  ;;  %10134 = vst [vmem:[#allocation129_spill] sm:$0xff] %v8571_v63 }
 0x307   : > { %v5249_v52 = vadd.f32 %v4031_v1, %v4030_v26  ;;  %v4026_v22 = vmul.f32 %v3002_v6, %v1978_v11  ;;  %v4027_v41 = vmul.f32 %v3003_v18, %v1979_v60  ;;  %v1990_v3 = vmax.f32 %v966_v15, 1e-06  ;;  %v8574_v26 = vpop.xlane.xlu1 %4912 }
 0x308   : > { %5237 = vadd.xlane.f32.xlu0 %v5236_v32  ;;  %v4028_v44 = vmul.f32 %v3004_v51, %v1980_v4  ;;  %v1991_v19 = vmax.f32 %v967_v16, 1e-06  ;;  %v1992_v7 = vmax.f32 %v968_v21, 1e-06  ;;  %v4029_v12 = vmul.f32 %v3005_v50, %v1981_v0  ;;  %v965_v32 = vld [vmem:[%s7536_s26 + $0x1858] sm:$0xff]  ;;  %10135 = vst [vmem:[#allocation130_spill] sm:$0xff] %v8574_v26 }
 0x309   : > { %v5250_v28 = vadd.f32 %v5249_v52, %v4032_v49  ;;  %v5244_v54 = vadd.f32 %v4027_v41, %v4026_v22  ;;  %v1993_v2 = vmax.f32 %v969_v43, 1e-06  ;;  %v1986_v34 = vmax.f32 %v962_v31, 1e-06  ;;  %v974_v52 = vld [vmem:[%s7536_s26 + $0x18a0] sm:$0xff] }
 0x30a   : > { %v3014_v11 = vmul.f32 %v1990_v3, %v1990_v3  ;;  %v3015_v60 = vmul.f32 %v1991_v19, %v1991_v19  ;;  %v3016_v4 = vmul.f32 %v1992_v7, %v1992_v7  ;;  %v1987_v49 = vmax.f32 %v963_v13, 1e-06  ;;  %v8579_v13 = vpop.xlane.xlu0 %4907 }
 0x30b   : > { %v5251_v48 = vadd.f32 %v5250_v28, %v4033_v9  ;;  %v5245_v1 = vadd.f32 %v5244_v54, %v4028_v44  ;;  %v3017_v6 = vmul.f32 %v1993_v2, %v1993_v2  ;;  %v1988_v18 = vmax.f32 %v964_v8, 1e-06  ;;  %v975_v54 = vld [vmem:[%s7536_s26 + $0x18a8] sm:$0xff]  ;;  %v976_v44 = vld [vmem:[%s7536_s26 + $0x18b0] sm:$0xff]  ;;  %10136 = vst [vmem:[#allocation131_spill] sm:$0xff] %v8579_v13 }
 0x30c   : > { %v4038_v51 = vmul.f32 %v3014_v11, %v1990_v3  ;;  %v4039_v0 = vmul.f32 %v3015_v60, %v1991_v19  ;;  %v4040_v50 = vmul.f32 %v3016_v4, %v1992_v7  ;;  %v1989_v15 = vmax.f32 %v965_v32, 1e-06  ;;  %v977_v3 = vld [vmem:[%s7536_s26 + $0x18b8] sm:$0xff]  ;;  %v970_v4 = vld [vmem:[%s7536_s26 + $0x1880] sm:$0xff] }
 0x30d   : > { %5252 = vadd.xlane.f32.xlu1 %v5251_v48  ;;  %v5246_v16 = vadd.f32 %v5245_v1, %v4029_v12  ;;  %v3010_v21 = vmul.f32 %v1986_v34, %v1986_v34  ;;  %v3011_v9 = vmul.f32 %v1987_v49, %v1987_v49  ;;  %v4041_v22 = vmul.f32 %v3017_v6, %v1993_v2  ;;  %v8582_v12 = vpop.xlane.xlu1 %4922  ;;  %v971_v1 = vld [vmem:[%s7536_s26 + $0x1888] sm:$0xff] }
 0x30e   : > { %v5259_v43 = vadd.f32 %v4039_v0, %v4038_v51  ;;  %v3012_v31 = vmul.f32 %v1988_v18, %v1988_v18  ;;  %v3013_v41 = vmul.f32 %v1989_v15, %v1989_v15  ;;  %10137 = vst [vmem:[#allocation132_spill] sm:$0xff] %v8582_v12  ;;  %v1998_v2 = vmax.f32 %v974_v52, 1e-06 }
 0x30f   : > { %5247 = vadd.xlane.f32.xlu0 %v5246_v16  ;;  %v4034_v8 = vmul.f32 %v3010_v21, %v1986_v34  ;;  %v4035_v28 = vmul.f32 %v3011_v9, %v1987_v49  ;;  %v1999_v11 = vmax.f32 %v975_v54, 1e-06  ;;  %v2000_v60 = vmax.f32 %v976_v44, 1e-06  ;;  %v972_v34 = vld [vmem:[%s7536_s26 + $0x1890] sm:$0xff]  ;;  %v982_v44 = vld [vmem:[%s7536_s26 + $0x18e0] sm:$0xff] }
 0x310   : > { %v5260_v19 = vadd.f32 %v5259_v43, %v4040_v50  ;;  %v4036_v7 = vmul.f32 %v3012_v31, %v1988_v18  ;;  %v4037_v32 = vmul.f32 %v3013_v41, %v1989_v15  ;;  %v2001_v51 = vmax.f32 %v977_v3, 1e-06  ;;  %v973_v50 = vld [vmem:[%s7536_s26 + $0x1898] sm:$0xff]  ;;  %v8588_v31 = vpop.xlane.xlu0 %4917 }
 0x311   : > { %v5254_v48 = vadd.f32 %v4035_v28, %v4034_v8  ;;  %v3022_v0 = vmul.f32 %v1998_v2, %v1998_v2  ;;  %v3023_v49 = vmul.f32 %v1999_v11, %v1999_v11  ;;  %v3024_v21 = vmul.f32 %v2000_v60, %v2000_v60  ;;  %10138 = vst [vmem:[#allocation133_spill] sm:$0xff] %v8588_v31 }
 0x312   : > { %v5261_v6 = vadd.f32 %v5260_v19, %v4041_v22  ;;  %v3025_v18 = vmul.f32 %v2001_v51, %v2001_v51  ;;  %v1994_v52 = vmax.f32 %v970_v4, 1e-06  ;;  %v1995_v15 = vmax.f32 %v971_v1, 1e-06  ;;  %v8591_v19 = vpop.xlane.xlu1 %4932  ;;  %v985_v1 = vld [vmem:[%s7536_s26 + $0x18f8] sm:$0xff] }
 0x313   : > { %v5255_v16 = vadd.f32 %v5254_v48, %v4036_v7  ;;  %v4046_v9 = vmul.f32 %v3022_v0, %v1998_v2  ;;  %v4047_v22 = vmul.f32 %v3023_v49, %v1999_v11  ;;  %v4048_v41 = vmul.f32 %v3024_v21, %v2000_v60  ;;  %10139 = vst [vmem:[#allocation134_spill] sm:$0xff] %v8591_v19  ;;  %v983_v7 = vld [vmem:[%s7536_s26 + $0x18e8] sm:$0xff] }
 0x314   : > { %5262 = vadd.xlane.f32.xlu1 %v5261_v6  ;;  %v1996_v54 = vmax.f32 %v972_v34, 1e-06  ;;  %v1997_v8 = vmax.f32 %v973_v50, 1e-06  ;;  %v3018_v28 = vmul.f32 %v1994_v52, %v1994_v52  ;;  %v3019_v3 = vmul.f32 %v1995_v15, %v1995_v15  ;;  %v978_v34 = vld [vmem:[%s7536_s26 + $0x18c0] sm:$0xff]  ;;  %v979_v50 = vld [vmem:[%s7536_s26 + $0x18c8] sm:$0xff] }
 0x315   : > { %v5256_v43 = vadd.f32 %v5255_v16, %v4037_v32  ;;  %v4049_v2 = vmul.f32 %v3025_v18, %v2001_v51  ;;  %v5269_v48 = vadd.f32 %v4047_v22, %v4046_v9  ;;  %v984_v32 = vld [vmem:[%s7536_s26 + $0x18f0] sm:$0xff]  ;;  %v2006_v0 = vmax.f32 %v982_v44, 1e-06  ;;  %v981_v18 = vld [vmem:[%s7536_s26 + $0x18d8] sm:$0xff]  ;;  %v8600_v22 = vpop.xlane.xlu0 %4927 }
 0x316   : > { %v3020_v4 = vmul.f32 %v1996_v54, %v1996_v54  ;;  %v3021_v11 = vmul.f32 %v1997_v8, %v1997_v8  ;;  %v4042_v60 = vmul.f32 %v3018_v28, %v1994_v52  ;;  %v4043_v6 = vmul.f32 %v3019_v3, %v1995_v15  ;;  %v980_v51 = vld [vmem:[%s7536_s26 + $0x18d0] sm:$0xff]  ;;  %10140 = vst [vmem:[#allocation135_spill] sm:$0xff] %v8600_v22 }
 0x317   : > { %5257 = vadd.xlane.f32.xlu0 %v5256_v43  ;;  %v5270_v16 = vadd.f32 %v5269_v48, %v4048_v41  ;;  %v2007_v21 = vmax.f32 %v983_v7, 1e-06  ;;  %v2008_v19 = vmax.f32 %v984_v32, 1e-06  ;;  %v2009_v43 = vmax.f32 %v985_v1, 1e-06 }
 0x318   : > { %v4044_v49 = vmul.f32 %v3020_v4, %v1996_v54  ;;  %v4045_v31 = vmul.f32 %v3021_v11, %v1997_v8  ;;  %v5264_v12 = vadd.f32 %v4043_v6, %v4042_v60  ;;  %v3030_v26 = vmul.f32 %v2006_v0, %v2006_v0  ;;  %v8602_v54 = vpop.xlane.xlu1 %4942 }
 0x319   : > { %v5271_v9 = vadd.f32 %v5270_v16, %v4049_v2  ;;  %v3031_v13 = vmul.f32 %v2007_v21, %v2007_v21  ;;  %v2002_v52 = vmax.f32 %v978_v34, 1e-06  ;;  %v3032_v44 = vmul.f32 %v2008_v19, %v2008_v19  ;;  %10141 = vst [vmem:[#allocation136_spill] sm:$0xff] %v8602_v54  ;;  %v990_v2 = vld [vmem:[%s7536_s26 + $0x1920] sm:$0xff]  ;;  %v991_v16 = vld [vmem:[%s7536_s26 + $0x1928] sm:$0xff] }
 0x31a   : > { %v5265_v15 = vadd.f32 %v5264_v12, %v4044_v49  ;;  %v3033_v28 = vmul.f32 %v2009_v43, %v2009_v43  ;;  %v2003_v41 = vmax.f32 %v979_v50, 1e-06  ;;  %v4054_v8 = vmul.f32 %v3030_v26, %v2006_v0  ;;  %v992_v49 = vld [vmem:[%s7536_s26 + $0x1930] sm:$0xff]  ;;  %v993_v50 = vld [vmem:[%s7536_s26 + $0x1938] sm:$0xff]  ;;  %v986_v0 = vld [vmem:[%s7536_s26 + $0x1900] sm:$0xff] }
 0x31b   : > { %5272 = vadd.xlane.f32.xlu1 %v5271_v9  ;;  %v4055_v3 = vmul.f32 %v3031_v13, %v2007_v21  ;;  %v2004_v7 = vmax.f32 %v980_v51, 1e-06  ;;  %v2005_v48 = vmax.f32 %v981_v18, 1e-06  ;;  %v4056_v32 = vmul.f32 %v3032_v44, %v2008_v19  ;;  %v8609_v19 = vpop.xlane.xlu0 %4937  ;;  %v988_v18 = vld [vmem:[%s7536_s26 + $0x1910] sm:$0xff]  ;;  %v989_v9 = vld [vmem:[%s7536_s26 + $0x1918] sm:$0xff] }
 0x31c   : > { %v5266_v4 = vadd.f32 %v5265_v15, %v4045_v31  ;;  %v4057_v1 = vmul.f32 %v3033_v28, %v2009_v43  ;;  %v3026_v11 = vmul.f32 %v2002_v52, %v2002_v52  ;;  %v3027_v60 = vmul.f32 %v2003_v41, %v2003_v41  ;;  %10142 = vst [vmem:[#allocation137_spill] sm:$0xff] %v8609_v19  ;;  %v987_v43 = vld [vmem:[%s7536_s26 + $0x1908] sm:$0xff] }
 0x31d   : > { %v5279_v12 = vadd.f32 %v4055_v3, %v4054_v8  ;;  %v3028_v6 = vmul.f32 %v2004_v7, %v2004_v7  ;;  %v3029_v34 = vmul.f32 %v2005_v48, %v2005_v48  ;;  %v2014_v13 = vmax.f32 %v990_v2, 1e-06  ;;  %v8614_v3 = vpop.xlane.xlu1 %4952 }
 0x31e   : > { %5267 = vadd.xlane.f32.xlu0 %v5266_v4  ;;  %v4050_v26 = vmul.f32 %v3026_v11, %v2002_v52  ;;  %v4051_v51 = vmul.f32 %v3027_v60, %v2003_v41  ;;  %v2015_v44 = vmax.f32 %v991_v16, 1e-06  ;;  %v2016_v28 = vmax.f32 %v992_v49, 1e-06  ;;  %10143 = vst [vmem:[#allocation138_spill] sm:$0xff] %v8614_v3 }
 0x31f   : > { %v5280_v21 = vadd.f32 %v5279_v12, %v4056_v32  ;;  %v4052_v31 = vmul.f32 %v3028_v6, %v2004_v7  ;;  %v4053_v15 = vmul.f32 %v3029_v34, %v2005_v48  ;;  %v2017_v8 = vmax.f32 %v993_v50, 1e-06 }
 0x320   : > { %v5274_v22 = vadd.f32 %v4051_v51, %v4050_v26  ;;  %v3038_v4 = vmul.f32 %v2014_v13, %v2014_v13  ;;  %v2010_v52 = vmax.f32 %v986_v0, 1e-06  ;;  %v3039_v2 = vmul.f32 %v2015_v44, %v2015_v44  ;;  %v8616_v0 = vpop.xlane.xlu0 %4947  ;;  %v999_v51 = vld [vmem:[%s7536_s26 + $0x1968] sm:$0xff] }
 0x321   : > { %v5281_v54 = vadd.f32 %v5280_v21, %v4057_v1  ;;  %v3040_v11 = vmul.f32 %v2016_v28, %v2016_v28  ;;  %v3041_v41 = vmul.f32 %v2017_v8, %v2017_v8  ;;  %v2011_v7 = vmax.f32 %v987_v43, 1e-06  ;;  %10144 = vst [vmem:[#allocation139_spill] sm:$0xff] %v8616_v0  ;;  %v998_v21 = vld [vmem:[%s7536_s26 + $0x1960] sm:$0xff]  ;;  %v1001_v43 = vld [vmem:[%s7536_s26 + $0x1978] sm:$0xff] }
 0x322   : > { %v5275_v32 = vadd.f32 %v5274_v22, %v4052_v31  ;;  %v4062_v12 = vmul.f32 %v3038_v4, %v2014_v13  ;;  %v2012_v48 = vmax.f32 %v988_v18, 1e-06  ;;  %v2013_v60 = vmax.f32 %v989_v9, 1e-06  ;;  %v994_v18 = vld [vmem:[%s7536_s26 + $0x1940] sm:$0xff]  ;;  %v8623_v9 = vpop.xlane.xlu1 %4962  ;;  %v996_v4 = vld [vmem:[%s7536_s26 + $0x1950] sm:$0xff] }
 0x323   : > { %5282 = vadd.xlane.f32.xlu1 %v5281_v54  ;;  %v4063_v6 = vmul.f32 %v3039_v2, %v2015_v44  ;;  %v4064_v34 = vmul.f32 %v3040_v11, %v2016_v28  ;;  %v3034_v1 = vmul.f32 %v2010_v52, %v2010_v52  ;;  %v3035_v49 = vmul.f32 %v2011_v7, %v2011_v7  ;;  %v1000_v54 = vld [vmem:[%s7536_s26 + $0x1970] sm:$0xff]  ;;  %v995_v28 = vld [vmem:[%s7536_s26 + $0x1948] sm:$0xff] }
 0x324   : > { %v5276_v16 = vadd.f32 %v5275_v32, %v4053_v15  ;;  %v3036_v50 = vmul.f32 %v2012_v48, %v2012_v48  ;;  %v3037_v26 = vmul.f32 %v2013_v60, %v2013_v60  ;;  %v4065_v22 = vmul.f32 %v3041_v41, %v2017_v8  ;;  %10145 = vst [vmem:[#allocation140_spill] sm:$0xff] %v8623_v9  ;;  %v997_v8 = vld [vmem:[%s7536_s26 + $0x1958] sm:$0xff] }
 0x325   : > { %v5289_v13 = vadd.f32 %v4063_v6, %v4062_v12  ;;  %v4058_v31 = vmul.f32 %v3034_v1, %v2010_v52  ;;  %v4059_v15 = vmul.f32 %v3035_v49, %v2011_v7  ;;  %v2022_v11 = vmax.f32 %v998_v21, 1e-06  ;;  %v8628_v49 = vpop.xlane.xlu0 %4957 }
 0x326   : > { %5277 = vadd.xlane.f32.xlu0 %v5276_v16  ;;  %v4060_v44 = vmul.f32 %v3036_v50, %v2012_v48  ;;  %v2023_v32 = vmax.f32 %v999_v51, 1e-06  ;;  %v2024_v3 = vmax.f32 %v1000_v54, 1e-06  ;;  %v4061_v0 = vmul.f32 %v3037_v26, %v2013_v60  ;;  %10146 = vst [vmem:[#allocation141_spill] sm:$0xff] %v8628_v49  ;;  %v8630_v21 = vpop.xlane.xlu1 %4972 }
 0x327   : > { %v5290_v2 = vadd.f32 %v5289_v13, %v4064_v34  ;;  %v5284_v19 = vadd.f32 %v4059_v15, %v4058_v31  ;;  %v2025_v63 = vmax.f32 %v1001_v43, 1e-06  ;;  %v2018_v41 = vmax.f32 %v994_v18, 1e-06  ;;  %10147 = vst [vmem:[#allocation142_spill] sm:$0xff] %v8630_v21  ;;  %v1007_v15 = vld [vmem:[%s7536_s26 + $0x19a8] sm:$0xff] }
 0x328   : > { %v3046_v12 = vmul.f32 %v2022_v11, %v2022_v11  ;;  %v3047_v6 = vmul.f32 %v2023_v32, %v2023_v32  ;;  %v3048_v1 = vmul.f32 %v2024_v3, %v2024_v3  ;;  %v2019_v7 = vmax.f32 %v995_v28, 1e-06 }
 0x329   : > { %v5291_v52 = vadd.f32 %v5290_v2, %v4065_v22  ;;  %v5285_v9 = vadd.f32 %v5284_v19, %v4060_v44  ;;  %v3049_v16 = vmul.f32 %v2025_v63, %v2025_v63  ;;  %v2020_v48 = vmax.f32 %v996_v4, 1e-06  ;;  %v1006_v19 = vld [vmem:[%s7536_s26 + $0x19a0] sm:$0xff]  ;;  %v1008_v44 = vld [vmem:[%s7536_s26 + $0x19b0] sm:$0xff]  ;;  %v1009_v4 = vld [vmem:[%s7536_s26 + $0x19b8] sm:$0xff] }
 0x32a   : > { %v4070_v34 = vmul.f32 %v3046_v12, %v2022_v11  ;;  %v4071_v60 = vmul.f32 %v3047_v6, %v2023_v32  ;;  %v4072_v50 = vmul.f32 %v3048_v1, %v2024_v3  ;;  %v2021_v26 = vmax.f32 %v997_v8, 1e-06  ;;  %v1002_v2 = vld [vmem:[%s7536_s26 + $0x1980] sm:$0xff]  ;;  %v1004_v6 = vld [vmem:[%s7536_s26 + $0x1990] sm:$0xff]  ;;  %v1005_v1 = vld [vmem:[%s7536_s26 + $0x1998] sm:$0xff] }
 0x32b   : > { %5292 = vadd.xlane.f32.xlu1 %v5291_v52  ;;  %v5286_v51 = vadd.f32 %v5285_v9, %v4061_v0  ;;  %v3042_v54 = vmul.f32 %v2018_v41, %v2018_v41  ;;  %v3043_v22 = vmul.f32 %v2019_v7, %v2019_v7  ;;  %v4073_v13 = vmul.f32 %v3049_v16, %v2025_v63  ;;  %v1003_v9 = vld [vmem:[%s7536_s26 + $0x1988] sm:$0xff]  ;;  %v8640_v16 = vpop.xlane.xlu0 %4967 }
 0x32c   : > { %v5299_v31 = vadd.f32 %v4071_v60, %v4070_v34  ;;  %v3044_v43 = vmul.f32 %v2020_v48, %v2020_v48  ;;  %v3045_v18 = vmul.f32 %v2021_v26, %v2021_v26  ;;  %v2030_v0 = vmax.f32 %v1006_v19, 1e-06  ;;  %10148 = vst [vmem:[#allocation143_spill] sm:$0xff] %v8640_v16 }
 0x32d   : > { %5287 = vadd.xlane.f32.xlu0 %v5286_v51  ;;  %v4066_v3 = vmul.f32 %v3042_v54, %v2018_v41  ;;  %v4067_v28 = vmul.f32 %v3043_v22, %v2019_v7  ;;  %v2031_v12 = vmax.f32 %v1007_v15, 1e-06  ;;  %v2032_v63 = vmax.f32 %v1008_v44, 1e-06  ;;  %v8642_v41 = vpop.xlane.xlu1 %4982 }
 0x32e   : > { %v5300_v11 = vadd.f32 %v5299_v31, %v4072_v50  ;;  %v4068_v32 = vmul.f32 %v3044_v43, %v2020_v48  ;;  %v4069_v8 = vmul.f32 %v3045_v18, %v2021_v26  ;;  %v2033_v60 = vmax.f32 %v1009_v4, 1e-06  ;;  %10149 = vst [vmem:[#allocation144_spill] sm:$0xff] %v8642_v41  ;;  %v1014_v4 = vld [vmem:[%s7536_s26 + $0x19e0] sm:$0xff] }
 0x32f   : > { %v5294_v52 = vadd.f32 %v4067_v28, %v4066_v3  ;;  %v3054_v21 = vmul.f32 %v2030_v0, %v2030_v0  ;;  %v2026_v51 = vmax.f32 %v1002_v2, 1e-06  ;;  %v3055_v50 = vmul.f32 %v2031_v12, %v2031_v12  ;;  %v1015_v2 = vld [vmem:[%s7536_s26 + $0x19e8] sm:$0xff] }
 0x330   : > { %v5301_v34 = vadd.f32 %v5300_v11, %v4073_v13  ;;  %v3056_v48 = vmul.f32 %v2032_v63, %v2032_v63  ;;  %v2027_v26 = vmax.f32 %v1003_v9, 1e-06  ;;  %v3057_v54 = vmul.f32 %v2033_v60, %v2033_v60  ;;  %v1016_v11 = vld [vmem:[%s7536_s26 + $0x19f0] sm:$0xff] }
 0x331   : > { %v5295_v7 = vadd.f32 %v5294_v52, %v4068_v32  ;;  %v4078_v22 = vmul.f32 %v3054_v21, %v2030_v0  ;;  %v2028_v19 = vmax.f32 %v1004_v6, 1e-06  ;;  %v2029_v31 = vmax.f32 %v1005_v1, 1e-06  ;;  %v1017_v0 = vld [vmem:[%s7536_s26 + $0x19f8] sm:$0xff]  ;;  %v1010_v52 = vld [vmem:[%s7536_s26 + $0x19c0] sm:$0xff]  ;;  %v8649_v6 = vpop.xlane.xlu0 %4977 }
 0x332   : > { %5302 = vadd.xlane.f32.xlu1 %v5301_v34  ;;  %v4079_v43 = vmul.f32 %v3055_v50, %v2031_v12  ;;  %v4080_v18 = vmul.f32 %v3056_v48, %v2032_v63  ;;  %v3050_v15 = vmul.f32 %v2026_v51, %v2026_v51  ;;  %v3051_v44 = vmul.f32 %v2027_v26, %v2027_v26  ;;  %v1011_v63 = vld [vmem:[%s7536_s26 + $0x19c8] sm:$0xff]  ;;  %v1012_v1 = vld [vmem:[%s7536_s26 + $0x19d0] sm:$0xff]  ;;  %v8653_v34 = vpop.xlane.xlu1 %4992 }
 0x333   : > { %v5296_v13 = vadd.f32 %v5295_v7, %v4069_v8  ;;  %v3052_v3 = vmul.f32 %v2028_v19, %v2028_v19  ;;  %v3053_v28 = vmul.f32 %v2029_v31, %v2029_v31  ;;  %v4081_v32 = vmul.f32 %v3057_v54, %v2033_v60  ;;  %10150 = vst [vmem:[#allocation145_spill] sm:$0xff] %v8649_v6  ;;  %v1013_v54 = vld [vmem:[%s7536_s26 + $0x19d8] sm:$0xff] }
 0x334   : > { %v5309_v9 = vadd.f32 %v4079_v43, %v4078_v22  ;;  %v4074_v21 = vmul.f32 %v3050_v15, %v2026_v51  ;;  %v4075_v8 = vmul.f32 %v3051_v44, %v2027_v26  ;;  %10151 = vst [vmem:[#allocation146_spill] sm:$0xff] %v8653_v34  ;;  %v2038_v50 = vmax.f32 %v1014_v4, 1e-06 }
 0x335   : > { %5297 = vadd.xlane.f32.xlu0 %v5296_v13  ;;  %v4076_v12 = vmul.f32 %v3052_v3, %v2028_v19  ;;  %v2039_v48 = vmax.f32 %v1015_v2, 1e-06  ;;  %v2040_v41 = vmax.f32 %v1016_v11, 1e-06  ;;  %v4077_v16 = vmul.f32 %v3053_v28, %v2029_v31  ;;  %v8656_v28 = vpop.xlane.xlu0 %4987 }
 0x336   : > { %v5310_v7 = vadd.f32 %v5309_v9, %v4080_v18  ;;  %v5304_v13 = vadd.f32 %v4075_v8, %v4074_v21  ;;  %v2041_v60 = vmax.f32 %v1017_v0, 1e-06  ;;  %v2034_v51 = vmax.f32 %v1010_v52, 1e-06  ;;  %10152 = vst [vmem:[#allocation147_spill] sm:$0xff] %v8656_v28  ;;  %v1022_v21 = vld [vmem:[%s7536_s26 + $0x1a20] sm:$0xff]  ;;  %v8659_v0 = vpop.xlane.xlu1 %5002 }
 0x337   : > { %v3062_v43 = vmul.f32 %v2038_v50, %v2038_v50  ;;  %v3063_v15 = vmul.f32 %v2039_v48, %v2039_v48  ;;  %v3064_v6 = vmul.f32 %v2040_v41, %v2040_v41  ;;  %v2035_v44 = vmax.f32 %v1011_v63, 1e-06  ;;  %10153 = vst [vmem:[#allocation148_spill] sm:$0xff] %v8659_v0 }
 0x338   : > { %v5311_v22 = vadd.f32 %v5310_v7, %v4081_v32  ;;  %v5305_v26 = vadd.f32 %v5304_v13, %v4076_v12  ;;  %v3065_v19 = vmul.f32 %v2041_v60, %v2041_v60  ;;  %v2036_v3 = vmax.f32 %v1012_v1, 1e-06  ;;  %v1023_v1 = vld [vmem:[%s7536_s26 + $0x1a28] sm:$0xff] }
 0x339   : > { %v4086_v18 = vmul.f32 %v3062_v43, %v2038_v50  ;;  %v4087_v4 = vmul.f32 %v3063_v15, %v2039_v48  ;;  %v4088_v2 = vmul.f32 %v3064_v6, %v2040_v41  ;;  %v2037_v31 = vmax.f32 %v1013_v54, 1e-06  ;;  %v1024_v41 = vld [vmem:[%s7536_s26 + $0x1a30] sm:$0xff]  ;;  %v1025_v50 = vld [vmem:[%s7536_s26 + $0x1a38] sm:$0xff]  ;;  %v1018_v48 = vld [vmem:[%s7536_s26 + $0x1a00] sm:$0xff]  ;;  %v8668_v49 = vpop.xlane.xlu0 %4997 }
 0x33a   : > { %5312 = vadd.xlane.f32.xlu1 %v5311_v22  ;;  %v5306_v11 = vadd.f32 %v5305_v26, %v4077_v16  ;;  %v3058_v32 = vmul.f32 %v2034_v51, %v2034_v51  ;;  %v3059_v9 = vmul.f32 %v2035_v44, %v2035_v44  ;;  %v4089_v52 = vmul.f32 %v3065_v19, %v2041_v60  ;;  %v1019_v22 = vld [vmem:[%s7536_s26 + $0x1a08] sm:$0xff]  ;;  %v1020_v19 = vld [vmem:[%s7536_s26 + $0x1a10] sm:$0xff] }
 0x33b   : > { %v5319_v8 = vadd.f32 %v4087_v4, %v4086_v18  ;;  %v3060_v12 = vmul.f32 %v2036_v3, %v2036_v3  ;;  %v3061_v63 = vmul.f32 %v2037_v31, %v2037_v31  ;;  %v2046_v54 = vmax.f32 %v1022_v21, 1e-06  ;;  %v1021_v18 = vld [vmem:[%s7536_s26 + $0x1a18] sm:$0xff]  ;;  %10154 = vst [vmem:[#allocation149_spill] sm:$0xff] %v8668_v49 }
 0x33c   : > { %5307 = vadd.xlane.f32.xlu0 %v5306_v11  ;;  %v4082_v6 = vmul.f32 %v3058_v32, %v2034_v51  ;;  %v4083_v7 = vmul.f32 %v3059_v9, %v2035_v44  ;;  %v2047_v26 = vmax.f32 %v1023_v1, 1e-06  ;;  %v2048_v60 = vmax.f32 %v1024_v41, 1e-06 }
 0x33d   : > { %v5320_v16 = vadd.f32 %v5319_v8, %v4088_v2  ;;  %v4084_v13 = vmul.f32 %v3060_v12, %v2036_v3  ;;  %v4085_v43 = vmul.f32 %v3061_v63, %v2037_v31  ;;  %v2049_v0 = vmax.f32 %v1025_v50, 1e-06  ;;  %v8670_v2 = vpop.xlane.xlu1 %5012  ;;  %v1083_v50 = vld [vmem:[%s7536_s26 + $0x1c08] sm:$0xff] }
 0x33e   : > { %v5314_v15 = vadd.f32 %v4083_v7, %v4082_v6  ;;  %v3070_v34 = vmul.f32 %v2046_v54, %v2046_v54  ;;  %v2042_v28 = vmax.f32 %v1018_v48, 1e-06  ;;  %v3071_v44 = vmul.f32 %v2047_v26, %v2047_v26  ;;  %10155 = vst [vmem:[#allocation150_spill] sm:$0xff] %v8670_v2  ;;  %v1082_v7 = vld [vmem:[%s7536_s26 + $0x1c00] sm:$0xff]  ;;  %v1084_v48 = vld [vmem:[%s7536_s26 + $0x1c10] sm:$0xff] }
 0x33f   : > { %v5321_v4 = vadd.f32 %v5320_v16, %v4089_v52  ;;  %v3072_v11 = vmul.f32 %v2048_v60, %v2048_v60  ;;  %v2043_v3 = vmax.f32 %v1019_v22, 1e-06  ;;  %v3073_v31 = vmul.f32 %v2049_v0, %v2049_v0  ;;  %v1026_v22 = vld [vmem:[%s7536_s26 + $0x1a40] sm:$0xff] }
 0x340   : > { %v5315_v51 = vadd.f32 %v5314_v15, %v4084_v13  ;;  %v4094_v32 = vmul.f32 %v3070_v34, %v2046_v54  ;;  %v2044_v9 = vmax.f32 %v1020_v19, 1e-06  ;;  %v2045_v21 = vmax.f32 %v1021_v18, 1e-06  ;;  %v1085_v54 = vld [vmem:[%s7536_s26 + $0x1c18] sm:$0xff]  ;;  %v8679_v19 = vpop.xlane.xlu0 %5007 }
 0x341   : > { %5322 = vadd.xlane.f32.xlu1 %v5321_v4  ;;  %v4095_v8 = vmul.f32 %v3071_v44, %v2047_v26  ;;  %v4096_v12 = vmul.f32 %v3072_v11, %v2048_v60  ;;  %v3066_v63 = vmul.f32 %v2042_v28, %v2042_v28  ;;  %v3067_v1 = vmul.f32 %v2043_v3, %v2043_v3  ;;  %v1027_v26 = vld [vmem:[%s7536_s26 + $0x1a48] sm:$0xff]  ;;  %v1028_v60 = vld [vmem:[%s7536_s26 + $0x1a50] sm:$0xff]  ;;  %v8681_v11 = vpop.xlane.xlu1 %5022 }
 0x342   : > { %v5316_v52 = vadd.f32 %v5315_v51, %v4085_v43  ;;  %v3068_v41 = vmul.f32 %v2044_v9, %v2044_v9  ;;  %v3069_v6 = vmul.f32 %v2045_v21, %v2045_v21  ;;  %v4097_v16 = vmul.f32 %v3073_v31, %v2049_v0  ;;  %10156 = vst [vmem:[#allocation151_spill] sm:$0xff] %v8679_v19  ;;  %v1029_v31 = vld [vmem:[%s7536_s26 + $0x1a58] sm:$0xff] }
 0x343   : > { %v5329_v13 = vadd.f32 %v4095_v8, %v4094_v32  ;;  %v4090_v34 = vmul.f32 %v3066_v63, %v2042_v28  ;;  %v4091_v15 = vmul.f32 %v3067_v1, %v2043_v3  ;;  %v2106_v4 = vmax.f32 %v1082_v7, 1e-06  ;;  %10157 = vst [vmem:[#allocation152_spill] sm:$0xff] %v8681_v11  ;;  %v1088_v11 = vld [vmem:[%s7536_s26 + $0x1c30] sm:$0xff] }
 0x344   : > { %5317 = vadd.xlane.f32.xlu0 %v5316_v52  ;;  %v4092_v43 = vmul.f32 %v3068_v41, %v2044_v9  ;;  %v2107_v51 = vmax.f32 %v1083_v50, 1e-06  ;;  %v2108_v44 = vmax.f32 %v1084_v48, 1e-06  ;;  %v4093_v49 = vmul.f32 %v3069_v6, %v2045_v21 }
 0x345   : > { %v5330_v18 = vadd.f32 %v5329_v13, %v4096_v12  ;;  %v5324_v52 = vadd.f32 %v4091_v15, %v4090_v34  ;;  %v2109_v0 = vmax.f32 %v1085_v54, 1e-06  ;;  %v2050_v28 = vmax.f32 %v1026_v22, 1e-06  ;;  %v8684_v34 = vpop.xlane.xlu0 %5017 }
 0x346   : > { %v3130_v8 = vmul.f32 %v2106_v4, %v2106_v4  ;;  %v3131_v63 = vmul.f32 %v2107_v51, %v2107_v51  ;;  %v3132_v3 = vmul.f32 %v2108_v44, %v2108_v44  ;;  %v2051_v41 = vmax.f32 %v1027_v26, 1e-06  ;;  %10158 = vst [vmem:[#allocation153_spill] sm:$0xff] %v8684_v34  ;;  %v1146_v26 = vld [vmem:[%s7536_s26 + $0x1e00] sm:$0xff] }
 0x347   : > { %v5331_v32 = vadd.f32 %v5330_v18, %v4097_v16  ;;  %v5325_v9 = vadd.f32 %v5324_v52, %v4092_v43  ;;  %v3133_v1 = vmul.f32 %v2109_v0, %v2109_v0  ;;  %v2052_v12 = vmax.f32 %v1028_v60, 1e-06  ;;  %v1147_v60 = vld [vmem:[%s7536_s26 + $0x1e08] sm:$0xff]  ;;  %v1148_v18 = vld [vmem:[%s7536_s26 + $0x1e10] sm:$0xff]  ;;  %v8689_v52 = vpop.xlane.xlu1 %5032 }
 0x348   : > { %v4154_v7 = vmul.f32 %v3130_v8, %v2106_v4  ;;  %v4155_v50 = vmul.f32 %v3131_v63, %v2107_v51  ;;  %v4156_v48 = vmul.f32 %v3132_v3, %v2108_v44  ;;  %v2053_v21 = vmax.f32 %v1029_v31, 1e-06  ;;  %10159 = vst [vmem:[#allocation154_spill] sm:$0xff] %v8689_v52  ;;  %v1086_v44 = vld [vmem:[%s7536_s26 + $0x1c20] sm:$0xff] }
 0x349   : > { %5332 = vadd.xlane.f32.xlu1 %v5331_v32  ;;  %v5326_v6 = vadd.f32 %v5325_v9, %v4093_v49  ;;  %v3074_v13 = vmul.f32 %v2050_v28, %v2050_v28  ;;  %v3075_v16 = vmul.f32 %v2051_v41, %v2051_v41  ;;  %v4157_v54 = vmul.f32 %v3133_v1, %v2109_v0  ;;  %v1149_v49 = vld [vmem:[%s7536_s26 + $0x1e18] sm:$0xff]  ;;  %v1087_v0 = vld [vmem:[%s7536_s26 + $0x1c28] sm:$0xff] }
 0x34a   : > { %v5404_v22 = vadd.f32 %v4155_v50, %v4154_v7  ;;  %v3076_v15 = vmul.f32 %v2052_v12, %v2052_v12  ;;  %v3077_v43 = vmul.f32 %v2053_v21, %v2053_v21  ;;  %v2170_v3 = vmax.f32 %v1146_v26, 1e-06  ;;  %v1030_v26 = vld [vmem:[%s7536_s26 + $0x1a60] sm:$0xff] }
 0x34b   : > { %5327 = vadd.xlane.f32.xlu0 %v5326_v6  ;;  %v4098_v4 = vmul.f32 %v3074_v13, %v2050_v28  ;;  %v4099_v51 = vmul.f32 %v3075_v16, %v2051_v41  ;;  %v2171_v9 = vmax.f32 %v1147_v60, 1e-06  ;;  %v2172_v1 = vmax.f32 %v1148_v18, 1e-06  ;;  %v1089_v41 = vld [vmem:[%s7536_s26 + $0x1c38] sm:$0xff]  ;;  %v8696_v13 = vpop.xlane.xlu0 %5027  ;;  %v8698_v16 = vpop.xlane.xlu1 %5042 }
 0x34c   : > { %v5405_v31 = vadd.f32 %v5404_v22, %v4156_v48  ;;  %v4100_v32 = vmul.f32 %v3076_v15, %v2052_v12  ;;  %v4101_v8 = vmul.f32 %v3077_v43, %v2053_v21  ;;  %v2173_v50 = vmax.f32 %v1149_v49, 1e-06  ;;  %10160 = vst [vmem:[#allocation155_spill] sm:$0xff] %v8696_v13  ;;  %10161 = vst [vmem:[#allocation156_spill] sm:$0xff] %v8698_v16 }
 0x34d   : > { %v5334_v63 = vadd.f32 %v4099_v51, %v4098_v4  ;;  %v2110_v52 = vmax.f32 %v1086_v44, 1e-06  ;;  %v3194_v6 = vmul.f32 %v2170_v3, %v2170_v3  ;;  %v3195_v28 = vmul.f32 %v2171_v9, %v2171_v9  ;;  %v1031_v51 = vld [vmem:[%s7536_s26 + $0x1a68] sm:$0xff] }
 0x34e   : > { %v5406_v7 = vadd.f32 %v5405_v31, %v4157_v54  ;;  %v3196_v12 = vmul.f32 %v2172_v1, %v2172_v1  ;;  %v3197_v48 = vmul.f32 %v2173_v50, %v2173_v50  ;;  %v2111_v21 = vmax.f32 %v1087_v0, 1e-06  ;;  %v1032_v0 = vld [vmem:[%s7536_s26 + $0x1a70] sm:$0xff] }
 0x34f   : > { %v5335_v34 = vadd.f32 %v5334_v63, %v4100_v32  ;;  %v4218_v22 = vmul.f32 %v3194_v6, %v2170_v3  ;;  %v4219_v15 = vmul.f32 %v3195_v28, %v2171_v9  ;;  %v2112_v43 = vmax.f32 %v1088_v11, 1e-06  ;;  %v1033_v63 = vld [vmem:[%s7536_s26 + $0x1a78] sm:$0xff]  ;;  %v1150_v6 = vld [vmem:[%s7536_s26 + $0x1e20] sm:$0xff]  ;;  %v1151_v28 = vld [vmem:[%s7536_s26 + $0x1e28] sm:$0xff] }
 0x350   : > { %5407 = vadd.xlane.f32.xlu1 %v5406_v7  ;;  %v4220_v60 = vmul.f32 %v3196_v12, %v2172_v1  ;;  %v2113_v18 = vmax.f32 %v1089_v41, 1e-06  ;;  %v3134_v4 = vmul.f32 %v2110_v52, %v2110_v52  ;;  %v4221_v49 = vmul.f32 %v3197_v48, %v2173_v50  ;;  %v8706_v41 = vpop.xlane.xlu0 %5037 }
 0x351   : > { %v5336_v54 = vadd.f32 %v5335_v34, %v4101_v8  ;;  %v5484_v44 = vadd.f32 %v4219_v15, %v4218_v22  ;;  %v3135_v31 = vmul.f32 %v2111_v21, %v2111_v21  ;;  %v3136_v32 = vmul.f32 %v2112_v43, %v2112_v43  ;;  %10162 = vst [vmem:[#allocation157_spill] sm:$0xff] %v8706_v41  ;;  %v8709_v22 = vpop.xlane.xlu1 %5052 }
 0x352   : > { %v3137_v7 = vmul.f32 %v2113_v18, %v2113_v18  ;;  %v4158_v34 = vmul.f32 %v3134_v4, %v2110_v52  ;;  %v2054_v8 = vmax.f32 %v1030_v26, 1e-06  ;;  %v2055_v1 = vmax.f32 %v1031_v51, 1e-06  ;;  %10163 = vst [vmem:[#allocation158_spill] sm:$0xff] %v8709_v22  ;;  %v1153_v26 = vld [vmem:[%s7536_s26 + $0x1e38] sm:$0xff] }
 0x353   : > { %5337 = vadd.xlane.f32.xlu0 %v5336_v54  ;;  %v5485_v3 = vadd.f32 %v5484_v44, %v4220_v60  ;;  %v4159_v11 = vmul.f32 %v3135_v31, %v2111_v21  ;;  %v4160_v9 = vmul.f32 %v3136_v32, %v2112_v43  ;;  %v2056_v50 = vmax.f32 %v1032_v0, 1e-06  ;;  %v1152_v54 = vld [vmem:[%s7536_s26 + $0x1e30] sm:$0xff]  ;;  %v1155_v22 = vld [vmem:[%s7536_s26 + $0x1e48] sm:$0xff] }
 0x354   : > { %v4161_v12 = vmul.f32 %v3137_v7, %v2113_v18  ;;  %v2057_v48 = vmax.f32 %v1033_v63, 1e-06  ;;  %v3078_v13 = vmul.f32 %v2054_v8, %v2054_v8  ;;  %v3079_v52 = vmul.f32 %v2055_v1, %v2055_v1  ;;  %v1154_v7 = vld [vmem:[%s7536_s26 + $0x1e40] sm:$0xff] }
 0x355   : > { %v5486_v15 = vadd.f32 %v5485_v3, %v4221_v49  ;;  %v5409_v16 = vadd.f32 %v4159_v11, %v4158_v34  ;;  %v3080_v60 = vmul.f32 %v2056_v50, %v2056_v50  ;;  %v2174_v43 = vmax.f32 %v1150_v6, 1e-06 }
 0x356   : > { %v3081_v21 = vmul.f32 %v2057_v48, %v2057_v48  ;;  %v2175_v4 = vmax.f32 %v1151_v28, 1e-06  ;;  %v4102_v18 = vmul.f32 %v3078_v13, %v2054_v8  ;;  %v4103_v44 = vmul.f32 %v3079_v52, %v2055_v1  ;;  %v1156_v28 = vld [vmem:[%s7536_s26 + $0x1e50] sm:$0xff]  ;;  %v1157_v8 = vld [vmem:[%s7536_s26 + $0x1e58] sm:$0xff]  ;;  %v1091_v52 = vld [vmem:[%s7536_s26 + $0x1c48] sm:$0xff] }
 0x357   : > { %5487 = vadd.xlane.f32.xlu1 %v5486_v15  ;;  %v5410_v51 = vadd.f32 %v5409_v16, %v4160_v9  ;;  %v2176_v31 = vmax.f32 %v1152_v54, 1e-06  ;;  %v4104_v32 = vmul.f32 %v3080_v60, %v2056_v50  ;;  %v2177_v49 = vmax.f32 %v1153_v26, 1e-06  ;;  %v8715_v15 = vpop.xlane.xlu0 %5047  ;;  %v8718_v9 = vpop.xlane.xlu1 %5062  ;;  %v1090_v54 = vld [vmem:[%s7536_s26 + $0x1c40] sm:$0xff] }
 0x358   : > { %v4105_v0 = vmul.f32 %v3081_v21, %v2057_v48  ;;  %v3198_v63 = vmul.f32 %v2174_v43, %v2174_v43  ;;  %v5339_v3 = vadd.f32 %v4103_v44, %v4102_v18  ;;  %v3199_v11 = vmul.f32 %v2175_v4, %v2175_v4  ;;  %10164 = vst [vmem:[#allocation159_spill] sm:$0xff] %v8715_v15 }
 0x359   : > { %v5411_v34 = vadd.f32 %v5410_v51, %v4161_v12  ;;  %v3200_v6 = vmul.f32 %v2176_v31, %v2176_v31  ;;  %v3201_v13 = vmul.f32 %v2177_v49, %v2177_v49  ;;  %10165 = vst [vmem:[#allocation160_spill] sm:$0xff] %v8718_v9  ;;  %v2178_v48 = vmax.f32 %v1154_v7, 1e-06  ;;  %v1092_v51 = vld [vmem:[%s7536_s26 + $0x1c50] sm:$0xff] }
 0x35a   : > { %v4222_v16 = vmul.f32 %v3198_v63, %v2174_v43  ;;  %v5340_v1 = vadd.f32 %v5339_v3, %v4104_v32  ;;  %v4223_v50 = vmul.f32 %v3199_v11, %v2175_v4  ;;  %v2179_v60 = vmax.f32 %v1155_v22, 1e-06  ;;  %v1093_v43 = vld [vmem:[%s7536_s26 + $0x1c58] sm:$0xff] }
 0x35b   : > { %5412 = vadd.xlane.f32.xlu0 %v5411_v34  ;;  %v4224_v12 = vmul.f32 %v3200_v6, %v2176_v31  ;;  %v4225_v26 = vmul.f32 %v3201_v13, %v2177_v49  ;;  %v2180_v21 = vmax.f32 %v1156_v28, 1e-06  ;;  %v2181_v15 = vmax.f32 %v1157_v8, 1e-06  ;;  %v8724_v22 = vpop.xlane.xlu0 %5057  ;;  %v8726_v6 = vpop.xlane.xlu1 %5072  ;;  %v1094_v8 = vld [vmem:[%s7536_s26 + $0x1c60] sm:$0xff] }
 0x35c   : > { %v5341_v18 = vadd.f32 %v5340_v1, %v4105_v0  ;;  %v5489_v44 = vadd.f32 %v4223_v50, %v4222_v16  ;;  %v3202_v41 = vmul.f32 %v2178_v48, %v2178_v48  ;;  %v3203_v63 = vmul.f32 %v2179_v60, %v2179_v60  ;;  %10166 = vst [vmem:[#allocation161_spill] sm:$0xff] %v8724_v22  ;;  %v1095_v1 = vld [vmem:[%s7536_s26 + $0x1c68] sm:$0xff] }
 0x35d   : > { %v3204_v19 = vmul.f32 %v2180_v21, %v2180_v21  ;;  %v2114_v9 = vmax.f32 %v1090_v54, 1e-06  ;;  %v2115_v34 = vmax.f32 %v1091_v52, 1e-06  ;;  %v3205_v31 = vmul.f32 %v2181_v15, %v2181_v15  ;;  %10167 = vst [vmem:[#allocation162_spill] sm:$0xff] %v8726_v6  ;;  %v1096_v54 = vld [vmem:[%s7536_s26 + $0x1c70] sm:$0xff] }
 0x35e   : > { %5342 = vadd.xlane.f32.xlu1 %v5341_v18  ;;  %v5490_v4 = vadd.f32 %v5489_v44, %v4224_v12  ;;  %v4226_v32 = vmul.f32 %v3202_v41, %v2178_v48  ;;  %v2116_v7 = vmax.f32 %v1092_v51, 1e-06  ;;  %v4227_v0 = vmul.f32 %v3203_v63, %v2179_v60  ;;  %v1097_v52 = vld [vmem:[%s7536_s26 + $0x1c78] sm:$0xff]  ;;  %v1035_v44 = vld [vmem:[%s7536_s26 + $0x1a88] sm:$0xff] }
 0x35f   : > { %v4228_v49 = vmul.f32 %v3204_v19, %v2180_v21  ;;  %v2117_v3 = vmax.f32 %v1093_v43, 1e-06  ;;  %v3138_v11 = vmul.f32 %v2114_v9, %v2114_v9  ;;  %v3139_v13 = vmul.f32 %v2115_v34, %v2115_v34  ;;  %v1034_v21 = vld [vmem:[%s7536_s26 + $0x1a80] sm:$0xff] }
 0x360   : > { %v5491_v28 = vadd.f32 %v5490_v4, %v4225_v26  ;;  %v3140_v16 = vmul.f32 %v2116_v7, %v2116_v7  ;;  %v4229_v50 = vmul.f32 %v3205_v31, %v2181_v15  ;;  %v5494_v41 = vadd.f32 %v4227_v0, %v4226_v32  ;;  %v1036_v15 = vld [vmem:[%s7536_s26 + $0x1a90] sm:$0xff]  ;;  %v1037_v31 = vld [vmem:[%s7536_s26 + $0x1a98] sm:$0xff]  ;;  %v8736_v32 = vpop.xlane.xlu0 %5067 }
 0x361   : > { %v3141_v12 = vmul.f32 %v2117_v3, %v2117_v3  ;;  %v4162_v48 = vmul.f32 %v3138_v11, %v2114_v9  ;;  %v4163_v19 = vmul.f32 %v3139_v13, %v2115_v34  ;;  %v2118_v18 = vmax.f32 %v1094_v8, 1e-06  ;;  %10168 = vst [vmem:[#allocation163_spill] sm:$0xff] %v8736_v32 }
 0x362   : > { %5492 = vadd.xlane.f32.xlu0 %v5491_v28  ;;  %v4164_v60 = vmul.f32 %v3140_v16, %v2116_v7  ;;  %v5495_v51 = vadd.f32 %v5494_v41, %v4228_v49  ;;  %v2119_v26 = vmax.f32 %v1095_v1, 1e-06  ;;  %v2120_v4 = vmax.f32 %v1096_v54, 1e-06  ;;  %v8738_v28 = vpop.xlane.xlu1 %5082 }
 0x363   : > { %v4165_v43 = vmul.f32 %v3141_v12, %v2117_v3  ;;  %v5414_v63 = vadd.f32 %v4163_v19, %v4162_v48  ;;  %v2121_v6 = vmax.f32 %v1097_v52, 1e-06  ;;  %v3142_v0 = vmul.f32 %v2118_v18, %v2118_v18  ;;  %10169 = vst [vmem:[#allocation164_spill] sm:$0xff] %v8738_v28 }
 0x364   : > { %v5496_v9 = vadd.f32 %v5495_v51, %v4229_v50  ;;  %v3143_v11 = vmul.f32 %v2119_v26, %v2119_v26  ;;  %v2058_v22 = vmax.f32 %v1034_v21, 1e-06  ;;  %v3144_v7 = vmul.f32 %v2120_v4, %v2120_v4  ;;  %v1038_v21 = vld [vmem:[%s7536_s26 + $0x1aa0] sm:$0xff]  ;;  %v1039_v51 = vld [vmem:[%s7536_s26 + $0x1aa8] sm:$0xff] }
 0x365   : > { %v5415_v34 = vadd.f32 %v5414_v63, %v4164_v60  ;;  %v3145_v49 = vmul.f32 %v2121_v6, %v2121_v6  ;;  %v2059_v13 = vmax.f32 %v1035_v44, 1e-06  ;;  %v4166_v3 = vmul.f32 %v3142_v0, %v2118_v18  ;;  %v1040_v44 = vld [vmem:[%s7536_s26 + $0x1ab0] sm:$0xff]  ;;  %v1158_v63 = vld [vmem:[%s7536_s26 + $0x1e60] sm:$0xff]  ;;  %v1161_v0 = vld [vmem:[%s7536_s26 + $0x1e78] sm:$0xff] }
 0x366   : > { %5497 = vadd.xlane.f32.xlu1 %v5496_v9  ;;  %v4167_v16 = vmul.f32 %v3143_v11, %v2119_v26  ;;  %v2060_v8 = vmax.f32 %v1036_v15, 1e-06  ;;  %v2061_v1 = vmax.f32 %v1037_v31, 1e-06  ;;  %v4168_v41 = vmul.f32 %v3144_v7, %v2120_v4  ;;  %v1041_v26 = vld [vmem:[%s7536_s26 + $0x1ab8] sm:$0xff]  ;;  %v8745_v15 = vpop.xlane.xlu0 %5077  ;;  %v1159_v31 = vld [vmem:[%s7536_s26 + $0x1e68] sm:$0xff]  ;;  %v8750_v11 = vpop.xlane.xlu1 %5092 }
 0x367   : > { %v5416_v50 = vadd.f32 %v5415_v34, %v4165_v43  ;;  %v4169_v12 = vmul.f32 %v3145_v49, %v2121_v6  ;;  %v3082_v48 = vmul.f32 %v2058_v22, %v2058_v22  ;;  %v3083_v52 = vmul.f32 %v2059_v13, %v2059_v13  ;;  %10170 = vst [vmem:[#allocation165_spill] sm:$0xff] %v8745_v15  ;;  %v1160_v9 = vld [vmem:[%s7536_s26 + $0x1e70] sm:$0xff] }
 0x368   : > { %v5419_v54 = vadd.f32 %v4167_v16, %v4166_v3  ;;  %v3084_v19 = vmul.f32 %v2060_v8, %v2060_v8  ;;  %v3085_v60 = vmul.f32 %v2061_v1, %v2061_v1  ;;  %10171 = vst [vmem:[#allocation166_spill] sm:$0xff] %v8750_v11  ;;  %v2062_v7 = vmax.f32 %v1038_v21, 1e-06 }
 0x369   : > { %5417 = vadd.xlane.f32.xlu0 %v5416_v50  ;;  %v4106_v18 = vmul.f32 %v3082_v48, %v2058_v22  ;;  %v4107_v4 = vmul.f32 %v3083_v52, %v2059_v13  ;;  %v2063_v49 = vmax.f32 %v1039_v51, 1e-06  ;;  %v2064_v3 = vmax.f32 %v1040_v44, 1e-06 }
 0x36a   : > { %v5420_v43 = vadd.f32 %v5419_v54, %v4168_v41  ;;  %v4108_v6 = vmul.f32 %v3084_v19, %v2060_v8  ;;  %v4109_v34 = vmul.f32 %v3085_v60, %v2061_v1  ;;  %v2065_v50 = vmax.f32 %v1041_v26, 1e-06  ;;  %v8752_v21 = vpop.xlane.xlu0 %5087  ;;  %v1162_v26 = vld [vmem:[%s7536_s26 + $0x1e80] sm:$0xff] }
 0x36b   : > { %v5344_v28 = vadd.f32 %v4107_v4, %v4106_v18  ;;  %v2182_v22 = vmax.f32 %v1158_v63, 1e-06  ;;  %v3086_v48 = vmul.f32 %v2062_v7, %v2062_v7  ;;  %v3087_v32 = vmul.f32 %v2063_v49, %v2063_v49  ;;  %10172 = vst [vmem:[#allocation167_spill] sm:$0xff] %v8752_v21  ;;  %v1163_v63 = vld [vmem:[%s7536_s26 + $0x1e88] sm:$0xff] }
 0x36c   : > { %v5421_v16 = vadd.f32 %v5420_v43, %v4169_v12  ;;  %v3088_v15 = vmul.f32 %v2064_v3, %v2064_v3  ;;  %v2183_v13 = vmax.f32 %v1159_v31, 1e-06  ;;  %v3089_v41 = vmul.f32 %v2065_v50, %v2065_v50  ;;  %v8756_v43 = vpop.xlane.xlu1 %5102 }
 0x36d   : > { %v5345_v8 = vadd.f32 %v5344_v28, %v4108_v6  ;;  %v2184_v54 = vmax.f32 %v1160_v9, 1e-06  ;;  %v2185_v52 = vmax.f32 %v1161_v0, 1e-06  ;;  %v4110_v1 = vmul.f32 %v3086_v48, %v2062_v7  ;;  %10173 = vst [vmem:[#allocation168_spill] sm:$0xff] %v8756_v43  ;;  %v1098_v7 = vld [vmem:[%s7536_s26 + $0x1c80] sm:$0xff] }
 0x36e   : > { %5422 = vadd.xlane.f32.xlu1 %v5421_v16  ;;  %v4111_v19 = vmul.f32 %v3087_v32, %v2063_v49  ;;  %v4112_v60 = vmul.f32 %v3088_v15, %v2064_v3  ;;  %v3206_v12 = vmul.f32 %v2182_v22, %v2182_v22  ;;  %v3207_v44 = vmul.f32 %v2183_v13, %v2183_v13  ;;  %v1164_v32 = vld [vmem:[%s7536_s26 + $0x1e90] sm:$0xff]  ;;  %v1165_v15 = vld [vmem:[%s7536_s26 + $0x1e98] sm:$0xff]  ;;  %v1099_v16 = vld [vmem:[%s7536_s26 + $0x1c88] sm:$0xff]  ;;  %v8764_v11 = vpop.xlane.xlu0 %5097 }
 0x36f   : > { %v5346_v51 = vadd.f32 %v5345_v8, %v4109_v34  ;;  %v3208_v18 = vmul.f32 %v2184_v54, %v2184_v54  ;;  %v4113_v28 = vmul.f32 %v3089_v41, %v2065_v50  ;;  %v3209_v6 = vmul.f32 %v2185_v52, %v2185_v52  ;;  %v1100_v50 = vld [vmem:[%s7536_s26 + $0x1c90] sm:$0xff]  ;;  %v1101_v41 = vld [vmem:[%s7536_s26 + $0x1c98] sm:$0xff]  ;;  %10174 = vst [vmem:[#allocation169_spill] sm:$0xff] %v8764_v11 }
 0x370   : > { %v5349_v4 = vadd.f32 %v4111_v19, %v4110_v1  ;;  %v4230_v31 = vmul.f32 %v3206_v12, %v2182_v22  ;;  %v4231_v9 = vmul.f32 %v3207_v44, %v2183_v13  ;;  %v2186_v49 = vmax.f32 %v1162_v26, 1e-06  ;;  %v8766_v44 = vpop.xlane.xlu1 %5112 }
 0x371   : > { %5347 = vadd.xlane.f32.xlu0 %v5346_v51  ;;  %v4232_v0 = vmul.f32 %v3208_v18, %v2184_v54  ;;  %v2187_v3 = vmax.f32 %v1163_v63, 1e-06  ;;  %v4233_v48 = vmul.f32 %v3209_v6, %v2185_v52  ;;  %v2188_v21 = vmax.f32 %v1164_v32, 1e-06  ;;  %10175 = vst [vmem:[#allocation170_spill] sm:$0xff] %v8766_v44 }
 0x372   : > { %v5350_v34 = vadd.f32 %v5349_v4, %v4112_v60  ;;  %v5499_v8 = vadd.f32 %v4231_v9, %v4230_v31  ;;  %v2189_v43 = vmax.f32 %v1165_v15, 1e-06  ;;  %v3210_v19 = vmul.f32 %v2186_v49, %v2186_v49 }
 0x373   : > { %v3211_v22 = vmul.f32 %v2187_v3, %v2187_v3  ;;  %v2122_v12 = vmax.f32 %v1098_v7, 1e-06  ;;  %v3212_v13 = vmul.f32 %v2188_v21, %v2188_v21  ;;  %v2123_v60 = vmax.f32 %v1099_v16, 1e-06  ;;  %v1102_v7 = vld [vmem:[%s7536_s26 + $0x1ca0] sm:$0xff]  ;;  %v1104_v16 = vld [vmem:[%s7536_s26 + $0x1cb0] sm:$0xff] }
 0x374   : > { %v5351_v1 = vadd.f32 %v5350_v34, %v4113_v28  ;;  %v5500_v51 = vadd.f32 %v5499_v8, %v4232_v0  ;;  %v3213_v54 = vmul.f32 %v2189_v43, %v2189_v43  ;;  %v4234_v52 = vmul.f32 %v3210_v19, %v2186_v49  ;;  %v1103_v34 = vld [vmem:[%s7536_s26 + $0x1ca8] sm:$0xff]  ;;  %v1042_v8 = vld [vmem:[%s7536_s26 + $0x1ac0] sm:$0xff]  ;;  %v8776_v19 = vpop.xlane.xlu0 %5107 }
 0x375   : > { %v4235_v18 = vmul.f32 %v3211_v22, %v2187_v3  ;;  %v2124_v26 = vmax.f32 %v1100_v50, 1e-06  ;;  %v2125_v63 = vmax.f32 %v1101_v41, 1e-06  ;;  %v4236_v4 = vmul.f32 %v3212_v13, %v2188_v21  ;;  %v1105_v3 = vld [vmem:[%s7536_s26 + $0x1cb8] sm:$0xff]  ;;  %v1043_v21 = vld [vmem:[%s7536_s26 + $0x1ac8] sm:$0xff] }
 0x376   : > { %5352 = vadd.xlane.f32.xlu1 %v5351_v1  ;;  %v5501_v28 = vadd.f32 %v5500_v51, %v4233_v48  ;;  %v4237_v6 = vmul.f32 %v3213_v54, %v2189_v43  ;;  %v3146_v31 = vmul.f32 %v2122_v12, %v2122_v12  ;;  %v3147_v15 = vmul.f32 %v2123_v60, %v2123_v60  ;;  %v1044_v43 = vld [vmem:[%s7536_s26 + $0x1ad0] sm:$0xff]  ;;  %v1045_v1 = vld [vmem:[%s7536_s26 + $0x1ad8] sm:$0xff] }
 0x377   : > { %v5504_v32 = vadd.f32 %v4235_v18, %v4234_v52  ;;  %v3148_v9 = vmul.f32 %v2124_v26, %v2124_v26  ;;  %v3149_v0 = vmul.f32 %v2125_v63, %v2125_v63  ;;  %10176 = vst [vmem:[#allocation171_spill] sm:$0xff] %v8776_v19  ;;  %v2126_v51 = vmax.f32 %v1102_v7, 1e-06  ;;  %v8778_v52 = vpop.xlane.xlu1 %5122 }
 0x378   : > { %5502 = vadd.xlane.f32.xlu0 %v5501_v28  ;;  %v4170_v49 = vmul.f32 %v3146_v31, %v2122_v12  ;;  %v4171_v41 = vmul.f32 %v3147_v15, %v2123_v60  ;;  %v2127_v13 = vmax.f32 %v1103_v34, 1e-06  ;;  %v2128_v54 = vmax.f32 %v1104_v16, 1e-06  ;;  %10177 = vst [vmem:[#allocation172_spill] sm:$0xff] %v8778_v52 }
 0x379   : > { %v5505_v50 = vadd.f32 %v5504_v32, %v4236_v4  ;;  %v4172_v48 = vmul.f32 %v3148_v9, %v2124_v26  ;;  %v4173_v22 = vmul.f32 %v3149_v0, %v2125_v63  ;;  %v2129_v28 = vmax.f32 %v1105_v3, 1e-06 }
 0x37a   : > { %v5424_v44 = vadd.f32 %v4171_v41, %v4170_v49  ;;  %v2066_v12 = vmax.f32 %v1042_v8, 1e-06  ;;  %v3150_v31 = vmul.f32 %v2126_v51, %v2126_v51  ;;  %v3151_v4 = vmul.f32 %v2127_v13, %v2127_v13  ;;  %v1046_v8 = vld [vmem:[%s7536_s26 + $0x1ae0] sm:$0xff]  ;;  %v8782_v41 = vpop.xlane.xlu0 %5117 }
 0x37b   : > { %v5506_v18 = vadd.f32 %v5505_v50, %v4237_v6  ;;  %v3152_v60 = vmul.f32 %v2128_v54, %v2128_v54  ;;  %v2067_v26 = vmax.f32 %v1043_v21, 1e-06  ;;  %v3153_v15 = vmul.f32 %v2129_v28, %v2129_v28  ;;  %v1047_v50 = vld [vmem:[%s7536_s26 + $0x1ae8] sm:$0xff]  ;;  %10178 = vst [vmem:[#allocation173_spill] sm:$0xff] %v8782_v41 }
 0x37c   : > { %v5425_v32 = vadd.f32 %v5424_v44, %v4172_v48  ;;  %v2068_v9 = vmax.f32 %v1044_v43, 1e-06  ;;  %v2069_v63 = vmax.f32 %v1045_v1, 1e-06  ;;  %v4174_v0 = vmul.f32 %v3150_v31, %v2126_v51  ;;  %v1048_v1 = vld [vmem:[%s7536_s26 + $0x1af0] sm:$0xff]  ;;  %v1049_v51 = vld [vmem:[%s7536_s26 + $0x1af8] sm:$0xff] }
 0x37d   : > { %5507 = vadd.xlane.f32.xlu1 %v5506_v18  ;;  %v4175_v7 = vmul.f32 %v3151_v4, %v2127_v13  ;;  %v4176_v34 = vmul.f32 %v3152_v60, %v2128_v54  ;;  %v3090_v6 = vmul.f32 %v2066_v12, %v2066_v12  ;;  %v3091_v49 = vmul.f32 %v2067_v26, %v2067_v26  ;;  %v8786_v13 = vpop.xlane.xlu1 %5132  ;;  %v1166_v18 = vld [vmem:[%s7536_s26 + $0x1ea0] sm:$0xff] }
 0x37e   : > { %v5426_v16 = vadd.f32 %v5425_v32, %v4173_v22  ;;  %v3092_v3 = vmul.f32 %v2068_v9, %v2068_v9  ;;  %v4177_v21 = vmul.f32 %v3153_v15, %v2129_v28  ;;  %v3093_v48 = vmul.f32 %v2069_v63, %v2069_v63  ;;  %10179 = vst [vmem:[#allocation174_spill] sm:$0xff] %v8786_v13  ;;  %v1167_v32 = vld [vmem:[%s7536_s26 + $0x1ea8] sm:$0xff] }
 0x37f   : > { %v5429_v44 = vadd.f32 %v4175_v7, %v4174_v0  ;;  %v4114_v43 = vmul.f32 %v3090_v6, %v2066_v12  ;;  %v4115_v22 = vmul.f32 %v3091_v49, %v2067_v26  ;;  %v2070_v4 = vmax.f32 %v1046_v8, 1e-06  ;;  %v1168_v0 = vld [vmem:[%s7536_s26 + $0x1eb0] sm:$0xff]  ;;  %v1169_v12 = vld [vmem:[%s7536_s26 + $0x1eb8] sm:$0xff] }
 0x380   : > { %5427 = vadd.xlane.f32.xlu0 %v5426_v16  ;;  %v4116_v54 = vmul.f32 %v3092_v3, %v2068_v9  ;;  %v2071_v60 = vmax.f32 %v1047_v50, 1e-06  ;;  %v4117_v52 = vmul.f32 %v3093_v48, %v2069_v63  ;;  %v2072_v28 = vmax.f32 %v1048_v1, 1e-06  ;;  %v8792_v9 = vpop.xlane.xlu0 %5127 }
 0x381   : > { %v5430_v31 = vadd.f32 %v5429_v44, %v4176_v34  ;;  %v5354_v41 = vadd.f32 %v4115_v22, %v4114_v43  ;;  %v2073_v15 = vmax.f32 %v1049_v51, 1e-06  ;;  %v3094_v6 = vmul.f32 %v2070_v4, %v2070_v4  ;;  %10180 = vst [vmem:[#allocation175_spill] sm:$0xff] %v8792_v9  ;;  %v8794_v8 = vpop.xlane.xlu1 %5142  ;;  %v1170_v22 = vld [vmem:[%s7536_s26 + $0x1ec0] sm:$0xff] }
 0x382   : > { %v3095_v19 = vmul.f32 %v2071_v60, %v2071_v60  ;;  %v2190_v11 = vmax.f32 %v1166_v18, 1e-06  ;;  %v3096_v13 = vmul.f32 %v2072_v28, %v2072_v28  ;;  %v2191_v26 = vmax.f32 %v1167_v32, 1e-06  ;;  %10181 = vst [vmem:[#allocation176_spill] sm:$0xff] %v8794_v8  ;;  %v1172_v18 = vld [vmem:[%s7536_s26 + $0x1ed0] sm:$0xff] }
 0x383   : > { %v5431_v7 = vadd.f32 %v5430_v31, %v4177_v21  ;;  %v5355_v2 = vadd.f32 %v5354_v41, %v4116_v54  ;;  %v3097_v16 = vmul.f32 %v2073_v15, %v2073_v15  ;;  %v4118_v63 = vmul.f32 %v3094_v6, %v2070_v4  ;;  %v1171_v54 = vld [vmem:[%s7536_s26 + $0x1ec8] sm:$0xff]  ;;  %v1173_v31 = vld [vmem:[%s7536_s26 + $0x1ed8] sm:$0xff] }
 0x384   : > { %v4119_v34 = vmul.f32 %v3095_v19, %v2071_v60  ;;  %v2192_v49 = vmax.f32 %v1168_v0, 1e-06  ;;  %v2193_v3 = vmax.f32 %v1169_v12, 1e-06  ;;  %v4120_v21 = vmul.f32 %v3096_v13, %v2072_v28  ;;  %v8802_v0 = vpop.xlane.xlu0 %5137 }
 0x385   : > { %5432 = vadd.xlane.f32.xlu1 %v5431_v7  ;;  %v5356_v50 = vadd.f32 %v5355_v2, %v4117_v52  ;;  %v4121_v41 = vmul.f32 %v3097_v16, %v2073_v15  ;;  %v3214_v44 = vmul.f32 %v2190_v11, %v2190_v11  ;;  %v3215_v43 = vmul.f32 %v2191_v26, %v2191_v26  ;;  %v1106_v2 = vld [vmem:[%s7536_s26 + $0x1cc0] sm:$0xff]  ;;  %v1107_v52 = vld [vmem:[%s7536_s26 + $0x1cc8] sm:$0xff] }
 0x386   : > { %v5359_v48 = vadd.f32 %v4119_v34, %v4118_v63  ;;  %v3216_v1 = vmul.f32 %v2192_v49, %v2192_v49  ;;  %v3217_v51 = vmul.f32 %v2193_v3, %v2193_v3  ;;  %v2194_v13 = vmax.f32 %v1170_v22, 1e-06  ;;  %10182 = vst [vmem:[#allocation177_spill] sm:$0xff] %v8802_v0  ;;  %v1108_v63 = vld [vmem:[%s7536_s26 + $0x1cd0] sm:$0xff]  ;;  %v8805_v34 = vpop.xlane.xlu1 %5152  ;;  %v1110_v22 = vld [vmem:[%s7536_s26 + $0x1ce0] sm:$0xff] }
 0x387   : > { %5357 = vadd.xlane.f32.xlu0 %v5356_v50  ;;  %v4238_v19 = vmul.f32 %v3214_v44, %v2190_v11  ;;  %v4239_v60 = vmul.f32 %v3215_v43, %v2191_v26  ;;  %v2195_v28 = vmax.f32 %v1171_v54, 1e-06  ;;  %v2196_v15 = vmax.f32 %v1172_v18, 1e-06  ;;  %10183 = vst [vmem:[#allocation178_spill] sm:$0xff] %v8805_v34  ;;  %v1113_v34 = vld [vmem:[%s7536_s26 + $0x1cf8] sm:$0xff] }
 0x388   : > { %v5360_v4 = vadd.f32 %v5359_v48, %v4120_v21  ;;  %v4240_v32 = vmul.f32 %v3216_v1, %v2192_v49  ;;  %v4241_v7 = vmul.f32 %v3217_v51, %v2193_v3  ;;  %v2197_v16 = vmax.f32 %v1173_v31, 1e-06  ;;  %v1109_v49 = vld [vmem:[%s7536_s26 + $0x1cd8] sm:$0xff]  ;;  %v1111_v31 = vld [vmem:[%s7536_s26 + $0x1ce8] sm:$0xff] }
 0x389   : > { %v5509_v6 = vadd.f32 %v4239_v60, %v4238_v19  ;;  %v3218_v11 = vmul.f32 %v2194_v13, %v2194_v13  ;;  %v3219_v50 = vmul.f32 %v2195_v28, %v2195_v28  ;;  %v3220_v26 = vmul.f32 %v2196_v15, %v2196_v15 }
 0x38a   : > { %v5361_v12 = vadd.f32 %v5360_v4, %v4121_v41  ;;  %v3221_v44 = vmul.f32 %v2197_v16, %v2197_v16  ;;  %v2130_v48 = vmax.f32 %v1106_v2, 1e-06  ;;  %v2131_v43 = vmax.f32 %v1107_v52, 1e-06  ;;  %v8812_v2 = vpop.xlane.xlu0 %5147 }
 0x38b   : > { %v5510_v21 = vadd.f32 %v5509_v6, %v4240_v32  ;;  %v4242_v41 = vmul.f32 %v3218_v11, %v2194_v13  ;;  %v4243_v3 = vmul.f32 %v3219_v50, %v2195_v28  ;;  %v4244_v1 = vmul.f32 %v3220_v26, %v2196_v15  ;;  %v1112_v6 = vld [vmem:[%s7536_s26 + $0x1cf0] sm:$0xff]  ;;  %10184 = vst [vmem:[#allocation179_spill] sm:$0xff] %v8812_v2  ;;  %v8814_v15 = vpop.xlane.xlu1 %5162  ;;  %v1050_v50 = vld [vmem:[%s7536_s26 + $0x1b00] sm:$0xff]  ;;  %v1051_v26 = vld [vmem:[%s7536_s26 + $0x1b08] sm:$0xff] }
 0x38c   : > { %5362 = vadd.xlane.f32.xlu1 %v5361_v12  ;;  %v2132_v51 = vmax.f32 %v1108_v63, 1e-06  ;;  %v2133_v18 = vmax.f32 %v1109_v49, 1e-06  ;;  %v3154_v19 = vmul.f32 %v2130_v48, %v2130_v48  ;;  %v4245_v4 = vmul.f32 %v3221_v44, %v2197_v16  ;;  %10185 = vst [vmem:[#allocation180_spill] sm:$0xff] %v8814_v15 }
 0x38d   : > { %v5511_v54 = vadd.f32 %v5510_v21, %v4241_v7  ;;  %v5514_v60 = vadd.f32 %v4243_v3, %v4242_v41  ;;  %v3155_v12 = vmul.f32 %v2131_v43, %v2131_v43  ;;  %v2134_v28 = vmax.f32 %v1110_v22, 1e-06  ;;  %v1052_v41 = vld [vmem:[%s7536_s26 + $0x1b10] sm:$0xff] }
 0x38e   : > { %v3156_v32 = vmul.f32 %v2132_v51, %v2132_v51  ;;  %v3157_v52 = vmul.f32 %v2133_v18, %v2133_v18  ;;  %v4178_v13 = vmul.f32 %v3154_v19, %v2130_v48  ;;  %v2135_v11 = vmax.f32 %v1111_v31, 1e-06  ;;  %v1053_v48 = vld [vmem:[%s7536_s26 + $0x1b18] sm:$0xff] }
 0x38f   : > { %5512 = vadd.xlane.f32.xlu0 %v5511_v54  ;;  %v5515_v7 = vadd.f32 %v5514_v60, %v4244_v1  ;;  %v4179_v63 = vmul.f32 %v3155_v12, %v2131_v43  ;;  %v2136_v21 = vmax.f32 %v1112_v6, 1e-06  ;;  %v2137_v44 = vmax.f32 %v1113_v34, 1e-06  ;;  %v8820_v34 = vpop.xlane.xlu0 %5157  ;;  %v8823_v6 = vpop.xlane.xlu1 %5172 }
 0x390   : > { %v4180_v16 = vmul.f32 %v3156_v32, %v2132_v51  ;;  %v4181_v49 = vmul.f32 %v3157_v52, %v2133_v18  ;;  %v3158_v2 = vmul.f32 %v2134_v28, %v2134_v28  ;;  %v3159_v54 = vmul.f32 %v2135_v11, %v2135_v11  ;;  %10186 = vst [vmem:[#allocation181_spill] sm:$0xff] %v8820_v34  ;;  %v1054_v32 = vld [vmem:[%s7536_s26 + $0x1b20] sm:$0xff]  ;;  %v1177_v34 = vld [vmem:[%s7536_s26 + $0x1ef8] sm:$0xff] }
 0x391   : > { %v5516_v3 = vadd.f32 %v5515_v7, %v4245_v4  ;;  %v5434_v8 = vadd.f32 %v4179_v63, %v4178_v13  ;;  %v3160_v22 = vmul.f32 %v2136_v21, %v2136_v21  ;;  %v3161_v19 = vmul.f32 %v2137_v44, %v2137_v44  ;;  %10187 = vst [vmem:[#allocation182_spill] sm:$0xff] %v8823_v6 }
 0x392   : > { %v2074_v0 = vmax.f32 %v1050_v50, 1e-06  ;;  %v2075_v15 = vmax.f32 %v1051_v26, 1e-06  ;;  %v4182_v1 = vmul.f32 %v3158_v2, %v2134_v28  ;;  %v4183_v51 = vmul.f32 %v3159_v54, %v2135_v11  ;;  %v1055_v2 = vld [vmem:[%s7536_s26 + $0x1b28] sm:$0xff]  ;;  %v1056_v28 = vld [vmem:[%s7536_s26 + $0x1b30] sm:$0xff] }
 0x393   : > { %5517 = vadd.xlane.f32.xlu1 %v5516_v3  ;;  %v5435_v43 = vadd.f32 %v5434_v8, %v4180_v16  ;;  %v2076_v18 = vmax.f32 %v1052_v41, 1e-06  ;;  %v4184_v31 = vmul.f32 %v3160_v22, %v2136_v21  ;;  %v4185_v4 = vmul.f32 %v3161_v19, %v2137_v44  ;;  %v1057_v11 = vld [vmem:[%s7536_s26 + $0x1b38] sm:$0xff]  ;;  %v1174_v41 = vld [vmem:[%s7536_s26 + $0x1ee0] sm:$0xff]  ;;  %v1175_v3 = vld [vmem:[%s7536_s26 + $0x1ee8] sm:$0xff]  ;;  %v8832_v9 = vpop.xlane.xlu0 %5167 }
 0x394   : > { %v2077_v60 = vmax.f32 %v1053_v48, 1e-06  ;;  %v3098_v12 = vmul.f32 %v2074_v0, %v2074_v0  ;;  %v5439_v13 = vadd.f32 %v4183_v51, %v4182_v1  ;;  %v3099_v7 = vmul.f32 %v2075_v15, %v2075_v15  ;;  %v1176_v22 = vld [vmem:[%s7536_s26 + $0x1ef0] sm:$0xff]  ;;  %10188 = vst [vmem:[#allocation183_spill] sm:$0xff] %v8832_v9 }
 0x395   : > { %v5436_v52 = vadd.f32 %v5435_v43, %v4181_v49  ;;  %v3100_v8 = vmul.f32 %v2076_v18, %v2076_v18  ;;  %v2078_v44 = vmax.f32 %v1054_v32, 1e-06  ;;  %v2079_v48 = vmax.f32 %v1055_v2, 1e-06 }
 0x396   : > { %v3101_v63 = vmul.f32 %v2077_v60, %v2077_v60  ;;  %v4122_v16 = vmul.f32 %v3098_v12, %v2074_v0  ;;  %v5440_v50 = vadd.f32 %v5439_v13, %v4184_v31  ;;  %v4123_v26 = vmul.f32 %v3099_v7, %v2075_v15 }
 0x397   : > { %5437 = vadd.xlane.f32.xlu0 %v5436_v52  ;;  %v4124_v21 = vmul.f32 %v3100_v8, %v2076_v18  ;;  %v2080_v49 = vmax.f32 %v1056_v28, 1e-06  ;;  %v2081_v1 = vmax.f32 %v1057_v11, 1e-06  ;;  %v3102_v51 = vmul.f32 %v2078_v44, %v2078_v44  ;;  %v8834_v18 = vpop.xlane.xlu1 %5182  ;;  %v1178_v11 = vld [vmem:[%s7536_s26 + $0x1f00] sm:$0xff] }
 0x398   : > { %v4125_v54 = vmul.f32 %v3101_v63, %v2077_v60  ;;  %v5441_v19 = vadd.f32 %v5440_v50, %v4185_v4  ;;  %v5364_v43 = vadd.f32 %v4123_v26, %v4122_v16  ;;  %v3103_v0 = vmul.f32 %v2079_v48, %v2079_v48  ;;  %10189 = vst [vmem:[#allocation184_spill] sm:$0xff] %v8834_v18  ;;  %v1179_v50 = vld [vmem:[%s7536_s26 + $0x1f08] sm:$0xff] }
 0x399   : > { %v3104_v12 = vmul.f32 %v2080_v49, %v2080_v49  ;;  %v2198_v31 = vmax.f32 %v1174_v41, 1e-06  ;;  %v2199_v15 = vmax.f32 %v1175_v3, 1e-06  ;;  %v3105_v32 = vmul.f32 %v2081_v1, %v2081_v1 }
 0x39a   : > { %5442 = vadd.xlane.f32.xlu1 %v5441_v19  ;;  %v5365_v60 = vadd.f32 %v5364_v43, %v4124_v21  ;;  %v4126_v52 = vmul.f32 %v3102_v51, %v2078_v44  ;;  %v2200_v4 = vmax.f32 %v1176_v22, 1e-06  ;;  %v4127_v13 = vmul.f32 %v3103_v0, %v2079_v48  ;;  %v1180_v19 = vld [vmem:[%s7536_s26 + $0x1f10] sm:$0xff]  ;;  %v1181_v44 = vld [vmem:[%s7536_s26 + $0x1f18] sm:$0xff]  ;;  %v8841_v22 = vpop.xlane.xlu0 %5177  ;;  %v1115_v0 = vld [vmem:[%s7536_s26 + $0x1d08] sm:$0xff] }
 0x39b   : > { %v4128_v7 = vmul.f32 %v3104_v12, %v2080_v49  ;;  %v2201_v8 = vmax.f32 %v1177_v34, 1e-06  ;;  %v3222_v2 = vmul.f32 %v2198_v31, %v2198_v31  ;;  %v3223_v63 = vmul.f32 %v2199_v15, %v2199_v15  ;;  %v1114_v34 = vld [vmem:[%s7536_s26 + $0x1d00] sm:$0xff]  ;;  %10190 = vst [vmem:[#allocation185_spill] sm:$0xff] %v8841_v22  ;;  %v8844_v12 = vpop.xlane.xlu1 %5192 }
 0x39c   : > { %v5366_v28 = vadd.f32 %v5365_v60, %v4125_v54  ;;  %v3224_v16 = vmul.f32 %v2200_v4, %v2200_v4  ;;  %v4129_v26 = vmul.f32 %v3105_v32, %v2081_v1  ;;  %v5369_v41 = vadd.f32 %v4127_v13, %v4126_v52  ;;  %10191 = vst [vmem:[#allocation186_spill] sm:$0xff] %v8844_v12  ;;  %v1116_v52 = vld [vmem:[%s7536_s26 + $0x1d10] sm:$0xff]  ;;  %v1117_v13 = vld [vmem:[%s7536_s26 + $0x1d18] sm:$0xff] }
 0x39d   : > { %v3225_v3 = vmul.f32 %v2201_v8, %v2201_v8  ;;  %v4246_v21 = vmul.f32 %v3222_v2, %v2198_v31  ;;  %v4247_v48 = vmul.f32 %v3223_v63, %v2199_v15  ;;  %v2202_v43 = vmax.f32 %v1178_v11, 1e-06 }
 0x39e   : > { %5367 = vadd.xlane.f32.xlu0 %v5366_v28  ;;  %v4248_v49 = vmul.f32 %v3224_v16, %v2200_v4  ;;  %v5370_v54 = vadd.f32 %v5369_v41, %v4128_v7  ;;  %v2203_v51 = vmax.f32 %v1179_v50, 1e-06  ;;  %v2204_v32 = vmax.f32 %v1180_v19, 1e-06 }
 0x39f   : > { %v4249_v1 = vmul.f32 %v3225_v3, %v2201_v8  ;;  %v5519_v60 = vadd.f32 %v4247_v48, %v4246_v21  ;;  %v2205_v31 = vmax.f32 %v1181_v44, 1e-06  ;;  %v3226_v18 = vmul.f32 %v2202_v43, %v2202_v43  ;;  %v8848_v44 = vpop.xlane.xlu0 %5187 }
 0x3a0   : > { %v5371_v2 = vadd.f32 %v5370_v54, %v4129_v26  ;;  %v3227_v28 = vmul.f32 %v2203_v51, %v2203_v51  ;;  %v2138_v15 = vmax.f32 %v1114_v34, 1e-06  ;;  %v3228_v63 = vmul.f32 %v2204_v32, %v2204_v32  ;;  %10192 = vst [vmem:[#allocation187_spill] sm:$0xff] %v8848_v44 }
 0x3a1   : > { %v5520_v4 = vadd.f32 %v5519_v60, %v4248_v49  ;;  %v3229_v16 = vmul.f32 %v2205_v31, %v2205_v31  ;;  %v2139_v7 = vmax.f32 %v1115_v0, 1e-06  ;;  %v4250_v11 = vmul.f32 %v3226_v18, %v2202_v43  ;;  %v1118_v0 = vld [vmem:[%s7536_s26 + $0x1d20] sm:$0xff]  ;;  %v1119_v18 = vld [vmem:[%s7536_s26 + $0x1d28] sm:$0xff]  ;;  %v1120_v43 = vld [vmem:[%s7536_s26 + $0x1d30] sm:$0xff] }
 0x3a2   : > { %5372 = vadd.xlane.f32.xlu1 %v5371_v2  ;;  %v4251_v50 = vmul.f32 %v3227_v28, %v2203_v51  ;;  %v2140_v8 = vmax.f32 %v1116_v52, 1e-06  ;;  %v2141_v41 = vmax.f32 %v1117_v13, 1e-06  ;;  %v4252_v21 = vmul.f32 %v3228_v63, %v2204_v32  ;;  %v8853_v51 = vpop.xlane.xlu1 %5202  ;;  %v1121_v60 = vld [vmem:[%s7536_s26 + $0x1d38] sm:$0xff]  ;;  %v1058_v32 = vld [vmem:[%s7536_s26 + $0x1b40] sm:$0xff] }
 0x3a3   : > { %v5521_v3 = vadd.f32 %v5520_v4, %v4249_v1  ;;  %v4253_v26 = vmul.f32 %v3229_v16, %v2205_v31  ;;  %v3162_v19 = vmul.f32 %v2138_v15, %v2138_v15  ;;  %v3163_v49 = vmul.f32 %v2139_v7, %v2139_v7  ;;  %10193 = vst [vmem:[#allocation188_spill] sm:$0xff] %v8853_v51  ;;  %v1059_v2 = vld [vmem:[%s7536_s26 + $0x1b48] sm:$0xff]  ;;  %v1060_v28 = vld [vmem:[%s7536_s26 + $0x1b50] sm:$0xff]  ;;  %v1061_v4 = vld [vmem:[%s7536_s26 + $0x1b58] sm:$0xff] }
 0x3a4   : > { %v5524_v48 = vadd.f32 %v4251_v50, %v4250_v11  ;;  %v3164_v34 = vmul.f32 %v2140_v8, %v2140_v8  ;;  %v3165_v54 = vmul.f32 %v2141_v41, %v2141_v41  ;;  %v2142_v16 = vmax.f32 %v1118_v0, 1e-06 }
 0x3a5   : > { %5522 = vadd.xlane.f32.xlu0 %v5521_v3  ;;  %v4186_v1 = vmul.f32 %v3162_v19, %v2138_v15  ;;  %v4187_v52 = vmul.f32 %v3163_v49, %v2139_v7  ;;  %v2143_v11 = vmax.f32 %v1119_v18, 1e-06  ;;  %v2144_v50 = vmax.f32 %v1120_v43, 1e-06 }
 0x3a6   : > { %v5525_v31 = vadd.f32 %v5524_v48, %v4252_v21  ;;  %v4188_v13 = vmul.f32 %v3164_v34, %v2140_v8  ;;  %v4189_v63 = vmul.f32 %v3165_v54, %v2141_v41  ;;  %v2145_v22 = vmax.f32 %v1121_v60, 1e-06  ;;  %v8860_v21 = vpop.xlane.xlu0 %5197  ;;  %v8862_v48 = vpop.xlane.xlu1 %5212  ;;  %v1063_v60 = vld [vmem:[%s7536_s26 + $0x1b68] sm:$0xff] }
 0x3a7   : > { %v5444_v44 = vadd.f32 %v4187_v52, %v4186_v1  ;;  %v2082_v9 = vmax.f32 %v1058_v32, 1e-06  ;;  %v3166_v6 = vmul.f32 %v2142_v16, %v2142_v16  ;;  %v3167_v51 = vmul.f32 %v2143_v11, %v2143_v11  ;;  %10194 = vst [vmem:[#allocation189_spill] sm:$0xff] %v8860_v21  ;;  %10195 = vst [vmem:[#allocation190_spill] sm:$0xff] %v8862_v48  ;;  %v1062_v1 = vld [vmem:[%s7536_s26 + $0x1b60] sm:$0xff]  ;;  %v1064_v52 = vld [vmem:[%s7536_s26 + $0x1b70] sm:$0xff] }
 0x3a8   : > { %v5526_v12 = vadd.f32 %v5525_v31, %v4253_v26  ;;  %v3168_v3 = vmul.f32 %v2144_v50, %v2144_v50  ;;  %v2083_v15 = vmax.f32 %v1059_v2, 1e-06  ;;  %v3169_v8 = vmul.f32 %v2145_v22, %v2145_v22  ;;  %v1182_v2 = vld [vmem:[%s7536_s26 + $0x1f20] sm:$0xff] }
 0x3a9   : > { %v5445_v7 = vadd.f32 %v5444_v44, %v4188_v13  ;;  %v2084_v19 = vmax.f32 %v1060_v28, 1e-06  ;;  %v2085_v41 = vmax.f32 %v1061_v4, 1e-06  ;;  %v4190_v26 = vmul.f32 %v3166_v6, %v2142_v16  ;;  %v1065_v13 = vld [vmem:[%s7536_s26 + $0x1b78] sm:$0xff]  ;;  %v1183_v16 = vld [vmem:[%s7536_s26 + $0x1f28] sm:$0xff] }
 0x3aa   : > { %5527 = vadd.xlane.f32.xlu1 %v5526_v12  ;;  %v4191_v49 = vmul.f32 %v3167_v51, %v2143_v11  ;;  %v4192_v34 = vmul.f32 %v3168_v3, %v2144_v50  ;;  %v3106_v54 = vmul.f32 %v2082_v9, %v2082_v9  ;;  %v3107_v18 = vmul.f32 %v2083_v15, %v2083_v15  ;;  %v8870_v11 = vpop.xlane.xlu0 %5207 }
 0x3ab   : > { %v5446_v0 = vadd.f32 %v5445_v7, %v4189_v63  ;;  %v3108_v43 = vmul.f32 %v2084_v19, %v2084_v19  ;;  %v4193_v12 = vmul.f32 %v3169_v8, %v2145_v22  ;;  %v3109_v32 = vmul.f32 %v2085_v41, %v2085_v41  ;;  %10196 = vst [vmem:[#allocation191_spill] sm:$0xff] %v8870_v11  ;;  %v1184_v8 = vld [vmem:[%s7536_s26 + $0x1f30] sm:$0xff] }
 0x3ac   : > { %v5449_v44 = vadd.f32 %v4191_v49, %v4190_v26  ;;  %v4130_v31 = vmul.f32 %v3106_v54, %v2082_v9  ;;  %v4131_v6 = vmul.f32 %v3107_v18, %v2083_v15  ;;  %v2086_v4 = vmax.f32 %v1062_v1, 1e-06  ;;  %v1185_v9 = vld [vmem:[%s7536_s26 + $0x1f38] sm:$0xff]  ;;  %v8874_v26 = vpop.xlane.xlu1 %5222 }
 0x3ad   : > { %5447 = vadd.xlane.f32.xlu0 %v5446_v0  ;;  %v4132_v51 = vmul.f32 %v3108_v43, %v2084_v19  ;;  %v2087_v63 = vmax.f32 %v1063_v60, 1e-06  ;;  %v4133_v50 = vmul.f32 %v3109_v32, %v2085_v41  ;;  %v2088_v22 = vmax.f32 %v1064_v52, 1e-06  ;;  %10197 = vst [vmem:[#allocation192_spill] sm:$0xff] %v8874_v26 }
 0x3ae   : > { %v5450_v28 = vadd.f32 %v5449_v44, %v4192_v34  ;;  %v5374_v3 = vadd.f32 %v4131_v6, %v4130_v31  ;;  %v2089_v7 = vmax.f32 %v1065_v13, 1e-06  ;;  %v3110_v54 = vmul.f32 %v2086_v4, %v2086_v4 }
 0x3af   : > { %v3111_v0 = vmul.f32 %v2087_v63, %v2087_v63  ;;  %v2206_v15 = vmax.f32 %v1182_v2, 1e-06  ;;  %v3112_v18 = vmul.f32 %v2088_v22, %v2088_v22  ;;  %v2207_v43 = vmax.f32 %v1183_v16, 1e-06  ;;  %v1187_v16 = vld [vmem:[%s7536_s26 + $0x1f48] sm:$0xff] }
 0x3b0   : > { %v5451_v49 = vadd.f32 %v5450_v28, %v4193_v12  ;;  %v5375_v19 = vadd.f32 %v5374_v3, %v4132_v51  ;;  %v3113_v34 = vmul.f32 %v2089_v7, %v2089_v7  ;;  %v4134_v41 = vmul.f32 %v3110_v54, %v2086_v4  ;;  %v1186_v28 = vld [vmem:[%s7536_s26 + $0x1f40] sm:$0xff]  ;;  %v1188_v3 = vld [vmem:[%s7536_s26 + $0x1f50] sm:$0xff]  ;;  %v8879_v4 = vpop.xlane.xlu0 %5217  ;;  %v1123_v54 = vld [vmem:[%s7536_s26 + $0x1d48] sm:$0xff] }
 0x3b1   : > { %v4135_v1 = vmul.f32 %v3111_v0, %v2087_v63  ;;  %v2208_v60 = vmax.f32 %v1184_v8, 1e-06  ;;  %v2209_v44 = vmax.f32 %v1185_v9, 1e-06  ;;  %v4136_v31 = vmul.f32 %v3112_v18, %v2088_v22  ;;  %10198 = vst [vmem:[#allocation193_spill] sm:$0xff] %v8879_v4  ;;  %v1189_v8 = vld [vmem:[%s7536_s26 + $0x1f58] sm:$0xff] }
 0x3b2   : > { %5452 = vadd.xlane.f32.xlu1 %v5451_v49  ;;  %v5376_v32 = vadd.f32 %v5375_v19, %v4133_v50  ;;  %v4137_v12 = vmul.f32 %v3113_v34, %v2089_v7  ;;  %v3230_v52 = vmul.f32 %v2206_v15, %v2206_v15  ;;  %v3231_v6 = vmul.f32 %v2207_v43, %v2207_v43  ;;  %v1122_v9 = vld [vmem:[%s7536_s26 + $0x1d40] sm:$0xff]  ;;  %v8883_v50 = vpop.xlane.xlu1 %5232  ;;  %v1124_v0 = vld [vmem:[%s7536_s26 + $0x1d50] sm:$0xff]  ;;  %v1125_v19 = vld [vmem:[%s7536_s26 + $0x1d58] sm:$0xff] }
 0x3b3   : > { %v5379_v13 = vadd.f32 %v4135_v1, %v4134_v41  ;;  %v3232_v51 = vmul.f32 %v2208_v60, %v2208_v60  ;;  %v3233_v2 = vmul.f32 %v2209_v44, %v2209_v44  ;;  %10199 = vst [vmem:[#allocation194_spill] sm:$0xff] %v8883_v50  ;;  %v2210_v34 = vmax.f32 %v1186_v28, 1e-06 }
 0x3b4   : > { %5377 = vadd.xlane.f32.xlu0 %v5376_v32  ;;  %v4254_v63 = vmul.f32 %v3230_v52, %v2206_v15  ;;  %v4255_v7 = vmul.f32 %v3231_v6, %v2207_v43  ;;  %v2211_v41 = vmax.f32 %v1187_v16, 1e-06  ;;  %v2212_v1 = vmax.f32 %v1188_v3, 1e-06 }
 0x3b5   : > { %v5380_v22 = vadd.f32 %v5379_v13, %v4136_v31  ;;  %v4256_v49 = vmul.f32 %v3232_v51, %v2208_v60  ;;  %v4257_v18 = vmul.f32 %v3233_v2, %v2209_v44  ;;  %v2213_v11 = vmax.f32 %v1189_v8, 1e-06  ;;  %v8888_v44 = vpop.xlane.xlu0 %5227 }
 0x3b6   : > { %v5529_v48 = vadd.f32 %v4255_v7, %v4254_v63  ;;  %v2146_v4 = vmax.f32 %v1122_v9, 1e-06  ;;  %v3234_v32 = vmul.f32 %v2210_v34, %v2210_v34  ;;  %v3235_v15 = vmul.f32 %v2211_v41, %v2211_v41  ;;  %10200 = vst [vmem:[#allocation195_spill] sm:$0xff] %v8888_v44  ;;  %v8890_v28 = vpop.xlane.xlu1 %5242 }
 0x3b7   : > { %v5381_v26 = vadd.f32 %v5380_v22, %v4137_v12  ;;  %v3236_v52 = vmul.f32 %v2212_v1, %v2212_v1  ;;  %v2147_v21 = vmax.f32 %v1123_v54, 1e-06  ;;  %v3237_v60 = vmul.f32 %v2213_v11, %v2213_v11  ;;  %10201 = vst [vmem:[#allocation196_spill] sm:$0xff] %v8890_v28  ;;  %v1129_v54 = vld [vmem:[%s7536_s26 + $0x1d78] sm:$0xff] }
 0x3b8   : > { %v5530_v43 = vadd.f32 %v5529_v48, %v4256_v49  ;;  %v2148_v31 = vmax.f32 %v1124_v0, 1e-06  ;;  %v2149_v13 = vmax.f32 %v1125_v19, 1e-06  ;;  %v4258_v6 = vmul.f32 %v3234_v32, %v2210_v34  ;;  %v1127_v48 = vld [vmem:[%s7536_s26 + $0x1d68] sm:$0xff]  ;;  %v1128_v49 = vld [vmem:[%s7536_s26 + $0x1d70] sm:$0xff] }
 0x3b9   : > { %5382 = vadd.xlane.f32.xlu1 %v5381_v26  ;;  %v4259_v12 = vmul.f32 %v3235_v15, %v2211_v41  ;;  %v4260_v51 = vmul.f32 %v3236_v52, %v2212_v1  ;;  %v3170_v2 = vmul.f32 %v2146_v4, %v2146_v4  ;;  %v3171_v3 = vmul.f32 %v2147_v21, %v2147_v21  ;;  %v1126_v26 = vld [vmem:[%s7536_s26 + $0x1d60] sm:$0xff]  ;;  %v1067_v32 = vld [vmem:[%s7536_s26 + $0x1b88] sm:$0xff] }
 0x3ba   : > { %v5531_v16 = vadd.f32 %v5530_v43, %v4257_v18  ;;  %v3172_v63 = vmul.f32 %v2148_v31, %v2148_v31  ;;  %v4261_v8 = vmul.f32 %v3237_v60, %v2213_v11  ;;  %v3173_v22 = vmul.f32 %v2149_v13, %v2149_v13  ;;  %v1066_v34 = vld [vmem:[%s7536_s26 + $0x1b80] sm:$0xff]  ;;  %v1068_v11 = vld [vmem:[%s7536_s26 + $0x1b90] sm:$0xff]  ;;  %v1069_v60 = vld [vmem:[%s7536_s26 + $0x1b98] sm:$0xff] }
 0x3bb   : > { %v5534_v9 = vadd.f32 %v4259_v12, %v4258_v6  ;;  %v4194_v7 = vmul.f32 %v3170_v2, %v2146_v4  ;;  %v4195_v0 = vmul.f32 %v3171_v3, %v2147_v21  ;;  %v2150_v1 = vmax.f32 %v1126_v26, 1e-06  ;;  %v8900_v6 = vpop.xlane.xlu0 %5237 }
 0x3bc   : > { %5532 = vadd.xlane.f32.xlu0 %v5531_v16  ;;  %v4196_v19 = vmul.f32 %v3172_v63, %v2148_v31  ;;  %v2151_v18 = vmax.f32 %v1127_v48, 1e-06  ;;  %v4197_v15 = vmul.f32 %v3173_v22, %v2149_v13  ;;  %v2152_v43 = vmax.f32 %v1128_v49, 1e-06  ;;  %10202 = vst [vmem:[#allocation197_spill] sm:$0xff] %v8900_v6  ;;  %v8902_v16 = vpop.xlane.xlu1 %5252 }
 0x3bd   : > { %v5535_v41 = vadd.f32 %v5534_v9, %v4260_v51  ;;  %v5454_v52 = vadd.f32 %v4195_v0, %v4194_v7  ;;  %v2153_v28 = vmax.f32 %v1129_v54, 1e-06  ;;  %v3174_v12 = vmul.f32 %v2150_v1, %v2150_v1 }
 0x3be   : > { %v3175_v2 = vmul.f32 %v2151_v18, %v2151_v18  ;;  %v2090_v50 = vmax.f32 %v1066_v34, 1e-06  ;;  %v3176_v31 = vmul.f32 %v2152_v43, %v2152_v43  ;;  %v2091_v3 = vmax.f32 %v1067_v32, 1e-06  ;;  %v1070_v34 = vld [vmem:[%s7536_s26 + $0x1ba0] sm:$0xff]  ;;  %v1072_v32 = vld [vmem:[%s7536_s26 + $0x1bb0] sm:$0xff] }
 0x3bf   : > { %v5536_v4 = vadd.f32 %v5535_v41, %v4261_v8  ;;  %v5455_v21 = vadd.f32 %v5454_v52, %v4196_v19  ;;  %v3177_v51 = vmul.f32 %v2153_v28, %v2153_v28  ;;  %v4198_v13 = vmul.f32 %v3174_v12, %v2150_v1  ;;  %v1071_v41 = vld [vmem:[%s7536_s26 + $0x1ba8] sm:$0xff]  ;;  %v1073_v1 = vld [vmem:[%s7536_s26 + $0x1bb8] sm:$0xff] }
 0x3c0   : > { %v4199_v63 = vmul.f32 %v3175_v2, %v2151_v18  ;;  %v2092_v26 = vmax.f32 %v1068_v11, 1e-06  ;;  %v2093_v48 = vmax.f32 %v1069_v60, 1e-06  ;;  %v4200_v8 = vmul.f32 %v3176_v31, %v2152_v43  ;;  %v8908_v18 = vpop.xlane.xlu0 %5247  ;;  %v1191_v43 = vld [vmem:[%s7536_s26 + $0x1f68] sm:$0xff] }
 0x3c1   : > { %5537 = vadd.xlane.f32.xlu1 %v5536_v4  ;;  %v5456_v9 = vadd.f32 %v5455_v21, %v4197_v15  ;;  %v4201_v22 = vmul.f32 %v3177_v51, %v2153_v28  ;;  %v3114_v7 = vmul.f32 %v2090_v50, %v2090_v50  ;;  %v3115_v54 = vmul.f32 %v2091_v3, %v2091_v3  ;;  %v1190_v28 = vld [vmem:[%s7536_s26 + $0x1f60] sm:$0xff]  ;;  %v8912_v4 = vpop.xlane.xlu1 %5262 }
 0x3c2   : > { %v5459_v49 = vadd.f32 %v4199_v63, %v4198_v13  ;;  %v3116_v0 = vmul.f32 %v2092_v26, %v2092_v26  ;;  %v3117_v19 = vmul.f32 %v2093_v48, %v2093_v48  ;;  %v5820_v12 = vlaneseq }
 0x3c3   : > { %5457 = vadd.xlane.f32.xlu0 %v5456_v9  ;;  %v4138_v52 = vmul.f32 %v3114_v7, %v2090_v50  ;;  %v4139_v60 = vmul.f32 %v3115_v54, %v2091_v3  ;;  %v2094_v2 = vmax.f32 %v1070_v34, 1e-06  ;;  %v2095_v21 = vmax.f32 %v1071_v41, 1e-06  ;;  %v1192_v3 = vld [vmem:[%s7536_s26 + $0x1f70] sm:$0xff] }
 0x3c4   : > { %v5460_v11 = vadd.f32 %v5459_v49, %v4200_v8  ;;  %v4140_v15 = vmul.f32 %v3116_v0, %v2092_v26  ;;  %v2096_v31 = vmax.f32 %v1072_v32, 1e-06  ;;  %v4141_v13 = vmul.f32 %v3117_v19, %v2093_v48  ;;  %v1193_v26 = vld [vmem:[%s7536_s26 + $0x1f78] sm:$0xff]  ;;  %v8917_v48 = vpop.xlane.xlu0 %5257 }
 0x3c5   : > { %v5384_v50 = vadd.f32 %v4139_v60, %v4138_v52  ;;  %v2097_v63 = vmax.f32 %v1073_v1, 1e-06  ;;  %v3118_v9 = vmul.f32 %v2094_v2, %v2094_v2  ;;  %v3119_v7 = vmul.f32 %v2095_v21, %v2095_v21  ;;  %v1195_v60 = vld [vmem:[%s7536_s26 + $0x1f88] sm:$0xff]  ;;  %v8922_v44 = vpop.xlane.xlu1 %5272 }
 0x3c6   : > { %v5461_v51 = vadd.f32 %v5460_v11, %v4201_v22  ;;  %v3120_v8 = vmul.f32 %v2096_v31, %v2096_v31  ;;  %v2214_v49 = vmax.f32 %v1190_v28, 1e-06  ;;  %v2215_v6 = vmax.f32 %v1191_v43, 1e-06  ;;  %v1194_v22 = vld [vmem:[%s7536_s26 + $0x1f80] sm:$0xff] }
 0x3c7   : > { %v5385_v54 = vadd.f32 %v5384_v50, %v4140_v15  ;;  %v3121_v0 = vmul.f32 %v2097_v63, %v2097_v63  ;;  %v4142_v34 = vmul.f32 %v3118_v9, %v2094_v2  ;;  %v4143_v41 = vmul.f32 %v3119_v7, %v2095_v21  ;;  %v1196_v21 = vld [vmem:[%s7536_s26 + $0x1f90] sm:$0xff]  ;;  %v1197_v9 = vld [vmem:[%s7536_s26 + $0x1f98] sm:$0xff] }
 0x3c8   : > { %5462 = vadd.xlane.f32.xlu1 %v5461_v51  ;;  %v4144_v32 = vmul.f32 %v3120_v8, %v2096_v31  ;;  %v8919_v19 = vand.u32 127, %v5820_v12  ;;  %v2216_v1 = vmax.f32 %v1192_v3, 1e-06  ;;  %v2217_v11 = vmax.f32 %v1193_v26, 1e-06 }
 0x3c9   : > { %v5386_v52 = vadd.f32 %v5385_v54, %v4141_v13  ;;  %v4145_v15 = vmul.f32 %v3121_v0, %v2097_v63  ;;  %v5389_v28 = vadd.f32 %v4143_v41, %v4142_v34  ;;  %v3238_v43 = vmul.f32 %v2214_v49, %v2214_v49  ;;  %v1130_v54 = vld [vmem:[%s7536_s26 + $0x1d80] sm:$0xff]  ;;  %v1131_v63 = vld [vmem:[%s7536_s26 + $0x1d88] sm:$0xff] }
 0x3ca   : > { %v3239_v2 = vmul.f32 %v2215_v6, %v2215_v6  ;;  %v8925_v31 = vshrl.u32 %v5820_v12, 7  ;;  %v3240_v51 = vmul.f32 %v2216_v1, %v2216_v1  ;;  %v3241_v50 = vmul.f32 %v2217_v11, %v2217_v11  ;;  %v1132_v12 = vld [vmem:[%s7536_s26 + $0x1d90] sm:$0xff] }
 0x3cb   : > { %5387 = vadd.xlane.f32.xlu0 %v5386_v52  ;;  %v2218_v13 = vmax.f32 %v1194_v22, 1e-06  ;;  %v5390_v7 = vadd.f32 %v5389_v28, %v4144_v32  ;;  %v4262_v8 = vmul.f32 %v3238_v43, %v2214_v49  ;;  %v2219_v26 = vmax.f32 %v1195_v60, 1e-06  ;;  %v8933_v22 = vpop.xlane.xlu0 %5267  ;;  %v8935_v28 = vpop.xlane.xlu1 %5282 }
 0x3cc   : > { %v4263_v3 = vmul.f32 %v3239_v2, %v2215_v6  ;;  %v5833_v0 = vadd.s32 4294967280, %v8919_v19  ;;  %v4264_v34 = vmul.f32 %v3240_v51, %v2216_v1  ;;  %v4265_v41 = vmul.f32 %v3241_v50, %v2217_v11 }
 0x3cd   : > { %v2220_v5 = vmax.f32 %v1196_v21, 1e-06  ;;  %v5391_v24 = vadd.f32 %v5390_v7, %v4145_v15  ;;  %v2221_v52 = vmax.f32 %v1197_v9, 1e-06  ;;  %v3242_v38 = vmul.f32 %v2218_v13, %v2218_v13  ;;  %v1134_v9 = vld [vmem:[%s7536_s26 + $0x1da0] sm:$0xff] }
 0x3ce   : > { %v5539_v30 = vadd.f32 %v4263_v3, %v4262_v8  ;;  %v3243_v32 = vmul.f32 %v2219_v26, %v2219_v26  ;;  %v2154_v6 = vmax.f32 %v1130_v54, 1e-06  ;;  %v2155_v60 = vmax.f32 %v1131_v63, 1e-06  ;;  %v1135_v63 = vld [vmem:[%s7536_s26 + $0x1da8] sm:$0xff] }
 0x3cf   : > { %v3244_v49 = vmul.f32 %v2220_v5, %v2220_v5  ;;  %5392 = vadd.xlane.f32.xlu1 %v5391_v24  ;;  %v3245_v11 = vmul.f32 %v2221_v52, %v2221_v52  ;;  %v4266_v43 = vmul.f32 %v3242_v38, %v2218_v13  ;;  %v2156_v15 = vmax.f32 %v1132_v12, 1e-06  ;;  %v1136_v24 = vld [vmem:[%s7536_s26 + $0x1db0] sm:$0xff] }
 0x3d0   : > { %v5540_v1 = vadd.f32 %v5539_v30, %v4264_v34  ;;  %v4267_v2 = vmul.f32 %v3243_v32, %v2219_v26  ;;  %v2157_v51 = vmax.f32 %v1133_v55, 1e-06  ;;  %v3178_v50 = vmul.f32 %v2154_v6, %v2154_v6  ;;  %v1137_v26 = vld [vmem:[%s7536_s26 + $0x1db8] sm:$0xff] }
 0x3d1   : > { %v4268_v21 = vmul.f32 %v3244_v49, %v2220_v5  ;;  %v8940_v7 = vsub.s32 %v8919_v19, %v8925_v31  ;;  %v3179_v3 = vmul.f32 %v2155_v60, %v2155_v60  ;;  %v3180_v54 = vmul.f32 %v2156_v15, %v2156_v15  ;;  %v8949_v49 = vpop.xlane.xlu0 %5277 }
 0x3d2   : > { %v5541_v8 = vadd.f32 %v5540_v1, %v4265_v41  ;;  %v4269_v30 = vmul.f32 %v3245_v11, %v2221_v52  ;;  %v5544_v38 = vadd.f32 %v4267_v2, %v4266_v43  ;;  %v3181_v13 = vmul.f32 %v2157_v51, %v2157_v51  ;;  %v1074_v41 = vld [vmem:[%s7536_s26 + $0x1bc0] sm:$0xff]  ;;  %v1075_v2 = vld [vmem:[%s7536_s26 + $0x1bc8] sm:$0xff] }
 0x3d3   : > { %v4202_v34 = vmul.f32 %v3178_v50, %v2154_v6  ;;  %v8946_v55 = vsub.s32 %v5833_v0, %v8925_v31  ;;  %v4203_v5 = vmul.f32 %v3179_v3, %v2155_v60  ;;  %v4204_v12 = vmul.f32 %v3180_v54, %v2156_v15  ;;  %v8953_v6 = vpop.xlane.xlu1 %5292  ;;  %v1077_v60 = vld [vmem:[%s7536_s26 + $0x1bd8] sm:$0xff] }
 0x3d4   : > { %5542 = vadd.xlane.f32.xlu0 %v5541_v8  ;;  %v2158_v32 = vmax.f32 %v1134_v9, 1e-06  ;;  %v5826_v1 = vadd.s32 4294967288, %v8919_v19  ;;  %v5545_v52 = vadd.f32 %v5544_v38, %v4268_v21  ;;  %v2159_v11 = vmax.f32 %v1135_v63, 1e-06 }
 0x3d5   : > { %v2160_v43 = vmax.f32 %v1136_v24, 1e-06  ;;  %v4205_v50 = vmul.f32 %v3181_v13, %v2157_v51  ;;  %v5464_v0 = vadd.f32 %v4203_v5, %v4202_v34  ;;  %v2161_v25 = vmax.f32 %v1137_v26, 1e-06  ;;  %v1078_v5 = vld [vmem:[%s7536_s26 + $0x1be0] sm:$0xff] }
 0x3d6   : > { %v3182_v8 = vmul.f32 %v2158_v32, %v2158_v32  ;;  %v5546_v3 = vadd.f32 %v5545_v52, %v4269_v30  ;;  %v3183_v15 = vmul.f32 %v2159_v11, %v2159_v11  ;;  %v2098_v54 = vmax.f32 %v1074_v41, 1e-06  ;;  %v8959_v41 = vpop.xlane.xlu0 %5287 }
 0x3d7   : > { %v3184_v9 = vmul.f32 %v2160_v43, %v2160_v43  ;;  %v5465_v20 = vadd.f32 %v5464_v0, %v4204_v12  ;;  %v3185_v47 = vmul.f32 %v2161_v25, %v2161_v25  ;;  %v2099_v21 = vmax.f32 %v1075_v2, 1e-06  ;;  %v1079_v0 = vld [vmem:[%s7536_s26 + $0x1be8] sm:$0xff] }
 0x3d8   : > { %v4206_v23 = vmul.f32 %v3182_v8, %v2158_v32  ;;  %5547 = vadd.xlane.f32.xlu1 %v5546_v3  ;;  %v4207_v63 = vmul.f32 %v3183_v15, %v2159_v11  ;;  %v2100_v51 = vmax.f32 %v1076_v40, 1e-06  ;;  %v2101_v38 = vmax.f32 %v1077_v60, 1e-06  ;;  %v1080_v11 = vld [vmem:[%s7536_s26 + $0x1bf0] sm:$0xff]  ;;  %v1081_v60 = vld [vmem:[%s7536_s26 + $0x1bf8] sm:$0xff] }
 0x3d9   : > { %v4208_v24 = vmul.f32 %v3184_v9, %v2160_v43  ;;  %v5840_v13 = vadd.s32 4294967272, %v8919_v19  ;;  %v5466_v34 = vadd.f32 %v5465_v20, %v4205_v50  ;;  %v3122_v26 = vmul.f32 %v2098_v54, %v2098_v54  ;;  %v8963_v43 = vpop.xlane.xlu1 %5302  ;;  %v1199_v9 = vld [vmem:[%s7536_s26 + $0x1fa8] sm:$0xff] }
 0x3da   : > { %v3123_v30 = vmul.f32 %v2099_v21, %v2099_v21  ;;  %v4209_v12 = vmul.f32 %v3185_v47, %v2161_v25  ;;  %v5469_v32 = vadd.f32 %v4207_v63, %v4206_v23  ;;  %v3124_v52 = vmul.f32 %v2100_v51, %v2100_v51  ;;  %v1198_v25 = vld [vmem:[%s7536_s26 + $0x1fa0] sm:$0xff]  ;;  %v8975_v62 = vpop.xlane.xlu0 %5297 }
 0x3db   : > { %v3125_v2 = vmul.f32 %v2101_v38, %v2101_v38  ;;  %v8966_v40 = vsub.s32 %v5826_v1, %v8925_v31  ;;  %v5854_v20 = vadd.s32 4294967256, %v8919_v19  ;;  %5467 = vadd.xlane.f32.xlu0 %v5466_v34  ;;  %v4146_v50 = vmul.f32 %v3122_v26, %v2098_v54 }
 0x3dc   : > { %v4147_v8 = vmul.f32 %v3123_v30, %v2099_v21  ;;  %v5847_v23 = vadd.s32 4294967264, %v8919_v19  ;;  %v5470_v47 = vadd.f32 %v5469_v32, %v4208_v24  ;;  %v4148_v3 = vmul.f32 %v3124_v52, %v2100_v51 }
 0x3dd   : > { %v2102_v15 = vmax.f32 %v1078_v5, 1e-06  ;;  %v4149_v63 = vmul.f32 %v3125_v2, %v2101_v38  ;;  %v2103_v39 = vmax.f32 %v1079_v0, 1e-06  ;;  %v2104_v1 = vmax.f32 %v1080_v11, 1e-06  ;;  %v8977_v32 = vpop.xlane.xlu1 %5312 }
 0x3de   : > { %v5394_v46 = vadd.f32 %v4147_v8, %v4146_v50  ;;  %v5471_v29 = vadd.f32 %v5470_v47, %v4209_v12  ;;  %v2105_v27 = vmax.f32 %v1081_v60, 1e-06  ;;  %v2222_v34 = vmax.f32 %v1198_v25, 1e-06  ;;  %v1202_v8 = vld [vmem:[%s7536_s26 + $0x1fc0] sm:$0xff]  ;;  %v1205_v47 = vld [vmem:[%s7536_s26 + $0x1fd8] sm:$0xff] }
 0x3df   : > { %v3126_v42 = vmul.f32 %v2102_v15, %v2102_v15  ;;  %v3127_v21 = vmul.f32 %v2103_v39, %v2103_v39  ;;  %v3128_v26 = vmul.f32 %v2104_v1, %v2104_v1  ;;  %v2223_v30 = vmax.f32 %v1199_v9, 1e-06 }
 0x3e0   : > { %v5395_v54 = vadd.f32 %v5394_v46, %v4148_v3  ;;  %5472 = vadd.xlane.f32.xlu1 %v5471_v29  ;;  %v3129_v24 = vmul.f32 %v2105_v27, %v2105_v27  ;;  %v2224_v38 = vmax.f32 %v1200_v45, 1e-06  ;;  %v2225_v5 = vmax.f32 %v1201_v35, 1e-06  ;;  %v1204_v45 = vld [vmem:[%s7536_s26 + $0x1fd0] sm:$0xff]  ;;  %v1138_v3 = vld [vmem:[%s7536_s26 + $0x1dc0] sm:$0xff] }
 0x3e1   : > { %v4150_v51 = vmul.f32 %v3126_v42, %v2102_v15  ;;  %v4151_v52 = vmul.f32 %v3127_v21, %v2103_v39  ;;  %v4152_v46 = vmul.f32 %v3128_v26, %v2104_v1  ;;  %v3246_v2 = vmul.f32 %v2222_v34, %v2222_v34  ;;  %v1203_v42 = vld [vmem:[%s7536_s26 + $0x1fc8] sm:$0xff] }
 0x3e2   : > { %v5396_v12 = vadd.f32 %v5395_v54, %v4149_v63  ;;  %v8980_v0 = vsub.s32 %v5840_v13, %v8925_v31  ;;  %v3247_v11 = vmul.f32 %v2223_v30, %v2223_v30  ;;  %v3248_v50 = vmul.f32 %v2224_v38, %v2224_v38  ;;  %v1139_v1 = vld [vmem:[%s7536_s26 + $0x1dc8] sm:$0xff]  ;;  %v1140_v54 = vld [vmem:[%s7536_s26 + $0x1dd0] sm:$0xff] }
 0x3e3   : > { %v3249_v29 = vmul.f32 %v2225_v5, %v2225_v5  ;;  %v4153_v60 = vmul.f32 %v3129_v24, %v2105_v27  ;;  %v5399_v39 = vadd.f32 %v4151_v52, %v4150_v51  ;;  %v4270_v25 = vmul.f32 %v3246_v2, %v2222_v34  ;;  %v8997_v27 = vpop.xlane.xlu0 %5307  ;;  %v1141_v52 = vld [vmem:[%s7536_s26 + $0x1dd8] sm:$0xff] }
 0x3e4   : > { %5397 = vadd.xlane.f32.xlu0 %v5396_v12  ;;  %v8990_v13 = vsub.s32 %v5854_v20, %v8925_v31  ;;  %v8993_v15 = vsub.s32 %v5847_v23, %v8925_v31  ;;  %v4271_v9 = vmul.f32 %v3247_v11, %v2223_v30  ;;  %v4272_v63 = vmul.f32 %v3248_v50, %v2224_v38  ;;  %v9000_v20 = vpop.xlane.xlu1 %5322 }
 0x3e5   : > { %v5400_v21 = vadd.f32 %v5399_v39, %v4152_v46  ;;  %v2226_v26 = vmax.f32 %v1202_v8, 1e-06  ;;  %v2227_v35 = vmax.f32 %v1203_v42, 1e-06  ;;  %v2228_v12 = vmax.f32 %v1204_v45, 1e-06 }
 0x3e6   : > { %v4273_v34 = vmul.f32 %v3249_v29, %v2225_v5  ;;  %v5549_v24 = vadd.f32 %v4271_v9, %v4270_v25  ;;  %v2229_v51 = vmax.f32 %v1205_v47, 1e-06  ;;  %v2162_v2 = vmax.f32 %v1138_v3, 1e-06  ;;  %v1206_v3 = vld [vmem:[%s7536_s26 + $0x1fe0] sm:$0xff] }
 0x3e7   : > { %v5401_v58 = vadd.f32 %v5400_v21, %v4153_v60  ;;  %v3250_v23 = vmul.f32 %v2226_v26, %v2226_v26  ;;  %v3251_v30 = vmul.f32 %v2227_v35, %v2227_v35  ;;  %v3252_v38 = vmul.f32 %v2228_v12, %v2228_v12 }
 0x3e8   : > { %v5550_v11 = vadd.f32 %v5549_v24, %v4272_v63  ;;  %v3253_v50 = vmul.f32 %v2229_v51, %v2229_v51  ;;  %v2163_v46 = vmax.f32 %v1139_v1, 1e-06  ;;  %v2164_v8 = vmax.f32 %v1140_v54, 1e-06  ;;  %v1207_v54 = vld [vmem:[%s7536_s26 + $0x1fe8] sm:$0xff]  ;;  %v1208_v24 = vld [vmem:[%s7536_s26 + $0x1ff0] sm:$0xff] }
 0x3e9   : > { %5402 = vadd.xlane.f32.xlu1 %v5401_v58  ;;  %v4274_v42 = vmul.f32 %v3250_v23, %v2226_v26  ;;  %v4275_v5 = vmul.f32 %v3251_v30, %v2227_v35  ;;  %v4276_v29 = vmul.f32 %v3252_v38, %v2228_v12  ;;  %v2165_v45 = vmax.f32 %v1141_v52, 1e-06  ;;  %v9006_v58 = vpop.xlane.xlu0 %5317  ;;  %v1209_v52 = vld [vmem:[%s7536_s26 + $0x1ff8] sm:$0xff]  ;;  %v1142_v23 = vld [vmem:[%s7536_s26 + $0x1de0] sm:$0xff] }
 0x3ea   : > { %v5868_v39 = vadd.s32 4294967240, %v8919_v19  ;;  %v5551_v25 = vadd.f32 %v5550_v11, %v4273_v34  ;;  %v3186_v60 = vmul.f32 %v2162_v2, %v2162_v2  ;;  %v3187_v47 = vmul.f32 %v2163_v46, %v2163_v46 }
 0x3eb   : > { %v4277_v9 = vmul.f32 %v3253_v50, %v2229_v51  ;;  %v5554_v63 = vadd.f32 %v4275_v5, %v4274_v42  ;;  %v3188_v21 = vmul.f32 %v2164_v8, %v2164_v8  ;;  %v3189_v1 = vmul.f32 %v2165_v45, %v2165_v45  ;;  %v9012_v51 = vpop.xlane.xlu1 %5332  ;;  %v1143_v42 = vld [vmem:[%s7536_s26 + $0x1de8] sm:$0xff] }
 0x3ec   : > { %v5861_v35 = vadd.s32 4294967248, %v8919_v19  ;;  %v5882_v26 = vadd.s32 4294967224, %v8919_v19  ;;  %5552 = vadd.xlane.f32.xlu0 %v5551_v25  ;;  %v4210_v12 = vmul.f32 %v3186_v60, %v2162_v2  ;;  %v4211_v34 = vmul.f32 %v3187_v47, %v2163_v46 }
 0x3ed   : > { %v5875_v30 = vadd.s32 4294967232, %v8919_v19  ;;  %v5555_v38 = vadd.f32 %v5554_v63, %v4276_v29  ;;  %v4212_v11 = vmul.f32 %v3188_v21, %v2164_v8  ;;  %v2230_v50 = vmax.f32 %v1206_v3, 1e-06 }
 0x3ee   : > { %v4213_v5 = vmul.f32 %v3189_v1, %v2165_v45  ;;  %v5474_v53 = vadd.f32 %v4211_v34, %v4210_v12  ;;  %v2231_v57 = vmax.f32 %v1207_v54, 1e-06  ;;  %v2232_v59 = vmax.f32 %v1208_v24, 1e-06  ;;  %v9018_v45 = vpop.xlane.xlu0 %5327 }
 0x3ef   : > { %v5556_v25 = vadd.f32 %v5555_v38, %v4277_v9  ;;  %v2233_v17 = vmax.f32 %v1209_v52, 1e-06  ;;  %v3254_v2 = vmul.f32 %v2230_v50, %v2230_v50  ;;  %v2166_v46 = vmax.f32 %v1142_v23, 1e-06  ;;  %v9020_v24 = vpop.xlane.xlu1 %5407 }
 0x3f0   : > { %v5475_v60 = vadd.f32 %v5474_v53, %v4212_v11  ;;  %v3255_v47 = vmul.f32 %v2231_v57, %v2231_v57  ;;  %v3256_v33 = vmul.f32 %v2232_v59, %v2232_v59  ;;  %v2167_v36 = vmax.f32 %v1143_v42, 1e-06 }
 0x3f1   : > { %5557 = vadd.xlane.f32.xlu1 %v5556_v25  ;;  %v3257_v29 = vmul.f32 %v2233_v17, %v2233_v17  ;;  %v4278_v8 = vmul.f32 %v3254_v2, %v2230_v50  ;;  %v2168_v3 = vmax.f32 %v1144_v37, 1e-06  ;;  %v2169_v63 = vmax.f32 %v1145_v10, 1e-06 }
 0x3f2   : > { %v5476_v21 = vadd.f32 %v5475_v60, %v4213_v5  ;;  %v4279_v1 = vmul.f32 %v3255_v47, %v2231_v57  ;;  %v4280_v54 = vmul.f32 %v3256_v33, %v2232_v59  ;;  %v3190_v9 = vmul.f32 %v2166_v46, %v2166_v46 }
 0x3f3   : > { %v5896_v53 = vadd.s32 4294967208, %v8919_v19  ;;  %v3191_v12 = vmul.f32 %v2167_v36, %v2167_v36  ;;  %v3192_v34 = vmul.f32 %v2168_v3, %v2168_v3  ;;  %v3193_v52 = vmul.f32 %v2169_v63, %v2169_v63  ;;  %v9046_v60 = vpop.xlane.xlu1 %5487 }
 0x3f4   : > { %vm5852_vm3 = vcmask 326912   ;;  %5477 = vadd.xlane.f32.xlu0 %v5476_v21  ;;  %v4281_v23 = vmul.f32 %v3257_v29, %v2233_v17  ;;  %v5559_v37 = vadd.f32 %v4279_v1, %v4278_v8  ;;  %v4214_v10 = vmul.f32 %v3190_v9, %v2166_v46 }
 0x3f5   : > { %v9024_v38 = vsub.s32 %v5868_v39, %v8925_v31  ;;  %vm5859_vm4 = vcmask 392512   ;;  %v9027_v33 = vsub.s32 %v5861_v35, %v8925_v31  ;;  %v4215_v57 = vmul.f32 %v3191_v12, %v2167_v36  ;;  %v5338_v35 = vpop.xlane.xlu0 %5337 }
 0x3f6   : > { %v4216_v59 = vmul.f32 %v3192_v34, %v2168_v3  ;;  %vm5866_vm5 = vcmask 458112   ;;  %v9030_v11 = vsub.s32 %v5882_v26, %v8925_v31  ;;  %v9033_v50 = vsub.s32 %v5875_v30, %v8925_v31 }
 0x3f7   : > { %v5889_v17 = vadd.s32 4294967216, %v8919_v19  ;;  %v5560_v42 = vadd.f32 %v5559_v37, %v4280_v54  ;;  %vm5873_vm6 = vcmask 523712   ;;  %v9037_v39 = vsub.s32 %v5896_v53, %v8925_v31 }
 0x3f8   : > { %v4217_v5 = vmul.f32 %v3193_v52, %v2169_v63  ;;  %v5479_v25 = vadd.f32 %v4215_v57, %v4214_v10  ;;  %v6807_v36 = vrot.slane %v8902_v16, %v8966_v40  ;;  %vm10008_vm7 = vcmask 589312   ;;  %v5343_v10 = vpop.xlane.xlu1 %5342 }
 0x3f9   : > { %v5910_v26 = vadd.s32 4294967192, %v8919_v19  ;;  %v5561_v2 = vadd.f32 %v5560_v42, %v4281_v23  ;;  %v6803_v30 = vrot.slane %v8908_v18, %v8940_v7  ;;  %v6817_v46 = vrot.slane %v8912_v4, %v8980_v0  ;;  %v5413_v34 = vpop.xlane.xlu0 %5412 }
 0x3fa   : > { %vm5887_vm8 = vcmask 654912   ;;  %v5903_v47 = vadd.s32 4294967200, %v8919_v19  ;;  %v5924_v29 = vadd.s32 4294967176, %v8919_v19  ;;  %v5480_v8 = vadd.f32 %v5479_v25, %v4216_v59 }
 0x3fb   : > { %v6812_v16 = vrot.slane %v8917_v48, %v8946_v55  ;;  %v5917_v3 = vadd.s32 4294967184, %v8919_v19  ;;  %5562 = vadd.xlane.f32.xlu1 %v5561_v2  ;;  %v6808_v63 = vsel %vm5831_vm0, %v6807_v36, %v6803_v30  ;;  %v6827_v18 = vrot.slane %v8922_v44, %v8990_v13 }
 0x3fc   : > { %v6822_v4 = vrot.slane %v8933_v22, %v8993_v15  ;;  %v9059_v21 = vsub.s32 %v5889_v17, %v8925_v31  ;;  %v5481_v1 = vadd.f32 %v5480_v8, %v4217_v5  ;;  %v6832_v48 = vrot.slane %v8949_v49, %v9027_v33 }
 0x3fd   : > { %v6813_v54 = vsel %vm5838_vm1, %v6812_v16, %v6808_v63  ;;  %vm5894_vm9 = vcmask 720512   ;;  %v9065_v19 = vsub.s32 %v5910_v26, %v8925_v31  ;;  %v6837_v44 = vrot.slane %v8935_v28, %v9024_v38  ;;  %v10205_v63 = vld [vmem:[#allocation9_spill] sm:$0xff] }
 0x3fe   : > { %v6818_v9 = vsel %vm5845_vm2, %v6817_v46, %v6813_v54  ;;  %v9071_v22 = vsub.s32 %v5903_v47, %v8925_v31  ;;  %v9074_v53 = vsub.s32 %v5924_v29, %v8925_v31  ;;  %5482 = vadd.xlane.f32.xlu0 %v5481_v1  ;;  %v6842_v49 = vrot.slane %v8959_v41, %v9033_v50  ;;  %v10207_v54 = vld [vmem:[#allocation10_spill] sm:$0xff] }
 0x3ff   : > { %v6823_v12 = vsel %vm5852_vm3, %v6822_v4, %v6818_v9  ;;  %v9080_v52 = vsub.s32 %v5917_v3, %v8925_v31  ;;  %v6847_v28 = vrot.slane %v8953_v6, %v9030_v11  ;;  %v6857_v37 = vrot.slane %v8963_v43, %v9037_v39 }
 0x400   : > { %v6828_v23 = vsel %vm5859_vm4, %v6827_v18, %v6823_v12  ;;  %v6852_v59 = vrot.slane %v8975_v62, %v9059_v21  ;;  %v6886_v41 = vrot.slane %v9012_v51, %v8966_v40  ;;  %v6882_v31 = vrot.slane %v9018_v45, %v8940_v7 }
 0x401   : > { %v6833_v57 = vsel %vm5866_vm5, %v6832_v48, %v6828_v23  ;;  %v6961_v6 = vrot.slane %v9020_v24, %v8940_v7  ;;  %v6891_v42 = vrot.slane %v5338_v35, %v8946_v55  ;;  %v6965_v43 = vrot.slane %v5413_v34, %v8966_v40  ;;  %v10210_v23 = vld [vmem:[#allocation23_spill] sm:$0xff] }
 0x402   : > { %v6838_v17 = vsel %vm5873_vm6, %v6837_v44, %v6833_v57  ;;  %v6862_v62 = vrot.slane %v8997_v27, %v9071_v22  ;;  %v6887_v25 = vsel %vm5831_vm0, %v6886_v41, %v6882_v31  ;;  %v6896_v51 = vrot.slane %v5343_v10, %v8980_v0  ;;  %v10208_v44 = vld [vmem:[#allocation13_spill] sm:$0xff]  ;;  %v10211_v10 = vld [vmem:[#allocation12_spill] sm:$0xff] }
 0x403   : > { %v6843_v5 = vsel %vm10008_vm7, %v6842_v49, %v6838_v17  ;;  %v6867_v36 = vrot.slane %v8977_v32, %v9065_v19  ;;  %v6892_v24 = vsel %vm5838_vm1, %v6891_v42, %v6887_v25  ;;  %v9109_v35 = vsel %vm5831_vm0, %v6965_v43, %v6961_v6  ;;  %v10209_v49 = vld [vmem:[#allocation22_spill] sm:$0xff]  ;;  %v10212_v41 = vld [vmem:[#allocation25_spill] sm:$0xff]  ;;  %v10213_v6 = vld [vmem:[#allocation15_spill] sm:$0xff] }
 0x404   : > { %v6848_v45 = vsel %vm5887_vm8, %v6847_v28, %v6843_v5  ;;  %vm5901_vm10 = vcmask 786112   ;;  %v6872_v27 = vrot.slane %v9006_v58, %v9080_v52  ;;  %v9115_v2 = vsel %vm5845_vm2, %v6896_v51, %v6892_v24  ;;  %v10214_v43 = vld [vmem:[#allocation38_spill] sm:$0xff] }
 0x405   : > { %v6853_v26 = vsel %vm5894_vm9, %v6852_v59, %v6848_v45  ;;  %v5825_v30 = vrot.slane %v7956_v14, %v8940_v7  ;;  %vm5908_vm11 = vcmask 851712   ;;  %v6877_v46 = vrot.slane %v9000_v20, %v9074_v53 }
 0x406   : > { %v6858_v32 = vsel %vm5901_vm10, %v6857_v37, %v6853_v26  ;;  %vm5915_vm12 = vcmask 917312   ;;  %v10203_v29 = vrot.slane %v7969_v56, %v8966_v40  ;;  %vm5922_vm13 = vcmask 982912   ;;  %v10206_v56 = vld [vmem:[#allocation11_spill] sm:$0xff]  ;;  %v9151_v37 = vpop.xlane.xlu1 %5497  ;;  %v10217_v26 = vld [vmem:[#allocation41_spill] sm:$0xff] }
 0x407   : > { %v6863_v47 = vsel %vm5908_vm11, %v6862_v62, %v6858_v32  ;;  %v5837_v14 = vrot.slane %v7950_v61, %v8946_v55  ;;  %vm5929_vm14 = vcmask 1048512   ;;  %v5844_v18 = vrot.slane %v10205_v63, %v8980_v0  ;;  %v9142_v61 = vpop.xlane.xlu0 %5492  ;;  %v10215_v62 = vld [vmem:[#allocation39_spill] sm:$0xff] }
 0x408   : > { %v5832_v58 = vsel %vm5831_vm0, %v10203_v29, %v5825_v30  ;;  %v6868_v8 = vsel %vm5915_vm12, %v6867_v36, %v6863_v47  ;;  %v5851_v4 = vrot.slane %v10206_v56, %v8993_v15  ;;  %v5858_v48 = vrot.slane %v10207_v54, %v8990_v13  ;;  %v10216_v36 = vld [vmem:[#allocation24_spill] sm:$0xff]  ;;  %v10218_v30 = vld [vmem:[#allocation14_spill] sm:$0xff]  ;;  %v10219_v29 = vld [vmem:[#allocation27_spill] sm:$0xff] }
 0x409   : > { %v6873_v16 = vsel %vm5922_vm13, %v6872_v27, %v6868_v8  ;;  %v5839_v20 = vsel %vm5838_vm1, %v5837_v14, %v5832_v58  ;;  %v5865_v12 = vrot.slane %v10208_v44, %v9027_v33  ;;  %v5938_v34 = vrot.slane %v10209_v49, %v8966_v40  ;;  %v10220_v14 = vld [vmem:[#allocation17_spill] sm:$0xff] }
 0x40a   : > { %v9132_v3 = vsel %vm5929_vm14, %v6877_v46, %v6873_v16  ;;  %v5846_v1 = vsel %vm5845_vm2, %v5844_v18, %v5839_v20  ;;  %v5934_v28 = vrot.slane %v10210_v23, %v8940_v7  ;;  %v5872_v57 = vrot.slane %v10211_v10, %v9024_v38  ;;  %v9181_v20 = vpop.xlane.xlu1 %5422  ;;  %v10221_v18 = vld [vmem:[#allocation40_spill] sm:$0xff] }
 0x40b   : > { %10204 = vst [vmem:[#allocation198_spill] sm:$0xff] %v9132_v3  ;;  %v5853_v9 = vsel %vm5852_vm3, %v5851_v4, %v5846_v1  ;;  %v5943_v31 = vrot.slane %v10212_v41, %v8946_v55  ;;  %v5879_v42 = vrot.slane %v10213_v6, %v9033_v50  ;;  %v6017_v5 = vrot.slane %v10214_v43, %v8966_v40  ;;  %v9165_v51 = vpop.xlane.xlu0 %5417  ;;  %v10222_v4 = vld [vmem:[#allocation26_spill] sm:$0xff]  ;;  %v10226_v41 = vld [vmem:[#allocation19_spill] sm:$0xff] }
 0x40c   : > { %v5860_v59 = vsel %vm5859_vm4, %v5858_v48, %v5853_v9  ;;  %v6013_v25 = vrot.slane %v10215_v62, %v8940_v7  ;;  %v5939_v45 = vsel %vm5831_vm0, %v5938_v34, %v5934_v28  ;;  %v5948_v24 = vrot.slane %v10216_v36, %v8980_v0  ;;  %v10223_v9 = vld [vmem:[#allocation43_spill] sm:$0xff]  ;;  %v10225_v28 = vld [vmem:[#allocation29_spill] sm:$0xff] }
 0x40d   : > { %v5867_v17 = vsel %vm5866_vm5, %v5865_v12, %v5860_v59  ;;  %v6022_v27 = vrot.slane %v10217_v26, %v8946_v55  ;;  %v5886_v32 = vrot.slane %v10218_v30, %v9030_v11  ;;  %v5944_v47 = vsel %vm5838_vm1, %v5943_v31, %v5939_v45  ;;  %v10224_v12 = vld [vmem:[#allocation16_spill] sm:$0xff]  ;;  %v10230_v45 = vld [vmem:[#allocation57_spill] sm:$0xff] }
 0x40e   : > { %v5874_v46 = vsel %vm5873_vm6, %v5872_v57, %v5867_v17  ;;  %v5953_v58 = vrot.slane %v10219_v29, %v8993_v15  ;;  %v5893_v16 = vrot.slane %v10220_v14, %v9059_v21  ;;  %v6018_v63 = vsel %vm5831_vm0, %v6017_v5, %v6013_v25  ;;  %v10227_v17 = vld [vmem:[#allocation54_spill] sm:$0xff] }
 0x40f   : > { %v5881_v8 = vsel %vm10008_vm7, %v5879_v42, %v5874_v46  ;;  %v6027_v56 = vrot.slane %v10221_v18, %v8980_v0  ;;  %v5958_v1 = vrot.slane %v10222_v4, %v8990_v13  ;;  %v5949_v54 = vsel %vm5845_vm2, %v5948_v24, %v5944_v47  ;;  %v9198_v57 = vpop.xlane.xlu0 %5347  ;;  %v10228_v42 = vld [vmem:[#allocation55_spill] sm:$0xff]  ;;  %v10229_v5 = vld [vmem:[#allocation42_spill] sm:$0xff]  ;;  %v10231_v24 = vld [vmem:[#allocation28_spill] sm:$0xff]  ;;  %v9218_v47 = vpop.xlane.xlu1 %5352 }
 0x410   : > { %v6023_v48 = vsel %vm5838_vm1, %v6022_v27, %v6018_v63  ;;  %v6032_v44 = vrot.slane %v10223_v9, %v8993_v15  ;;  %v5900_v49 = vrot.slane %v10224_v12, %v9037_v39  ;;  %v5888_v34 = vsel %vm5887_vm8, %v5886_v32, %v5881_v8  ;;  %v10232_v32 = vld [vmem:[#allocation45_spill] sm:$0xff]  ;;  %v10233_v29 = vld [vmem:[#allocation18_spill] sm:$0xff]  ;;  %v10237_v9 = vld [vmem:[#allocation44_spill] sm:$0xff] }
 0x411   : > { %v5954_v23 = vsel %vm5852_vm3, %v5953_v58, %v5949_v54  ;;  %v5963_v10 = vrot.slane %v10225_v28, %v9027_v33  ;;  %v5895_v59 = vsel %vm5894_vm9, %v5893_v16, %v5888_v34  ;;  %v5907_v31 = vrot.slane %v10226_v41, %v9071_v22  ;;  %v10234_v16 = vld [vmem:[#allocation31_spill] sm:$0xff]  ;;  %v10236_v54 = vld [vmem:[#allocation56_spill] sm:$0xff] }
 0x412   : > { %v6096_v6 = vrot.slane %v10227_v17, %v8966_v40  ;;  %v6092_v43 = vrot.slane %v10228_v42, %v8940_v7  ;;  %v6037_v62 = vrot.slane %v10229_v5, %v8990_v13  ;;  %v6028_v25 = vsel %vm5845_vm2, %v6027_v56, %v6023_v48  ;;  %v10235_v56 = vld [vmem:[#allocation21_spill] sm:$0xff]  ;;  %v10238_v34 = vld [vmem:[#allocation59_spill] sm:$0xff]  ;;  %v10241_v42 = vld [vmem:[#allocation20_spill] sm:$0xff] }
 0x413   : > { %v6101_v36 = vrot.slane %v10230_v45, %v8946_v55  ;;  %v5968_v26 = vrot.slane %v10231_v24, %v9024_v38  ;;  %v5959_v27 = vsel %vm5859_vm4, %v5958_v1, %v5954_v23  ;;  %v6033_v30 = vsel %vm5852_vm3, %v6032_v44, %v6028_v25  ;;  %v9238_v28 = vpop.xlane.xlu0 %5502  ;;  %v10240_v17 = vld [vmem:[#allocation47_spill] sm:$0xff]  ;;  %v10242_v25 = vld [vmem:[#allocation33_spill] sm:$0xff]  ;;  %v10243_v24 = vld [vmem:[#allocation58_spill] sm:$0xff] }
 0x414   : > { %v6042_v46 = vrot.slane %v10232_v32, %v9027_v33  ;;  %v5914_v58 = vrot.slane %v10233_v29, %v9065_v19  ;;  %v5902_v8 = vsel %vm5901_vm10, %v5900_v49, %v5895_v59  ;;  %v5964_v14 = vsel %vm5866_vm5, %v5963_v10, %v5959_v27  ;;  %v10239_v10 = vld [vmem:[#allocation30_spill] sm:$0xff] }
 0x415   : > { %v5973_v63 = vrot.slane %v10234_v16, %v9033_v50  ;;  %v5909_v18 = vsel %vm5908_vm11, %v5907_v31, %v5902_v8  ;;  %v5921_v4 = vrot.slane %v10235_v56, %v9080_v52  ;;  %v6097_v1 = vsel %vm5831_vm0, %v6096_v6, %v6092_v43  ;;  %v10244_v32 = vld [vmem:[#allocation46_spill] sm:$0xff]  ;;  %v10245_v8 = vld [vmem:[#allocation61_spill] sm:$0xff] }
 0x416   : > { %v6106_v48 = vrot.slane %v10236_v54, %v8980_v0  ;;  %v6047_v44 = vrot.slane %v10237_v9, %v9024_v38  ;;  %v6038_v12 = vsel %vm5859_vm4, %v6037_v62, %v6033_v30  ;;  %v6102_v49 = vsel %vm5838_vm1, %v6101_v36, %v6097_v1  ;;  %v9256_v30 = vpop.xlane.xlu1 %5507  ;;  %v10247_v1 = vld [vmem:[#allocation32_spill] sm:$0xff] }
 0x417   : > { %v6111_v23 = vrot.slane %v10238_v34, %v8993_v15  ;;  %v5978_v59 = vrot.slane %v10239_v10, %v9030_v11  ;;  %v5969_v41 = vsel %vm5873_vm6, %v5968_v26, %v5964_v14  ;;  %v6043_v31 = vsel %vm5866_vm5, %v6042_v46, %v6038_v12  ;;  %v9274_v9 = vpop.xlane.xlu0 %5427 }
 0x418   : > { %v6052_v6 = vrot.slane %v10240_v17, %v9033_v50  ;;  %v5928_v43 = vrot.slane %v10241_v42, %v9074_v53  ;;  %v5916_v5 = vsel %vm5915_vm12, %v5914_v58, %v5909_v18  ;;  %v5974_v62 = vsel %vm10008_vm7, %v5973_v63, %v5969_v41  ;;  %v10246_v18 = vld [vmem:[#allocation49_spill] sm:$0xff]  ;;  %v10251_v41 = vld [vmem:[#allocation48_spill] sm:$0xff]  ;;  %v10252_v42 = vld [vmem:[#allocation63_spill] sm:$0xff] }
 0x419   : > { %v5983_v45 = vrot.slane %v10242_v25, %v9059_v21  ;;  %v5923_v36 = vsel %vm5922_vm13, %v5921_v4, %v5916_v5  ;;  %v6116_v26 = vrot.slane %v10243_v24, %v8990_v13  ;;  %v6107_v27 = vsel %vm5845_vm2, %v6106_v48, %v6102_v49  ;;  %v10249_v49 = vld [vmem:[#allocation35_spill] sm:$0xff] }
 0x41a   : > { %v6057_v46 = vrot.slane %v10244_v32, %v9030_v11  ;;  %v6048_v29 = vsel %vm5873_vm6, %v6047_v44, %v6043_v31  ;;  %v6112_v58 = vsel %vm5852_vm3, %v6111_v23, %v6107_v27  ;;  %v6121_v14 = vrot.slane %v10245_v8, %v9027_v33  ;;  %v10248_v44 = vld [vmem:[#allocation34_spill] sm:$0xff]  ;;  %v10250_v23 = vld [vmem:[#allocation60_spill] sm:$0xff]  ;;  %v10255_v24 = vld [vmem:[#allocation71_spill] sm:$0xff]  ;;  %v9296_v27 = vpop.xlane.xlu1 %5432 }
 0x41b   : > { %v5979_v16 = vsel %vm5887_vm8, %v5978_v59, %v5974_v62  ;;  %v6053_v63 = vsel %vm10008_vm7, %v6052_v6, %v6048_v29  ;;  %v6062_v56 = vrot.slane %v10246_v18, %v9059_v21  ;;  %v9269_v4 = vsel %vm5929_vm14, %v5928_v43, %v5923_v36  ;;  %v10253_v62 = vld [vmem:[#allocation51_spill] sm:$0xff]  ;;  %v10259_v18 = vld [vmem:[#allocation62_spill] sm:$0xff] }
 0x41c   : > { %v5988_v54 = vrot.slane %v10247_v1, %v9037_v39  ;;  %v5984_v48 = vsel %vm5894_vm9, %v5983_v45, %v5979_v16  ;;  %v5998_v12 = vrot.slane %v10248_v44, %v9065_v19  ;;  %v5993_v34 = vrot.slane %v10249_v49, %v9071_v22  ;;  %v10254_v45 = vld [vmem:[#allocation70_spill] sm:$0xff]  ;;  %v10260_v44 = vld [vmem:[#allocation89_spill] sm:$0xff] }
 0x41d   : > { %v6126_v10 = vrot.slane %v10250_v23, %v9024_v38  ;;  %v6117_v59 = vsel %vm5859_vm4, %v6116_v26, %v6112_v58  ;;  %v6067_v31 = vrot.slane %v10251_v41, %v9037_v39  ;;  %v6058_v17 = vsel %vm5887_vm8, %v6057_v46, %v6053_v63  ;;  %v10256_v46 = vld [vmem:[#allocation73_spill] sm:$0xff]  ;;  %v10257_v58 = vld [vmem:[#allocation86_spill] sm:$0xff] }
 0x41e   : > { %v6122_v6 = vsel %vm5866_vm5, %v6121_v14, %v6117_v59  ;;  %v6131_v43 = vrot.slane %v10252_v42, %v9033_v50  ;;  %v6063_v5 = vsel %vm5894_vm9, %v6062_v56, %v6058_v17  ;;  %v6072_v25 = vrot.slane %v10253_v62, %v9071_v22  ;;  %v10258_v14 = vld [vmem:[#allocation87_spill] sm:$0xff]  ;;  %v10262_v41 = vld [vmem:[#allocation65_spill] sm:$0xff]  ;;  %v9317_v42 = vpop.xlane.xlu0 %5357 }
 0x41f   : > { %v6175_v36 = vrot.slane %v10254_v45, %v8966_v40  ;;  %v6171_v26 = vrot.slane %v10255_v24, %v8940_v7  ;;  %v5989_v32 = vsel %vm5901_vm10, %v5988_v54, %v5984_v48  ;;  %v6180_v29 = vrot.slane %v10256_v46, %v8946_v55  ;;  %v10261_v54 = vld [vmem:[#allocation50_spill] sm:$0xff]  ;;  %v10263_v62 = vld [vmem:[#allocation53_spill] sm:$0xff]  ;;  %v10264_v45 = vld [vmem:[#allocation72_spill] sm:$0xff] }
 0x420   : > { %v6254_v8 = vrot.slane %v10257_v58, %v8966_v40  ;;  %v6250_v16 = vrot.slane %v10258_v14, %v8940_v7  ;;  %v5994_v63 = vsel %vm5908_vm11, %v5993_v34, %v5989_v32  ;;  %v6136_v56 = vrot.slane %v10259_v18, %v9030_v11  ;;  %v10266_v46 = vld [vmem:[#allocation88_spill] sm:$0xff] }
 0x421   : > { %v6127_v1 = vsel %vm5873_vm6, %v6126_v10, %v6122_v6  ;;  %v6259_v49 = vrot.slane %v10260_v44, %v8946_v55  ;;  %v6077_v48 = vrot.slane %v10261_v54, %v9065_v19  ;;  %v6068_v23 = vsel %vm5901_vm10, %v6067_v31, %v6063_v5  ;;  %v10265_v31 = vld [vmem:[#allocation75_spill] sm:$0xff]  ;;  %v9337_v44 = vpop.xlane.xlu1 %5362 }
 0x422   : > { %v6132_v59 = vsel %vm10008_vm7, %v6131_v43, %v6127_v1  ;;  %v6141_v17 = vrot.slane %v10262_v41, %v9059_v21  ;;  %v6073_v34 = vsel %vm5908_vm11, %v6072_v25, %v6068_v23  ;;  %v6082_v10 = vrot.slane %v10263_v62, %v9080_v52  ;;  %v10267_v25 = vld [vmem:[#allocation64_spill] sm:$0xff]  ;;  %10269 = vst [vmem:[#allocation9_spill] sm:$0xff] %v9337_v44  ;;  %v10271_v23 = vld [vmem:[#allocation67_spill] sm:$0xff]  ;;  %v10273_v62 = vld [vmem:[#allocation74_spill] sm:$0xff] }
 0x423   : > { %v6176_v6 = vsel %vm5831_vm0, %v6175_v36, %v6171_v26  ;;  %v6185_v24 = vrot.slane %v10264_v45, %v8980_v0  ;;  %v6190_v43 = vrot.slane %v10265_v31, %v8993_v15  ;;  %v6255_v5 = vsel %vm5831_vm0, %v6254_v8, %v6250_v16  ;;  %v10268_v26 = vld [vmem:[#allocation91_spill] sm:$0xff]  ;;  %v10270_v8 = vld [vmem:[#allocation37_spill] sm:$0xff]  ;;  %v10297_v44 = vld [vmem:[#allocation94_spill] sm:$0xff] }
 0x424   : > { %v6181_v32 = vsel %vm5838_vm1, %v6180_v29, %v6176_v6  ;;  %v6264_v58 = vrot.slane %v10266_v46, %v8980_v0  ;;  %v6146_v14 = vrot.slane %v10267_v25, %v9037_v39  ;;  %v6137_v18 = vsel %vm5887_vm8, %v6136_v56, %v6132_v59  ;;  %v10272_v56 = vld [vmem:[#allocation52_spill] sm:$0xff]  ;;  %v9359_v25 = vpop.xlane.xlu0 %5512  ;;  %v10289_v16 = vld [vmem:[#allocation119_spill] sm:$0xff] }
 0x425   : > { %v6260_v36 = vsel %vm5838_vm1, %v6259_v49, %v6255_v5  ;;  %v6269_v1 = vrot.slane %v10268_v26, %v8993_v15  ;;  %v9340_v29 = vsel %vm5915_vm12, %v5998_v12, %v5994_v63  ;;  %v6142_v54 = vsel %vm5894_vm9, %v6141_v17, %v6137_v18  ;;  %v10274_v63 = vld [vmem:[#allocation77_spill] sm:$0xff]  ;;  %v10275_v17 = vld [vmem:[#allocation90_spill] sm:$0xff]  ;;  %10276 = vst [vmem:[#allocation11_spill] sm:$0xff] %v9359_v25 }
 0x426   : > { %v6151_v41 = vrot.slane %v10271_v23, %v9071_v22  ;;  %v6078_v49 = vsel %vm5915_vm12, %v6077_v48, %v6073_v34  ;;  %v6195_v6 = vrot.slane %v10273_v62, %v8990_v13  ;;  %v6186_v45 = vsel %vm5845_vm2, %v6185_v24, %v6181_v32  ;;  %v10277_v24 = vld [vmem:[#allocation93_spill] sm:$0xff]  ;;  %v10280_v62 = vld [vmem:[#allocation103_spill] sm:$0xff] }
 0x427   : > { %v6191_v12 = vsel %vm5852_vm3, %v6190_v43, %v6186_v45  ;;  %v6200_v31 = vrot.slane %v10274_v63, %v9027_v33  ;;  %v6274_v5 = vrot.slane %v10275_v17, %v8990_v13  ;;  %v6265_v46 = vsel %vm5845_vm2, %v6264_v58, %v6260_v36  ;;  %v10278_v43 = vld [vmem:[#allocation66_spill] sm:$0xff]  ;;  %v10283_v63 = vld [vmem:[#allocation105_spill] sm:$0xff] }
 0x428   : > { %v9362_v18 = vsel %vm5922_vm13, %v6082_v10, %v6078_v49  ;;  %v6147_v48 = vsel %vm5901_vm10, %v6146_v14, %v6142_v54  ;;  %v6270_v34 = vsel %vm5852_vm3, %v6269_v1, %v6265_v46  ;;  %v6279_v32 = vrot.slane %v10277_v24, %v9027_v33  ;;  %v10279_v58 = vld [vmem:[#allocation102_spill] sm:$0xff]  ;;  %v10281_v49 = vld [vmem:[#allocation68_spill] sm:$0xff]  ;;  %v9384_v46 = vpop.xlane.xlu1 %5517 }
 0x429   : > { %v9371_v23 = vsel %vm5908_vm11, %v6151_v41, %v6147_v48  ;;  %v6333_v36 = vrot.slane %v10279_v58, %v8966_v40  ;;  %v6329_v10 = vrot.slane %v10280_v62, %v8940_v7  ;;  %v10282_v1 = vld [vmem:[#allocation76_spill] sm:$0xff]  ;;  %v6196_v45 = vsel %vm5859_vm4, %v6195_v6, %v6191_v12  ;;  %10284 = vst [vmem:[#allocation10_spill] sm:$0xff] %v9384_v46  ;;  %v10285_v48 = vld [vmem:[#allocation79_spill] sm:$0xff]  ;;  %v10288_v12 = vld [vmem:[#allocation118_spill] sm:$0xff] }
 0x42a   : > { %v6205_v54 = vrot.slane %v10282_v1, %v9024_v38  ;;  %v6338_v17 = vrot.slane %v10283_v63, %v8946_v55  ;;  %v6201_v41 = vsel %vm5866_vm5, %v6200_v31, %v6196_v45  ;;  %v6210_v24 = vrot.slane %v10285_v48, %v9033_v50  ;;  %v10286_v58 = vld [vmem:[#allocation92_spill] sm:$0xff]  ;;  %v10287_v1 = vld [vmem:[#allocation95_spill] sm:$0xff]  ;;  %v10290_v31 = vld [vmem:[#allocation69_spill] sm:$0xff] }
 0x42b   : > { %v6284_v62 = vrot.slane %v10286_v58, %v9024_v38  ;;  %v6275_v14 = vsel %vm5859_vm4, %v6274_v5, %v6270_v34  ;;  %v6289_v6 = vrot.slane %v10287_v1, %v9033_v50  ;;  %v6412_v63 = vrot.slane %v10288_v12, %v8966_v40  ;;  %v10291_v58 = vld [vmem:[#allocation104_spill] sm:$0xff]  ;;  %v10292_v5 = vld [vmem:[#allocation121_spill] sm:$0xff]  ;;  %v10295_v46 = vld [vmem:[#allocation107_spill] sm:$0xff] }
 0x42c   : > { %v6280_v59 = vsel %vm5866_vm5, %v6279_v32, %v6275_v14  ;;  %v6408_v26 = vrot.slane %v10289_v16, %v8940_v7  ;;  %v6161_v45 = vrot.slane %v10290_v31, %v9080_v52  ;;  %v6334_v48 = vsel %vm5831_vm0, %v6333_v36, %v6329_v10  ;;  %v9406_v32 = vpop.xlane.xlu0 %5437  ;;  %v10294_v14 = vld [vmem:[#allocation78_spill] sm:$0xff]  ;;  %v10296_v10 = vld [vmem:[#allocation81_spill] sm:$0xff] }
 0x42d   : > { %v6343_v3 = vrot.slane %v10291_v58, %v8980_v0  ;;  %v6417_v34 = vrot.slane %v10292_v5, %v8946_v55  ;;  %10293 = vst [vmem:[#allocation13_spill] sm:$0xff] %v9406_v32  ;;  %v6215_v1 = vrot.slane %v10294_v14, %v9030_v11  ;;  %v6206_v12 = vsel %vm5873_vm6, %v6205_v54, %v6201_v41  ;;  %v10298_v14 = vld [vmem:[#allocation97_spill] sm:$0xff]  ;;  %v10299_v41 = vld [vmem:[#allocation120_spill] sm:$0xff] }
 0x42e   : > { %v6339_v16 = vsel %vm5838_vm1, %v6338_v17, %v6334_v48  ;;  %v6348_v31 = vrot.slane %v10295_v46, %v8993_v15  ;;  %v6211_v36 = vsel %vm10008_vm7, %v6210_v24, %v6206_v12  ;;  %v6220_v58 = vrot.slane %v10296_v10, %v9059_v21  ;;  %v9426_v48 = vpop.xlane.xlu1 %5442  ;;  %v10301_v24 = vld [vmem:[#allocation106_spill] sm:$0xff] }
 0x42f   : > { %v6294_v5 = vrot.slane %v10297_v44, %v9030_v11  ;;  %v6285_v32 = vsel %vm5873_vm6, %v6284_v62, %v6280_v59  ;;  %v6299_v54 = vrot.slane %v10298_v14, %v9059_v21  ;;  %v6413_v17 = vsel %vm5831_vm0, %v6412_v63, %v6408_v26  ;;  %10300 = vst [vmem:[#allocation22_spill] sm:$0xff] %v9426_v48  ;;  %v10302_v59 = vld [vmem:[#allocation123_spill] sm:$0xff]  ;;  %v10304_v14 = vld [vmem:[#allocation109_spill] sm:$0xff] }
 0x430   : > { %v6290_v25 = vsel %vm10008_vm7, %v6289_v6, %v6285_v32  ;;  %v6422_v46 = vrot.slane %v10299_v41, %v8980_v0  ;;  %v6353_v12 = vrot.slane %v10301_v24, %v8990_v13  ;;  %v6344_v10 = vsel %vm5845_vm2, %v6343_v3, %v6339_v16  ;;  %v10303_v6 = vld [vmem:[#allocation80_spill] sm:$0xff]  ;;  %v10305_v24 = vld [vmem:[#allocation83_spill] sm:$0xff] }
 0x431   : > { %v6418_v44 = vsel %vm5838_vm1, %v6417_v34, %v6413_v17  ;;  %v6427_v62 = vrot.slane %v10302_v59, %v8993_v15  ;;  %v6225_v32 = vrot.slane %v10303_v6, %v9037_v39  ;;  %v6216_v26 = vsel %vm5887_vm8, %v6215_v1, %v6211_v36  ;;  %v10306_v34 = vld [vmem:[#allocation96_spill] sm:$0xff]  ;;  %v9446_v59 = vpop.xlane.xlu0 %5367  ;;  %v10308_v1 = vld [vmem:[#allocation99_spill] sm:$0xff]  ;;  %v10309_v36 = vld [vmem:[#allocation122_spill] sm:$0xff] }
 0x432   : > { %v6349_v63 = vsel %vm5852_vm3, %v6348_v31, %v6344_v10  ;;  %v6358_v41 = vrot.slane %v10304_v14, %v9027_v33  ;;  %v6221_v48 = vsel %vm5894_vm9, %v6220_v58, %v6216_v26  ;;  %v6230_v3 = vrot.slane %v10305_v24, %v9071_v22  ;;  %10307 = vst [vmem:[#allocation23_spill] sm:$0xff] %v9446_v59  ;;  %v10310_v26 = vld [vmem:[#allocation108_spill] sm:$0xff] }
 0x433   : > { %v6304_v16 = vrot.slane %v10306_v34, %v9037_v39  ;;  %v6295_v17 = vsel %vm5887_vm8, %v6294_v5, %v6290_v25  ;;  %v6309_v31 = vrot.slane %v10308_v1, %v9071_v22  ;;  %v6432_v10 = vrot.slane %v10309_v36, %v8990_v13  ;;  %v10311_v25 = vld [vmem:[#allocation125_spill] sm:$0xff]  ;;  %v10313_v36 = vld [vmem:[#allocation111_spill] sm:$0xff] }
 0x434   : > { %v6300_v6 = vsel %vm5894_vm9, %v6299_v54, %v6295_v17  ;;  %v6423_v58 = vsel %vm5845_vm2, %v6422_v46, %v6418_v44  ;;  %v6363_v14 = vrot.slane %v10310_v26, %v9024_v38  ;;  %v6354_v24 = vsel %vm5859_vm4, %v6353_v12, %v6349_v63  ;;  %v10312_v54 = vld [vmem:[#allocation82_spill] sm:$0xff]  ;;  %v9466_v44 = vpop.xlane.xlu1 %5372  ;;  %v10315_v12 = vld [vmem:[#allocation85_spill] sm:$0xff] }
 0x435   : > { %v6428_v34 = vsel %vm5852_vm3, %v6427_v62, %v6423_v58  ;;  %v6437_v5 = vrot.slane %v10311_v25, %v9027_v33  ;;  %v6235_v17 = vrot.slane %v10312_v54, %v9065_v19  ;;  %v6226_v1 = vsel %vm5901_vm10, %v6225_v32, %v6221_v48  ;;  %10314 = vst [vmem:[#allocation12_spill] sm:$0xff] %v9466_v44  ;;  %v10316_v63 = vld [vmem:[#allocation98_spill] sm:$0xff]  ;;  %v10317_v48 = vld [vmem:[#allocation101_spill] sm:$0xff] }
 0x436   : > { %v6359_v59 = vsel %vm5866_vm5, %v6358_v41, %v6354_v24  ;;  %v6368_v46 = vrot.slane %v10313_v36, %v9033_v50  ;;  %v6231_v26 = vsel %vm5908_vm11, %v6230_v3, %v6226_v1  ;;  %v6240_v62 = vrot.slane %v10315_v12, %v9080_v52  ;;  %v10318_v41 = vld [vmem:[#allocation124_spill] sm:$0xff]  ;;  %v10319_v3 = vld [vmem:[#allocation110_spill] sm:$0xff] }
 0x437   : > { %v6314_v58 = vrot.slane %v10316_v63, %v9065_v19  ;;  %v6305_v25 = vsel %vm5901_vm10, %v6304_v16, %v6300_v6  ;;  %v6319_v32 = vrot.slane %v10317_v48, %v9080_v52  ;;  %v6442_v24 = vrot.slane %v10318_v41, %v9024_v38  ;;  %v10320_v63 = vld [vmem:[#allocation127_spill] sm:$0xff]  ;;  %v9486_v6 = vpop.xlane.xlu0 %5522  ;;  %v10322_v48 = vld [vmem:[#allocation113_spill] sm:$0xff] }
 0x438   : > { %v6310_v54 = vsel %vm5908_vm11, %v6309_v31, %v6305_v25  ;;  %v6433_v36 = vsel %vm5859_vm4, %v6432_v10, %v6428_v34  ;;  %v6373_v1 = vrot.slane %v10319_v3, %v9030_v11  ;;  %v6364_v12 = vsel %vm5873_vm6, %v6363_v14, %v6359_v59 }
 0x439   : > { %v6438_v44 = vsel %vm5866_vm5, %v6437_v5, %v6433_v36  ;;  %v6447_v16 = vrot.slane %v10320_v63, %v9033_v50  ;;  %v10321_v31 = vrot.slane %v10278_v43, %v9065_v19  ;;  %v6236_v10 = vsel %vm5915_vm12, %v6235_v17, %v6231_v26  ;;  %v10323_v5 = vld [vmem:[#allocation84_spill] sm:$0xff]  ;;  %v10325_v17 = vld [vmem:[#allocation126_spill] sm:$0xff] }
 0x43a   : > { %v6369_v34 = vsel %vm10008_vm7, %v6368_v46, %v6364_v12  ;;  %v6378_v59 = vrot.slane %v10322_v48, %v9059_v21  ;;  %v6245_v41 = vrot.slane %v10323_v5, %v9074_v53  ;;  %v6241_v36 = vsel %vm5922_vm13, %v6240_v62, %v6236_v10  ;;  %v10324_v43 = vld [vmem:[#allocation100_spill] sm:$0xff]  ;;  %v9508_v12 = vpop.xlane.xlu1 %5527  ;;  %v10330_v5 = vld [vmem:[#allocation115_spill] sm:$0xff] }
 0x43b   : > { %v6157_v25 = vsel %vm5915_vm12, %v10321_v31, %v9371_v23  ;;  %v6315_v3 = vsel %vm5915_vm12, %v6314_v58, %v6310_v54  ;;  %v6324_v63 = vrot.slane %v10324_v43, %v9074_v53  ;;  %v6452_v46 = vrot.slane %v10325_v17, %v9030_v11  ;;  %v10327_v58 = vld [vmem:[#allocation129_spill] sm:$0xff]  ;;  %v10328_v10 = vld [vmem:[#allocation36_spill] sm:$0xff] }
 0x43c   : > { %v6162_v14 = vsel %vm5922_vm13, %v6161_v45, %v6157_v25  ;;  %v6320_v23 = vsel %vm5922_vm13, %v6319_v32, %v6315_v3  ;;  %v6443_v26 = vsel %vm5873_vm6, %v6442_v24, %v6438_v44  ;;  %v10326_v45 = vld [vmem:[#allocation112_spill] sm:$0xff]  ;;  %v6374_v25 = vsel %vm5887_vm8, %v6373_v1, %v6369_v34 }
 0x43d   : > { %v6383_v31 = vrot.slane %v10326_v45, %v9037_v39  ;;  %v6448_v62 = vsel %vm10008_vm7, %v6447_v16, %v6443_v26  ;;  %v6457_v54 = vrot.slane %v10327_v58, %v9059_v21  ;;  %v6008_v32 = vrot.slane %v10328_v10, %v9074_v53  ;;  %v10334_v17 = vld [vmem:[#allocation128_spill] sm:$0xff] }
 0x43e   : > { %v10329_v48 = vrot.slane %v10270_v8, %v9080_v52  ;;  %v6379_v24 = vsel %vm5894_vm9, %v6378_v59, %v6374_v25  ;;  %v6388_v3 = vrot.slane %v10330_v5, %v9071_v22  ;;  %vm7116_vm15 = vcmask 1041409   ;;  %v9535_v8 = vpop.xlane.xlu0 %5447 }
 0x43f   : > { %v10331_v1 = vrot.slane %v10272_v56, %v9074_v53  ;;  %v10332_v34 = vrot.slane %v10281_v49, %v9074_v53  ;;  %vm7118_vm7 = vcmask 1042434   ;;  %10333 = vst [vmem:[#allocation25_spill] sm:$0xff] %v9535_v8  ;;  %v6325_v59 = vsel %vm5929_vm14, %v6324_v63, %v6320_v23  ;;  %v10335_v56 = vld [vmem:[#allocation114_spill] sm:$0xff]  ;;  %v10338_v23 = vld [vmem:[#allocation151_spill] sm:$0xff]  ;;  %v10361_v8 = vld [vmem:[#allocation157_spill] sm:$0xff] }
 0x440   : > { %v6004_v44 = vsel %vm5922_vm13, %v10329_v48, %v9340_v29  ;;  %v6246_v29 = vsel %vm5929_vm14, %v6245_v41, %v6241_v36  ;;  %v6462_v26 = vrot.slane %v10334_v17, %v9037_v39  ;;  %v6453_v45 = vsel %vm5887_vm8, %v6452_v46, %v6448_v62  ;;  %v10337_v36 = vld [vmem:[#allocation150_spill] sm:$0xff]  ;;  %v9554_v62 = vpop.xlane.xlu1 %5452  ;;  %v10340_v48 = vld [vmem:[#allocation153_spill] sm:$0xff] }
 0x441   : > { %v6088_v16 = vsel %vm5929_vm14, %v10331_v1, %v9362_v18  ;;  %v6167_v43 = vsel %vm5929_vm14, %v10332_v34, %v6162_v14  ;;  %v6393_v18 = vrot.slane %v10335_v56, %v9065_v19  ;;  %v6384_v25 = vsel %vm5901_vm10, %v6383_v31, %v6379_v24  ;;  %v10336_v14 = vld [vmem:[#allocation131_spill] sm:$0xff]  ;;  %10339 = vst [vmem:[#allocation15_spill] sm:$0xff] %v9554_v62  ;;  %v10342_v1 = vld [vmem:[#allocation117_spill] sm:$0xff] }
 0x442   : > { %v6458_v49 = vsel %vm5894_vm9, %v6457_v54, %v6453_v45  ;;  %v6467_v58 = vrot.slane %v10336_v14, %v9071_v22  ;;  %v6009_v10 = vsel %vm5929_vm14, %v6008_v32, %v6004_v44  ;;  %v6389_v41 = vsel %vm5908_vm11, %v6388_v3, %v6384_v25  ;;  %v9576_v17 = vpop.xlane.xlu0 %5377 }
 0x443   : > { %v6570_v63 = vrot.slane %v10337_v36, %v8966_v40  ;;  %v6566_v46 = vrot.slane %v10338_v23, %v8940_v7  ;;  %v7117_v31 = vsel %vm7116_vm15, %v6088_v16, %v9269_v4  ;;  %v7130_v54 = vsel %vm7116_vm15, %v6167_v43, %v6009_v10  ;;  %v10343_v4 = vld [vmem:[#allocation130_spill] sm:$0xff]  ;;  %v10348_v10 = vld [vmem:[#allocation137_spill] sm:$0xff]  ;;  %v10349_v36 = vld [vmem:[#allocation155_spill] sm:$0xff] }
 0x444   : > { %v6575_v24 = vrot.slane %v10340_v48, %v8946_v55  ;;  %v9562_v32 = vsel %vm7118_vm7, %v6246_v29, %v7117_v31  ;;  %v9565_v44 = vsel %vm7118_vm7, %v6325_v59, %v7130_v54  ;;  %v6463_v5 = vsel %vm5901_vm10, %v6462_v26, %v6458_v49  ;;  %v10344_v29 = vld [vmem:[#allocation134_spill] sm:$0xff]  ;;  %v10345_v59 = vld [vmem:[#allocation135_spill] sm:$0xff]  ;;  %v10347_v49 = vld [vmem:[#allocation132_spill] sm:$0xff] }
 0x445   : > { %10341 = vst [vmem:[#allocation38_spill] sm:$0xff] %v9562_v32  ;;  %v9569_v3 = vsel %vm5915_vm12, %v6393_v18, %v6389_v41  ;;  %v6472_v16 = vrot.slane %v10343_v4, %v9065_v19  ;;  %v6468_v43 = vsel %vm5908_vm11, %v6467_v58, %v6463_v5  ;;  %v6491_v45 = vrot.slane %v10344_v29, %v8966_v40  ;;  %v10346_v18 = vld [vmem:[#allocation152_spill] sm:$0xff]  ;;  %v10350_v31 = vld [vmem:[#allocation166_spill] sm:$0xff]  ;;  %v10351_v48 = vld [vmem:[#allocation167_spill] sm:$0xff] }
 0x446   : > { %v6487_v56 = vrot.slane %v10345_v59, %v8940_v7  ;;  %v6571_v26 = vsel %vm5831_vm0, %v6570_v63, %v6566_v46  ;;  %v6580_v25 = vrot.slane %v10346_v18, %v8980_v0  ;;  %v6496_v41 = vrot.slane %v10348_v10, %v8946_v55  ;;  %v10352_v46 = vld [vmem:[#allocation182_spill] sm:$0xff]  ;;  %v10353_v4 = vld [vmem:[#allocation183_spill] sm:$0xff]  ;;  %v9600_v59 = vpop.xlane.xlu1 %5382  ;;  %v10356_v10 = vld [vmem:[#allocation169_spill] sm:$0xff] }
 0x447   : > { %v6576_v58 = vsel %vm5838_vm1, %v6575_v24, %v6571_v26  ;;  %v6585_v23 = vrot.slane %v10349_v36, %v8993_v15  ;;  %v6649_v54 = vrot.slane %v10350_v31, %v8966_v40  ;;  %v6645_v63 = vrot.slane %v10351_v48, %v8940_v7  ;;  %10354 = vst [vmem:[#allocation39_spill] sm:$0xff] %v9600_v59  ;;  %v10355_v24 = vld [vmem:[#allocation133_spill] sm:$0xff]  ;;  %v10360_v26 = vld [vmem:[#allocation139_spill] sm:$0xff]  ;;  %v9623_v59 = vpop.xlane.xlu0 %5532 }
 0x448   : > { %v6728_v5 = vrot.slane %v10352_v46, %v8966_v40  ;;  %v6724_v29 = vrot.slane %v10353_v4, %v8940_v7  ;;  %v9603_v18 = vsel %vm5915_vm12, %v6472_v16, %v6468_v43  ;;  %v6654_v36 = vrot.slane %v10356_v10, %v8946_v55  ;;  %v10357_v31 = vld [vmem:[#allocation185_spill] sm:$0xff]  ;;  %v10358_v46 = vld [vmem:[#allocation136_spill] sm:$0xff]  ;;  %v10359_v4 = vld [vmem:[#allocation154_spill] sm:$0xff]  ;;  %10362 = vst [vmem:[#allocation24_spill] sm:$0xff] %v9623_v59 }
 0x449   : > { %v6733_v48 = vrot.slane %v10357_v31, %v8946_v55  ;;  %v6492_v14 = vsel %vm5831_vm0, %v6491_v45, %v6487_v56  ;;  %v6501_v34 = vrot.slane %v10358_v46, %v8980_v0  ;;  %v6590_v32 = vrot.slane %v10359_v4, %v8990_v13  ;;  %v10363_v56 = vld [vmem:[#allocation168_spill] sm:$0xff] }
 0x44a   : > { %v6581_v16 = vsel %vm5845_vm2, %v6580_v25, %v6576_v58  ;;  %v6497_v43 = vsel %vm5838_vm1, %v6496_v41, %v6492_v14  ;;  %v6506_v62 = vrot.slane %v10360_v26, %v8993_v15  ;;  %v6595_v31 = vrot.slane %v10361_v8, %v9027_v33  ;;  %v10364_v25 = vld [vmem:[#allocation184_spill] sm:$0xff]  ;;  %v10365_v58 = vld [vmem:[#allocation171_spill] sm:$0xff]  ;;  %v9643_v59 = vpop.xlane.xlu1 %5537 }
 0x44b   : > { %v6586_v10 = vsel %vm5852_vm3, %v6585_v23, %v6581_v16  ;;  %v6650_v45 = vsel %vm5831_vm0, %v6649_v54, %v6645_v63  ;;  %v6659_v46 = vrot.slane %v10363_v56, %v8980_v0  ;;  %v6729_v4 = vsel %vm5831_vm0, %v6728_v5, %v6724_v29  ;;  %v10366_v8 = vld [vmem:[#allocation187_spill] sm:$0xff]  ;;  %v10367_v54 = vld [vmem:[#allocation138_spill] sm:$0xff]  ;;  %v10368_v5 = vld [vmem:[#allocation156_spill] sm:$0xff]  ;;  %10369 = vst [vmem:[#allocation41_spill] sm:$0xff] %v9643_v59 }
 0x44c   : > { %v6738_v14 = vrot.slane %v10364_v25, %v8980_v0  ;;  %v6655_v41 = vsel %vm5838_vm1, %v6654_v36, %v6650_v45  ;;  %v6664_v23 = vrot.slane %v10365_v58, %v8993_v15  ;;  %v6734_v26 = vsel %vm5838_vm1, %v6733_v48, %v6729_v4  ;;  %v10370_v45 = vld [vmem:[#allocation141_spill] sm:$0xff]  ;;  %v10371_v58 = vld [vmem:[#allocation159_spill] sm:$0xff]  ;;  %v9663_v59 = vpop.xlane.xlu0 %5457 }
 0x44d   : > { %v6743_v16 = vrot.slane %v10366_v8, %v8993_v15  ;;  %v6511_v63 = vrot.slane %v10367_v54, %v8990_v13  ;;  %v6502_v56 = vsel %vm5845_vm2, %v6501_v34, %v6497_v43  ;;  %v6600_v29 = vrot.slane %v10368_v5, %v9024_v38  ;;  %v10372_v54 = vld [vmem:[#allocation170_spill] sm:$0xff]  ;;  %10376 = vst [vmem:[#allocation14_spill] sm:$0xff] %v9663_v59  ;;  %v10382_v59 = vld [vmem:[#allocation172_spill] sm:$0xff] }
 0x44e   : > { %v6591_v25 = vsel %vm5859_vm4, %v6590_v32, %v6586_v10  ;;  %v6507_v36 = vsel %vm5852_vm3, %v6506_v62, %v6502_v56  ;;  %v6516_v48 = vrot.slane %v10370_v45, %v9027_v33  ;;  %v6605_v8 = vrot.slane %v10371_v58, %v9033_v50  ;;  %v10373_v5 = vld [vmem:[#allocation186_spill] sm:$0xff]  ;;  %v10374_v56 = vld [vmem:[#allocation173_spill] sm:$0xff] }
 0x44f   : > { %v6596_v4 = vsel %vm5866_vm5, %v6595_v31, %v6591_v25  ;;  %v6669_v34 = vrot.slane %v10372_v54, %v8990_v13  ;;  %v6660_v43 = vsel %vm5845_vm2, %v6659_v46, %v6655_v41  ;;  %v6748_v32 = vrot.slane %v10373_v5, %v8990_v13  ;;  %v10375_v25 = vld [vmem:[#allocation189_spill] sm:$0xff]  ;;  %v10377_v54 = vld [vmem:[#allocation140_spill] sm:$0xff]  ;;  %v10378_v5 = vld [vmem:[#allocation158_spill] sm:$0xff] }
 0x450   : > { %v6739_v10 = vsel %vm5845_vm2, %v6738_v14, %v6734_v26  ;;  %v6665_v62 = vsel %vm5852_vm3, %v6664_v23, %v6660_v43  ;;  %v6674_v45 = vrot.slane %v10374_v56, %v9027_v33  ;;  %v6753_v58 = vrot.slane %v10375_v25, %v9027_v33  ;;  %v10379_v43 = vld [vmem:[#allocation143_spill] sm:$0xff]  ;;  %v10381_v56 = vld [vmem:[#allocation161_spill] sm:$0xff] }
 0x451   : > { %v6744_v31 = vsel %vm5852_vm3, %v6743_v16, %v6739_v10  ;;  %v6521_v46 = vrot.slane %v10377_v54, %v9024_v38  ;;  %v6512_v41 = vsel %vm5859_vm4, %v6511_v63, %v6507_v36  ;;  %v6610_v14 = vrot.slane %v10378_v5, %v9030_v11  ;;  %v10383_v36 = vld [vmem:[#allocation188_spill] sm:$0xff] }
 0x452   : > { %v6601_v23 = vsel %vm5873_vm6, %v6600_v29, %v6596_v4  ;;  %v6517_v26 = vsel %vm5866_vm5, %v6516_v48, %v6512_v41  ;;  %v6526_v16 = vrot.slane %v10379_v43, %v9033_v50  ;;  %vm10380_vm7 = vcmask 589312   ;;  %v9683_v4 = vpop.xlane.xlu1 %5462  ;;  %v10385_v41 = vld [vmem:[#allocation175_spill] sm:$0xff] }
 0x453   : > { %v6606_v10 = vsel %vm10380_vm7, %v6605_v8, %v6601_v23  ;;  %v6615_v25 = vrot.slane %v10381_v56, %v9059_v21  ;;  %v6679_v54 = vrot.slane %v10382_v59, %v9024_v38  ;;  %v6670_v63 = vsel %vm5859_vm4, %v6669_v34, %v6665_v62  ;;  %10384 = vst [vmem:[#allocation27_spill] sm:$0xff] %v9683_v4  ;;  %v10386_v43 = vld [vmem:[#allocation191_spill] sm:$0xff]  ;;  %v10387_v59 = vld [vmem:[#allocation142_spill] sm:$0xff]  ;;  %vm10389_vm15 = vmmov %vm10380_vm7 }
 0x454   : > { %v6758_v5 = vrot.slane %v10383_v36, %v9024_v38  ;;  %v6749_v29 = vsel %vm5859_vm4, %v6748_v32, %v6744_v31  ;;  %v6675_v48 = vsel %vm5866_vm5, %v6674_v45, %v6670_v63  ;;  %v6684_v8 = vrot.slane %v10385_v41, %v9033_v50  ;;  %v10388_v36 = vld [vmem:[#allocation160_spill] sm:$0xff]  ;;  %v10390_v63 = vld [vmem:[#allocation145_spill] sm:$0xff]  ;;  %v9703_v4 = vpop.xlane.xlu0 %5387 }
 0x455   : > { %v6754_v23 = vsel %vm5866_vm5, %v6753_v58, %v6749_v29  ;;  %v6763_v56 = vrot.slane %v10386_v43, %v9033_v50  ;;  %v6531_v34 = vrot.slane %v10387_v59, %v9030_v11  ;;  %v6522_v62 = vsel %vm5873_vm6, %v6521_v46, %v6517_v26  ;;  %v10391_v29 = vld [vmem:[#allocation163_spill] sm:$0xff]  ;;  %10392 = vst [vmem:[#allocation17_spill] sm:$0xff] %v9703_v4  ;;  %v10393_v59 = vld [vmem:[#allocation174_spill] sm:$0xff]  ;;  %v10398_v4 = vld [vmem:[#allocation144_spill] sm:$0xff] }
 0x456   : > { %v6620_v32 = vrot.slane %v10388_v36, %v9037_v39  ;;  %v6611_v31 = vsel %vm5887_vm8, %v6610_v14, %v6606_v10  ;;  %v6527_v45 = vsel %vm10389_vm15, %v6526_v16, %v6522_v62  ;;  %v6536_v41 = vrot.slane %v10390_v63, %v9059_v21  ;;  %v10394_v36 = vld [vmem:[#allocation190_spill] sm:$0xff]  ;;  %v10395_v62 = vld [vmem:[#allocation177_spill] sm:$0xff]  ;;  %vm10396_vm15 = vmmov %vm10380_vm7 }
 0x457   : > { %v6616_v58 = vsel %vm5894_vm9, %v6615_v25, %v6611_v31  ;;  %v6625_v43 = vrot.slane %v10391_v29, %v9071_v22  ;;  %v6689_v46 = vrot.slane %v10393_v59, %v9030_v11  ;;  %v6680_v26 = vsel %vm5873_vm6, %v6679_v54, %v6675_v48  ;;  %v10397_v63 = vld [vmem:[#allocation193_spill] sm:$0xff]  ;;  %v10399_v48 = vld [vmem:[#allocation162_spill] sm:$0xff] }
 0x458   : > { %v6768_v14 = vrot.slane %v10394_v36, %v9030_v11  ;;  %v6759_v16 = vsel %vm5873_vm6, %v6758_v5, %v6754_v23  ;;  %v6685_v10 = vsel %vm10380_vm7, %v6684_v8, %v6680_v26  ;;  %v6694_v25 = vrot.slane %v10395_v62, %v9059_v21  ;;  %v9723_v23 = vpop.xlane.xlu1 %5392  ;;  %v10401_v26 = vld [vmem:[#allocation147_spill] sm:$0xff]  ;;  %v10402_v62 = vld [vmem:[#allocation165_spill] sm:$0xff] }
 0x459   : > { %v6764_v31 = vsel %vm10396_vm15, %v6763_v56, %v6759_v16  ;;  %v6773_v29 = vrot.slane %v10397_v63, %v9059_v21  ;;  %v6541_v59 = vrot.slane %v10398_v4, %v9037_v39  ;;  %v6532_v54 = vsel %vm5887_vm8, %v6531_v34, %v6527_v45  ;;  %10400 = vst [vmem:[#allocation40_spill] sm:$0xff] %v9723_v23  ;;  %v10403_v4 = vld [vmem:[#allocation176_spill] sm:$0xff] }
 0x45a   : > { %v6630_v36 = vrot.slane %v10399_v48, %v9065_v19  ;;  %v6621_v5 = vsel %vm5901_vm10, %v6620_v32, %v6616_v58  ;;  %v6537_v8 = vsel %vm5894_vm9, %v6536_v41, %v6532_v54  ;;  %v6546_v56 = vrot.slane %v10401_v26, %v9071_v22  ;;  %v10404_v48 = vld [vmem:[#allocation192_spill] sm:$0xff]  ;;  %v10405_v54 = vld [vmem:[#allocation179_spill] sm:$0xff] }
 0x45b   : > { %v6626_v16 = vsel %vm5908_vm11, %v6625_v43, %v6621_v5  ;;  %v6635_v63 = vrot.slane %v10402_v62, %v9080_v52  ;;  %v6699_v34 = vrot.slane %v10403_v4, %v9037_v39  ;;  %v6690_v45 = vsel %vm5887_vm8, %v6689_v46, %v6685_v10  ;;  %v10406_v5 = vld [vmem:[#allocation195_spill] sm:$0xff] }
 0x45c   : > { %v6778_v32 = vrot.slane %v10404_v48, %v9037_v39  ;;  %v6769_v58 = vsel %vm5887_vm8, %v6768_v14, %v6764_v31  ;;  %v6695_v41 = vsel %vm5894_vm9, %v6694_v25, %v6690_v45  ;;  %v6704_v26 = vrot.slane %v10405_v54, %v9071_v22  ;;  %v10408_v14 = vld [vmem:[#allocation146_spill] sm:$0xff]  ;;  %v10409_v45 = vld [vmem:[#allocation149_spill] sm:$0xff] }
 0x45d   : > { %v6774_v43 = vsel %vm5894_vm9, %v6773_v29, %v6769_v58  ;;  %v6783_v62 = vrot.slane %v10406_v5, %v9071_v22  ;;  %v9743_v23 = vpop.xlane.xlu0 %5542  ;;  %v10407_v46 = vrot.slane %v10355_v24, %v9080_v52  ;;  %v6551_v31 = vrot.slane %v10408_v14, %v9065_v19  ;;  %v10410_v58 = vld [vmem:[#allocation164_spill] sm:$0xff]  ;;  %v10411_v24 = vld [vmem:[#allocation178_spill] sm:$0xff] }
 0x45e   : > { %v6542_v25 = vsel %vm5901_vm10, %v6541_v59, %v6537_v8  ;;  %v6631_v4 = vsel %vm5915_vm12, %v6630_v36, %v6626_v16  ;;  %v6556_v48 = vrot.slane %v10409_v45, %v9080_v52  ;;  %v6640_v54 = vrot.slane %v10410_v58, %v9074_v53  ;;  %v10412_v14 = vld [vmem:[#allocation194_spill] sm:$0xff]  ;;  %v10413_v16 = vld [vmem:[#allocation181_spill] sm:$0xff]  ;;  %v10415_v58 = vld [vmem:[#allocation116_spill] sm:$0xff] }
 0x45f   : > { %v6478_v10 = vsel %vm5922_vm13, %v10407_v46, %v9603_v18  ;;  %v6547_v29 = vsel %vm5908_vm11, %v6546_v56, %v6542_v25  ;;  %v6636_v5 = vsel %vm5922_vm13, %v6635_v63, %v6631_v4  ;;  %v6709_v18 = vrot.slane %v10411_v24, %v9065_v19  ;;  %v10414_v63 = vld [vmem:[#allocation197_spill] sm:$0xff]  ;;  %v10418_v24 = vld [vmem:[#allocation148_spill] sm:$0xff] }
 0x460   : > { %v6700_v46 = vsel %vm5901_vm10, %v6699_v34, %v6695_v41  ;;  %v6788_v59 = vrot.slane %v10412_v14, %v9065_v19  ;;  %v6779_v36 = vsel %vm5901_vm10, %v6778_v32, %v6774_v43  ;;  %v6714_v25 = vrot.slane %v10413_v16, %v9080_v52 }
 0x461   : > { %v9766_v8 = vpop.xlane.xlu1 %5547  ;;  %v6705_v56 = vsel %vm5908_vm11, %v6704_v26, %v6700_v46  ;;  %v6784_v45 = vsel %vm5908_vm11, %v6783_v62, %v6779_v36  ;;  %v6793_v4 = vrot.slane %v10414_v63, %v9080_v52  ;;  %v6403_v34 = vrot.slane %v10415_v58, %v9074_v53 }
 0x462   : > { %vm7120_vm7 = vcmask 1043459   ;;  %v10416_v32 = vrot.slane %v10342_v1, %v9080_v52  ;;  %v6552_v26 = vsel %vm5915_vm12, %v6551_v31, %v6547_v29  ;;  %v10417_v43 = vrot.slane %v10347_v49, %v9074_v53  ;;  %v10419_v1 = vld [vmem:[#allocation180_spill] sm:$0xff] }
 0x463   : > { %v6561_v46 = vrot.slane %v10418_v24, %v9074_v53  ;;  %v6557_v14 = vsel %vm5922_vm13, %v6556_v48, %v6552_v26  ;;  %v6641_v36 = vsel %vm5929_vm14, %v6640_v54, %v6636_v5  ;;  %v6719_v63 = vrot.slane %v10419_v1, %v9074_v53  ;;  %v10420_v31 = vld [vmem:[#allocation196_spill] sm:$0xff]  ;;  %v10422_v26 = vld [vmem:[#allocation13_spill] sm:$0xff] }
 0x464   : > { %v6399_v41 = vsel %vm5922_vm13, %v10416_v32, %v9569_v3  ;;  %v6483_v62 = vsel %vm5929_vm14, %v10417_v43, %v6478_v10  ;;  %v9790_v16 = vpop.xlane.xlu0 %5467  ;;  %v6710_v3 = vsel %vm5915_vm12, %v6709_v18, %v6705_v56  ;;  %v6798_v29 = vrot.slane %v10420_v31, %v9074_v53  ;;  %v10423_v24 = vld [vmem:[#allocation9_spill] sm:$0xff] }
 0x465   : > { %v6789_v49 = vsel %vm5915_vm12, %v6788_v59, %v6784_v45  ;;  %v6715_v10 = vsel %vm5922_vm13, %v6714_v25, %v6710_v3  ;;  %v7044_v48 = vrot.slane %v9142_v61, %v8966_v40  ;;  %v6970_v54 = vrot.slane %v9165_v51, %v8946_v55 }
 0x466   : > { %v6794_v58 = vsel %vm5922_vm13, %v6793_v4, %v6789_v49  ;;  %v9805_v5 = vsel %vm5929_vm14, %v6403_v34, %v6399_v41  ;;  %v7132_v18 = vsel %vm7120_vm7, %v6483_v62, %v9565_v44  ;;  %v7049_v56 = vrot.slane %v9151_v37, %v8946_v55 }
 0x467   : > { %v6975_v59 = vrot.slane %v9181_v20, %v8980_v0  ;;  %vm7122_vm15 = vcmask 1044484   ;;  %v9816_v40 = vsel %vm5929_vm14, %v6561_v46, %v6557_v14  ;;  %v7040_v61 = vrot.slane %v9046_v60, %v8940_v7  ;;  %v10425_v46 = vld [vmem:[#allocation22_spill] sm:$0xff] }
 0x468   : > { %v6901_v51 = vrot.slane %v9198_v57, %v8993_v15  ;;  %v9823_v44 = vsel %vm7122_vm15, %v6641_v36, %v7132_v18  ;;  %v9826_v55 = vsel %vm5929_vm14, %v6719_v63, %v6715_v10  ;;  %v9829_v37 = vsel %vm5929_vm14, %v6798_v29, %v6794_v58 }
 0x469   : > { %v9813_v25 = vpop.xlane.xlu1 %5472  ;;  %v6906_v20 = vrot.slane %v9218_v47, %v8990_v13  ;;  %v7045_v45 = vsel %vm5831_vm0, %v7044_v48, %v7040_v61  ;;  %v6971_v7 = vsel %vm5838_vm1, %v6970_v54, %v9109_v35  ;;  %v7054_v60 = vrot.slane %v9238_v28, %v8980_v0  ;;  %v10421_v28 = vld [vmem:[#allocation11_spill] sm:$0xff] }
 0x46a   : > { %v6980_v57 = vrot.slane %v9274_v9, %v8993_v15  ;;  %v7050_v34 = vsel %vm5838_vm1, %v7049_v56, %v7045_v45  ;;  %v6976_v32 = vsel %vm5845_vm2, %v6975_v59, %v6971_v7  ;;  %v7059_v47 = vrot.slane %v9256_v30, %v8993_v15  ;;  %v10424_v30 = vld [vmem:[#allocation10_spill] sm:$0xff]  ;;  %v10428_v59 = vld [vmem:[#allocation39_spill] sm:$0xff] }
 0x46b   : > { %v6985_v41 = vrot.slane %v9296_v27, %v8990_v13  ;;  %v6902_v35 = vsel %vm5852_vm3, %v6901_v51, %v9115_v2  ;;  %v6911_v0 = vrot.slane %v9317_v42, %v9027_v33  ;;  %v7064_v9 = vrot.slane %v10421_v28, %v8990_v13  ;;  %v10426_v13 = vld [vmem:[#allocation23_spill] sm:$0xff] }
 0x46c   : > { %v6990_v43 = vrot.slane %v10422_v26, %v9027_v33  ;;  %v6907_v62 = vsel %vm5859_vm4, %v6906_v20, %v6902_v35  ;;  %v6916_v15 = vrot.slane %v10423_v24, %v9024_v38  ;;  %v7069_v27 = vrot.slane %v10424_v30, %v9027_v33  ;;  %v10427_v33 = vld [vmem:[#allocation12_spill] sm:$0xff] }
 0x46d   : > { %v9840_v4 = vpop.xlane.xlu0 %5397  ;;  %v6995_v2 = vrot.slane %v10425_v46, %v9024_v38  ;;  %v7055_v42 = vsel %vm5845_vm2, %v7054_v60, %v7050_v34  ;;  %v6981_v36 = vsel %vm5852_vm3, %v6980_v57, %v6976_v32  ;;  %v6921_v1 = vrot.slane %v10426_v13, %v9033_v50  ;;  %v10430_v20 = vld [vmem:[#allocation24_spill] sm:$0xff]  ;;  %v10433_v34 = vld [vmem:[#allocation41_spill] sm:$0xff]  ;;  %v10437_v46 = vld [vmem:[#allocation14_spill] sm:$0xff] }
 0x46e   : > { %v7074_v63 = vrot.slane %v9486_v6, %v9024_v38  ;;  %v7060_v3 = vsel %vm5852_vm3, %v7059_v47, %v7055_v42  ;;  %v6986_v31 = vsel %vm5859_vm4, %v6985_v41, %v6981_v36  ;;  %v6926_v29 = vrot.slane %v10427_v33, %v9030_v11  ;;  %v10434_v47 = vld [vmem:[#allocation40_spill] sm:$0xff]  ;;  %v10438_v36 = vld [vmem:[#allocation27_spill] sm:$0xff] }
 0x46f   : > { %v7079_v49 = vrot.slane %v9508_v12, %v9033_v50  ;;  %v6912_v10 = vsel %vm5866_vm5, %v6911_v0, %v6907_v62  ;;  %v7065_v58 = vsel %vm5859_vm4, %v7064_v9, %v7060_v3  ;;  %v6991_v48 = vsel %vm5866_vm5, %v6990_v43, %v6986_v31  ;;  %v10435_v0 = vld [vmem:[#allocation25_spill] sm:$0xff]  ;;  %v10436_v62 = vld [vmem:[#allocation15_spill] sm:$0xff] }
 0x470   : > { %v6931_v54 = vrot.slane %v9576_v17, %v9059_v21  ;;  %v6917_v6 = vsel %vm5873_vm6, %v6916_v15, %v6912_v10  ;;  %v7070_v18 = vsel %vm5866_vm5, %v7069_v27, %v7065_v58  ;;  %v6996_v56 = vsel %vm5873_vm6, %v6995_v2, %v6991_v48  ;;  %v10431_v17 = vld [vmem:[#allocation17_spill] sm:$0xff] }
 0x471   : > { %v6936_v61 = vrot.slane %v10428_v59, %v9037_v39  ;;  %vm7124_vm0 = vcmask 1045509   ;;  %vm10429_vm1 = vcmask 589312   ;;  %v7075_v51 = vsel %vm5873_vm6, %v7074_v63, %v7070_v18 }
 0x472   : > { %v5403_v14 = vpop.xlane.xlu1 %5402  ;;  %v6922_v12 = vsel %vm10429_vm1, %v6921_v1, %v6917_v6  ;;  %v7084_v45 = vrot.slane %v10430_v20, %v9030_v11  ;;  %v6941_v7 = vrot.slane %v10431_v17, %v9071_v22  ;;  %vm7128_vm2 = vcmask 1047559   ;;  %vm10432_vm3 = vmmov %vm10429_vm1 }
 0x473   : > { %v6927_v60 = vsel %vm5887_vm8, %v6926_v29, %v6922_v12  ;;  %v7080_v57 = vsel %vm10432_vm3, %v7079_v49, %v7075_v51  ;;  %v7089_v32 = vrot.slane %v10433_v34, %v9059_v21  ;;  %v6946_v41 = vrot.slane %v10434_v47, %v9065_v19  ;;  %vm10439_vm5 = vmmov %vm10429_vm1  ;;  %v10441_v51 = vld [vmem:[#allocation198_spill] sm:$0xff] }
 0x474   : > { %vm7126_vm4 = vcmask 1046534   ;;  %v7000_v28 = vrot.slane %v10435_v0, %v9033_v50  ;;  %v6932_v9 = vsel %vm5894_vm9, %v6931_v54, %v6927_v60  ;;  %v7094_v26 = vrot.slane %v9743_v23, %v9037_v39 }
 0x475   : > { %v5553_v38 = vpop.xlane.xlu0 %5552  ;;  %v6951_v43 = vrot.slane %v9840_v4, %v9080_v52  ;;  %v7005_v24 = vrot.slane %v10436_v62, %v9030_v11  ;;  %v6937_v15 = vsel %vm5901_vm10, %v6936_v61, %v6932_v9  ;;  %v7099_v30 = vrot.slane %v9766_v8, %v9071_v22 }
 0x476   : > { %v6956_v27 = vrot.slane %v5403_v14, %v9074_v53  ;;  %v7085_v50 = vsel %vm5887_vm8, %v7084_v45, %v7080_v57  ;;  %v7010_v2 = vrot.slane %v10437_v46, %v9059_v21  ;;  %v6942_v23 = vsel %vm5908_vm11, %v6941_v7, %v6937_v15 }
 0x477   : > { %v7104_v4 = vrot.slane %v5553_v38, %v9065_v19  ;;  %v7090_v11 = vsel %vm5894_vm9, %v7089_v32, %v7085_v50  ;;  %v7015_v13 = vrot.slane %v10438_v36, %v9037_v39  ;;  %v6947_v1 = vsel %vm5915_vm12, %v6946_v41, %v6942_v23 }
 0x478   : > { %v7001_v14 = vsel %vm10439_vm5, %v7000_v28, %v6996_v56  ;;  %v7095_v63 = vsel %vm5901_vm10, %v7094_v26, %v7090_v11  ;;  %v7020_v21 = vrot.slane %v9790_v16, %v9071_v22  ;;  %v6952_v3 = vsel %vm5922_vm13, %v6951_v43, %v6947_v1 }
 0x479   : > { %v7006_v31 = vsel %vm5887_vm8, %v7005_v24, %v7001_v14  ;;  %v7100_v33 = vsel %vm5908_vm11, %v7099_v30, %v7095_v63  ;;  %v7025_v39 = vrot.slane %v9813_v25, %v9065_v19  ;;  %v6957_v29 = vsel %vm5929_vm14, %v6956_v27, %v6952_v3  ;;  %v10440_v25 = vld [vmem:[#allocation38_spill] sm:$0xff] }
 0x47a   : > { %v5558_v35 = vpop.xlane.xlu1 %5557  ;;  %v7011_v10 = vsel %vm5894_vm9, %v7010_v2, %v7006_v31  ;;  %v7105_v58 = vsel %vm5915_vm12, %v7104_v4, %v7100_v33  ;;  %v7134_v54 = vsel %vm7124_vm0, %v9829_v37, %v9823_v44  ;;  %v7121_v38 = vsel %vm7120_vm7, %v9805_v5, %v10440_v25 }
 0x47b   : > { %v7109_v8 = vrot.slane %v5558_v35, %v9080_v52  ;;  %v7016_v16 = vsel %vm5901_vm10, %v7015_v13, %v7011_v10  ;;  %v7135_v18 = vsel %vm7126_vm4, %v6957_v29, %v7134_v54  ;;  %v7123_v59 = vsel %vm7122_vm15, %v9816_v40, %v7121_v38 }
 0x47c   : > { %v7021_v6 = vsel %vm5908_vm11, %v7020_v21, %v7016_v16  ;;  %v7125_v5 = vsel %vm7124_vm0, %v9826_v55, %v7123_v59 }
 0x47d   : > { %v5478_v42 = vpop.xlane.xlu0 %5477  ;;  %v7110_v19 = vsel %vm5922_vm13, %v7109_v8, %v7105_v58  ;;  %v7026_v61 = vsel %vm5915_vm12, %v7025_v39, %v7021_v6  ;;  %v7127_v20 = vsel %vm7126_vm4, %v10441_v51, %v7125_v5 }
 0x47e   : > { %v7030_v48 = vrot.slane %v5478_v42, %v9080_v52 }
 0x480   : > { %v7031_v12 = vsel %vm5922_vm13, %v7030_v48, %v7026_v61 }
 0x484   : > { %v5563_v49 = vpop.xlane.xlu1 %5562 }
 0x485   : > { %v7114_v22 = vrot.slane %v5563_v49, %v9074_v53 }
 0x487   : > { %v7115_v52 = vsel %vm5929_vm14, %v7114_v22, %v7110_v19  ;;  %v5483_v56 = vpop.xlane.xlu0 %5482 }
 0x488   : > { %v7136_v44 = vsel %vm7128_vm2, %v7115_v52, %v7135_v18  ;;  %v7035_v37 = vrot.slane %v5483_v56, %v9074_v53 }
 0x489   : > { %7142 = vst [vmem:[%s177_s28 + $0x8] sm:$0xff] %v7136_v44 }
 0x48a   : > { %v7036_v40 = vsel %vm5929_vm14, %v7035_v37, %v7031_v12 }
 0x48b   : > { %v7129_v45 = vsel %vm7128_vm2, %v7036_v40, %v7127_v20 }
 0x48c   : > { %7141 = vst [vmem:[%s177_s28] sm:$0xff] %v7129_v45 }
 0x48d   : > { %7361 = shalt.err (!%p7358_p6)
}
 0x48e   : > { %s7362_s14 = scalar_lea.hbm %s7156_s4, 256  ;;  %s7366_s18 = scalar_lea.hbm %s10000_s2, 512 }
 0x48f   : > { %p7363_p7 = scmp.ne.s32.totalorder %s7156_s4, %s7362_s14  ;;  %p7367_p13 = scmp.lt.s32.totalorder %s7156_s4, %s10000_s2 }
 0x490   : > { %p7368_p1 = scmp.lt.s32.totalorder %s7366_s18, %s7362_s14 }
 0x491   : > { %p7364_p10 = pnand %p7363_p7, %p7501_p9 }
 0x492   : > { %p7369_p8 = por %p7368_p1, %p7367_p13 }
 0x493   : > { %p7365_p4 = pneg %p7364_p10 }
 0x495   : > { %p7370_p12 = pnand %p7369_p8, %p7365_p4 }
 0x497   : > { %7373 = shalt.err (!%p7370_p12)
}
 0x498   : > { %7256 = dma.vmem_to_hbm [thread:$0]  (%p7501_p9), %s7159_s29, 256, %s7156_s4, %s7144_s5  }
 0x499 PF: > { %s7170_s25 = sand.u32 1, %s7408_s9   ;;  %p10442_p0 = scmp.ge.s32.totalorder %s7428_s0, 2 }
 0x49a   : > { %s7171_s26 = scalar_lea.sflag [#allocation5], %s7170_s25 }
 0x49b   : > { %p7263_p2 = pnand %p10442_p0, %p7508_p11 }
 0x49d   : > { %p7264_p3 = pneg %p7263_p2 }
 0x49f   : > { %7403 = dma.done.wait (%p7264_p3), %s7171_s26, 256  }
 0x4a0   : > { %7405 = vsyncadd (%p7264_p3), %s7171_s26, 4294967040  ;;  %s19_s0 = sadd.s32 1, %s7428_s0   ;;  %s10443_s9 = smov %s7412_s10 }
 0x4a1   : > { %p16_p5 = scmp.ge.s32.totalorder %s19_s0, 4   ;;  %s10444_s10 = smov %s7416_s11 }
 0x4a2   : > { %s10445_s11 = smov %s7506_s22  ;;  %s10446_s12 = smov %s7424_s13 }
 0x4a3   : > { %s10447_s13 = smov %s10449_s16  ;;  %18 = sbr.rel (!%p16_p5) target bundleno = 6 (0x6), region = 77 }
 0x4a8   :  { %7176 = vsyncpa [#allocation4], 1 }
 0x4a9   :  { %7178 = vsyncpa [#allocation4 + $0x1], 1 }
 0x4aa   :  { %7179 = vsyncpa [#allocation5], 1 }
 0x4ab   :  { %7181 = vsyncpa [#allocation5 + $0x1], 1 }

</bundles_post_ra>
